<compile_context>
chip_gen: v7x
topology: tpu7x:2x2x1
jax: 0.10.0
libtpu: 0.0.40
codegen_flags: <defaults>
</compile_context>

<pallas_src>
import functools
import math

import jax
import jax.numpy as jnp
from jax.experimental import pallas as pl
from jax.experimental.pallas import tpu as pltpu


# =========================================================================
# Layout helpers (padded-flat: (N, C, (H+2)*(W+2)) with zero borders)
# =========================================================================

def pad_flat(x_nchw):
    """(N, C, H, W) -> padded-flat (N, C, (H+2)*(W+2)), borders = 0."""
    n, c, h, w = x_nchw.shape
    xp = jnp.pad(x_nchw, ((0, 0), (0, 0), (1, 1), (1, 1)))
    return xp.reshape(n, c, (h + 2) * (w + 2))


def unpad(x_pf, H, W):
    n, c, _ = x_pf.shape
    return x_pf.reshape(n, c, H + 2, W + 2)[:, :, 1:H + 1, 1:W + 1]


def max_pool2_pf(x_pf, H, W):
    x = unpad(x_pf, H, W)
    n, c = x.shape[:2]
    x = x.reshape(n, c, H // 2, 2, W // 2, 2).max(axis=(3, 5))
    return pad_flat(x)


def upsample2_pf(x_pf, H, W):
    x = unpad(x_pf, H, W)
    x = jnp.repeat(jnp.repeat(x, 2, axis=2), 2, axis=3)   # nearest-neighbour
    return pad_flat(x)


def _wide_col_mask(H, W):
    """(1, Lw) mask over the 'wide' conv output grid (row stride Wp=W+2):
    1.0 at real output columns, 0.0 at the two wrap-around pad columns."""
    Wp = W + 2
    Lw = (H - 1) * Wp + W
    m = jnp.concatenate([jnp.ones((H, W), jnp.float32),
                         jnp.zeros((H, 2), jnp.float32)], axis=1)
    return m.reshape(1, H * Wp)[:, :Lw]


def _interior_mask(H, W):
    """(1, P) mask: 1.0 at interior pixels of the padded-flat layout."""
    Wp, Hp = W + 2, H + 2
    m = jnp.zeros((Hp, Wp), jnp.float32).at[1:H + 1, 1:W + 1].set(1.0)
    return m.reshape(1, Hp * Wp)


# =========================================================================
# Pallas kernels
# =========================================================================

def _conv_taps(parts, w_refs_or_vals, K, Wp, Lw, cout):
    """Accumulate K*K tap matmuls: acc[cout, Lw] += W_tap @ window."""
    acc = jnp.zeros((cout, Lw), jnp.float32)
    t = 0
    for kh in range(K):
        for kw in range(K):
            off = kh * Wp + kw
            for (x, w_ref, cin, use_mxu) in parts:
                win = x[:, off:off + Lw]                     # (cin, Lw) f32
                if use_mxu:
                    acc = acc + jnp.dot(
                        w_ref[t].astype(jnp.bfloat16),
                        win.astype(jnp.bfloat16),
                        preferred_element_type=jnp.float32)
                else:
                    # tiny Cin (raw image / prev): VPU multiply-accumulate, f32
                    w_t = w_ref[t]                           # (cout, cin) f32
                    for c in range(cin):
                        acc = acc + w_t[:, c:c + 1] * win[c:c + 1, :]
            t += 1
    return acc


def _double_conv_kernel(*refs, H, W, K, Ca, Cb, Cmid, Cout):
    """Fused (3x3 conv + ReLU) x 2 on one padded-flat batch element.

    The optional second input (Cb > 0) realises channel concatenation by
    splitting conv1's weight along Cin (two matmul streams, one accumulator).
    The conv1 result is written (zero-bordered) into a VMEM scratch in the same
    padded-flat layout so conv2 reads it with identical window slicing; the
    intermediate never touches HBM.
    """
    Wp = W + 2
    P = (H + 2) * Wp
    Lw = (H - 1) * Wp + W            # wide-output length (pad cols masked)
    OFF = Wp + 1                     # interior write offset in padded-flat

    if Cb > 0:
        (xa_ref, xb_ref, mask_ref, w1a_ref, w1b_ref, b1_ref,
         w2_ref, b2_ref, o_ref, mid_ref) = refs
    else:
        (xa_ref, mask_ref, w1a_ref, b1_ref, w2_ref, b2_ref,
         o_ref, mid_ref) = refs
        xb_ref = w1b_ref = None

    mask = mask_ref[...]                                     # (1, Lw) f32

    parts = [(xa_ref[0], w1a_ref, Ca, Ca >= 8)]
    if Cb > 0:
        parts.append((xb_ref[0], w1b_ref, Cb, Cb >= 8))

    # ---- conv1 + ReLU, masked, into padded-flat mid scratch ---------------
    h1 = jnp.maximum(_conv_taps(parts, None, K, Wp, Lw, Cmid)
                     + b1_ref[...], 0.0) * mask              # (Cmid, Lw)
    mid_ref[:, :OFF] = jnp.zeros((Cmid, OFF), jnp.float32)
    mid_ref[:, OFF + Lw:P] = jnp.zeros((Cmid, P - OFF - Lw), jnp.float32)
    mid_ref[:, OFF:OFF + Lw] = h1

    # ---- conv2 + ReLU, masked, zero-bordered padded-flat output ------------
    mid_parts = [(mid_ref[...], w2_ref, Cmid, True)]
    out = jnp.maximum(_conv_taps(mid_parts, None, K, Wp, Lw, Cout)
                      + b2_ref[...], 0.0) * mask             # (Cout, Lw)
    o_ref[0, :, :OFF] = jnp.zeros((Cout, OFF), jnp.float32)
    o_ref[0, :, OFF + Lw:P] = jnp.zeros((Cout, P - OFF - Lw), jnp.float32)
    o_ref[0, :, OFF:OFF + Lw] = out


def _head_kernel(*refs, Cin, Cout, add_prev):
    """Fused 1x1 head conv (+ optional residual add of prev) + sigmoid,
    emitting a zero-bordered padded-flat activation (valid next-conv input)."""
    if add_prev:
        x_ref, mask_ref, w_ref, b_ref, prev_ref, o_ref = refs
    else:
        x_ref, mask_ref, w_ref, b_ref, o_ref = refs
        prev_ref = None

    x = x_ref[0].astype(jnp.bfloat16)                        # (Cin, P)
    z = jnp.dot(w_ref[...].astype(jnp.bfloat16), x,
                preferred_element_type=jnp.float32) + b_ref[...]
    if add_prev:
        z = z + prev_ref[0]
    p = 1.0 / (1.0 + jnp.exp(-z))                            # exact sigmoid
    o_ref[0] = p * mask_ref[...]                             # zero the borders


def _head_bce_kernel(*refs, Cin, Cout, add_prev, inv_total):
    """Final 1x1 head conv + residual add + weighted BCE, computed from logits
    (numerically stable, final prediction never hits HBM).  Per-step work is a
    pure elementwise add into a (Cout, P) accumulator; the cross-lane reduce
    happens only on the last grid step."""
    if add_prev:
        (x_ref, t_ref, mask_ref, w_ref, b_ref, cw_ref,
         prev_ref, o_ref, acc_ref) = refs
    else:
        (x_ref, t_ref, mask_ref, w_ref, b_ref, cw_ref,
         o_ref, acc_ref) = refs
        prev_ref = None

    n = pl.program_id(0)

    @pl.when(n == 0)
    def _():
        acc_ref[...] = jnp.zeros_like(acc_ref)

    x = x_ref[0].astype(jnp.bfloat16)
    z = jnp.dot(w_ref[...].astype(jnp.bfloat16), x,
                preferred_element_type=jnp.float32) + b_ref[...]
    if add_prev:
        z = z + prev_ref[0]                                  # logits of sigmoid(prev + head)
    t = t_ref[0]
    # BCE with logits:  max(z,0) - z*t + log(1 + exp(-|z|))
    elem = jnp.maximum(z, 0.0) - z * t + jnp.log(1.0 + jnp.exp(-jnp.abs(z)))
    acc_ref[...] = acc_ref[...] + elem * cw_ref[...] * mask_ref[...]

    @pl.when(n == pl.num_programs(0) - 1)
    def _():
        o_ref[...] = jnp.sum(acc_ref[...], keepdims=True) * inv_total


# =========================================================================
# Pallas wrappers
# =========================================================================

_CONV_PARAMS = pltpu.CompilerParams(dimension_semantics=("parallel",),
                                    vmem_limit_bytes=32 * 1024 * 1024)


def double_conv_pallas(xa, xb, p, H, W):
    """Fused double conv.  xa/xb: (N, C, P) padded-flat f32; xb may be None.
    Logical input is cat([xa, xb], channel) — never materialized."""
    N, Ca, P = xa.shape
    Wp = W + 2
    assert P == (H + 2) * Wp
    Lw = (H - 1) * Wp + W
    w1, b1, w2, b2 = p["w1"], p["b1"], p["w2"], p["b2"]
    KK, Cmid, Cin_tot = w1.shape
    Cout = w2.shape[1]
    K = int(round(KK ** 0.5))
    Cb = 0 if xb is None else xb.shape[1]
    assert Ca + Cb == Cin_tot

    mask = _wide_col_mask(H, W)
    w1a = w1[:, :, :Ca]

    if Cb > 0:
        w1b = w1[:, :, Ca:]
        inputs = [xa, xb, mask, w1a, w1b, b1, w2, b2]
        in_specs = [
            pl.BlockSpec((1, Ca, P), lambda n: (n, 0, 0)),
            pl.BlockSpec((1, Cb, P), lambda n: (n, 0, 0)),
            pl.BlockSpec((1, Lw), lambda n: (0, 0)),
            pl.BlockSpec((KK, Cmid, Ca), lambda n: (0, 0, 0)),
            pl.BlockSpec((KK, Cmid, Cb), lambda n: (0, 0, 0)),
            pl.BlockSpec((Cmid, 1), lambda n: (0, 0)),
            pl.BlockSpec((KK, Cout, Cmid), lambda n: (0, 0, 0)),
            pl.BlockSpec((Cout, 1), lambda n: (0, 0)),
        ]
    else:
        inputs = [xa, mask, w1a, b1, w2, b2]
        in_specs = [
            pl.BlockSpec((1, Ca, P), lambda n: (n, 0, 0)),
            pl.BlockSpec((1, Lw), lambda n: (0, 0)),
            pl.BlockSpec((KK, Cmid, Ca), lambda n: (0, 0, 0)),
            pl.BlockSpec((Cmid, 1), lambda n: (0, 0)),
            pl.BlockSpec((KK, Cout, Cmid), lambda n: (0, 0, 0)),
            pl.BlockSpec((Cout, 1), lambda n: (0, 0)),
        ]

    kernel = functools.partial(_double_conv_kernel, H=H, W=W, K=K,
                               Ca=Ca, Cb=Cb, Cmid=Cmid, Cout=Cout)
    return pl.pallas_call(
        kernel,
        out_shape=jax.ShapeDtypeStruct((N, Cout, P), jnp.float32),
        grid=(N,),
        in_specs=in_specs,
        out_specs=pl.BlockSpec((1, Cout, P), lambda n: (n, 0, 0)),
        scratch_shapes=[pltpu.VMEM((Cmid, P), jnp.float32)],
        compiler_params=_CONV_PARAMS,
    )(*inputs)


def head_pallas(x_pf, head_w, head_b, H, W, prev_pf=None):
    """1x1 conv + optional `prev +` + sigmoid -> padded-flat (N, Cout, P)."""
    N, Cin, P = x_pf.shape
    Cout = head_w.shape[0]
    mask = _interior_mask(H, W)

    inputs = [x_pf, mask, head_w, head_b]
    in_specs = [pl.BlockSpec((1, Cin, P), lambda n: (n, 0, 0)),
                pl.BlockSpec((1, P), lambda n: (0, 0)),
                pl.BlockSpec((Cout, Cin), lambda n: (0, 0)),
                pl.BlockSpec((Cout, 1), lambda n: (0, 0))]
    if prev_pf is not None:
        inputs.append(prev_pf)
        in_specs.append(pl.BlockSpec((1, Cout, P), lambda n: (n, 0, 0)))

    kernel = functools.partial(_head_kernel, Cin=Cin, Cout=Cout,
                               add_prev=prev_pf is not None)
    return pl.pallas_call(
        kernel,
        out_shape=jax.ShapeDtypeStruct((N, Cout, P), jnp.float32),
        grid=(N,),
        in_specs=in_specs,
        out_specs=pl.BlockSpec((1, Cout, P), lambda n: (n, 0, 0)),
        compiler_params=_CONV_PARAMS,
    )(*inputs)


def head_bce_pallas(x_pf, head_w, head_b, target_pf, channel_weights, H, W,
                    prev_pf=None):
    """Fused final head + residual add + sigmoid + weighted BCE (from logits).
    Returns the scalar mean loss (PyTorch binary_cross_entropy semantics)."""
    N, Cin, P = x_pf.shape
    Cout = head_w.shape[0]
    mask = _interior_mask(H, W)
    cw = channel_weights.astype(jnp.float32).reshape(Cout, 1)

    inputs = [x_pf, target_pf, mask, head_w, head_b, cw]
    in_specs = [pl.BlockSpec((1, Cin, P), lambda n: (n, 0, 0)),
                pl.BlockSpec((1, Cout, P), lambda n: (n, 0, 0)),
                pl.BlockSpec((1, P), lambda n: (0, 0)),
                pl.BlockSpec((Cout, Cin), lambda n: (0, 0)),
                pl.BlockSpec((Cout, 1), lambda n: (0, 0)),
                pl.BlockSpec((Cout, 1), lambda n: (0, 0))]
    if prev_pf is not None:
        inputs.append(prev_pf)
        in_specs.append(pl.BlockSpec((1, Cout, P), lambda n: (n, 0, 0)))

    kernel = functools.partial(_head_bce_kernel, Cin=Cin, Cout=Cout,
                               add_prev=prev_pf is not None,
                               inv_total=1.0 / float(N * H * W * Cout))
    out = pl.pallas_call(
        kernel,
        out_shape=jax.ShapeDtypeStruct((1, 1), jnp.float32),
        grid=(N,),
        in_specs=in_specs,
        out_specs=pl.BlockSpec((1, 1), lambda n: (0, 0)),
        scratch_shapes=[pltpu.VMEM((Cout, P), jnp.float32)],
        compiler_params=pltpu.CompilerParams(
            dimension_semantics=("arbitrary",),     # cross-step accumulator
            vmem_limit_bytes=32 * 1024 * 1024),
    )(*inputs)
    return out[0, 0]


# =========================================================================
# UNet / ScoreResidueU glue (pool / upsample stay as fused XLA ops, jitted)
# =========================================================================

def unet_trunk(x_pf, extra_pf, params, depth, H, W):
    """Encoder/decoder trunk (no head).  `extra` is channel-concatenated (via
    weight split) onto the first conv.  Requires H, W divisible by 2**(depth-1)."""
    skips = []
    h, aux = x_pf, extra_pf
    hh, ww = H, W
    for d in range(depth - 1):
        h = double_conv_pallas(h, aux, params["enc"][d], hh, ww)
        aux = None
        skips.append((h, hh, ww))
        h = max_pool2_pf(h, hh, ww)
        hh //= 2
        ww //= 2
    h = double_conv_pallas(h, aux, params["enc"][depth - 1], hh, ww)  # bottleneck
    for d in reversed(range(depth - 1)):
        skip, sh, sw = skips[d]
        up = upsample2_pf(h, hh, ww)
        hh, ww = sh, sw
        # logical cat([up, skip], channel) handled by the weight split
        h = double_conv_pallas(up, skip, params["dec"][d], hh, ww)
    return h


@functools.partial(jax.jit, static_argnums=(4, 5))
def score_residue_u_loss_forward(feature_nchw, target_nchw, params,
                                 channel_weights, base_depth, residue_depth):
    N, _, H, W = feature_nchw.shape
    x_pf = pad_flat(feature_nchw)       # padded-flat input, reused by all blocks
    t_pf = pad_flat(target_nchw)
    n_res = len(params["res"])

    base = params["base"]
    h = unet_trunk(x_pf, None, base, base_depth, H, W)
    if n_res == 0:
        loss = head_bce_pallas(h, base["head_w"], base["head_b"], t_pf,
                               channel_weights, H, W, prev_pf=None)
    else:
        # prev = sigmoid(base UNet(input))   (sigmoid_once = False path)
        prev = head_pallas(h, base["head_w"], base["head_b"], H, W)
        for i, rp in enumerate(params["res"]):
            # UNet(cat([input, prev])) — concat via weight split
            h = unet_trunk(x_pf, prev, rp, residue_depth, H, W)
            if i == n_res - 1:
                # final: sigmoid(prev + head(h)) fused with weighted BCE
                loss = head_bce_pallas(h, rp["head_w"], rp["head_b"], t_pf,
                                       channel_weights, H, W, prev_pf=prev)
            else:
                prev = head_pallas(h, rp["head_w"], rp["head_b"], H, W,
                                   prev_pf=prev)

    metric = {"acc": -jnp.log(loss)}     # on-device, no host sync
    # TODO(synk): not self.training -> Compounder semantic metric skipped.
    return loss, metric


# =========================================================================
# Deterministic parameter init (channel-major packing: w = (K*K, Cout, Cin))
# =========================================================================

def init_conv(key, k, cin, cout):
    wkey, bkey = jax.random.split(key)
    std = math.sqrt(2.0 / (k * k * cin))
    w = jax.random.normal(wkey, (k * k, cout, cin), jnp.float32) * std
    b = jax.random.normal(bkey, (cout, 1), jnp.float32) * 0.01
    return w, b


def init_double_conv(key, cin, cout):
    k1, k2 = jax.random.split(key)
    w1, b1 = init_conv(k1, 3, cin, cout)
    w2, b2 = init_conv(k2, 3, cout, cout)
    return {"w1": w1, "b1": b1, "w2": w2, "b2": b2}


def init_unet(key, in_ch, out_ch, depth, width):
    chans = [width * (2 ** d) for d in range(depth)]
    keys = jax.random.split(key, 2 * depth)
    enc, prev = [], in_ch
    for d in range(depth):
        enc.append(init_double_conv(keys[d], prev, chans[d]))
        prev = chans[d]
    dec = []
    for d in range(depth - 1):
        # decoder input channels: cat([up (chans[d+1]), skip (chans[d])])
        dec.append(init_double_conv(keys[depth + d], chans[d + 1] + chans[d],
                                    chans[d]))
    hw, hb = init_conv(keys[2 * depth - 1], 1, chans[0], out_ch)
    return {"enc": enc, "dec": dec,
            "head_w": hw.reshape(out_ch, chans[0]), "head_b": hb}


def init_score_residue_u(key, in_ch, out_ch, residue_blocks, base_depth,
                         base_init_width, residue_depth, residue_init_width):
    keys = jax.random.split(key, residue_blocks + 1)
    base = init_unet(keys[0], in_ch, out_ch, base_depth, base_init_width)
    res = [init_unet(keys[i + 1], in_ch + out_ch, out_ch,
                     residue_depth, residue_init_width)
           for i in range(residue_blocks)]
    return {"base": base, "res": res}


# =========================================================================

if __name__ == "__main__":
    # Small, module-consistent config:
    #   in_channels=1, out_channels=3, residue_blocks=1,
    #   base_depth=2, base_init_width=8, residue_depth=2, residue_init_width=8
    N, IN_CH, H, W = 2, 1, 16, 16
    OUT_CH = 3
    RESIDUE_BLOCKS = 1
    BASE_DEPTH, BASE_WIDTH = 2, 8
    RES_DEPTH, RES_WIDTH = 2, 8

    key = jax.random.PRNGKey(0)
    kf, kt, kp = jax.random.split(key, 3)

    feature = jax.random.normal(kf, (N, IN_CH, H, W), jnp.float32)       # NCHW
    target = jax.random.uniform(kt, (N, OUT_CH, H, W), jnp.float32)      # NCHW in [0,1]
    channel_weights = jnp.array([1.0, 2.0, 0.5], jnp.float32)            # (out_channels,)

    params = init_score_residue_u(kp, IN_CH, OUT_CH, RESIDUE_BLOCKS,
                                  BASE_DEPTH, BASE_WIDTH, RES_DEPTH, RES_WIDTH)

    loss, metric = score_residue_u_loss_forward(
        feature, target, params, channel_weights, BASE_DEPTH, RES_DEPTH)

    jax.block_until_ready(loss)
    assert jnp.isfinite(loss)
    assert "acc" in metric and jnp.isfinite(metric["acc"])
    print("KERNEL_OK")
</pallas_src>

<mosaic_0001>
module attributes {stable_mosaic.version = 11 : i64} {
  func.func @_double_conv_kernel(%arg0: i32, %arg1: memref<1x1x324xf32, #tpu.memory_space<vmem>>, %arg2: memref<1x286xf32, #tpu.memory_space<vmem>>, %arg3: memref<9x8x1xf32, #tpu.memory_space<vmem>>, %arg4: memref<8x1xf32, #tpu.memory_space<vmem>>, %arg5: memref<9x8x8xf32, #tpu.memory_space<vmem>>, %arg6: memref<8x1xf32, #tpu.memory_space<vmem>>, %arg7: memref<1x8x324xf32, #tpu.memory_space<vmem>>, %arg8: memref<8x324xf32, #tpu.memory_space<vmem>>) attributes {dimension_semantics = [#tpu.dimension_semantics<parallel>], iteration_bounds = array<i64: 2>, scalar_prefetch = 0 : i64, scratch_operands = 1 : i64, tpu.core_type = #tpu.core_type<tc>, window_params = [{transform_indices = @transform_0, window_bounds = array<i64: 1, 1, 324>}, {pipeline_mode = #tpu.pipeline_mode<synchronous>, transform_indices = @transform_1, window_bounds = array<i64: 1, 286>}, {pipeline_mode = #tpu.pipeline_mode<synchronous>, transform_indices = @transform_2, window_bounds = array<i64: 9, 8, 1>}, {pipeline_mode = #tpu.pipeline_mode<synchronous>, transform_indices = @transform_3, window_bounds = array<i64: 8, 1>}, {pipeline_mode = #tpu.pipeline_mode<synchronous>, transform_indices = @transform_4, window_bounds = array<i64: 9, 8, 8>}, {pipeline_mode = #tpu.pipeline_mode<synchronous>, transform_indices = @transform_5, window_bounds = array<i64: 8, 1>}, {transform_indices = @transform_6, window_bounds = array<i64: 1, 8, 324>}]} {
    %c0 = arith.constant 0 : index
    %c0_0 = arith.constant 0 : index
    %0 = vector.load %arg2[%c0, %c0_0] : memref<1x286xf32, #tpu.memory_space<vmem>>, vector<1x286xf32>
    %c0_1 = arith.constant 0 : index
    %c0_2 = arith.constant 0 : index
    %c0_3 = arith.constant 0 : index
    %1 = vector.load %arg1[%c0_1, %c0_2, %c0_3] : memref<1x1x324xf32, #tpu.memory_space<vmem>>, vector<1x1x324xf32>
    %2 = vector.shape_cast %1 : vector<1x1x324xf32> to vector<1x324xf32>
    %cst = arith.constant 0.000000e+00 : f32
    %3 = vector.broadcast %cst : f32 to vector<8x286xf32>
    %4 = vector.extract_strided_slice %2 {offsets = [0, 0], sizes = [1, 286], strides = [1, 1]} : vector<1x324xf32> to vector<1x286xf32>
    %c0_4 = arith.constant 0 : index
    %c0_5 = arith.constant 0 : index
    %c0_6 = arith.constant 0 : index
    %5 = vector.load %arg3[%c0_4, %c0_5, %c0_6] : memref<9x8x1xf32, #tpu.memory_space<vmem>>, vector<1x8x1xf32>
    %6 = vector.shape_cast %5 : vector<1x8x1xf32> to vector<8x1xf32>
    %7 = vector.broadcast %6 : vector<8x1xf32> to vector<8x286xf32>
    %8 = vector.broadcast %4 : vector<1x286xf32> to vector<8x286xf32>
    %9 = arith.mulf %7, %8 : vector<8x286xf32>
    %10 = arith.addf %3, %9 : vector<8x286xf32>
    %11 = vector.extract_strided_slice %2 {offsets = [0, 1], sizes = [1, 286], strides = [1, 1]} : vector<1x324xf32> to vector<1x286xf32>
    %c1 = arith.constant 1 : index
    %c0_7 = arith.constant 0 : index
    %c0_8 = arith.constant 0 : index
    %12 = vector.load %arg3[%c1, %c0_7, %c0_8] : memref<9x8x1xf32, #tpu.memory_space<vmem>>, vector<1x8x1xf32>
    %13 = vector.shape_cast %12 : vector<1x8x1xf32> to vector<8x1xf32>
    %14 = vector.broadcast %13 : vector<8x1xf32> to vector<8x286xf32>
    %15 = vector.broadcast %11 : vector<1x286xf32> to vector<8x286xf32>
    %16 = arith.mulf %14, %15 : vector<8x286xf32>
    %17 = arith.addf %10, %16 : vector<8x286xf32>
    %18 = vector.extract_strided_slice %2 {offsets = [0, 2], sizes = [1, 286], strides = [1, 1]} : vector<1x324xf32> to vector<1x286xf32>
    %c2 = arith.constant 2 : index
    %c0_9 = arith.constant 0 : index
    %c0_10 = arith.constant 0 : index
    %19 = vector.load %arg3[%c2, %c0_9, %c0_10] : memref<9x8x1xf32, #tpu.memory_space<vmem>>, vector<1x8x1xf32>
    %20 = vector.shape_cast %19 : vector<1x8x1xf32> to vector<8x1xf32>
    %21 = vector.broadcast %20 : vector<8x1xf32> to vector<8x286xf32>
    %22 = vector.broadcast %18 : vector<1x286xf32> to vector<8x286xf32>
    %23 = arith.mulf %21, %22 : vector<8x286xf32>
    %24 = arith.addf %17, %23 : vector<8x286xf32>
    %25 = vector.extract_strided_slice %2 {offsets = [0, 18], sizes = [1, 286], strides = [1, 1]} : vector<1x324xf32> to vector<1x286xf32>
    %c3 = arith.constant 3 : index
    %c0_11 = arith.constant 0 : index
    %c0_12 = arith.constant 0 : index
    %26 = vector.load %arg3[%c3, %c0_11, %c0_12] : memref<9x8x1xf32, #tpu.memory_space<vmem>>, vector<1x8x1xf32>
    %27 = vector.shape_cast %26 : vector<1x8x1xf32> to vector<8x1xf32>
    %28 = vector.broadcast %27 : vector<8x1xf32> to vector<8x286xf32>
    %29 = vector.broadcast %25 : vector<1x286xf32> to vector<8x286xf32>
    %30 = arith.mulf %28, %29 : vector<8x286xf32>
    %31 = arith.addf %24, %30 : vector<8x286xf32>
    %32 = vector.extract_strided_slice %2 {offsets = [0, 19], sizes = [1, 286], strides = [1, 1]} : vector<1x324xf32> to vector<1x286xf32>
    %c4 = arith.constant 4 : index
    %c0_13 = arith.constant 0 : index
    %c0_14 = arith.constant 0 : index
    %33 = vector.load %arg3[%c4, %c0_13, %c0_14] : memref<9x8x1xf32, #tpu.memory_space<vmem>>, vector<1x8x1xf32>
    %34 = vector.shape_cast %33 : vector<1x8x1xf32> to vector<8x1xf32>
    %35 = vector.broadcast %34 : vector<8x1xf32> to vector<8x286xf32>
    %36 = vector.broadcast %32 : vector<1x286xf32> to vector<8x286xf32>
    %37 = arith.mulf %35, %36 : vector<8x286xf32>
    %38 = arith.addf %31, %37 : vector<8x286xf32>
    %39 = vector.extract_strided_slice %2 {offsets = [0, 20], sizes = [1, 286], strides = [1, 1]} : vector<1x324xf32> to vector<1x286xf32>
    %c5 = arith.constant 5 : index
    %c0_15 = arith.constant 0 : index
    %c0_16 = arith.constant 0 : index
    %40 = vector.load %arg3[%c5, %c0_15, %c0_16] : memref<9x8x1xf32, #tpu.memory_space<vmem>>, vector<1x8x1xf32>
    %41 = vector.shape_cast %40 : vector<1x8x1xf32> to vector<8x1xf32>
    %42 = vector.broadcast %41 : vector<8x1xf32> to vector<8x286xf32>
    %43 = vector.broadcast %39 : vector<1x286xf32> to vector<8x286xf32>
    %44 = arith.mulf %42, %43 : vector<8x286xf32>
    %45 = arith.addf %38, %44 : vector<8x286xf32>
    %46 = vector.extract_strided_slice %2 {offsets = [0, 36], sizes = [1, 286], strides = [1, 1]} : vector<1x324xf32> to vector<1x286xf32>
    %c6 = arith.constant 6 : index
    %c0_17 = arith.constant 0 : index
    %c0_18 = arith.constant 0 : index
    %47 = vector.load %arg3[%c6, %c0_17, %c0_18] : memref<9x8x1xf32, #tpu.memory_space<vmem>>, vector<1x8x1xf32>
    %48 = vector.shape_cast %47 : vector<1x8x1xf32> to vector<8x1xf32>
    %49 = vector.broadcast %48 : vector<8x1xf32> to vector<8x286xf32>
    %50 = vector.broadcast %46 : vector<1x286xf32> to vector<8x286xf32>
    %51 = arith.mulf %49, %50 : vector<8x286xf32>
    %52 = arith.addf %45, %51 : vector<8x286xf32>
    %53 = vector.extract_strided_slice %2 {offsets = [0, 37], sizes = [1, 286], strides = [1, 1]} : vector<1x324xf32> to vector<1x286xf32>
    %c7 = arith.constant 7 : index
    %c0_19 = arith.constant 0 : index
    %c0_20 = arith.constant 0 : index
    %54 = vector.load %arg3[%c7, %c0_19, %c0_20] : memref<9x8x1xf32, #tpu.memory_space<vmem>>, vector<1x8x1xf32>
    %55 = vector.shape_cast %54 : vector<1x8x1xf32> to vector<8x1xf32>
    %56 = vector.broadcast %55 : vector<8x1xf32> to vector<8x286xf32>
    %57 = vector.broadcast %53 : vector<1x286xf32> to vector<8x286xf32>
    %58 = arith.mulf %56, %57 : vector<8x286xf32>
    %59 = arith.addf %52, %58 : vector<8x286xf32>
    %60 = vector.extract_strided_slice %2 {offsets = [0, 38], sizes = [1, 286], strides = [1, 1]} : vector<1x324xf32> to vector<1x286xf32>
    %c8 = arith.constant 8 : index
    %c0_21 = arith.constant 0 : index
    %c0_22 = arith.constant 0 : index
    %61 = vector.load %arg3[%c8, %c0_21, %c0_22] : memref<9x8x1xf32, #tpu.memory_space<vmem>>, vector<1x8x1xf32>
    %62 = vector.shape_cast %61 : vector<1x8x1xf32> to vector<8x1xf32>
    %63 = vector.broadcast %62 : vector<8x1xf32> to vector<8x286xf32>
    %64 = vector.broadcast %60 : vector<1x286xf32> to vector<8x286xf32>
    %65 = arith.mulf %63, %64 : vector<8x286xf32>
    %66 = arith.addf %59, %65 : vector<8x286xf32>
    %c0_23 = arith.constant 0 : index
    %c0_24 = arith.constant 0 : index
    %67 = vector.load %arg4[%c0_23, %c0_24] : memref<8x1xf32, #tpu.memory_space<vmem>>, vector<8x1xf32>
    %68 = vector.broadcast %67 : vector<8x1xf32> to vector<8x286xf32>
    %69 = arith.addf %66, %68 : vector<8x286xf32>
    %cst_25 = arith.constant 0.000000e+00 : f32
    %70 = vector.broadcast %cst_25 : f32 to vector<8x286xf32>
    %71 = arith.maximumf %69, %70 : vector<8x286xf32>
    %72 = vector.broadcast %0 : vector<1x286xf32> to vector<8x286xf32>
    %73 = arith.mulf %71, %72 : vector<8x286xf32>
    %cst_26 = arith.constant 0.000000e+00 : f32
    %74 = vector.broadcast %cst_26 : f32 to vector<8x19xf32>
    %c0_27 = arith.constant 0 : index
    %c0_28 = arith.constant 0 : index
    %75 = vector.load %arg8[%c0_27, %c0_28] : memref<8x324xf32, #tpu.memory_space<vmem>>, vector<8x19xf32>
    tpu.vector_store %arg8[%c0_27, %c0_28], %74 {strides = array<i32>} : memref<8x324xf32, #tpu.memory_space<vmem>>, vector<8x19xf32>,
    %cst_29 = arith.constant 0.000000e+00 : f32
    %76 = vector.broadcast %cst_29 : f32 to vector<8x19xf32>
    %c0_30 = arith.constant 0 : index
    %c305 = arith.constant 305 : index
    %77 = vector.load %arg8[%c0_30, %c305] : memref<8x324xf32, #tpu.memory_space<vmem>>, vector<8x19xf32>
    tpu.vector_store %arg8[%c0_30, %c305], %76 {strides = array<i32>} : memref<8x324xf32, #tpu.memory_space<vmem>>, vector<8x19xf32>,
    %c0_31 = arith.constant 0 : index
    %c19 = arith.constant 19 : index
    %78 = vector.load %arg8[%c0_31, %c19] : memref<8x324xf32, #tpu.memory_space<vmem>>, vector<8x286xf32>
    tpu.vector_store %arg8[%c0_31, %c19], %73 {strides = array<i32>} : memref<8x324xf32, #tpu.memory_space<vmem>>, vector<8x286xf32>,
    %c0_32 = arith.constant 0 : index
    %c0_33 = arith.constant 0 : index
    %79 = vector.load %arg8[%c0_32, %c0_33] : memref<8x324xf32, #tpu.memory_space<vmem>>, vector<8x324xf32>
    %cst_34 = arith.constant 0.000000e+00 : f32
    %80 = vector.broadcast %cst_34 : f32 to vector<8x286xf32>
    %81 = vector.extract_strided_slice %79 {offsets = [0, 0], sizes = [8, 286], strides = [1, 1]} : vector<8x324xf32> to vector<8x286xf32>
    %c0_35 = arith.constant 0 : index
    %c0_36 = arith.constant 0 : index
    %c0_37 = arith.constant 0 : index
    %82 = vector.load %arg5[%c0_35, %c0_36, %c0_37] : memref<9x8x8xf32, #tpu.memory_space<vmem>>, vector<1x8x8xf32>
    %83 = vector.shape_cast %82 : vector<1x8x8xf32> to vector<8x8xf32>
    %84 = arith.truncf %83 : vector<8x8xf32> to vector<8x8xbf16>
    %85 = arith.truncf %81 : vector<8x286xf32> to vector<8x286xbf16>
    %cst_38 = arith.constant dense<0.000000e+00> : vector<8x286xf32>
    %86 = tpu.matmul %84, %85, %cst_38 {dimension_numbers = #tpu.dot_dimension_numbers<[1], [0], [0], [1], [0, 0, 1, 1], [], []>} : vector<8x8xbf16>, vector<8x286xbf16>, vector<8x286xf32> -> vector<8x286xf32>
    %87 = arith.addf %80, %86 : vector<8x286xf32>
    %88 = vector.extract_strided_slice %79 {offsets = [0, 1], sizes = [8, 286], strides = [1, 1]} : vector<8x324xf32> to vector<8x286xf32>
    %c1_39 = arith.constant 1 : index
    %c0_40 = arith.constant 0 : index
    %c0_41 = arith.constant 0 : index
    %89 = vector.load %arg5[%c1_39, %c0_40, %c0_41] : memref<9x8x8xf32, #tpu.memory_space<vmem>>, vector<1x8x8xf32>
    %90 = vector.shape_cast %89 : vector<1x8x8xf32> to vector<8x8xf32>
    %91 = arith.truncf %90 : vector<8x8xf32> to vector<8x8xbf16>
    %92 = arith.truncf %88 : vector<8x286xf32> to vector<8x286xbf16>
    %cst_42 = arith.constant dense<0.000000e+00> : vector<8x286xf32>
    %93 = tpu.matmul %91, %92, %cst_42 {dimension_numbers = #tpu.dot_dimension_numbers<[1], [0], [0], [1], [0, 0, 1, 1], [], []>} : vector<8x8xbf16>, vector<8x286xbf16>, vector<8x286xf32> -> vector<8x286xf32>
    %94 = arith.addf %87, %93 : vector<8x286xf32>
    %95 = vector.extract_strided_slice %79 {offsets = [0, 2], sizes = [8, 286], strides = [1, 1]} : vector<8x324xf32> to vector<8x286xf32>
    %c2_43 = arith.constant 2 : index
    %c0_44 = arith.constant 0 : index
    %c0_45 = arith.constant 0 : index
    %96 = vector.load %arg5[%c2_43, %c0_44, %c0_45] : memref<9x8x8xf32, #tpu.memory_space<vmem>>, vector<1x8x8xf32>
    %97 = vector.shape_cast %96 : vector<1x8x8xf32> to vector<8x8xf32>
    %98 = arith.truncf %97 : vector<8x8xf32> to vector<8x8xbf16>
    %99 = arith.truncf %95 : vector<8x286xf32> to vector<8x286xbf16>
    %cst_46 = arith.constant dense<0.000000e+00> : vector<8x286xf32>
    %100 = tpu.matmul %98, %99, %cst_46 {dimension_numbers = #tpu.dot_dimension_numbers<[1], [0], [0], [1], [0, 0, 1, 1], [], []>} : vector<8x8xbf16>, vector<8x286xbf16>, vector<8x286xf32> -> vector<8x286xf32>
    %101 = arith.addf %94, %100 : vector<8x286xf32>
    %102 = vector.extract_strided_slice %79 {offsets = [0, 18], sizes = [8, 286], strides = [1, 1]} : vector<8x324xf32> to vector<8x286xf32>
    %c3_47 = arith.constant 3 : index
    %c0_48 = arith.constant 0 : index
    %c0_49 = arith.constant 0 : index
    %103 = vector.load %arg5[%c3_47, %c0_48, %c0_49] : memref<9x8x8xf32, #tpu.memory_space<vmem>>, vector<1x8x8xf32>
    %104 = vector.shape_cast %103 : vector<1x8x8xf32> to vector<8x8xf32>
    %105 = arith.truncf %104 : vector<8x8xf32> to vector<8x8xbf16>
    %106 = arith.truncf %102 : vector<8x286xf32> to vector<8x286xbf16>
    %cst_50 = arith.constant dense<0.000000e+00> : vector<8x286xf32>
    %107 = tpu.matmul %105, %106, %cst_50 {dimension_numbers = #tpu.dot_dimension_numbers<[1], [0], [0], [1], [0, 0, 1, 1], [], []>} : vector<8x8xbf16>, vector<8x286xbf16>, vector<8x286xf32> -> vector<8x286xf32>
    %108 = arith.addf %101, %107 : vector<8x286xf32>
    %109 = vector.extract_strided_slice %79 {offsets = [0, 19], sizes = [8, 286], strides = [1, 1]} : vector<8x324xf32> to vector<8x286xf32>
    %c4_51 = arith.constant 4 : index
    %c0_52 = arith.constant 0 : index
    %c0_53 = arith.constant 0 : index
    %110 = vector.load %arg5[%c4_51, %c0_52, %c0_53] : memref<9x8x8xf32, #tpu.memory_space<vmem>>, vector<1x8x8xf32>
    %111 = vector.shape_cast %110 : vector<1x8x8xf32> to vector<8x8xf32>
    %112 = arith.truncf %111 : vector<8x8xf32> to vector<8x8xbf16>
    %113 = arith.truncf %109 : vector<8x286xf32> to vector<8x286xbf16>
    %cst_54 = arith.constant dense<0.000000e+00> : vector<8x286xf32>
    %114 = tpu.matmul %112, %113, %cst_54 {dimension_numbers = #tpu.dot_dimension_numbers<[1], [0], [0], [1], [0, 0, 1, 1], [], []>} : vector<8x8xbf16>, vector<8x286xbf16>, vector<8x286xf32> -> vector<8x286xf32>
    %115 = arith.addf %108, %114 : vector<8x286xf32>
    %116 = vector.extract_strided_slice %79 {offsets = [0, 20], sizes = [8, 286], strides = [1, 1]} : vector<8x324xf32> to vector<8x286xf32>
    %c5_55 = arith.constant 5 : index
    %c0_56 = arith.constant 0 : index
    %c0_57 = arith.constant 0 : index
    %117 = vector.load %arg5[%c5_55, %c0_56, %c0_57] : memref<9x8x8xf32, #tpu.memory_space<vmem>>, vector<1x8x8xf32>
    %118 = vector.shape_cast %117 : vector<1x8x8xf32> to vector<8x8xf32>
    %119 = arith.truncf %118 : vector<8x8xf32> to vector<8x8xbf16>
    %120 = arith.truncf %116 : vector<8x286xf32> to vector<8x286xbf16>
    %cst_58 = arith.constant dense<0.000000e+00> : vector<8x286xf32>
    %121 = tpu.matmul %119, %120, %cst_58 {dimension_numbers = #tpu.dot_dimension_numbers<[1], [0], [0], [1], [0, 0, 1, 1], [], []>} : vector<8x8xbf16>, vector<8x286xbf16>, vector<8x286xf32> -> vector<8x286xf32>
    %122 = arith.addf %115, %121 : vector<8x286xf32>
    %123 = vector.extract_strided_slice %79 {offsets = [0, 36], sizes = [8, 286], strides = [1, 1]} : vector<8x324xf32> to vector<8x286xf32>
    %c6_59 = arith.constant 6 : index
    %c0_60 = arith.constant 0 : index
    %c0_61 = arith.constant 0 : index
    %124 = vector.load %arg5[%c6_59, %c0_60, %c0_61] : memref<9x8x8xf32, #tpu.memory_space<vmem>>, vector<1x8x8xf32>
    %125 = vector.shape_cast %124 : vector<1x8x8xf32> to vector<8x8xf32>
    %126 = arith.truncf %125 : vector<8x8xf32> to vector<8x8xbf16>
    %127 = arith.truncf %123 : vector<8x286xf32> to vector<8x286xbf16>
    %cst_62 = arith.constant dense<0.000000e+00> : vector<8x286xf32>
    %128 = tpu.matmul %126, %127, %cst_62 {dimension_numbers = #tpu.dot_dimension_numbers<[1], [0], [0], [1], [0, 0, 1, 1], [], []>} : vector<8x8xbf16>, vector<8x286xbf16>, vector<8x286xf32> -> vector<8x286xf32>
    %129 = arith.addf %122, %128 : vector<8x286xf32>
    %130 = vector.extract_strided_slice %79 {offsets = [0, 37], sizes = [8, 286], strides = [1, 1]} : vector<8x324xf32> to vector<8x286xf32>
    %c7_63 = arith.constant 7 : index
    %c0_64 = arith.constant 0 : index
    %c0_65 = arith.constant 0 : index
    %131 = vector.load %arg5[%c7_63, %c0_64, %c0_65] : memref<9x8x8xf32, #tpu.memory_space<vmem>>, vector<1x8x8xf32>
    %132 = vector.shape_cast %131 : vector<1x8x8xf32> to vector<8x8xf32>
    %133 = arith.truncf %132 : vector<8x8xf32> to vector<8x8xbf16>
    %134 = arith.truncf %130 : vector<8x286xf32> to vector<8x286xbf16>
    %cst_66 = arith.constant dense<0.000000e+00> : vector<8x286xf32>
    %135 = tpu.matmul %133, %134, %cst_66 {dimension_numbers = #tpu.dot_dimension_numbers<[1], [0], [0], [1], [0, 0, 1, 1], [], []>} : vector<8x8xbf16>, vector<8x286xbf16>, vector<8x286xf32> -> vector<8x286xf32>
    %136 = arith.addf %129, %135 : vector<8x286xf32>
    %137 = vector.extract_strided_slice %79 {offsets = [0, 38], sizes = [8, 286], strides = [1, 1]} : vector<8x324xf32> to vector<8x286xf32>
    %c8_67 = arith.constant 8 : index
    %c0_68 = arith.constant 0 : index
    %c0_69 = arith.constant 0 : index
    %138 = vector.load %arg5[%c8_67, %c0_68, %c0_69] : memref<9x8x8xf32, #tpu.memory_space<vmem>>, vector<1x8x8xf32>
    %139 = vector.shape_cast %138 : vector<1x8x8xf32> to vector<8x8xf32>
    %140 = arith.truncf %139 : vector<8x8xf32> to vector<8x8xbf16>
    %141 = arith.truncf %137 : vector<8x286xf32> to vector<8x286xbf16>
    %cst_70 = arith.constant dense<0.000000e+00> : vector<8x286xf32>
    %142 = tpu.matmul %140, %141, %cst_70 {dimension_numbers = #tpu.dot_dimension_numbers<[1], [0], [0], [1], [0, 0, 1, 1], [], []>} : vector<8x8xbf16>, vector<8x286xbf16>, vector<8x286xf32> -> vector<8x286xf32>
    %143 = arith.addf %136, %142 : vector<8x286xf32>
    %c0_71 = arith.constant 0 : index
    %c0_72 = arith.constant 0 : index
    %144 = vector.load %arg6[%c0_71, %c0_72] : memref<8x1xf32, #tpu.memory_space<vmem>>, vector<8x1xf32>
    %145 = vector.broadcast %144 : vector<8x1xf32> to vector<8x286xf32>
    %146 = arith.addf %143, %145 : vector<8x286xf32>
    %cst_73 = arith.constant 0.000000e+00 : f32
    %147 = vector.broadcast %cst_73 : f32 to vector<8x286xf32>
    %148 = arith.maximumf %146, %147 : vector<8x286xf32>
    %149 = vector.broadcast %0 : vector<1x286xf32> to vector<8x286xf32>
    %150 = arith.mulf %148, %149 : vector<8x286xf32>
    %cst_74 = arith.constant 0.000000e+00 : f32
    %151 = vector.broadcast %cst_74 : f32 to vector<8x19xf32>
    %c0_75 = arith.constant 0 : index
    %c0_76 = arith.constant 0 : index
    %c0_77 = arith.constant 0 : index
    %152 = vector.load %arg7[%c0_75, %c0_76, %c0_77] : memref<1x8x324xf32, #tpu.memory_space<vmem>>, vector<1x8x19xf32>
    %153 = vector.shape_cast %152 : vector<1x8x19xf32> to vector<8x19xf32>
    %154 = vector.shape_cast %151 : vector<8x19xf32> to vector<1x8x19xf32>
    tpu.vector_store %arg7[%c0_75, %c0_76, %c0_77], %154 {strides = array<i32>} : memref<1x8x324xf32, #tpu.memory_space<vmem>>, vector<1x8x19xf32>,
    %cst_78 = arith.constant 0.000000e+00 : f32
    %155 = vector.broadcast %cst_78 : f32 to vector<8x19xf32>
    %c0_79 = arith.constant 0 : index
    %c0_80 = arith.constant 0 : index
    %c305_81 = arith.constant 305 : index
    %156 = vector.load %arg7[%c0_79, %c0_80, %c305_81] : memref<1x8x324xf32, #tpu.memory_space<vmem>>, vector<1x8x19xf32>
    %157 = vector.shape_cast %156 : vector<1x8x19xf32> to vector<8x19xf32>
    %158 = vector.shape_cast %155 : vector<8x19xf32> to vector<1x8x19xf32>
    tpu.vector_store %arg7[%c0_79, %c0_80, %c305_81], %158 {strides = array<i32>} : memref<1x8x324xf32, #tpu.memory_space<vmem>>, vector<1x8x19xf32>,
    %c0_82 = arith.constant 0 : index
    %c0_83 = arith.constant 0 : index
    %c19_84 = arith.constant 19 : index
    %159 = vector.load %arg7[%c0_82, %c0_83, %c19_84] : memref<1x8x324xf32, #tpu.memory_space<vmem>>, vector<1x8x286xf32>
    %160 = vector.shape_cast %159 : vector<1x8x286xf32> to vector<8x286xf32>
    %161 = vector.shape_cast %150 : vector<8x286xf32> to vector<1x8x286xf32>
    tpu.vector_store %arg7[%c0_82, %c0_83, %c19_84], %161 {strides = array<i32>} : memref<1x8x324xf32, #tpu.memory_space<vmem>>, vector<1x8x286xf32>,
    return
  }
  func.func @transform_0(%arg0: i32) -> (i32, i32, i32) {
    %c0_i32 = arith.constant 0 : i32
    %c0_i32_0 = arith.constant 0 : i32
    %c0_i32_1 = arith.constant 0 : i32
    return %arg0, %c0_i32, %c0_i32_0 : i32, i32, i32
  }
  func.func @transform_1(%arg0: i32) -> (i32, i32) {
    %c0_i32 = arith.constant 0 : i32
    %c0_i32_0 = arith.constant 0 : i32
    %c0_i32_1 = arith.constant 0 : i32
    return %c0_i32, %c0_i32_0 : i32, i32
  }
  func.func @transform_2(%arg0: i32) -> (i32, i32, i32) {
    %c0_i32 = arith.constant 0 : i32
    %c0_i32_0 = arith.constant 0 : i32
    %c0_i32_1 = arith.constant 0 : i32
    %c0_i32_2 = arith.constant 0 : i32
    return %c0_i32, %c0_i32_0, %c0_i32_1 : i32, i32, i32
  }
  func.func @transform_3(%arg0: i32) -> (i32, i32) {
    %c0_i32 = arith.constant 0 : i32
    %c0_i32_0 = arith.constant 0 : i32
    %c0_i32_1 = arith.constant 0 : i32
    return %c0_i32, %c0_i32_0 : i32, i32
  }
  func.func @transform_4(%arg0: i32) -> (i32, i32, i32) {
    %c0_i32 = arith.constant 0 : i32
    %c0_i32_0 = arith.constant 0 : i32
    %c0_i32_1 = arith.constant 0 : i32
    %c0_i32_2 = arith.constant 0 : i32
    return %c0_i32, %c0_i32_0, %c0_i32_1 : i32, i32, i32
  }
  func.func @transform_5(%arg0: i32) -> (i32, i32) {
    %c0_i32 = arith.constant 0 : i32
    %c0_i32_0 = arith.constant 0 : i32
    %c0_i32_1 = arith.constant 0 : i32
    return %c0_i32, %c0_i32_0 : i32, i32
  }
  func.func @transform_6(%arg0: i32) -> (i32, i32, i32) {
    %c0_i32 = arith.constant 0 : i32
    %c0_i32_0 = arith.constant 0 : i32
    %c0_i32_1 = arith.constant 0 : i32
    return %arg0, %c0_i32, %c0_i32_0 : i32, i32, i32
  }
}

module attributes {stable_mosaic.version = 11 : i64} {
  func.func @_double_conv_kernel(%arg0: i32, %arg1: memref<1x8x100xf32, #tpu.memory_space<vmem>>, %arg2: memref<1x78xf32, #tpu.memory_space<vmem>>, %arg3: memref<9x16x8xf32, #tpu.memory_space<vmem>>, %arg4: memref<16x1xf32, #tpu.memory_space<vmem>>, %arg5: memref<9x16x16xf32, #tpu.memory_space<vmem>>, %arg6: memref<16x1xf32, #tpu.memory_space<vmem>>, %arg7: memref<1x16x100xf32, #tpu.memory_space<vmem>>, %arg8: memref<16x100xf32, #tpu.memory_space<vmem>>) attributes {dimension_semantics = [#tpu.dimension_semantics<parallel>], iteration_bounds = array<i64: 2>, scalar_prefetch = 0 : i64, scratch_operands = 1 : i64, tpu.core_type = #tpu.core_type<tc>, window_params = [{transform_indices = @transform_0, window_bounds = array<i64: 1, 8, 100>}, {pipeline_mode = #tpu.pipeline_mode<synchronous>, transform_indices = @transform_1, window_bounds = array<i64: 1, 78>}, {pipeline_mode = #tpu.pipeline_mode<synchronous>, transform_indices = @transform_2, window_bounds = array<i64: 9, 16, 8>}, {pipeline_mode = #tpu.pipeline_mode<synchronous>, transform_indices = @transform_3, window_bounds = array<i64: 16, 1>}, {pipeline_mode = #tpu.pipeline_mode<synchronous>, transform_indices = @transform_4, window_bounds = array<i64: 9, 16, 16>}, {pipeline_mode = #tpu.pipeline_mode<synchronous>, transform_indices = @transform_5, window_bounds = array<i64: 16, 1>}, {transform_indices = @transform_6, window_bounds = array<i64: 1, 16, 100>}]} {
    %c0 = arith.constant 0 : index
    %c0_0 = arith.constant 0 : index
    %0 = vector.load %arg2[%c0, %c0_0] : memref<1x78xf32, #tpu.memory_space<vmem>>, vector<1x78xf32>
    %c0_1 = arith.constant 0 : index
    %c0_2 = arith.constant 0 : index
    %c0_3 = arith.constant 0 : index
    %1 = vector.load %arg1[%c0_1, %c0_2, %c0_3] : memref<1x8x100xf32, #tpu.memory_space<vmem>>, vector<1x8x100xf32>
    %2 = vector.shape_cast %1 : vector<1x8x100xf32> to vector<8x100xf32>
    %cst = arith.constant 0.000000e+00 : f32
    %3 = vector.broadcast %cst : f32 to vector<16x78xf32>
    %4 = vector.extract_strided_slice %2 {offsets = [0, 0], sizes = [8, 78], strides = [1, 1]} : vector<8x100xf32> to vector<8x78xf32>
    %c0_4 = arith.constant 0 : index
    %c0_5 = arith.constant 0 : index
    %c0_6 = arith.constant 0 : index
    %5 = vector.load %arg3[%c0_4, %c0_5, %c0_6] : memref<9x16x8xf32, #tpu.memory_space<vmem>>, vector<1x16x8xf32>
    %6 = vector.shape_cast %5 : vector<1x16x8xf32> to vector<16x8xf32>
    %7 = arith.truncf %6 : vector<16x8xf32> to vector<16x8xbf16>
    %8 = arith.truncf %4 : vector<8x78xf32> to vector<8x78xbf16>
    %cst_7 = arith.constant dense<0.000000e+00> : vector<16x78xf32>
    %9 = tpu.matmul %7, %8, %cst_7 {dimension_numbers = #tpu.dot_dimension_numbers<[1], [0], [0], [1], [0, 0, 1, 1], [], []>} : vector<16x8xbf16>, vector<8x78xbf16>, vector<16x78xf32> -> vector<16x78xf32>
    %10 = arith.addf %3, %9 : vector<16x78xf32>
    %11 = vector.extract_strided_slice %2 {offsets = [0, 1], sizes = [8, 78], strides = [1, 1]} : vector<8x100xf32> to vector<8x78xf32>
    %c1 = arith.constant 1 : index
    %c0_8 = arith.constant 0 : index
    %c0_9 = arith.constant 0 : index
    %12 = vector.load %arg3[%c1, %c0_8, %c0_9] : memref<9x16x8xf32, #tpu.memory_space<vmem>>, vector<1x16x8xf32>
    %13 = vector.shape_cast %12 : vector<1x16x8xf32> to vector<16x8xf32>
    %14 = arith.truncf %13 : vector<16x8xf32> to vector<16x8xbf16>
    %15 = arith.truncf %11 : vector<8x78xf32> to vector<8x78xbf16>
    %cst_10 = arith.constant dense<0.000000e+00> : vector<16x78xf32>
    %16 = tpu.matmul %14, %15, %cst_10 {dimension_numbers = #tpu.dot_dimension_numbers<[1], [0], [0], [1], [0, 0, 1, 1], [], []>} : vector<16x8xbf16>, vector<8x78xbf16>, vector<16x78xf32> -> vector<16x78xf32>
    %17 = arith.addf %10, %16 : vector<16x78xf32>
    %18 = vector.extract_strided_slice %2 {offsets = [0, 2], sizes = [8, 78], strides = [1, 1]} : vector<8x100xf32> to vector<8x78xf32>
    %c2 = arith.constant 2 : index
    %c0_11 = arith.constant 0 : index
    %c0_12 = arith.constant 0 : index
    %19 = vector.load %arg3[%c2, %c0_11, %c0_12] : memref<9x16x8xf32, #tpu.memory_space<vmem>>, vector<1x16x8xf32>
    %20 = vector.shape_cast %19 : vector<1x16x8xf32> to vector<16x8xf32>
    %21 = arith.truncf %20 : vector<16x8xf32> to vector<16x8xbf16>
    %22 = arith.truncf %18 : vector<8x78xf32> to vector<8x78xbf16>
    %cst_13 = arith.constant dense<0.000000e+00> : vector<16x78xf32>
    %23 = tpu.matmul %21, %22, %cst_13 {dimension_numbers = #tpu.dot_dimension_numbers<[1], [0], [0], [1], [0, 0, 1, 1], [], []>} : vector<16x8xbf16>, vector<8x78xbf16>, vector<16x78xf32> -> vector<16x78xf32>
    %24 = arith.addf %17, %23 : vector<16x78xf32>
    %25 = vector.extract_strided_slice %2 {offsets = [0, 10], sizes = [8, 78], strides = [1, 1]} : vector<8x100xf32> to vector<8x78xf32>
    %c3 = arith.constant 3 : index
    %c0_14 = arith.constant 0 : index
    %c0_15 = arith.constant 0 : index
    %26 = vector.load %arg3[%c3, %c0_14, %c0_15] : memref<9x16x8xf32, #tpu.memory_space<vmem>>, vector<1x16x8xf32>
    %27 = vector.shape_cast %26 : vector<1x16x8xf32> to vector<16x8xf32>
    %28 = arith.truncf %27 : vector<16x8xf32> to vector<16x8xbf16>
    %29 = arith.truncf %25 : vector<8x78xf32> to vector<8x78xbf16>
    %cst_16 = arith.constant dense<0.000000e+00> : vector<16x78xf32>
    %30 = tpu.matmul %28, %29, %cst_16 {dimension_numbers = #tpu.dot_dimension_numbers<[1], [0], [0], [1], [0, 0, 1, 1], [], []>} : vector<16x8xbf16>, vector<8x78xbf16>, vector<16x78xf32> -> vector<16x78xf32>
    %31 = arith.addf %24, %30 : vector<16x78xf32>
    %32 = vector.extract_strided_slice %2 {offsets = [0, 11], sizes = [8, 78], strides = [1, 1]} : vector<8x100xf32> to vector<8x78xf32>
    %c4 = arith.constant 4 : index
    %c0_17 = arith.constant 0 : index
    %c0_18 = arith.constant 0 : index
    %33 = vector.load %arg3[%c4, %c0_17, %c0_18] : memref<9x16x8xf32, #tpu.memory_space<vmem>>, vector<1x16x8xf32>
    %34 = vector.shape_cast %33 : vector<1x16x8xf32> to vector<16x8xf32>
    %35 = arith.truncf %34 : vector<16x8xf32> to vector<16x8xbf16>
    %36 = arith.truncf %32 : vector<8x78xf32> to vector<8x78xbf16>
    %cst_19 = arith.constant dense<0.000000e+00> : vector<16x78xf32>
    %37 = tpu.matmul %35, %36, %cst_19 {dimension_numbers = #tpu.dot_dimension_numbers<[1], [0], [0], [1], [0, 0, 1, 1], [], []>} : vector<16x8xbf16>, vector<8x78xbf16>, vector<16x78xf32> -> vector<16x78xf32>
    %38 = arith.addf %31, %37 : vector<16x78xf32>
    %39 = vector.extract_strided_slice %2 {offsets = [0, 12], sizes = [8, 78], strides = [1, 1]} : vector<8x100xf32> to vector<8x78xf32>
    %c5 = arith.constant 5 : index
    %c0_20 = arith.constant 0 : index
    %c0_21 = arith.constant 0 : index
    %40 = vector.load %arg3[%c5, %c0_20, %c0_21] : memref<9x16x8xf32, #tpu.memory_space<vmem>>, vector<1x16x8xf32>
    %41 = vector.shape_cast %40 : vector<1x16x8xf32> to vector<16x8xf32>
    %42 = arith.truncf %41 : vector<16x8xf32> to vector<16x8xbf16>
    %43 = arith.truncf %39 : vector<8x78xf32> to vector<8x78xbf16>
    %cst_22 = arith.constant dense<0.000000e+00> : vector<16x78xf32>
    %44 = tpu.matmul %42, %43, %cst_22 {dimension_numbers = #tpu.dot_dimension_numbers<[1], [0], [0], [1], [0, 0, 1, 1], [], []>} : vector<16x8xbf16>, vector<8x78xbf16>, vector<16x78xf32> -> vector<16x78xf32>
    %45 = arith.addf %38, %44 : vector<16x78xf32>
    %46 = vector.extract_strided_slice %2 {offsets = [0, 20], sizes = [8, 78], strides = [1, 1]} : vector<8x100xf32> to vector<8x78xf32>
    %c6 = arith.constant 6 : index
    %c0_23 = arith.constant 0 : index
    %c0_24 = arith.constant 0 : index
    %47 = vector.load %arg3[%c6, %c0_23, %c0_24] : memref<9x16x8xf32, #tpu.memory_space<vmem>>, vector<1x16x8xf32>
    %48 = vector.shape_cast %47 : vector<1x16x8xf32> to vector<16x8xf32>
    %49 = arith.truncf %48 : vector<16x8xf32> to vector<16x8xbf16>
    %50 = arith.truncf %46 : vector<8x78xf32> to vector<8x78xbf16>
    %cst_25 = arith.constant dense<0.000000e+00> : vector<16x78xf32>
    %51 = tpu.matmul %49, %50, %cst_25 {dimension_numbers = #tpu.dot_dimension_numbers<[1], [0], [0], [1], [0, 0, 1, 1], [], []>} : vector<16x8xbf16>, vector<8x78xbf16>, vector<16x78xf32> -> vector<16x78xf32>
    %52 = arith.addf %45, %51 : vector<16x78xf32>
    %53 = vector.extract_strided_slice %2 {offsets = [0, 21], sizes = [8, 78], strides = [1, 1]} : vector<8x100xf32> to vector<8x78xf32>
    %c7 = arith.constant 7 : index
    %c0_26 = arith.constant 0 : index
    %c0_27 = arith.constant 0 : index
    %54 = vector.load %arg3[%c7, %c0_26, %c0_27] : memref<9x16x8xf32, #tpu.memory_space<vmem>>, vector<1x16x8xf32>
    %55 = vector.shape_cast %54 : vector<1x16x8xf32> to vector<16x8xf32>
    %56 = arith.truncf %55 : vector<16x8xf32> to vector<16x8xbf16>
    %57 = arith.truncf %53 : vector<8x78xf32> to vector<8x78xbf16>
    %cst_28 = arith.constant dense<0.000000e+00> : vector<16x78xf32>
    %58 = tpu.matmul %56, %57, %cst_28 {dimension_numbers = #tpu.dot_dimension_numbers<[1], [0], [0], [1], [0, 0, 1, 1], [], []>} : vector<16x8xbf16>, vector<8x78xbf16>, vector<16x78xf32> -> vector<16x78xf32>
    %59 = arith.addf %52, %58 : vector<16x78xf32>
    %60 = vector.extract_strided_slice %2 {offsets = [0, 22], sizes = [8, 78], strides = [1, 1]} : vector<8x100xf32> to vector<8x78xf32>
    %c8 = arith.constant 8 : index
    %c0_29 = arith.constant 0 : index
    %c0_30 = arith.constant 0 : index
    %61 = vector.load %arg3[%c8, %c0_29, %c0_30] : memref<9x16x8xf32, #tpu.memory_space<vmem>>, vector<1x16x8xf32>
    %62 = vector.shape_cast %61 : vector<1x16x8xf32> to vector<16x8xf32>
    %63 = arith.truncf %62 : vector<16x8xf32> to vector<16x8xbf16>
    %64 = arith.truncf %60 : vector<8x78xf32> to vector<8x78xbf16>
    %cst_31 = arith.constant dense<0.000000e+00> : vector<16x78xf32>
    %65 = tpu.matmul %63, %64, %cst_31 {dimension_numbers = #tpu.dot_dimension_numbers<[1], [0], [0], [1], [0, 0, 1, 1], [], []>} : vector<16x8xbf16>, vector<8x78xbf16>, vector<16x78xf32> -> vector<16x78xf32>
    %66 = arith.addf %59, %65 : vector<16x78xf32>
    %c0_32 = arith.constant 0 : index
    %c0_33 = arith.constant 0 : index
    %67 = vector.load %arg4[%c0_32, %c0_33] : memref<16x1xf32, #tpu.memory_space<vmem>>, vector<16x1xf32>
    %68 = vector.broadcast %67 : vector<16x1xf32> to vector<16x78xf32>
    %69 = arith.addf %66, %68 : vector<16x78xf32>
    %cst_34 = arith.constant 0.000000e+00 : f32
    %70 = vector.broadcast %cst_34 : f32 to vector<16x78xf32>
    %71 = arith.maximumf %69, %70 : vector<16x78xf32>
    %72 = vector.broadcast %0 : vector<1x78xf32> to vector<16x78xf32>
    %73 = arith.mulf %71, %72 : vector<16x78xf32>
    %cst_35 = arith.constant 0.000000e+00 : f32
    %74 = vector.broadcast %cst_35 : f32 to vector<16x11xf32>
    %c0_36 = arith.constant 0 : index
    %c0_37 = arith.constant 0 : index
    %75 = vector.load %arg8[%c0_36, %c0_37] : memref<16x100xf32, #tpu.memory_space<vmem>>, vector<16x11xf32>
    tpu.vector_store %arg8[%c0_36, %c0_37], %74 {strides = array<i32>} : memref<16x100xf32, #tpu.memory_space<vmem>>, vector<16x11xf32>,
    %cst_38 = arith.constant 0.000000e+00 : f32
    %76 = vector.broadcast %cst_38 : f32 to vector<16x11xf32>
    %c0_39 = arith.constant 0 : index
    %c89 = arith.constant 89 : index
    %77 = vector.load %arg8[%c0_39, %c89] : memref<16x100xf32, #tpu.memory_space<vmem>>, vector<16x11xf32>
    tpu.vector_store %arg8[%c0_39, %c89], %76 {strides = array<i32>} : memref<16x100xf32, #tpu.memory_space<vmem>>, vector<16x11xf32>,
    %c0_40 = arith.constant 0 : index
    %c11 = arith.constant 11 : index
    %78 = vector.load %arg8[%c0_40, %c11] : memref<16x100xf32, #tpu.memory_space<vmem>>, vector<16x78xf32>
    tpu.vector_store %arg8[%c0_40, %c11], %73 {strides = array<i32>} : memref<16x100xf32, #tpu.memory_space<vmem>>, vector<16x78xf32>,
    %c0_41 = arith.constant 0 : index
    %c0_42 = arith.constant 0 : index
    %79 = vector.load %arg8[%c0_41, %c0_42] : memref<16x100xf32, #tpu.memory_space<vmem>>, vector<16x100xf32>
    %cst_43 = arith.constant 0.000000e+00 : f32
    %80 = vector.broadcast %cst_43 : f32 to vector<16x78xf32>
    %81 = vector.extract_strided_slice %79 {offsets = [0, 0], sizes = [16, 78], strides = [1, 1]} : vector<16x100xf32> to vector<16x78xf32>
    %c0_44 = arith.constant 0 : index
    %c0_45 = arith.constant 0 : index
    %c0_46 = arith.constant 0 : index
    %82 = vector.load %arg5[%c0_44, %c0_45, %c0_46] : memref<9x16x16xf32, #tpu.memory_space<vmem>>, vector<1x16x16xf32>
    %83 = vector.shape_cast %82 : vector<1x16x16xf32> to vector<16x16xf32>
    %84 = arith.truncf %83 : vector<16x16xf32> to vector<16x16xbf16>
    %85 = arith.truncf %81 : vector<16x78xf32> to vector<16x78xbf16>
    %cst_47 = arith.constant dense<0.000000e+00> : vector<16x78xf32>
    %86 = tpu.matmul %84, %85, %cst_47 {dimension_numbers = #tpu.dot_dimension_numbers<[1], [0], [0], [1], [0, 0, 1, 1], [], []>} : vector<16x16xbf16>, vector<16x78xbf16>, vector<16x78xf32> -> vector<16x78xf32>
    %87 = arith.addf %80, %86 : vector<16x78xf32>
    %88 = vector.extract_strided_slice %79 {offsets = [0, 1], sizes = [16, 78], strides = [1, 1]} : vector<16x100xf32> to vector<16x78xf32>
    %c1_48 = arith.constant 1 : index
    %c0_49 = arith.constant 0 : index
    %c0_50 = arith.constant 0 : index
    %89 = vector.load %arg5[%c1_48, %c0_49, %c0_50] : memref<9x16x16xf32, #tpu.memory_space<vmem>>, vector<1x16x16xf32>
    %90 = vector.shape_cast %89 : vector<1x16x16xf32> to vector<16x16xf32>
    %91 = arith.truncf %90 : vector<16x16xf32> to vector<16x16xbf16>
    %92 = arith.truncf %88 : vector<16x78xf32> to vector<16x78xbf16>
    %cst_51 = arith.constant dense<0.000000e+00> : vector<16x78xf32>
    %93 = tpu.matmul %91, %92, %cst_51 {dimension_numbers = #tpu.dot_dimension_numbers<[1], [0], [0], [1], [0, 0, 1, 1], [], []>} : vector<16x16xbf16>, vector<16x78xbf16>, vector<16x78xf32> -> vector<16x78xf32>
    %94 = arith.addf %87, %93 : vector<16x78xf32>
    %95 = vector.extract_strided_slice %79 {offsets = [0, 2], sizes = [16, 78], strides = [1, 1]} : vector<16x100xf32> to vector<16x78xf32>
    %c2_52 = arith.constant 2 : index
    %c0_53 = arith.constant 0 : index
    %c0_54 = arith.constant 0 : index
    %96 = vector.load %arg5[%c2_52, %c0_53, %c0_54] : memref<9x16x16xf32, #tpu.memory_space<vmem>>, vector<1x16x16xf32>
    %97 = vector.shape_cast %96 : vector<1x16x16xf32> to vector<16x16xf32>
    %98 = arith.truncf %97 : vector<16x16xf32> to vector<16x16xbf16>
    %99 = arith.truncf %95 : vector<16x78xf32> to vector<16x78xbf16>
    %cst_55 = arith.constant dense<0.000000e+00> : vector<16x78xf32>
    %100 = tpu.matmul %98, %99, %cst_55 {dimension_numbers = #tpu.dot_dimension_numbers<[1], [0], [0], [1], [0, 0, 1, 1], [], []>} : vector<16x16xbf16>, vector<16x78xbf16>, vector<16x78xf32> -> vector<16x78xf32>
    %101 = arith.addf %94, %100 : vector<16x78xf32>
    %102 = vector.extract_strided_slice %79 {offsets = [0, 10], sizes = [16, 78], strides = [1, 1]} : vector<16x100xf32> to vector<16x78xf32>
    %c3_56 = arith.constant 3 : index
    %c0_57 = arith.constant 0 : index
    %c0_58 = arith.constant 0 : index
    %103 = vector.load %arg5[%c3_56, %c0_57, %c0_58] : memref<9x16x16xf32, #tpu.memory_space<vmem>>, vector<1x16x16xf32>
    %104 = vector.shape_cast %103 : vector<1x16x16xf32> to vector<16x16xf32>
    %105 = arith.truncf %104 : vector<16x16xf32> to vector<16x16xbf16>
    %106 = arith.truncf %102 : vector<16x78xf32> to vector<16x78xbf16>
    %cst_59 = arith.constant dense<0.000000e+00> : vector<16x78xf32>
    %107 = tpu.matmul %105, %106, %cst_59 {dimension_numbers = #tpu.dot_dimension_numbers<[1], [0], [0], [1], [0, 0, 1, 1], [], []>} : vector<16x16xbf16>, vector<16x78xbf16>, vector<16x78xf32> -> vector<16x78xf32>
    %108 = arith.addf %101, %107 : vector<16x78xf32>
    %109 = vector.extract_strided_slice %79 {offsets = [0, 11], sizes = [16, 78], strides = [1, 1]} : vector<16x100xf32> to vector<16x78xf32>
    %c4_60 = arith.constant 4 : index
    %c0_61 = arith.constant 0 : index
    %c0_62 = arith.constant 0 : index
    %110 = vector.load %arg5[%c4_60, %c0_61, %c0_62] : memref<9x16x16xf32, #tpu.memory_space<vmem>>, vector<1x16x16xf32>
    %111 = vector.shape_cast %110 : vector<1x16x16xf32> to vector<16x16xf32>
    %112 = arith.truncf %111 : vector<16x16xf32> to vector<16x16xbf16>
    %113 = arith.truncf %109 : vector<16x78xf32> to vector<16x78xbf16>
    %cst_63 = arith.constant dense<0.000000e+00> : vector<16x78xf32>
    %114 = tpu.matmul %112, %113, %cst_63 {dimension_numbers = #tpu.dot_dimension_numbers<[1], [0], [0], [1], [0, 0, 1, 1], [], []>} : vector<16x16xbf16>, vector<16x78xbf16>, vector<16x78xf32> -> vector<16x78xf32>
    %115 = arith.addf %108, %114 : vector<16x78xf32>
    %116 = vector.extract_strided_slice %79 {offsets = [0, 12], sizes = [16, 78], strides = [1, 1]} : vector<16x100xf32> to vector<16x78xf32>
    %c5_64 = arith.constant 5 : index
    %c0_65 = arith.constant 0 : index
    %c0_66 = arith.constant 0 : index
    %117 = vector.load %arg5[%c5_64, %c0_65, %c0_66] : memref<9x16x16xf32, #tpu.memory_space<vmem>>, vector<1x16x16xf32>
    %118 = vector.shape_cast %117 : vector<1x16x16xf32> to vector<16x16xf32>
    %119 = arith.truncf %118 : vector<16x16xf32> to vector<16x16xbf16>
    %120 = arith.truncf %116 : vector<16x78xf32> to vector<16x78xbf16>
    %cst_67 = arith.constant dense<0.000000e+00> : vector<16x78xf32>
    %121 = tpu.matmul %119, %120, %cst_67 {dimension_numbers = #tpu.dot_dimension_numbers<[1], [0], [0], [1], [0, 0, 1, 1], [], []>} : vector<16x16xbf16>, vector<16x78xbf16>, vector<16x78xf32> -> vector<16x78xf32>
    %122 = arith.addf %115, %121 : vector<16x78xf32>
    %123 = vector.extract_strided_slice %79 {offsets = [0, 20], sizes = [16, 78], strides = [1, 1]} : vector<16x100xf32> to vector<16x78xf32>
    %c6_68 = arith.constant 6 : index
    %c0_69 = arith.constant 0 : index
    %c0_70 = arith.constant 0 : index
    %124 = vector.load %arg5[%c6_68, %c0_69, %c0_70] : memref<9x16x16xf32, #tpu.memory_space<vmem>>, vector<1x16x16xf32>
    %125 = vector.shape_cast %124 : vector<1x16x16xf32> to vector<16x16xf32>
    %126 = arith.truncf %125 : vector<16x16xf32> to vector<16x16xbf16>
    %127 = arith.truncf %123 : vector<16x78xf32> to vector<16x78xbf16>
    %cst_71 = arith.constant dense<0.000000e+00> : vector<16x78xf32>
    %128 = tpu.matmul %126, %127, %cst_71 {dimension_numbers = #tpu.dot_dimension_numbers<[1], [0], [0], [1], [0, 0, 1, 1], [], []>} : vector<16x16xbf16>, vector<16x78xbf16>, vector<16x78xf32> -> vector<16x78xf32>
    %129 = arith.addf %122, %128 : vector<16x78xf32>
    %130 = vector.extract_strided_slice %79 {offsets = [0, 21], sizes = [16, 78], strides = [1, 1]} : vector<16x100xf32> to vector<16x78xf32>
    %c7_72 = arith.constant 7 : index
    %c0_73 = arith.constant 0 : index
    %c0_74 = arith.constant 0 : index
    %131 = vector.load %arg5[%c7_72, %c0_73, %c0_74] : memref<9x16x16xf32, #tpu.memory_space<vmem>>, vector<1x16x16xf32>
    %132 = vector.shape_cast %131 : vector<1x16x16xf32> to vector<16x16xf32>
    %133 = arith.truncf %132 : vector<16x16xf32> to vector<16x16xbf16>
    %134 = arith.truncf %130 : vector<16x78xf32> to vector<16x78xbf16>
    %cst_75 = arith.constant dense<0.000000e+00> : vector<16x78xf32>
    %135 = tpu.matmul %133, %134, %cst_75 {dimension_numbers = #tpu.dot_dimension_numbers<[1], [0], [0], [1], [0, 0, 1, 1], [], []>} : vector<16x16xbf16>, vector<16x78xbf16>, vector<16x78xf32> -> vector<16x78xf32>
    %136 = arith.addf %129, %135 : vector<16x78xf32>
    %137 = vector.extract_strided_slice %79 {offsets = [0, 22], sizes = [16, 78], strides = [1, 1]} : vector<16x100xf32> to vector<16x78xf32>
    %c8_76 = arith.constant 8 : index
    %c0_77 = arith.constant 0 : index
    %c0_78 = arith.constant 0 : index
    %138 = vector.load %arg5[%c8_76, %c0_77, %c0_78] : memref<9x16x16xf32, #tpu.memory_space<vmem>>, vector<1x16x16xf32>
    %139 = vector.shape_cast %138 : vector<1x16x16xf32> to vector<16x16xf32>
    %140 = arith.truncf %139 : vector<16x16xf32> to vector<16x16xbf16>
    %141 = arith.truncf %137 : vector<16x78xf32> to vector<16x78xbf16>
    %cst_79 = arith.constant dense<0.000000e+00> : vector<16x78xf32>
    %142 = tpu.matmul %140, %141, %cst_79 {dimension_numbers = #tpu.dot_dimension_numbers<[1], [0], [0], [1], [0, 0, 1, 1], [], []>} : vector<16x16xbf16>, vector<16x78xbf16>, vector<16x78xf32> -> vector<16x78xf32>
    %143 = arith.addf %136, %142 : vector<16x78xf32>
    %c0_80 = arith.constant 0 : index
    %c0_81 = arith.constant 0 : index
    %144 = vector.load %arg6[%c0_80, %c0_81] : memref<16x1xf32, #tpu.memory_space<vmem>>, vector<16x1xf32>
    %145 = vector.broadcast %144 : vector<16x1xf32> to vector<16x78xf32>
    %146 = arith.addf %143, %145 : vector<16x78xf32>
    %cst_82 = arith.constant 0.000000e+00 : f32
    %147 = vector.broadcast %cst_82 : f32 to vector<16x78xf32>
    %148 = arith.maximumf %146, %147 : vector<16x78xf32>
    %149 = vector.broadcast %0 : vector<1x78xf32> to vector<16x78xf32>
    %150 = arith.mulf %148, %149 : vector<16x78xf32>
    %cst_83 = arith.constant 0.000000e+00 : f32
    %151 = vector.broadcast %cst_83 : f32 to vector<16x11xf32>
    %c0_84 = arith.constant 0 : index
    %c0_85 = arith.constant 0 : index
    %c0_86 = arith.constant 0 : index
    %152 = vector.load %arg7[%c0_84, %c0_85, %c0_86] : memref<1x16x100xf32, #tpu.memory_space<vmem>>, vector<1x16x11xf32>
    %153 = vector.shape_cast %152 : vector<1x16x11xf32> to vector<16x11xf32>
    %154 = vector.shape_cast %151 : vector<16x11xf32> to vector<1x16x11xf32>
    tpu.vector_store %arg7[%c0_84, %c0_85, %c0_86], %154 {strides = array<i32>} : memref<1x16x100xf32, #tpu.memory_space<vmem>>, vector<1x16x11xf32>,
    %cst_87 = arith.constant 0.000000e+00 : f32
    %155 = vector.broadcast %cst_87 : f32 to vector<16x11xf32>
    %c0_88 = arith.constant 0 : index
    %c0_89 = arith.constant 0 : index
    %c89_90 = arith.constant 89 : index
    %156 = vector.load %arg7[%c0_88, %c0_89, %c89_90] : memref<1x16x100xf32, #tpu.memory_space<vmem>>, vector<1x16x11xf32>
    %157 = vector.shape_cast %156 : vector<1x16x11xf32> to vector<16x11xf32>
    %158 = vector.shape_cast %155 : vector<16x11xf32> to vector<1x16x11xf32>
    tpu.vector_store %arg7[%c0_88, %c0_89, %c89_90], %158 {strides = array<i32>} : memref<1x16x100xf32, #tpu.memory_space<vmem>>, vector<1x16x11xf32>,
    %c0_91 = arith.constant 0 : index
    %c0_92 = arith.constant 0 : index
    %c11_93 = arith.constant 11 : index
    %159 = vector.load %arg7[%c0_91, %c0_92, %c11_93] : memref<1x16x100xf32, #tpu.memory_space<vmem>>, vector<1x16x78xf32>
    %160 = vector.shape_cast %159 : vector<1x16x78xf32> to vector<16x78xf32>
    %161 = vector.shape_cast %150 : vector<16x78xf32> to vector<1x16x78xf32>
    tpu.vector_store %arg7[%c0_91, %c0_92, %c11_93], %161 {strides = array<i32>} : memref<1x16x100xf32, #tpu.memory_space<vmem>>, vector<1x16x78xf32>,
    return
  }
  func.func @transform_0(%arg0: i32) -> (i32, i32, i32) {
    %c0_i32 = arith.constant 0 : i32
    %c0_i32_0 = arith.constant 0 : i32
    %c0_i32_1 = arith.constant 0 : i32
    return %arg0, %c0_i32, %c0_i32_0 : i32, i32, i32
  }
  func.func @transform_1(%arg0: i32) -> (i32, i32) {
    %c0_i32 = arith.constant 0 : i32
    %c0_i32_0 = arith.constant 0 : i32
    %c0_i32_1 = arith.constant 0 : i32
    return %c0_i32, %c0_i32_0 : i32, i32
  }
  func.func @transform_2(%arg0: i32) -> (i32, i32, i32) {
    %c0_i32 = arith.constant 0 : i32
    %c0_i32_0 = arith.constant 0 : i32
    %c0_i32_1 = arith.constant 0 : i32
    %c0_i32_2 = arith.constant 0 : i32
    return %c0_i32, %c0_i32_0, %c0_i32_1 : i32, i32, i32
  }
  func.func @transform_3(%arg0: i32) -> (i32, i32) {
    %c0_i32 = arith.constant 0 : i32
    %c0_i32_0 = arith.constant 0 : i32
    %c0_i32_1 = arith.constant 0 : i32
    return %c0_i32, %c0_i32_0 : i32, i32
  }
  func.func @transform_4(%arg0: i32) -> (i32, i32, i32) {
    %c0_i32 = arith.constant 0 : i32
    %c0_i32_0 = arith.constant 0 : i32
    %c0_i32_1 = arith.constant 0 : i32
    %c0_i32_2 = arith.constant 0 : i32
    return %c0_i32, %c0_i32_0, %c0_i32_1 : i32, i32, i32
  }
  func.func @transform_5(%arg0: i32) -> (i32, i32) {
    %c0_i32 = arith.constant 0 : i32
    %c0_i32_0 = arith.constant 0 : i32
    %c0_i32_1 = arith.constant 0 : i32
    return %c0_i32, %c0_i32_0 : i32, i32
  }
  func.func @transform_6(%arg0: i32) -> (i32, i32, i32) {
    %c0_i32 = arith.constant 0 : i32
    %c0_i32_0 = arith.constant 0 : i32
    %c0_i32_1 = arith.constant 0 : i32
    return %arg0, %c0_i32, %c0_i32_0 : i32, i32, i32
  }
}

module attributes {stable_mosaic.version = 11 : i64} {
  func.func @_double_conv_kernel(%arg0: i32, %arg1: memref<1x16x324xf32, #tpu.memory_space<vmem>>, %arg2: memref<1x8x324xf32, #tpu.memory_space<vmem>>, %arg3: memref<1x286xf32, #tpu.memory_space<vmem>>, %arg4: memref<9x8x16xf32, #tpu.memory_space<vmem>>, %arg5: memref<9x8x8xf32, #tpu.memory_space<vmem>>, %arg6: memref<8x1xf32, #tpu.memory_space<vmem>>, %arg7: memref<9x8x8xf32, #tpu.memory_space<vmem>>, %arg8: memref<8x1xf32, #tpu.memory_space<vmem>>, %arg9: memref<1x8x324xf32, #tpu.memory_space<vmem>>, %arg10: memref<8x324xf32, #tpu.memory_space<vmem>>) attributes {dimension_semantics = [#tpu.dimension_semantics<parallel>], iteration_bounds = array<i64: 2>, scalar_prefetch = 0 : i64, scratch_operands = 1 : i64, tpu.core_type = #tpu.core_type<tc>, window_params = [{transform_indices = @transform_0, window_bounds = array<i64: 1, 16, 324>}, {transform_indices = @transform_1, window_bounds = array<i64: 1, 8, 324>}, {pipeline_mode = #tpu.pipeline_mode<synchronous>, transform_indices = @transform_2, window_bounds = array<i64: 1, 286>}, {pipeline_mode = #tpu.pipeline_mode<synchronous>, transform_indices = @transform_3, window_bounds = array<i64: 9, 8, 16>}, {pipeline_mode = #tpu.pipeline_mode<synchronous>, transform_indices = @transform_4, window_bounds = array<i64: 9, 8, 8>}, {pipeline_mode = #tpu.pipeline_mode<synchronous>, transform_indices = @transform_5, window_bounds = array<i64: 8, 1>}, {pipeline_mode = #tpu.pipeline_mode<synchronous>, transform_indices = @transform_6, window_bounds = array<i64: 9, 8, 8>}, {pipeline_mode = #tpu.pipeline_mode<synchronous>, transform_indices = @transform_7, window_bounds = array<i64: 8, 1>}, {transform_indices = @transform_8, window_bounds = array<i64: 1, 8, 324>}]} {
    %c0 = arith.constant 0 : index
    %c0_0 = arith.constant 0 : index
    %0 = vector.load %arg3[%c0, %c0_0] : memref<1x286xf32, #tpu.memory_space<vmem>>, vector<1x286xf32>
    %c0_1 = arith.constant 0 : index
    %c0_2 = arith.constant 0 : index
    %c0_3 = arith.constant 0 : index
    %1 = vector.load %arg1[%c0_1, %c0_2, %c0_3] : memref<1x16x324xf32, #tpu.memory_space<vmem>>, vector<1x16x324xf32>
    %2 = vector.shape_cast %1 : vector<1x16x324xf32> to vector<16x324xf32>
    %c0_4 = arith.constant 0 : index
    %c0_5 = arith.constant 0 : index
    %c0_6 = arith.constant 0 : index
    %3 = vector.load %arg2[%c0_4, %c0_5, %c0_6] : memref<1x8x324xf32, #tpu.memory_space<vmem>>, vector<1x8x324xf32>
    %4 = vector.shape_cast %3 : vector<1x8x324xf32> to vector<8x324xf32>
    %cst = arith.constant 0.000000e+00 : f32
    %5 = vector.broadcast %cst : f32 to vector<8x286xf32>
    %6 = vector.extract_strided_slice %2 {offsets = [0, 0], sizes = [16, 286], strides = [1, 1]} : vector<16x324xf32> to vector<16x286xf32>
    %c0_7 = arith.constant 0 : index
    %c0_8 = arith.constant 0 : index
    %c0_9 = arith.constant 0 : index
    %7 = vector.load %arg4[%c0_7, %c0_8, %c0_9] : memref<9x8x16xf32, #tpu.memory_space<vmem>>, vector<1x8x16xf32>
    %8 = vector.shape_cast %7 : vector<1x8x16xf32> to vector<8x16xf32>
    %9 = arith.truncf %8 : vector<8x16xf32> to vector<8x16xbf16>
    %10 = arith.truncf %6 : vector<16x286xf32> to vector<16x286xbf16>
    %cst_10 = arith.constant dense<0.000000e+00> : vector<8x286xf32>
    %11 = tpu.matmul %9, %10, %cst_10 {dimension_numbers = #tpu.dot_dimension_numbers<[1], [0], [0], [1], [0, 0, 1, 1], [], []>} : vector<8x16xbf16>, vector<16x286xbf16>, vector<8x286xf32> -> vector<8x286xf32>
    %12 = arith.addf %5, %11 : vector<8x286xf32>
    %13 = vector.extract_strided_slice %4 {offsets = [0, 0], sizes = [8, 286], strides = [1, 1]} : vector<8x324xf32> to vector<8x286xf32>
    %c0_11 = arith.constant 0 : index
    %c0_12 = arith.constant 0 : index
    %c0_13 = arith.constant 0 : index
    %14 = vector.load %arg5[%c0_11, %c0_12, %c0_13] : memref<9x8x8xf32, #tpu.memory_space<vmem>>, vector<1x8x8xf32>
    %15 = vector.shape_cast %14 : vector<1x8x8xf32> to vector<8x8xf32>
    %16 = arith.truncf %15 : vector<8x8xf32> to vector<8x8xbf16>
    %17 = arith.truncf %13 : vector<8x286xf32> to vector<8x286xbf16>
    %cst_14 = arith.constant dense<0.000000e+00> : vector<8x286xf32>
    %18 = tpu.matmul %16, %17, %cst_14 {dimension_numbers = #tpu.dot_dimension_numbers<[1], [0], [0], [1], [0, 0, 1, 1], [], []>} : vector<8x8xbf16>, vector<8x286xbf16>, vector<8x286xf32> -> vector<8x286xf32>
    %19 = arith.addf %12, %18 : vector<8x286xf32>
    %20 = vector.extract_strided_slice %2 {offsets = [0, 1], sizes = [16, 286], strides = [1, 1]} : vector<16x324xf32> to vector<16x286xf32>
    %c1 = arith.constant 1 : index
    %c0_15 = arith.constant 0 : index
    %c0_16 = arith.constant 0 : index
    %21 = vector.load %arg4[%c1, %c0_15, %c0_16] : memref<9x8x16xf32, #tpu.memory_space<vmem>>, vector<1x8x16xf32>
    %22 = vector.shape_cast %21 : vector<1x8x16xf32> to vector<8x16xf32>
    %23 = arith.truncf %22 : vector<8x16xf32> to vector<8x16xbf16>
    %24 = arith.truncf %20 : vector<16x286xf32> to vector<16x286xbf16>
    %cst_17 = arith.constant dense<0.000000e+00> : vector<8x286xf32>
    %25 = tpu.matmul %23, %24, %cst_17 {dimension_numbers = #tpu.dot_dimension_numbers<[1], [0], [0], [1], [0, 0, 1, 1], [], []>} : vector<8x16xbf16>, vector<16x286xbf16>, vector<8x286xf32> -> vector<8x286xf32>
    %26 = arith.addf %19, %25 : vector<8x286xf32>
    %27 = vector.extract_strided_slice %4 {offsets = [0, 1], sizes = [8, 286], strides = [1, 1]} : vector<8x324xf32> to vector<8x286xf32>
    %c1_18 = arith.constant 1 : index
    %c0_19 = arith.constant 0 : index
    %c0_20 = arith.constant 0 : index
    %28 = vector.load %arg5[%c1_18, %c0_19, %c0_20] : memref<9x8x8xf32, #tpu.memory_space<vmem>>, vector<1x8x8xf32>
    %29 = vector.shape_cast %28 : vector<1x8x8xf32> to vector<8x8xf32>
    %30 = arith.truncf %29 : vector<8x8xf32> to vector<8x8xbf16>
    %31 = arith.truncf %27 : vector<8x286xf32> to vector<8x286xbf16>
    %cst_21 = arith.constant dense<0.000000e+00> : vector<8x286xf32>
    %32 = tpu.matmul %30, %31, %cst_21 {dimension_numbers = #tpu.dot_dimension_numbers<[1], [0], [0], [1], [0, 0, 1, 1], [], []>} : vector<8x8xbf16>, vector<8x286xbf16>, vector<8x286xf32> -> vector<8x286xf32>
    %33 = arith.addf %26, %32 : vector<8x286xf32>
    %34 = vector.extract_strided_slice %2 {offsets = [0, 2], sizes = [16, 286], strides = [1, 1]} : vector<16x324xf32> to vector<16x286xf32>
    %c2 = arith.constant 2 : index
    %c0_22 = arith.constant 0 : index
    %c0_23 = arith.constant 0 : index
    %35 = vector.load %arg4[%c2, %c0_22, %c0_23] : memref<9x8x16xf32, #tpu.memory_space<vmem>>, vector<1x8x16xf32>
    %36 = vector.shape_cast %35 : vector<1x8x16xf32> to vector<8x16xf32>
    %37 = arith.truncf %36 : vector<8x16xf32> to vector<8x16xbf16>
    %38 = arith.truncf %34 : vector<16x286xf32> to vector<16x286xbf16>
    %cst_24 = arith.constant dense<0.000000e+00> : vector<8x286xf32>
    %39 = tpu.matmul %37, %38, %cst_24 {dimension_numbers = #tpu.dot_dimension_numbers<[1], [0], [0], [1], [0, 0, 1, 1], [], []>} : vector<8x16xbf16>, vector<16x286xbf16>, vector<8x286xf32> -> vector<8x286xf32>
    %40 = arith.addf %33, %39 : vector<8x286xf32>
    %41 = vector.extract_strided_slice %4 {offsets = [0, 2], sizes = [8, 286], strides = [1, 1]} : vector<8x324xf32> to vector<8x286xf32>
    %c2_25 = arith.constant 2 : index
    %c0_26 = arith.constant 0 : index
    %c0_27 = arith.constant 0 : index
    %42 = vector.load %arg5[%c2_25, %c0_26, %c0_27] : memref<9x8x8xf32, #tpu.memory_space<vmem>>, vector<1x8x8xf32>
    %43 = vector.shape_cast %42 : vector<1x8x8xf32> to vector<8x8xf32>
    %44 = arith.truncf %43 : vector<8x8xf32> to vector<8x8xbf16>
    %45 = arith.truncf %41 : vector<8x286xf32> to vector<8x286xbf16>
    %cst_28 = arith.constant dense<0.000000e+00> : vector<8x286xf32>
    %46 = tpu.matmul %44, %45, %cst_28 {dimension_numbers = #tpu.dot_dimension_numbers<[1], [0], [0], [1], [0, 0, 1, 1], [], []>} : vector<8x8xbf16>, vector<8x286xbf16>, vector<8x286xf32> -> vector<8x286xf32>
    %47 = arith.addf %40, %46 : vector<8x286xf32>
    %48 = vector.extract_strided_slice %2 {offsets = [0, 18], sizes = [16, 286], strides = [1, 1]} : vector<16x324xf32> to vector<16x286xf32>
    %c3 = arith.constant 3 : index
    %c0_29 = arith.constant 0 : index
    %c0_30 = arith.constant 0 : index
    %49 = vector.load %arg4[%c3, %c0_29, %c0_30] : memref<9x8x16xf32, #tpu.memory_space<vmem>>, vector<1x8x16xf32>
    %50 = vector.shape_cast %49 : vector<1x8x16xf32> to vector<8x16xf32>
    %51 = arith.truncf %50 : vector<8x16xf32> to vector<8x16xbf16>
    %52 = arith.truncf %48 : vector<16x286xf32> to vector<16x286xbf16>
    %cst_31 = arith.constant dense<0.000000e+00> : vector<8x286xf32>
    %53 = tpu.matmul %51, %52, %cst_31 {dimension_numbers = #tpu.dot_dimension_numbers<[1], [0], [0], [1], [0, 0, 1, 1], [], []>} : vector<8x16xbf16>, vector<16x286xbf16>, vector<8x286xf32> -> vector<8x286xf32>
    %54 = arith.addf %47, %53 : vector<8x286xf32>
    %55 = vector.extract_strided_slice %4 {offsets = [0, 18], sizes = [8, 286], strides = [1, 1]} : vector<8x324xf32> to vector<8x286xf32>
    %c3_32 = arith.constant 3 : index
    %c0_33 = arith.constant 0 : index
    %c0_34 = arith.constant 0 : index
    %56 = vector.load %arg5[%c3_32, %c0_33, %c0_34] : memref<9x8x8xf32, #tpu.memory_space<vmem>>, vector<1x8x8xf32>
    %57 = vector.shape_cast %56 : vector<1x8x8xf32> to vector<8x8xf32>
    %58 = arith.truncf %57 : vector<8x8xf32> to vector<8x8xbf16>
    %59 = arith.truncf %55 : vector<8x286xf32> to vector<8x286xbf16>
    %cst_35 = arith.constant dense<0.000000e+00> : vector<8x286xf32>
    %60 = tpu.matmul %58, %59, %cst_35 {dimension_numbers = #tpu.dot_dimension_numbers<[1], [0], [0], [1], [0, 0, 1, 1], [], []>} : vector<8x8xbf16>, vector<8x286xbf16>, vector<8x286xf32> -> vector<8x286xf32>
    %61 = arith.addf %54, %60 : vector<8x286xf32>
    %62 = vector.extract_strided_slice %2 {offsets = [0, 19], sizes = [16, 286], strides = [1, 1]} : vector<16x324xf32> to vector<16x286xf32>
    %c4 = arith.constant 4 : index
    %c0_36 = arith.constant 0 : index
    %c0_37 = arith.constant 0 : index
    %63 = vector.load %arg4[%c4, %c0_36, %c0_37] : memref<9x8x16xf32, #tpu.memory_space<vmem>>, vector<1x8x16xf32>
    %64 = vector.shape_cast %63 : vector<1x8x16xf32> to vector<8x16xf32>
    %65 = arith.truncf %64 : vector<8x16xf32> to vector<8x16xbf16>
    %66 = arith.truncf %62 : vector<16x286xf32> to vector<16x286xbf16>
    %cst_38 = arith.constant dense<0.000000e+00> : vector<8x286xf32>
    %67 = tpu.matmul %65, %66, %cst_38 {dimension_numbers = #tpu.dot_dimension_numbers<[1], [0], [0], [1], [0, 0, 1, 1], [], []>} : vector<8x16xbf16>, vector<16x286xbf16>, vector<8x286xf32> -> vector<8x286xf32>
    %68 = arith.addf %61, %67 : vector<8x286xf32>
    %69 = vector.extract_strided_slice %4 {offsets = [0, 19], sizes = [8, 286], strides = [1, 1]} : vector<8x324xf32> to vector<8x286xf32>
    %c4_39 = arith.constant 4 : index
    %c0_40 = arith.constant 0 : index
    %c0_41 = arith.constant 0 : index
    %70 = vector.load %arg5[%c4_39, %c0_40, %c0_41] : memref<9x8x8xf32, #tpu.memory_space<vmem>>, vector<1x8x8xf32>
    %71 = vector.shape_cast %70 : vector<1x8x8xf32> to vector<8x8xf32>
    %72 = arith.truncf %71 : vector<8x8xf32> to vector<8x8xbf16>
    %73 = arith.truncf %69 : vector<8x286xf32> to vector<8x286xbf16>
    %cst_42 = arith.constant dense<0.000000e+00> : vector<8x286xf32>
    %74 = tpu.matmul %72, %73, %cst_42 {dimension_numbers = #tpu.dot_dimension_numbers<[1], [0], [0], [1], [0, 0, 1, 1], [], []>} : vector<8x8xbf16>, vector<8x286xbf16>, vector<8x286xf32> -> vector<8x286xf32>
    %75 = arith.addf %68, %74 : vector<8x286xf32>
    %76 = vector.extract_strided_slice %2 {offsets = [0, 20], sizes = [16, 286], strides = [1, 1]} : vector<16x324xf32> to vector<16x286xf32>
    %c5 = arith.constant 5 : index
    %c0_43 = arith.constant 0 : index
    %c0_44 = arith.constant 0 : index
    %77 = vector.load %arg4[%c5, %c0_43, %c0_44] : memref<9x8x16xf32, #tpu.memory_space<vmem>>, vector<1x8x16xf32>
    %78 = vector.shape_cast %77 : vector<1x8x16xf32> to vector<8x16xf32>
    %79 = arith.truncf %78 : vector<8x16xf32> to vector<8x16xbf16>
    %80 = arith.truncf %76 : vector<16x286xf32> to vector<16x286xbf16>
    %cst_45 = arith.constant dense<0.000000e+00> : vector<8x286xf32>
    %81 = tpu.matmul %79, %80, %cst_45 {dimension_numbers = #tpu.dot_dimension_numbers<[1], [0], [0], [1], [0, 0, 1, 1], [], []>} : vector<8x16xbf16>, vector<16x286xbf16>, vector<8x286xf32> -> vector<8x286xf32>
    %82 = arith.addf %75, %81 : vector<8x286xf32>
    %83 = vector.extract_strided_slice %4 {offsets = [0, 20], sizes = [8, 286], strides = [1, 1]} : vector<8x324xf32> to vector<8x286xf32>
    %c5_46 = arith.constant 5 : index
    %c0_47 = arith.constant 0 : index
    %c0_48 = arith.constant 0 : index
    %84 = vector.load %arg5[%c5_46, %c0_47, %c0_48] : memref<9x8x8xf32, #tpu.memory_space<vmem>>, vector<1x8x8xf32>
    %85 = vector.shape_cast %84 : vector<1x8x8xf32> to vector<8x8xf32>
    %86 = arith.truncf %85 : vector<8x8xf32> to vector<8x8xbf16>
    %87 = arith.truncf %83 : vector<8x286xf32> to vector<8x286xbf16>
    %cst_49 = arith.constant dense<0.000000e+00> : vector<8x286xf32>
    %88 = tpu.matmul %86, %87, %cst_49 {dimension_numbers = #tpu.dot_dimension_numbers<[1], [0], [0], [1], [0, 0, 1, 1], [], []>} : vector<8x8xbf16>, vector<8x286xbf16>, vector<8x286xf32> -> vector<8x286xf32>
    %89 = arith.addf %82, %88 : vector<8x286xf32>
    %90 = vector.extract_strided_slice %2 {offsets = [0, 36], sizes = [16, 286], strides = [1, 1]} : vector<16x324xf32> to vector<16x286xf32>
    %c6 = arith.constant 6 : index
    %c0_50 = arith.constant 0 : index
    %c0_51 = arith.constant 0 : index
    %91 = vector.load %arg4[%c6, %c0_50, %c0_51] : memref<9x8x16xf32, #tpu.memory_space<vmem>>, vector<1x8x16xf32>
    %92 = vector.shape_cast %91 : vector<1x8x16xf32> to vector<8x16xf32>
    %93 = arith.truncf %92 : vector<8x16xf32> to vector<8x16xbf16>
    %94 = arith.truncf %90 : vector<16x286xf32> to vector<16x286xbf16>
    %cst_52 = arith.constant dense<0.000000e+00> : vector<8x286xf32>
    %95 = tpu.matmul %93, %94, %cst_52 {dimension_numbers = #tpu.dot_dimension_numbers<[1], [0], [0], [1], [0, 0, 1, 1], [], []>} : vector<8x16xbf16>, vector<16x286xbf16>, vector<8x286xf32> -> vector<8x286xf32>
    %96 = arith.addf %89, %95 : vector<8x286xf32>
    %97 = vector.extract_strided_slice %4 {offsets = [0, 36], sizes = [8, 286], strides = [1, 1]} : vector<8x324xf32> to vector<8x286xf32>
    %c6_53 = arith.constant 6 : index
    %c0_54 = arith.constant 0 : index
    %c0_55 = arith.constant 0 : index
    %98 = vector.load %arg5[%c6_53, %c0_54, %c0_55] : memref<9x8x8xf32, #tpu.memory_space<vmem>>, vector<1x8x8xf32>
    %99 = vector.shape_cast %98 : vector<1x8x8xf32> to vector<8x8xf32>
    %100 = arith.truncf %99 : vector<8x8xf32> to vector<8x8xbf16>
    %101 = arith.truncf %97 : vector<8x286xf32> to vector<8x286xbf16>
    %cst_56 = arith.constant dense<0.000000e+00> : vector<8x286xf32>
    %102 = tpu.matmul %100, %101, %cst_56 {dimension_numbers = #tpu.dot_dimension_numbers<[1], [0], [0], [1], [0, 0, 1, 1], [], []>} : vector<8x8xbf16>, vector<8x286xbf16>, vector<8x286xf32> -> vector<8x286xf32>
    %103 = arith.addf %96, %102 : vector<8x286xf32>
    %104 = vector.extract_strided_slice %2 {offsets = [0, 37], sizes = [16, 286], strides = [1, 1]} : vector<16x324xf32> to vector<16x286xf32>
    %c7 = arith.constant 7 : index
    %c0_57 = arith.constant 0 : index
    %c0_58 = arith.constant 0 : index
    %105 = vector.load %arg4[%c7, %c0_57, %c0_58] : memref<9x8x16xf32, #tpu.memory_space<vmem>>, vector<1x8x16xf32>
    %106 = vector.shape_cast %105 : vector<1x8x16xf32> to vector<8x16xf32>
    %107 = arith.truncf %106 : vector<8x16xf32> to vector<8x16xbf16>
    %108 = arith.truncf %104 : vector<16x286xf32> to vector<16x286xbf16>
    %cst_59 = arith.constant dense<0.000000e+00> : vector<8x286xf32>
    %109 = tpu.matmul %107, %108, %cst_59 {dimension_numbers = #tpu.dot_dimension_numbers<[1], [0], [0], [1], [0, 0, 1, 1], [], []>} : vector<8x16xbf16>, vector<16x286xbf16>, vector<8x286xf32> -> vector<8x286xf32>
    %110 = arith.addf %103, %109 : vector<8x286xf32>
    %111 = vector.extract_strided_slice %4 {offsets = [0, 37], sizes = [8, 286], strides = [1, 1]} : vector<8x324xf32> to vector<8x286xf32>
    %c7_60 = arith.constant 7 : index
    %c0_61 = arith.constant 0 : index
    %c0_62 = arith.constant 0 : index
    %112 = vector.load %arg5[%c7_60, %c0_61, %c0_62] : memref<9x8x8xf32, #tpu.memory_space<vmem>>, vector<1x8x8xf32>
    %113 = vector.shape_cast %112 : vector<1x8x8xf32> to vector<8x8xf32>
    %114 = arith.truncf %113 : vector<8x8xf32> to vector<8x8xbf16>
    %115 = arith.truncf %111 : vector<8x286xf32> to vector<8x286xbf16>
    %cst_63 = arith.constant dense<0.000000e+00> : vector<8x286xf32>
    %116 = tpu.matmul %114, %115, %cst_63 {dimension_numbers = #tpu.dot_dimension_numbers<[1], [0], [0], [1], [0, 0, 1, 1], [], []>} : vector<8x8xbf16>, vector<8x286xbf16>, vector<8x286xf32> -> vector<8x286xf32>
    %117 = arith.addf %110, %116 : vector<8x286xf32>
    %118 = vector.extract_strided_slice %2 {offsets = [0, 38], sizes = [16, 286], strides = [1, 1]} : vector<16x324xf32> to vector<16x286xf32>
    %c8 = arith.constant 8 : index
    %c0_64 = arith.constant 0 : index
    %c0_65 = arith.constant 0 : index
    %119 = vector.load %arg4[%c8, %c0_64, %c0_65] : memref<9x8x16xf32, #tpu.memory_space<vmem>>, vector<1x8x16xf32>
    %120 = vector.shape_cast %119 : vector<1x8x16xf32> to vector<8x16xf32>
    %121 = arith.truncf %120 : vector<8x16xf32> to vector<8x16xbf16>
    %122 = arith.truncf %118 : vector<16x286xf32> to vector<16x286xbf16>
    %cst_66 = arith.constant dense<0.000000e+00> : vector<8x286xf32>
    %123 = tpu.matmul %121, %122, %cst_66 {dimension_numbers = #tpu.dot_dimension_numbers<[1], [0], [0], [1], [0, 0, 1, 1], [], []>} : vector<8x16xbf16>, vector<16x286xbf16>, vector<8x286xf32> -> vector<8x286xf32>
    %124 = arith.addf %117, %123 : vector<8x286xf32>
    %125 = vector.extract_strided_slice %4 {offsets = [0, 38], sizes = [8, 286], strides = [1, 1]} : vector<8x324xf32> to vector<8x286xf32>
    %c8_67 = arith.constant 8 : index
    %c0_68 = arith.constant 0 : index
    %c0_69 = arith.constant 0 : index
    %126 = vector.load %arg5[%c8_67, %c0_68, %c0_69] : memref<9x8x8xf32, #tpu.memory_space<vmem>>, vector<1x8x8xf32>
    %127 = vector.shape_cast %126 : vector<1x8x8xf32> to vector<8x8xf32>
    %128 = arith.truncf %127 : vector<8x8xf32> to vector<8x8xbf16>
    %129 = arith.truncf %125 : vector<8x286xf32> to vector<8x286xbf16>
    %cst_70 = arith.constant dense<0.000000e+00> : vector<8x286xf32>
    %130 = tpu.matmul %128, %129, %cst_70 {dimension_numbers = #tpu.dot_dimension_numbers<[1], [0], [0], [1], [0, 0, 1, 1], [], []>} : vector<8x8xbf16>, vector<8x286xbf16>, vector<8x286xf32> -> vector<8x286xf32>
    %131 = arith.addf %124, %130 : vector<8x286xf32>
    %c0_71 = arith.constant 0 : index
    %c0_72 = arith.constant 0 : index
    %132 = vector.load %arg6[%c0_71, %c0_72] : memref<8x1xf32, #tpu.memory_space<vmem>>, vector<8x1xf32>
    %133 = vector.broadcast %132 : vector<8x1xf32> to vector<8x286xf32>
    %134 = arith.addf %131, %133 : vector<8x286xf32>
    %cst_73 = arith.constant 0.000000e+00 : f32
    %135 = vector.broadcast %cst_73 : f32 to vector<8x286xf32>
    %136 = arith.maximumf %134, %135 : vector<8x286xf32>
    %137 = vector.broadcast %0 : vector<1x286xf32> to vector<8x286xf32>
    %138 = arith.mulf %136, %137 : vector<8x286xf32>
    %cst_74 = arith.constant 0.000000e+00 : f32
    %139 = vector.broadcast %cst_74 : f32 to vector<8x19xf32>
    %c0_75 = arith.constant 0 : index
    %c0_76 = arith.constant 0 : index
    %140 = vector.load %arg10[%c0_75, %c0_76] : memref<8x324xf32, #tpu.memory_space<vmem>>, vector<8x19xf32>
    tpu.vector_store %arg10[%c0_75, %c0_76], %139 {strides = array<i32>} : memref<8x324xf32, #tpu.memory_space<vmem>>, vector<8x19xf32>,
    %cst_77 = arith.constant 0.000000e+00 : f32
    %141 = vector.broadcast %cst_77 : f32 to vector<8x19xf32>
    %c0_78 = arith.constant 0 : index
    %c305 = arith.constant 305 : index
    %142 = vector.load %arg10[%c0_78, %c305] : memref<8x324xf32, #tpu.memory_space<vmem>>, vector<8x19xf32>
    tpu.vector_store %arg10[%c0_78, %c305], %141 {strides = array<i32>} : memref<8x324xf32, #tpu.memory_space<vmem>>, vector<8x19xf32>,
    %c0_79 = arith.constant 0 : index
    %c19 = arith.constant 19 : index
    %143 = vector.load %arg10[%c0_79, %c19] : memref<8x324xf32, #tpu.memory_space<vmem>>, vector<8x286xf32>
    tpu.vector_store %arg10[%c0_79, %c19], %138 {strides = array<i32>} : memref<8x324xf32, #tpu.memory_space<vmem>>, vector<8x286xf32>,
    %c0_80 = arith.constant 0 : index
    %c0_81 = arith.constant 0 : index
    %144 = vector.load %arg10[%c0_80, %c0_81] : memref<8x324xf32, #tpu.memory_space<vmem>>, vector<8x324xf32>
    %cst_82 = arith.constant 0.000000e+00 : f32
    %145 = vector.broadcast %cst_82 : f32 to vector<8x286xf32>
    %146 = vector.extract_strided_slice %144 {offsets = [0, 0], sizes = [8, 286], strides = [1, 1]} : vector<8x324xf32> to vector<8x286xf32>
    %c0_83 = arith.constant 0 : index
    %c0_84 = arith.constant 0 : index
    %c0_85 = arith.constant 0 : index
    %147 = vector.load %arg7[%c0_83, %c0_84, %c0_85] : memref<9x8x8xf32, #tpu.memory_space<vmem>>, vector<1x8x8xf32>
    %148 = vector.shape_cast %147 : vector<1x8x8xf32> to vector<8x8xf32>
    %149 = arith.truncf %148 : vector<8x8xf32> to vector<8x8xbf16>
    %150 = arith.truncf %146 : vector<8x286xf32> to vector<8x286xbf16>
    %cst_86 = arith.constant dense<0.000000e+00> : vector<8x286xf32>
    %151 = tpu.matmul %149, %150, %cst_86 {dimension_numbers = #tpu.dot_dimension_numbers<[1], [0], [0], [1], [0, 0, 1, 1], [], []>} : vector<8x8xbf16>, vector<8x286xbf16>, vector<8x286xf32> -> vector<8x286xf32>
    %152 = arith.addf %145, %151 : vector<8x286xf32>
    %153 = vector.extract_strided_slice %144 {offsets = [0, 1], sizes = [8, 286], strides = [1, 1]} : vector<8x324xf32> to vector<8x286xf32>
    %c1_87 = arith.constant 1 : index
    %c0_88 = arith.constant 0 : index
    %c0_89 = arith.constant 0 : index
    %154 = vector.load %arg7[%c1_87, %c0_88, %c0_89] : memref<9x8x8xf32, #tpu.memory_space<vmem>>, vector<1x8x8xf32>
    %155 = vector.shape_cast %154 : vector<1x8x8xf32> to vector<8x8xf32>
    %156 = arith.truncf %155 : vector<8x8xf32> to vector<8x8xbf16>
    %157 = arith.truncf %153 : vector<8x286xf32> to vector<8x286xbf16>
    %cst_90 = arith.constant dense<0.000000e+00> : vector<8x286xf32>
    %158 = tpu.matmul %156, %157, %cst_90 {dimension_numbers = #tpu.dot_dimension_numbers<[1], [0], [0], [1], [0, 0, 1, 1], [], []>} : vector<8x8xbf16>, vector<8x286xbf16>, vector<8x286xf32> -> vector<8x286xf32>
    %159 = arith.addf %152, %158 : vector<8x286xf32>
    %160 = vector.extract_strided_slice %144 {offsets = [0, 2], sizes = [8, 286], strides = [1, 1]} : vector<8x324xf32> to vector<8x286xf32>
    %c2_91 = arith.constant 2 : index
    %c0_92 = arith.constant 0 : index
    %c0_93 = arith.constant 0 : index
    %161 = vector.load %arg7[%c2_91, %c0_92, %c0_93] : memref<9x8x8xf32, #tpu.memory_space<vmem>>, vector<1x8x8xf32>
    %162 = vector.shape_cast %161 : vector<1x8x8xf32> to vector<8x8xf32>
    %163 = arith.truncf %162 : vector<8x8xf32> to vector<8x8xbf16>
    %164 = arith.truncf %160 : vector<8x286xf32> to vector<8x286xbf16>
    %cst_94 = arith.constant dense<0.000000e+00> : vector<8x286xf32>
    %165 = tpu.matmul %163, %164, %cst_94 {dimension_numbers = #tpu.dot_dimension_numbers<[1], [0], [0], [1], [0, 0, 1, 1], [], []>} : vector<8x8xbf16>, vector<8x286xbf16>, vector<8x286xf32> -> vector<8x286xf32>
    %166 = arith.addf %159, %165 : vector<8x286xf32>
    %167 = vector.extract_strided_slice %144 {offsets = [0, 18], sizes = [8, 286], strides = [1, 1]} : vector<8x324xf32> to vector<8x286xf32>
    %c3_95 = arith.constant 3 : index
    %c0_96 = arith.constant 0 : index
    %c0_97 = arith.constant 0 : index
    %168 = vector.load %arg7[%c3_95, %c0_96, %c0_97] : memref<9x8x8xf32, #tpu.memory_space<vmem>>, vector<1x8x8xf32>
    %169 = vector.shape_cast %168 : vector<1x8x8xf32> to vector<8x8xf32>
    %170 = arith.truncf %169 : vector<8x8xf32> to vector<8x8xbf16>
    %171 = arith.truncf %167 : vector<8x286xf32> to vector<8x286xbf16>
    %cst_98 = arith.constant dense<0.000000e+00> : vector<8x286xf32>
    %172 = tpu.matmul %170, %171, %cst_98 {dimension_numbers = #tpu.dot_dimension_numbers<[1], [0], [0], [1], [0, 0, 1, 1], [], []>} : vector<8x8xbf16>, vector<8x286xbf16>, vector<8x286xf32> -> vector<8x286xf32>
    %173 = arith.addf %166, %172 : vector<8x286xf32>
    %174 = vector.extract_strided_slice %144 {offsets = [0, 19], sizes = [8, 286], strides = [1, 1]} : vector<8x324xf32> to vector<8x286xf32>
    %c4_99 = arith.constant 4 : index
    %c0_100 = arith.constant 0 : index
    %c0_101 = arith.constant 0 : index
    %175 = vector.load %arg7[%c4_99, %c0_100, %c0_101] : memref<9x8x8xf32, #tpu.memory_space<vmem>>, vector<1x8x8xf32>
    %176 = vector.shape_cast %175 : vector<1x8x8xf32> to vector<8x8xf32>
    %177 = arith.truncf %176 : vector<8x8xf32> to vector<8x8xbf16>
    %178 = arith.truncf %174 : vector<8x286xf32> to vector<8x286xbf16>
    %cst_102 = arith.constant dense<0.000000e+00> : vector<8x286xf32>
    %179 = tpu.matmul %177, %178, %cst_102 {dimension_numbers = #tpu.dot_dimension_numbers<[1], [0], [0], [1], [0, 0, 1, 1], [], []>} : vector<8x8xbf16>, vector<8x286xbf16>, vector<8x286xf32> -> vector<8x286xf32>
    %180 = arith.addf %173, %179 : vector<8x286xf32>
    %181 = vector.extract_strided_slice %144 {offsets = [0, 20], sizes = [8, 286], strides = [1, 1]} : vector<8x324xf32> to vector<8x286xf32>
    %c5_103 = arith.constant 5 : index
    %c0_104 = arith.constant 0 : index
    %c0_105 = arith.constant 0 : index
    %182 = vector.load %arg7[%c5_103, %c0_104, %c0_105] : memref<9x8x8xf32, #tpu.memory_space<vmem>>, vector<1x8x8xf32>
    %183 = vector.shape_cast %182 : vector<1x8x8xf32> to vector<8x8xf32>
    %184 = arith.truncf %183 : vector<8x8xf32> to vector<8x8xbf16>
    %185 = arith.truncf %181 : vector<8x286xf32> to vector<8x286xbf16>
    %cst_106 = arith.constant dense<0.000000e+00> : vector<8x286xf32>
    %186 = tpu.matmul %184, %185, %cst_106 {dimension_numbers = #tpu.dot_dimension_numbers<[1], [0], [0], [1], [0, 0, 1, 1], [], []>} : vector<8x8xbf16>, vector<8x286xbf16>, vector<8x286xf32> -> vector<8x286xf32>
    %187 = arith.addf %180, %186 : vector<8x286xf32>
    %188 = vector.extract_strided_slice %144 {offsets = [0, 36], sizes = [8, 286], strides = [1, 1]} : vector<8x324xf32> to vector<8x286xf32>
    %c6_107 = arith.constant 6 : index
    %c0_108 = arith.constant 0 : index
    %c0_109 = arith.constant 0 : index
    %189 = vector.load %arg7[%c6_107, %c0_108, %c0_109] : memref<9x8x8xf32, #tpu.memory_space<vmem>>, vector<1x8x8xf32>
    %190 = vector.shape_cast %189 : vector<1x8x8xf32> to vector<8x8xf32>
    %191 = arith.truncf %190 : vector<8x8xf32> to vector<8x8xbf16>
    %192 = arith.truncf %188 : vector<8x286xf32> to vector<8x286xbf16>
    %cst_110 = arith.constant dense<0.000000e+00> : vector<8x286xf32>
    %193 = tpu.matmul %191, %192, %cst_110 {dimension_numbers = #tpu.dot_dimension_numbers<[1], [0], [0], [1], [0, 0, 1, 1], [], []>} : vector<8x8xbf16>, vector<8x286xbf16>, vector<8x286xf32> -> vector<8x286xf32>
    %194 = arith.addf %187, %193 : vector<8x286xf32>
    %195 = vector.extract_strided_slice %144 {offsets = [0, 37], sizes = [8, 286], strides = [1, 1]} : vector<8x324xf32> to vector<8x286xf32>
    %c7_111 = arith.constant 7 : index
    %c0_112 = arith.constant 0 : index
    %c0_113 = arith.constant 0 : index
    %196 = vector.load %arg7[%c7_111, %c0_112, %c0_113] : memref<9x8x8xf32, #tpu.memory_space<vmem>>, vector<1x8x8xf32>
    %197 = vector.shape_cast %196 : vector<1x8x8xf32> to vector<8x8xf32>
    %198 = arith.truncf %197 : vector<8x8xf32> to vector<8x8xbf16>
    %199 = arith.truncf %195 : vector<8x286xf32> to vector<8x286xbf16>
    %cst_114 = arith.constant dense<0.000000e+00> : vector<8x286xf32>
    %200 = tpu.matmul %198, %199, %cst_114 {dimension_numbers = #tpu.dot_dimension_numbers<[1], [0], [0], [1], [0, 0, 1, 1], [], []>} : vector<8x8xbf16>, vector<8x286xbf16>, vector<8x286xf32> -> vector<8x286xf32>
    %201 = arith.addf %194, %200 : vector<8x286xf32>
    %202 = vector.extract_strided_slice %144 {offsets = [0, 38], sizes = [8, 286], strides = [1, 1]} : vector<8x324xf32> to vector<8x286xf32>
    %c8_115 = arith.constant 8 : index
    %c0_116 = arith.constant 0 : index
    %c0_117 = arith.constant 0 : index
    %203 = vector.load %arg7[%c8_115, %c0_116, %c0_117] : memref<9x8x8xf32, #tpu.memory_space<vmem>>, vector<1x8x8xf32>
    %204 = vector.shape_cast %203 : vector<1x8x8xf32> to vector<8x8xf32>
    %205 = arith.truncf %204 : vector<8x8xf32> to vector<8x8xbf16>
    %206 = arith.truncf %202 : vector<8x286xf32> to vector<8x286xbf16>
    %cst_118 = arith.constant dense<0.000000e+00> : vector<8x286xf32>
    %207 = tpu.matmul %205, %206, %cst_118 {dimension_numbers = #tpu.dot_dimension_numbers<[1], [0], [0], [1], [0, 0, 1, 1], [], []>} : vector<8x8xbf16>, vector<8x286xbf16>, vector<8x286xf32> -> vector<8x286xf32>
    %208 = arith.addf %201, %207 : vector<8x286xf32>
    %c0_119 = arith.constant 0 : index
    %c0_120 = arith.constant 0 : index
    %209 = vector.load %arg8[%c0_119, %c0_120] : memref<8x1xf32, #tpu.memory_space<vmem>>, vector<8x1xf32>
    %210 = vector.broadcast %209 : vector<8x1xf32> to vector<8x286xf32>
    %211 = arith.addf %208, %210 : vector<8x286xf32>
    %cst_121 = arith.constant 0.000000e+00 : f32
    %212 = vector.broadcast %cst_121 : f32 to vector<8x286xf32>
    %213 = arith.maximumf %211, %212 : vector<8x286xf32>
    %214 = vector.broadcast %0 : vector<1x286xf32> to vector<8x286xf32>
    %215 = arith.mulf %213, %214 : vector<8x286xf32>
    %cst_122 = arith.constant 0.000000e+00 : f32
    %216 = vector.broadcast %cst_122 : f32 to vector<8x19xf32>
    %c0_123 = arith.constant 0 : index
    %c0_124 = arith.constant 0 : index
    %c0_125 = arith.constant 0 : index
    %217 = vector.load %arg9[%c0_123, %c0_124, %c0_125] : memref<1x8x324xf32, #tpu.memory_space<vmem>>, vector<1x8x19xf32>
    %218 = vector.shape_cast %217 : vector<1x8x19xf32> to vector<8x19xf32>
    %219 = vector.shape_cast %216 : vector<8x19xf32> to vector<1x8x19xf32>
    tpu.vector_store %arg9[%c0_123, %c0_124, %c0_125], %219 {strides = array<i32>} : memref<1x8x324xf32, #tpu.memory_space<vmem>>, vector<1x8x19xf32>,
    %cst_126 = arith.constant 0.000000e+00 : f32
    %220 = vector.broadcast %cst_126 : f32 to vector<8x19xf32>
    %c0_127 = arith.constant 0 : index
    %c0_128 = arith.constant 0 : index
    %c305_129 = arith.constant 305 : index
    %221 = vector.load %arg9[%c0_127, %c0_128, %c305_129] : memref<1x8x324xf32, #tpu.memory_space<vmem>>, vector<1x8x19xf32>
    %222 = vector.shape_cast %221 : vector<1x8x19xf32> to vector<8x19xf32>
    %223 = vector.shape_cast %220 : vector<8x19xf32> to vector<1x8x19xf32>
    tpu.vector_store %arg9[%c0_127, %c0_128, %c305_129], %223 {strides = array<i32>} : memref<1x8x324xf32, #tpu.memory_space<vmem>>, vector<1x8x19xf32>,
    %c0_130 = arith.constant 0 : index
    %c0_131 = arith.constant 0 : index
    %c19_132 = arith.constant 19 : index
    %224 = vector.load %arg9[%c0_130, %c0_131, %c19_132] : memref<1x8x324xf32, #tpu.memory_space<vmem>>, vector<1x8x286xf32>
    %225 = vector.shape_cast %224 : vector<1x8x286xf32> to vector<8x286xf32>
    %226 = vector.shape_cast %215 : vector<8x286xf32> to vector<1x8x286xf32>
    tpu.vector_store %arg9[%c0_130, %c0_131, %c19_132], %226 {strides = array<i32>} : memref<1x8x324xf32, #tpu.memory_space<vmem>>, vector<1x8x286xf32>,
    return
  }
  func.func @transform_0(%arg0: i32) -> (i32, i32, i32) {
    %c0_i32 = arith.constant 0 : i32
    %c0_i32_0 = arith.constant 0 : i32
    %c0_i32_1 = arith.constant 0 : i32
    return %arg0, %c0_i32, %c0_i32_0 : i32, i32, i32
  }
  func.func @transform_1(%arg0: i32) -> (i32, i32, i32) {
    %c0_i32 = arith.constant 0 : i32
    %c0_i32_0 = arith.constant 0 : i32
    %c0_i32_1 = arith.constant 0 : i32
    return %arg0, %c0_i32, %c0_i32_0 : i32, i32, i32
  }
  func.func @transform_2(%arg0: i32) -> (i32, i32) {
    %c0_i32 = arith.constant 0 : i32
    %c0_i32_0 = arith.constant 0 : i32
    %c0_i32_1 = arith.constant 0 : i32
    return %c0_i32, %c0_i32_0 : i32, i32
  }
  func.func @transform_3(%arg0: i32) -> (i32, i32, i32) {
    %c0_i32 = arith.constant 0 : i32
    %c0_i32_0 = arith.constant 0 : i32
    %c0_i32_1 = arith.constant 0 : i32
    %c0_i32_2 = arith.constant 0 : i32
    return %c0_i32, %c0_i32_0, %c0_i32_1 : i32, i32, i32
  }
  func.func @transform_4(%arg0: i32) -> (i32, i32, i32) {
    %c0_i32 = arith.constant 0 : i32
    %c0_i32_0 = arith.constant 0 : i32
    %c0_i32_1 = arith.constant 0 : i32
    %c0_i32_2 = arith.constant 0 : i32
    return %c0_i32, %c0_i32_0, %c0_i32_1 : i32, i32, i32
  }
  func.func @transform_5(%arg0: i32) -> (i32, i32) {
    %c0_i32 = arith.constant 0 : i32
    %c0_i32_0 = arith.constant 0 : i32
    %c0_i32_1 = arith.constant 0 : i32
    return %c0_i32, %c0_i32_0 : i32, i32
  }
  func.func @transform_6(%arg0: i32) -> (i32, i32, i32) {
    %c0_i32 = arith.constant 0 : i32
    %c0_i32_0 = arith.constant 0 : i32
    %c0_i32_1 = arith.constant 0 : i32
    %c0_i32_2 = arith.constant 0 : i32
    return %c0_i32, %c0_i32_0, %c0_i32_1 : i32, i32, i32
  }
  func.func @transform_7(%arg0: i32) -> (i32, i32) {
    %c0_i32 = arith.constant 0 : i32
    %c0_i32_0 = arith.constant 0 : i32
    %c0_i32_1 = arith.constant 0 : i32
    return %c0_i32, %c0_i32_0 : i32, i32
  }
  func.func @transform_8(%arg0: i32) -> (i32, i32, i32) {
    %c0_i32 = arith.constant 0 : i32
    %c0_i32_0 = arith.constant 0 : i32
    %c0_i32_1 = arith.constant 0 : i32
    return %arg0, %c0_i32, %c0_i32_0 : i32, i32, i32
  }
}

module attributes {stable_mosaic.version = 11 : i64} {
  func.func @_head_kernel(%arg0: i32, %arg1: memref<1x8x324xf32, #tpu.memory_space<vmem>>, %arg2: memref<1x324xf32, #tpu.memory_space<vmem>>, %arg3: memref<3x8xf32, #tpu.memory_space<vmem>>, %arg4: memref<3x1xf32, #tpu.memory_space<vmem>>, %arg5: memref<1x3x324xf32, #tpu.memory_space<vmem>>) attributes {dimension_semantics = [#tpu.dimension_semantics<parallel>], iteration_bounds = array<i64: 2>, scalar_prefetch = 0 : i64, scratch_operands = 0 : i64, tpu.core_type = #tpu.core_type<tc>, window_params = [{transform_indices = @transform_0, window_bounds = array<i64: 1, 8, 324>}, {pipeline_mode = #tpu.pipeline_mode<synchronous>, transform_indices = @transform_1, window_bounds = array<i64: 1, 324>}, {pipeline_mode = #tpu.pipeline_mode<synchronous>, transform_indices = @transform_2, window_bounds = array<i64: 3, 8>}, {pipeline_mode = #tpu.pipeline_mode<synchronous>, transform_indices = @transform_3, window_bounds = array<i64: 3, 1>}, {transform_indices = @transform_4, window_bounds = array<i64: 1, 3, 324>}]} {
    %c0 = arith.constant 0 : index
    %c0_0 = arith.constant 0 : index
    %c0_1 = arith.constant 0 : index
    %0 = vector.load %arg1[%c0, %c0_0, %c0_1] : memref<1x8x324xf32, #tpu.memory_space<vmem>>, vector<1x8x324xf32>
    %1 = vector.shape_cast %0 : vector<1x8x324xf32> to vector<8x324xf32>
    %2 = arith.truncf %1 : vector<8x324xf32> to vector<8x324xbf16>
    %c0_2 = arith.constant 0 : index
    %c0_3 = arith.constant 0 : index
    %3 = vector.load %arg3[%c0_2, %c0_3] : memref<3x8xf32, #tpu.memory_space<vmem>>, vector<3x8xf32>
    %4 = arith.truncf %3 : vector<3x8xf32> to vector<3x8xbf16>
    %cst = arith.constant dense<0.000000e+00> : vector<3x324xf32>
    %5 = tpu.matmul %4, %2, %cst {dimension_numbers = #tpu.dot_dimension_numbers<[1], [0], [0], [1], [0, 0, 1, 1], [], []>} : vector<3x8xbf16>, vector<8x324xbf16>, vector<3x324xf32> -> vector<3x324xf32>
    %c0_4 = arith.constant 0 : index
    %c0_5 = arith.constant 0 : index
    %6 = vector.load %arg4[%c0_4, %c0_5] : memref<3x1xf32, #tpu.memory_space<vmem>>, vector<3x1xf32>
    %7 = vector.broadcast %6 : vector<3x1xf32> to vector<3x324xf32>
    %8 = arith.addf %5, %7 : vector<3x324xf32>
    %cst_6 = arith.constant 0.000000e+00 : f32
    %9 = vector.broadcast %cst_6 : f32 to vector<3x324xf32>
    %10 = arith.subf %9, %8 : vector<3x324xf32>
    %11 = math.exp %10 : vector<3x324xf32>
    %cst_7 = arith.constant 1.000000e+00 : f32
    %12 = vector.broadcast %cst_7 : f32 to vector<3x324xf32>
    %13 = arith.addf %12, %11 : vector<3x324xf32>
    %cst_8 = arith.constant 1.000000e+00 : f32
    %14 = vector.broadcast %cst_8 : f32 to vector<3x324xf32>
    %15 = arith.divf %14, %13 : vector<3x324xf32>
    %c0_9 = arith.constant 0 : index
    %c0_10 = arith.constant 0 : index
    %16 = vector.load %arg2[%c0_9, %c0_10] : memref<1x324xf32, #tpu.memory_space<vmem>>, vector<1x324xf32>
    %17 = vector.broadcast %16 : vector<1x324xf32> to vector<3x324xf32>
    %18 = arith.mulf %15, %17 : vector<3x324xf32>
    %c0_11 = arith.constant 0 : index
    %c0_12 = arith.constant 0 : index
    %c0_13 = arith.constant 0 : index
    %19 = vector.load %arg5[%c0_11, %c0_12, %c0_13] : memref<1x3x324xf32, #tpu.memory_space<vmem>>, vector<1x3x324xf32>
    %20 = vector.shape_cast %19 : vector<1x3x324xf32> to vector<3x324xf32>
    %21 = vector.shape_cast %18 : vector<3x324xf32> to vector<1x3x324xf32>
    tpu.vector_store %arg5[%c0_11, %c0_12, %c0_13], %21 {strides = array<i32>} : memref<1x3x324xf32, #tpu.memory_space<vmem>>, vector<1x3x324xf32>,
    return
  }
  func.func @transform_0(%arg0: i32) -> (i32, i32, i32) {
    %c0_i32 = arith.constant 0 : i32
    %c0_i32_0 = arith.constant 0 : i32
    %c0_i32_1 = arith.constant 0 : i32
    return %arg0, %c0_i32, %c0_i32_0 : i32, i32, i32
  }
  func.func @transform_1(%arg0: i32) -> (i32, i32) {
    %c0_i32 = arith.constant 0 : i32
    %c0_i32_0 = arith.constant 0 : i32
    %c0_i32_1 = arith.constant 0 : i32
    return %c0_i32, %c0_i32_0 : i32, i32
  }
  func.func @transform_2(%arg0: i32) -> (i32, i32) {
    %c0_i32 = arith.constant 0 : i32
    %c0_i32_0 = arith.constant 0 : i32
    %c0_i32_1 = arith.constant 0 : i32
    return %c0_i32, %c0_i32_0 : i32, i32
  }
  func.func @transform_3(%arg0: i32) -> (i32, i32) {
    %c0_i32 = arith.constant 0 : i32
    %c0_i32_0 = arith.constant 0 : i32
    %c0_i32_1 = arith.constant 0 : i32
    return %c0_i32, %c0_i32_0 : i32, i32
  }
  func.func @transform_4(%arg0: i32) -> (i32, i32, i32) {
    %c0_i32 = arith.constant 0 : i32
    %c0_i32_0 = arith.constant 0 : i32
    %c0_i32_1 = arith.constant 0 : i32
    return %arg0, %c0_i32, %c0_i32_0 : i32, i32, i32
  }
}

module attributes {stable_mosaic.version = 11 : i64} {
  func.func @_double_conv_kernel(%arg0: i32, %arg1: memref<1x1x324xf32, #tpu.memory_space<vmem>>, %arg2: memref<1x3x324xf32, #tpu.memory_space<vmem>>, %arg3: memref<1x286xf32, #tpu.memory_space<vmem>>, %arg4: memref<9x8x1xf32, #tpu.memory_space<vmem>>, %arg5: memref<9x8x3xf32, #tpu.memory_space<vmem>>, %arg6: memref<8x1xf32, #tpu.memory_space<vmem>>, %arg7: memref<9x8x8xf32, #tpu.memory_space<vmem>>, %arg8: memref<8x1xf32, #tpu.memory_space<vmem>>, %arg9: memref<1x8x324xf32, #tpu.memory_space<vmem>>, %arg10: memref<8x324xf32, #tpu.memory_space<vmem>>) attributes {dimension_semantics = [#tpu.dimension_semantics<parallel>], iteration_bounds = array<i64: 2>, scalar_prefetch = 0 : i64, scratch_operands = 1 : i64, tpu.core_type = #tpu.core_type<tc>, window_params = [{transform_indices = @transform_0, window_bounds = array<i64: 1, 1, 324>}, {transform_indices = @transform_1, window_bounds = array<i64: 1, 3, 324>}, {pipeline_mode = #tpu.pipeline_mode<synchronous>, transform_indices = @transform_2, window_bounds = array<i64: 1, 286>}, {pipeline_mode = #tpu.pipeline_mode<synchronous>, transform_indices = @transform_3, window_bounds = array<i64: 9, 8, 1>}, {pipeline_mode = #tpu.pipeline_mode<synchronous>, transform_indices = @transform_4, window_bounds = array<i64: 9, 8, 3>}, {pipeline_mode = #tpu.pipeline_mode<synchronous>, transform_indices = @transform_5, window_bounds = array<i64: 8, 1>}, {pipeline_mode = #tpu.pipeline_mode<synchronous>, transform_indices = @transform_6, window_bounds = array<i64: 9, 8, 8>}, {pipeline_mode = #tpu.pipeline_mode<synchronous>, transform_indices = @transform_7, window_bounds = array<i64: 8, 1>}, {transform_indices = @transform_8, window_bounds = array<i64: 1, 8, 324>}]} {
    %c0 = arith.constant 0 : index
    %c0_0 = arith.constant 0 : index
    %0 = vector.load %arg3[%c0, %c0_0] : memref<1x286xf32, #tpu.memory_space<vmem>>, vector<1x286xf32>
    %c0_1 = arith.constant 0 : index
    %c0_2 = arith.constant 0 : index
    %c0_3 = arith.constant 0 : index
    %1 = vector.load %arg1[%c0_1, %c0_2, %c0_3] : memref<1x1x324xf32, #tpu.memory_space<vmem>>, vector<1x1x324xf32>
    %2 = vector.shape_cast %1 : vector<1x1x324xf32> to vector<1x324xf32>
    %c0_4 = arith.constant 0 : index
    %c0_5 = arith.constant 0 : index
    %c0_6 = arith.constant 0 : index
    %3 = vector.load %arg2[%c0_4, %c0_5, %c0_6] : memref<1x3x324xf32, #tpu.memory_space<vmem>>, vector<1x3x324xf32>
    %4 = vector.shape_cast %3 : vector<1x3x324xf32> to vector<3x324xf32>
    %cst = arith.constant 0.000000e+00 : f32
    %5 = vector.broadcast %cst : f32 to vector<8x286xf32>
    %6 = vector.extract_strided_slice %2 {offsets = [0, 0], sizes = [1, 286], strides = [1, 1]} : vector<1x324xf32> to vector<1x286xf32>
    %c0_7 = arith.constant 0 : index
    %c0_8 = arith.constant 0 : index
    %c0_9 = arith.constant 0 : index
    %7 = vector.load %arg4[%c0_7, %c0_8, %c0_9] : memref<9x8x1xf32, #tpu.memory_space<vmem>>, vector<1x8x1xf32>
    %8 = vector.shape_cast %7 : vector<1x8x1xf32> to vector<8x1xf32>
    %9 = vector.broadcast %8 : vector<8x1xf32> to vector<8x286xf32>
    %10 = vector.broadcast %6 : vector<1x286xf32> to vector<8x286xf32>
    %11 = arith.mulf %9, %10 : vector<8x286xf32>
    %12 = arith.addf %5, %11 : vector<8x286xf32>
    %13 = vector.extract_strided_slice %4 {offsets = [0, 0], sizes = [3, 286], strides = [1, 1]} : vector<3x324xf32> to vector<3x286xf32>
    %c0_10 = arith.constant 0 : index
    %c0_11 = arith.constant 0 : index
    %c0_12 = arith.constant 0 : index
    %14 = vector.load %arg5[%c0_10, %c0_11, %c0_12] : memref<9x8x3xf32, #tpu.memory_space<vmem>>, vector<1x8x3xf32>
    %15 = vector.shape_cast %14 : vector<1x8x3xf32> to vector<8x3xf32>
    %16 = vector.extract_strided_slice %15 {offsets = [0, 0], sizes = [8, 1], strides = [1, 1]} : vector<8x3xf32> to vector<8x1xf32>
    %17 = vector.extract_strided_slice %13 {offsets = [0, 0], sizes = [1, 286], strides = [1, 1]} : vector<3x286xf32> to vector<1x286xf32>
    %18 = vector.broadcast %16 : vector<8x1xf32> to vector<8x286xf32>
    %19 = vector.broadcast %17 : vector<1x286xf32> to vector<8x286xf32>
    %20 = arith.mulf %18, %19 : vector<8x286xf32>
    %21 = arith.addf %12, %20 : vector<8x286xf32>
    %22 = vector.extract_strided_slice %15 {offsets = [0, 1], sizes = [8, 1], strides = [1, 1]} : vector<8x3xf32> to vector<8x1xf32>
    %23 = vector.extract_strided_slice %13 {offsets = [1, 0], sizes = [1, 286], strides = [1, 1]} : vector<3x286xf32> to vector<1x286xf32>
    %24 = vector.broadcast %22 : vector<8x1xf32> to vector<8x286xf32>
    %25 = vector.broadcast %23 : vector<1x286xf32> to vector<8x286xf32>
    %26 = arith.mulf %24, %25 : vector<8x286xf32>
    %27 = arith.addf %21, %26 : vector<8x286xf32>
    %28 = vector.extract_strided_slice %15 {offsets = [0, 2], sizes = [8, 1], strides = [1, 1]} : vector<8x3xf32> to vector<8x1xf32>
    %29 = vector.extract_strided_slice %13 {offsets = [2, 0], sizes = [1, 286], strides = [1, 1]} : vector<3x286xf32> to vector<1x286xf32>
    %30 = vector.broadcast %28 : vector<8x1xf32> to vector<8x286xf32>
    %31 = vector.broadcast %29 : vector<1x286xf32> to vector<8x286xf32>
    %32 = arith.mulf %30, %31 : vector<8x286xf32>
    %33 = arith.addf %27, %32 : vector<8x286xf32>
    %34 = vector.extract_strided_slice %2 {offsets = [0, 1], sizes = [1, 286], strides = [1, 1]} : vector<1x324xf32> to vector<1x286xf32>
    %c1 = arith.constant 1 : index
    %c0_13 = arith.constant 0 : index
    %c0_14 = arith.constant 0 : index
    %35 = vector.load %arg4[%c1, %c0_13, %c0_14] : memref<9x8x1xf32, #tpu.memory_space<vmem>>, vector<1x8x1xf32>
    %36 = vector.shape_cast %35 : vector<1x8x1xf32> to vector<8x1xf32>
    %37 = vector.broadcast %36 : vector<8x1xf32> to vector<8x286xf32>
    %38 = vector.broadcast %34 : vector<1x286xf32> to vector<8x286xf32>
    %39 = arith.mulf %37, %38 : vector<8x286xf32>
    %40 = arith.addf %33, %39 : vector<8x286xf32>
    %41 = vector.extract_strided_slice %4 {offsets = [0, 1], sizes = [3, 286], strides = [1, 1]} : vector<3x324xf32> to vector<3x286xf32>
    %c1_15 = arith.constant 1 : index
    %c0_16 = arith.constant 0 : index
    %c0_17 = arith.constant 0 : index
    %42 = vector.load %arg5[%c1_15, %c0_16, %c0_17] : memref<9x8x3xf32, #tpu.memory_space<vmem>>, vector<1x8x3xf32>
    %43 = vector.shape_cast %42 : vector<1x8x3xf32> to vector<8x3xf32>
    %44 = vector.extract_strided_slice %43 {offsets = [0, 0], sizes = [8, 1], strides = [1, 1]} : vector<8x3xf32> to vector<8x1xf32>
    %45 = vector.extract_strided_slice %41 {offsets = [0, 0], sizes = [1, 286], strides = [1, 1]} : vector<3x286xf32> to vector<1x286xf32>
    %46 = vector.broadcast %44 : vector<8x1xf32> to vector<8x286xf32>
    %47 = vector.broadcast %45 : vector<1x286xf32> to vector<8x286xf32>
    %48 = arith.mulf %46, %47 : vector<8x286xf32>
    %49 = arith.addf %40, %48 : vector<8x286xf32>
    %50 = vector.extract_strided_slice %43 {offsets = [0, 1], sizes = [8, 1], strides = [1, 1]} : vector<8x3xf32> to vector<8x1xf32>
    %51 = vector.extract_strided_slice %41 {offsets = [1, 0], sizes = [1, 286], strides = [1, 1]} : vector<3x286xf32> to vector<1x286xf32>
    %52 = vector.broadcast %50 : vector<8x1xf32> to vector<8x286xf32>
    %53 = vector.broadcast %51 : vector<1x286xf32> to vector<8x286xf32>
    %54 = arith.mulf %52, %53 : vector<8x286xf32>
    %55 = arith.addf %49, %54 : vector<8x286xf32>
    %56 = vector.extract_strided_slice %43 {offsets = [0, 2], sizes = [8, 1], strides = [1, 1]} : vector<8x3xf32> to vector<8x1xf32>
    %57 = vector.extract_strided_slice %41 {offsets = [2, 0], sizes = [1, 286], strides = [1, 1]} : vector<3x286xf32> to vector<1x286xf32>
    %58 = vector.broadcast %56 : vector<8x1xf32> to vector<8x286xf32>
    %59 = vector.broadcast %57 : vector<1x286xf32> to vector<8x286xf32>
    %60 = arith.mulf %58, %59 : vector<8x286xf32>
    %61 = arith.addf %55, %60 : vector<8x286xf32>
    %62 = vector.extract_strided_slice %2 {offsets = [0, 2], sizes = [1, 286], strides = [1, 1]} : vector<1x324xf32> to vector<1x286xf32>
    %c2 = arith.constant 2 : index
    %c0_18 = arith.constant 0 : index
    %c0_19 = arith.constant 0 : index
    %63 = vector.load %arg4[%c2, %c0_18, %c0_19] : memref<9x8x1xf32, #tpu.memory_space<vmem>>, vector<1x8x1xf32>
    %64 = vector.shape_cast %63 : vector<1x8x1xf32> to vector<8x1xf32>
    %65 = vector.broadcast %64 : vector<8x1xf32> to vector<8x286xf32>
    %66 = vector.broadcast %62 : vector<1x286xf32> to vector<8x286xf32>
    %67 = arith.mulf %65, %66 : vector<8x286xf32>
    %68 = arith.addf %61, %67 : vector<8x286xf32>
    %69 = vector.extract_strided_slice %4 {offsets = [0, 2], sizes = [3, 286], strides = [1, 1]} : vector<3x324xf32> to vector<3x286xf32>
    %c2_20 = arith.constant 2 : index
    %c0_21 = arith.constant 0 : index
    %c0_22 = arith.constant 0 : index
    %70 = vector.load %arg5[%c2_20, %c0_21, %c0_22] : memref<9x8x3xf32, #tpu.memory_space<vmem>>, vector<1x8x3xf32>
    %71 = vector.shape_cast %70 : vector<1x8x3xf32> to vector<8x3xf32>
    %72 = vector.extract_strided_slice %71 {offsets = [0, 0], sizes = [8, 1], strides = [1, 1]} : vector<8x3xf32> to vector<8x1xf32>
    %73 = vector.extract_strided_slice %69 {offsets = [0, 0], sizes = [1, 286], strides = [1, 1]} : vector<3x286xf32> to vector<1x286xf32>
    %74 = vector.broadcast %72 : vector<8x1xf32> to vector<8x286xf32>
    %75 = vector.broadcast %73 : vector<1x286xf32> to vector<8x286xf32>
    %76 = arith.mulf %74, %75 : vector<8x286xf32>
    %77 = arith.addf %68, %76 : vector<8x286xf32>
    %78 = vector.extract_strided_slice %71 {offsets = [0, 1], sizes = [8, 1], strides = [1, 1]} : vector<8x3xf32> to vector<8x1xf32>
    %79 = vector.extract_strided_slice %69 {offsets = [1, 0], sizes = [1, 286], strides = [1, 1]} : vector<3x286xf32> to vector<1x286xf32>
    %80 = vector.broadcast %78 : vector<8x1xf32> to vector<8x286xf32>
    %81 = vector.broadcast %79 : vector<1x286xf32> to vector<8x286xf32>
    %82 = arith.mulf %80, %81 : vector<8x286xf32>
    %83 = arith.addf %77, %82 : vector<8x286xf32>
    %84 = vector.extract_strided_slice %71 {offsets = [0, 2], sizes = [8, 1], strides = [1, 1]} : vector<8x3xf32> to vector<8x1xf32>
    %85 = vector.extract_strided_slice %69 {offsets = [2, 0], sizes = [1, 286], strides = [1, 1]} : vector<3x286xf32> to vector<1x286xf32>
    %86 = vector.broadcast %84 : vector<8x1xf32> to vector<8x286xf32>
    %87 = vector.broadcast %85 : vector<1x286xf32> to vector<8x286xf32>
    %88 = arith.mulf %86, %87 : vector<8x286xf32>
    %89 = arith.addf %83, %88 : vector<8x286xf32>
    %90 = vector.extract_strided_slice %2 {offsets = [0, 18], sizes = [1, 286], strides = [1, 1]} : vector<1x324xf32> to vector<1x286xf32>
    %c3 = arith.constant 3 : index
    %c0_23 = arith.constant 0 : index
    %c0_24 = arith.constant 0 : index
    %91 = vector.load %arg4[%c3, %c0_23, %c0_24] : memref<9x8x1xf32, #tpu.memory_space<vmem>>, vector<1x8x1xf32>
    %92 = vector.shape_cast %91 : vector<1x8x1xf32> to vector<8x1xf32>
    %93 = vector.broadcast %92 : vector<8x1xf32> to vector<8x286xf32>
    %94 = vector.broadcast %90 : vector<1x286xf32> to vector<8x286xf32>
    %95 = arith.mulf %93, %94 : vector<8x286xf32>
    %96 = arith.addf %89, %95 : vector<8x286xf32>
    %97 = vector.extract_strided_slice %4 {offsets = [0, 18], sizes = [3, 286], strides = [1, 1]} : vector<3x324xf32> to vector<3x286xf32>
    %c3_25 = arith.constant 3 : index
    %c0_26 = arith.constant 0 : index
    %c0_27 = arith.constant 0 : index
    %98 = vector.load %arg5[%c3_25, %c0_26, %c0_27] : memref<9x8x3xf32, #tpu.memory_space<vmem>>, vector<1x8x3xf32>
    %99 = vector.shape_cast %98 : vector<1x8x3xf32> to vector<8x3xf32>
    %100 = vector.extract_strided_slice %99 {offsets = [0, 0], sizes = [8, 1], strides = [1, 1]} : vector<8x3xf32> to vector<8x1xf32>
    %101 = vector.extract_strided_slice %97 {offsets = [0, 0], sizes = [1, 286], strides = [1, 1]} : vector<3x286xf32> to vector<1x286xf32>
    %102 = vector.broadcast %100 : vector<8x1xf32> to vector<8x286xf32>
    %103 = vector.broadcast %101 : vector<1x286xf32> to vector<8x286xf32>
    %104 = arith.mulf %102, %103 : vector<8x286xf32>
    %105 = arith.addf %96, %104 : vector<8x286xf32>
    %106 = vector.extract_strided_slice %99 {offsets = [0, 1], sizes = [8, 1], strides = [1, 1]} : vector<8x3xf32> to vector<8x1xf32>
    %107 = vector.extract_strided_slice %97 {offsets = [1, 0], sizes = [1, 286], strides = [1, 1]} : vector<3x286xf32> to vector<1x286xf32>
    %108 = vector.broadcast %106 : vector<8x1xf32> to vector<8x286xf32>
    %109 = vector.broadcast %107 : vector<1x286xf32> to vector<8x286xf32>
    %110 = arith.mulf %108, %109 : vector<8x286xf32>
    %111 = arith.addf %105, %110 : vector<8x286xf32>
    %112 = vector.extract_strided_slice %99 {offsets = [0, 2], sizes = [8, 1], strides = [1, 1]} : vector<8x3xf32> to vector<8x1xf32>
    %113 = vector.extract_strided_slice %97 {offsets = [2, 0], sizes = [1, 286], strides = [1, 1]} : vector<3x286xf32> to vector<1x286xf32>
    %114 = vector.broadcast %112 : vector<8x1xf32> to vector<8x286xf32>
    %115 = vector.broadcast %113 : vector<1x286xf32> to vector<8x286xf32>
    %116 = arith.mulf %114, %115 : vector<8x286xf32>
    %117 = arith.addf %111, %116 : vector<8x286xf32>
    %118 = vector.extract_strided_slice %2 {offsets = [0, 19], sizes = [1, 286], strides = [1, 1]} : vector<1x324xf32> to vector<1x286xf32>
    %c4 = arith.constant 4 : index
    %c0_28 = arith.constant 0 : index
    %c0_29 = arith.constant 0 : index
    %119 = vector.load %arg4[%c4, %c0_28, %c0_29] : memref<9x8x1xf32, #tpu.memory_space<vmem>>, vector<1x8x1xf32>
    %120 = vector.shape_cast %119 : vector<1x8x1xf32> to vector<8x1xf32>
    %121 = vector.broadcast %120 : vector<8x1xf32> to vector<8x286xf32>
    %122 = vector.broadcast %118 : vector<1x286xf32> to vector<8x286xf32>
    %123 = arith.mulf %121, %122 : vector<8x286xf32>
    %124 = arith.addf %117, %123 : vector<8x286xf32>
    %125 = vector.extract_strided_slice %4 {offsets = [0, 19], sizes = [3, 286], strides = [1, 1]} : vector<3x324xf32> to vector<3x286xf32>
    %c4_30 = arith.constant 4 : index
    %c0_31 = arith.constant 0 : index
    %c0_32 = arith.constant 0 : index
    %126 = vector.load %arg5[%c4_30, %c0_31, %c0_32] : memref<9x8x3xf32, #tpu.memory_space<vmem>>, vector<1x8x3xf32>
    %127 = vector.shape_cast %126 : vector<1x8x3xf32> to vector<8x3xf32>
    %128 = vector.extract_strided_slice %127 {offsets = [0, 0], sizes = [8, 1], strides = [1, 1]} : vector<8x3xf32> to vector<8x1xf32>
    %129 = vector.extract_strided_slice %125 {offsets = [0, 0], sizes = [1, 286], strides = [1, 1]} : vector<3x286xf32> to vector<1x286xf32>
    %130 = vector.broadcast %128 : vector<8x1xf32> to vector<8x286xf32>
    %131 = vector.broadcast %129 : vector<1x286xf32> to vector<8x286xf32>
    %132 = arith.mulf %130, %131 : vector<8x286xf32>
    %133 = arith.addf %124, %132 : vector<8x286xf32>
    %134 = vector.extract_strided_slice %127 {offsets = [0, 1], sizes = [8, 1], strides = [1, 1]} : vector<8x3xf32> to vector<8x1xf32>
    %135 = vector.extract_strided_slice %125 {offsets = [1, 0], sizes = [1, 286], strides = [1, 1]} : vector<3x286xf32> to vector<1x286xf32>
    %136 = vector.broadcast %134 : vector<8x1xf32> to vector<8x286xf32>
    %137 = vector.broadcast %135 : vector<1x286xf32> to vector<8x286xf32>
    %138 = arith.mulf %136, %137 : vector<8x286xf32>
    %139 = arith.addf %133, %138 : vector<8x286xf32>
    %140 = vector.extract_strided_slice %127 {offsets = [0, 2], sizes = [8, 1], strides = [1, 1]} : vector<8x3xf32> to vector<8x1xf32>
    %141 = vector.extract_strided_slice %125 {offsets = [2, 0], sizes = [1, 286], strides = [1, 1]} : vector<3x286xf32> to vector<1x286xf32>
    %142 = vector.broadcast %140 : vector<8x1xf32> to vector<8x286xf32>
    %143 = vector.broadcast %141 : vector<1x286xf32> to vector<8x286xf32>
    %144 = arith.mulf %142, %143 : vector<8x286xf32>
    %145 = arith.addf %139, %144 : vector<8x286xf32>
    %146 = vector.extract_strided_slice %2 {offsets = [0, 20], sizes = [1, 286], strides = [1, 1]} : vector<1x324xf32> to vector<1x286xf32>
    %c5 = arith.constant 5 : index
    %c0_33 = arith.constant 0 : index
    %c0_34 = arith.constant 0 : index
    %147 = vector.load %arg4[%c5, %c0_33, %c0_34] : memref<9x8x1xf32, #tpu.memory_space<vmem>>, vector<1x8x1xf32>
    %148 = vector.shape_cast %147 : vector<1x8x1xf32> to vector<8x1xf32>
    %149 = vector.broadcast %148 : vector<8x1xf32> to vector<8x286xf32>
    %150 = vector.broadcast %146 : vector<1x286xf32> to vector<8x286xf32>
    %151 = arith.mulf %149, %150 : vector<8x286xf32>
    %152 = arith.addf %145, %151 : vector<8x286xf32>
    %153 = vector.extract_strided_slice %4 {offsets = [0, 20], sizes = [3, 286], strides = [1, 1]} : vector<3x324xf32> to vector<3x286xf32>
    %c5_35 = arith.constant 5 : index
    %c0_36 = arith.constant 0 : index
    %c0_37 = arith.constant 0 : index
    %154 = vector.load %arg5[%c5_35, %c0_36, %c0_37] : memref<9x8x3xf32, #tpu.memory_space<vmem>>, vector<1x8x3xf32>
    %155 = vector.shape_cast %154 : vector<1x8x3xf32> to vector<8x3xf32>
    %156 = vector.extract_strided_slice %155 {offsets = [0, 0], sizes = [8, 1], strides = [1, 1]} : vector<8x3xf32> to vector<8x1xf32>
    %157 = vector.extract_strided_slice %153 {offsets = [0, 0], sizes = [1, 286], strides = [1, 1]} : vector<3x286xf32> to vector<1x286xf32>
    %158 = vector.broadcast %156 : vector<8x1xf32> to vector<8x286xf32>
    %159 = vector.broadcast %157 : vector<1x286xf32> to vector<8x286xf32>
    %160 = arith.mulf %158, %159 : vector<8x286xf32>
    %161 = arith.addf %152, %160 : vector<8x286xf32>
    %162 = vector.extract_strided_slice %155 {offsets = [0, 1], sizes = [8, 1], strides = [1, 1]} : vector<8x3xf32> to vector<8x1xf32>
    %163 = vector.extract_strided_slice %153 {offsets = [1, 0], sizes = [1, 286], strides = [1, 1]} : vector<3x286xf32> to vector<1x286xf32>
    %164 = vector.broadcast %162 : vector<8x1xf32> to vector<8x286xf32>
    %165 = vector.broadcast %163 : vector<1x286xf32> to vector<8x286xf32>
    %166 = arith.mulf %164, %165 : vector<8x286xf32>
    %167 = arith.addf %161, %166 : vector<8x286xf32>
    %168 = vector.extract_strided_slice %155 {offsets = [0, 2], sizes = [8, 1], strides = [1, 1]} : vector<8x3xf32> to vector<8x1xf32>
    %169 = vector.extract_strided_slice %153 {offsets = [2, 0], sizes = [1, 286], strides = [1, 1]} : vector<3x286xf32> to vector<1x286xf32>
    %170 = vector.broadcast %168 : vector<8x1xf32> to vector<8x286xf32>
    %171 = vector.broadcast %169 : vector<1x286xf32> to vector<8x286xf32>
    %172 = arith.mulf %170, %171 : vector<8x286xf32>
    %173 = arith.addf %167, %172 : vector<8x286xf32>
    %174 = vector.extract_strided_slice %2 {offsets = [0, 36], sizes = [1, 286], strides = [1, 1]} : vector<1x324xf32> to vector<1x286xf32>
    %c6 = arith.constant 6 : index
    %c0_38 = arith.constant 0 : index
    %c0_39 = arith.constant 0 : index
    %175 = vector.load %arg4[%c6, %c0_38, %c0_39] : memref<9x8x1xf32, #tpu.memory_space<vmem>>, vector<1x8x1xf32>
    %176 = vector.shape_cast %175 : vector<1x8x1xf32> to vector<8x1xf32>
    %177 = vector.broadcast %176 : vector<8x1xf32> to vector<8x286xf32>
    %178 = vector.broadcast %174 : vector<1x286xf32> to vector<8x286xf32>
    %179 = arith.mulf %177, %178 : vector<8x286xf32>
    %180 = arith.addf %173, %179 : vector<8x286xf32>
    %181 = vector.extract_strided_slice %4 {offsets = [0, 36], sizes = [3, 286], strides = [1, 1]} : vector<3x324xf32> to vector<3x286xf32>
    %c6_40 = arith.constant 6 : index
    %c0_41 = arith.constant 0 : index
    %c0_42 = arith.constant 0 : index
    %182 = vector.load %arg5[%c6_40, %c0_41, %c0_42] : memref<9x8x3xf32, #tpu.memory_space<vmem>>, vector<1x8x3xf32>
    %183 = vector.shape_cast %182 : vector<1x8x3xf32> to vector<8x3xf32>
    %184 = vector.extract_strided_slice %183 {offsets = [0, 0], sizes = [8, 1], strides = [1, 1]} : vector<8x3xf32> to vector<8x1xf32>
    %185 = vector.extract_strided_slice %181 {offsets = [0, 0], sizes = [1, 286], strides = [1, 1]} : vector<3x286xf32> to vector<1x286xf32>
    %186 = vector.broadcast %184 : vector<8x1xf32> to vector<8x286xf32>
    %187 = vector.broadcast %185 : vector<1x286xf32> to vector<8x286xf32>
    %188 = arith.mulf %186, %187 : vector<8x286xf32>
    %189 = arith.addf %180, %188 : vector<8x286xf32>
    %190 = vector.extract_strided_slice %183 {offsets = [0, 1], sizes = [8, 1], strides = [1, 1]} : vector<8x3xf32> to vector<8x1xf32>
    %191 = vector.extract_strided_slice %181 {offsets = [1, 0], sizes = [1, 286], strides = [1, 1]} : vector<3x286xf32> to vector<1x286xf32>
    %192 = vector.broadcast %190 : vector<8x1xf32> to vector<8x286xf32>
    %193 = vector.broadcast %191 : vector<1x286xf32> to vector<8x286xf32>
    %194 = arith.mulf %192, %193 : vector<8x286xf32>
    %195 = arith.addf %189, %194 : vector<8x286xf32>
    %196 = vector.extract_strided_slice %183 {offsets = [0, 2], sizes = [8, 1], strides = [1, 1]} : vector<8x3xf32> to vector<8x1xf32>
    %197 = vector.extract_strided_slice %181 {offsets = [2, 0], sizes = [1, 286], strides = [1, 1]} : vector<3x286xf32> to vector<1x286xf32>
    %198 = vector.broadcast %196 : vector<8x1xf32> to vector<8x286xf32>
    %199 = vector.broadcast %197 : vector<1x286xf32> to vector<8x286xf32>
    %200 = arith.mulf %198, %199 : vector<8x286xf32>
    %201 = arith.addf %195, %200 : vector<8x286xf32>
    %202 = vector.extract_strided_slice %2 {offsets = [0, 37], sizes = [1, 286], strides = [1, 1]} : vector<1x324xf32> to vector<1x286xf32>
    %c7 = arith.constant 7 : index
    %c0_43 = arith.constant 0 : index
    %c0_44 = arith.constant 0 : index
    %203 = vector.load %arg4[%c7, %c0_43, %c0_44] : memref<9x8x1xf32, #tpu.memory_space<vmem>>, vector<1x8x1xf32>
    %204 = vector.shape_cast %203 : vector<1x8x1xf32> to vector<8x1xf32>
    %205 = vector.broadcast %204 : vector<8x1xf32> to vector<8x286xf32>
    %206 = vector.broadcast %202 : vector<1x286xf32> to vector<8x286xf32>
    %207 = arith.mulf %205, %206 : vector<8x286xf32>
    %208 = arith.addf %201, %207 : vector<8x286xf32>
    %209 = vector.extract_strided_slice %4 {offsets = [0, 37], sizes = [3, 286], strides = [1, 1]} : vector<3x324xf32> to vector<3x286xf32>
    %c7_45 = arith.constant 7 : index
    %c0_46 = arith.constant 0 : index
    %c0_47 = arith.constant 0 : index
    %210 = vector.load %arg5[%c7_45, %c0_46, %c0_47] : memref<9x8x3xf32, #tpu.memory_space<vmem>>, vector<1x8x3xf32>
    %211 = vector.shape_cast %210 : vector<1x8x3xf32> to vector<8x3xf32>
    %212 = vector.extract_strided_slice %211 {offsets = [0, 0], sizes = [8, 1], strides = [1, 1]} : vector<8x3xf32> to vector<8x1xf32>
    %213 = vector.extract_strided_slice %209 {offsets = [0, 0], sizes = [1, 286], strides = [1, 1]} : vector<3x286xf32> to vector<1x286xf32>
    %214 = vector.broadcast %212 : vector<8x1xf32> to vector<8x286xf32>
    %215 = vector.broadcast %213 : vector<1x286xf32> to vector<8x286xf32>
    %216 = arith.mulf %214, %215 : vector<8x286xf32>
    %217 = arith.addf %208, %216 : vector<8x286xf32>
    %218 = vector.extract_strided_slice %211 {offsets = [0, 1], sizes = [8, 1], strides = [1, 1]} : vector<8x3xf32> to vector<8x1xf32>
    %219 = vector.extract_strided_slice %209 {offsets = [1, 0], sizes = [1, 286], strides = [1, 1]} : vector<3x286xf32> to vector<1x286xf32>
    %220 = vector.broadcast %218 : vector<8x1xf32> to vector<8x286xf32>
    %221 = vector.broadcast %219 : vector<1x286xf32> to vector<8x286xf32>
    %222 = arith.mulf %220, %221 : vector<8x286xf32>
    %223 = arith.addf %217, %222 : vector<8x286xf32>
    %224 = vector.extract_strided_slice %211 {offsets = [0, 2], sizes = [8, 1], strides = [1, 1]} : vector<8x3xf32> to vector<8x1xf32>
    %225 = vector.extract_strided_slice %209 {offsets = [2, 0], sizes = [1, 286], strides = [1, 1]} : vector<3x286xf32> to vector<1x286xf32>
    %226 = vector.broadcast %224 : vector<8x1xf32> to vector<8x286xf32>
    %227 = vector.broadcast %225 : vector<1x286xf32> to vector<8x286xf32>
    %228 = arith.mulf %226, %227 : vector<8x286xf32>
    %229 = arith.addf %223, %228 : vector<8x286xf32>
    %230 = vector.extract_strided_slice %2 {offsets = [0, 38], sizes = [1, 286], strides = [1, 1]} : vector<1x324xf32> to vector<1x286xf32>
    %c8 = arith.constant 8 : index
    %c0_48 = arith.constant 0 : index
    %c0_49 = arith.constant 0 : index
    %231 = vector.load %arg4[%c8, %c0_48, %c0_49] : memref<9x8x1xf32, #tpu.memory_space<vmem>>, vector<1x8x1xf32>
    %232 = vector.shape_cast %231 : vector<1x8x1xf32> to vector<8x1xf32>
    %233 = vector.broadcast %232 : vector<8x1xf32> to vector<8x286xf32>
    %234 = vector.broadcast %230 : vector<1x286xf32> to vector<8x286xf32>
    %235 = arith.mulf %233, %234 : vector<8x286xf32>
    %236 = arith.addf %229, %235 : vector<8x286xf32>
    %237 = vector.extract_strided_slice %4 {offsets = [0, 38], sizes = [3, 286], strides = [1, 1]} : vector<3x324xf32> to vector<3x286xf32>
    %c8_50 = arith.constant 8 : index
    %c0_51 = arith.constant 0 : index
    %c0_52 = arith.constant 0 : index
    %238 = vector.load %arg5[%c8_50, %c0_51, %c0_52] : memref<9x8x3xf32, #tpu.memory_space<vmem>>, vector<1x8x3xf32>
    %239 = vector.shape_cast %238 : vector<1x8x3xf32> to vector<8x3xf32>
    %240 = vector.extract_strided_slice %239 {offsets = [0, 0], sizes = [8, 1], strides = [1, 1]} : vector<8x3xf32> to vector<8x1xf32>
    %241 = vector.extract_strided_slice %237 {offsets = [0, 0], sizes = [1, 286], strides = [1, 1]} : vector<3x286xf32> to vector<1x286xf32>
    %242 = vector.broadcast %240 : vector<8x1xf32> to vector<8x286xf32>
    %243 = vector.broadcast %241 : vector<1x286xf32> to vector<8x286xf32>
    %244 = arith.mulf %242, %243 : vector<8x286xf32>
    %245 = arith.addf %236, %244 : vector<8x286xf32>
    %246 = vector.extract_strided_slice %239 {offsets = [0, 1], sizes = [8, 1], strides = [1, 1]} : vector<8x3xf32> to vector<8x1xf32>
    %247 = vector.extract_strided_slice %237 {offsets = [1, 0], sizes = [1, 286], strides = [1, 1]} : vector<3x286xf32> to vector<1x286xf32>
    %248 = vector.broadcast %246 : vector<8x1xf32> to vector<8x286xf32>
    %249 = vector.broadcast %247 : vector<1x286xf32> to vector<8x286xf32>
    %250 = arith.mulf %248, %249 : vector<8x286xf32>
    %251 = arith.addf %245, %250 : vector<8x286xf32>
    %252 = vector.extract_strided_slice %239 {offsets = [0, 2], sizes = [8, 1], strides = [1, 1]} : vector<8x3xf32> to vector<8x1xf32>
    %253 = vector.extract_strided_slice %237 {offsets = [2, 0], sizes = [1, 286], strides = [1, 1]} : vector<3x286xf32> to vector<1x286xf32>
    %254 = vector.broadcast %252 : vector<8x1xf32> to vector<8x286xf32>
    %255 = vector.broadcast %253 : vector<1x286xf32> to vector<8x286xf32>
    %256 = arith.mulf %254, %255 : vector<8x286xf32>
    %257 = arith.addf %251, %256 : vector<8x286xf32>
    %c0_53 = arith.constant 0 : index
    %c0_54 = arith.constant 0 : index
    %258 = vector.load %arg6[%c0_53, %c0_54] : memref<8x1xf32, #tpu.memory_space<vmem>>, vector<8x1xf32>
    %259 = vector.broadcast %258 : vector<8x1xf32> to vector<8x286xf32>
    %260 = arith.addf %257, %259 : vector<8x286xf32>
    %cst_55 = arith.constant 0.000000e+00 : f32
    %261 = vector.broadcast %cst_55 : f32 to vector<8x286xf32>
    %262 = arith.maximumf %260, %261 : vector<8x286xf32>
    %263 = vector.broadcast %0 : vector<1x286xf32> to vector<8x286xf32>
    %264 = arith.mulf %262, %263 : vector<8x286xf32>
    %cst_56 = arith.constant 0.000000e+00 : f32
    %265 = vector.broadcast %cst_56 : f32 to vector<8x19xf32>
    %c0_57 = arith.constant 0 : index
    %c0_58 = arith.constant 0 : index
    %266 = vector.load %arg10[%c0_57, %c0_58] : memref<8x324xf32, #tpu.memory_space<vmem>>, vector<8x19xf32>
    tpu.vector_store %arg10[%c0_57, %c0_58], %265 {strides = array<i32>} : memref<8x324xf32, #tpu.memory_space<vmem>>, vector<8x19xf32>,
    %cst_59 = arith.constant 0.000000e+00 : f32
    %267 = vector.broadcast %cst_59 : f32 to vector<8x19xf32>
    %c0_60 = arith.constant 0 : index
    %c305 = arith.constant 305 : index
    %268 = vector.load %arg10[%c0_60, %c305] : memref<8x324xf32, #tpu.memory_space<vmem>>, vector<8x19xf32>
    tpu.vector_store %arg10[%c0_60, %c305], %267 {strides = array<i32>} : memref<8x324xf32, #tpu.memory_space<vmem>>, vector<8x19xf32>,
    %c0_61 = arith.constant 0 : index
    %c19 = arith.constant 19 : index
    %269 = vector.load %arg10[%c0_61, %c19] : memref<8x324xf32, #tpu.memory_space<vmem>>, vector<8x286xf32>
    tpu.vector_store %arg10[%c0_61, %c19], %264 {strides = array<i32>} : memref<8x324xf32, #tpu.memory_space<vmem>>, vector<8x286xf32>,
    %c0_62 = arith.constant 0 : index
    %c0_63 = arith.constant 0 : index
    %270 = vector.load %arg10[%c0_62, %c0_63] : memref<8x324xf32, #tpu.memory_space<vmem>>, vector<8x324xf32>
    %cst_64 = arith.constant 0.000000e+00 : f32
    %271 = vector.broadcast %cst_64 : f32 to vector<8x286xf32>
    %272 = vector.extract_strided_slice %270 {offsets = [0, 0], sizes = [8, 286], strides = [1, 1]} : vector<8x324xf32> to vector<8x286xf32>
    %c0_65 = arith.constant 0 : index
    %c0_66 = arith.constant 0 : index
    %c0_67 = arith.constant 0 : index
    %273 = vector.load %arg7[%c0_65, %c0_66, %c0_67] : memref<9x8x8xf32, #tpu.memory_space<vmem>>, vector<1x8x8xf32>
    %274 = vector.shape_cast %273 : vector<1x8x8xf32> to vector<8x8xf32>
    %275 = arith.truncf %274 : vector<8x8xf32> to vector<8x8xbf16>
    %276 = arith.truncf %272 : vector<8x286xf32> to vector<8x286xbf16>
    %cst_68 = arith.constant dense<0.000000e+00> : vector<8x286xf32>
    %277 = tpu.matmul %275, %276, %cst_68 {dimension_numbers = #tpu.dot_dimension_numbers<[1], [0], [0], [1], [0, 0, 1, 1], [], []>} : vector<8x8xbf16>, vector<8x286xbf16>, vector<8x286xf32> -> vector<8x286xf32>
    %278 = arith.addf %271, %277 : vector<8x286xf32>
    %279 = vector.extract_strided_slice %270 {offsets = [0, 1], sizes = [8, 286], strides = [1, 1]} : vector<8x324xf32> to vector<8x286xf32>
    %c1_69 = arith.constant 1 : index
    %c0_70 = arith.constant 0 : index
    %c0_71 = arith.constant 0 : index
    %280 = vector.load %arg7[%c1_69, %c0_70, %c0_71] : memref<9x8x8xf32, #tpu.memory_space<vmem>>, vector<1x8x8xf32>
    %281 = vector.shape_cast %280 : vector<1x8x8xf32> to vector<8x8xf32>
    %282 = arith.truncf %281 : vector<8x8xf32> to vector<8x8xbf16>
    %283 = arith.truncf %279 : vector<8x286xf32> to vector<8x286xbf16>
    %cst_72 = arith.constant dense<0.000000e+00> : vector<8x286xf32>
    %284 = tpu.matmul %282, %283, %cst_72 {dimension_numbers = #tpu.dot_dimension_numbers<[1], [0], [0], [1], [0, 0, 1, 1], [], []>} : vector<8x8xbf16>, vector<8x286xbf16>, vector<8x286xf32> -> vector<8x286xf32>
    %285 = arith.addf %278, %284 : vector<8x286xf32>
    %286 = vector.extract_strided_slice %270 {offsets = [0, 2], sizes = [8, 286], strides = [1, 1]} : vector<8x324xf32> to vector<8x286xf32>
    %c2_73 = arith.constant 2 : index
    %c0_74 = arith.constant 0 : index
    %c0_75 = arith.constant 0 : index
    %287 = vector.load %arg7[%c2_73, %c0_74, %c0_75] : memref<9x8x8xf32, #tpu.memory_space<vmem>>, vector<1x8x8xf32>
    %288 = vector.shape_cast %287 : vector<1x8x8xf32> to vector<8x8xf32>
    %289 = arith.truncf %288 : vector<8x8xf32> to vector<8x8xbf16>
    %290 = arith.truncf %286 : vector<8x286xf32> to vector<8x286xbf16>
    %cst_76 = arith.constant dense<0.000000e+00> : vector<8x286xf32>
    %291 = tpu.matmul %289, %290, %cst_76 {dimension_numbers = #tpu.dot_dimension_numbers<[1], [0], [0], [1], [0, 0, 1, 1], [], []>} : vector<8x8xbf16>, vector<8x286xbf16>, vector<8x286xf32> -> vector<8x286xf32>
    %292 = arith.addf %285, %291 : vector<8x286xf32>
    %293 = vector.extract_strided_slice %270 {offsets = [0, 18], sizes = [8, 286], strides = [1, 1]} : vector<8x324xf32> to vector<8x286xf32>
    %c3_77 = arith.constant 3 : index
    %c0_78 = arith.constant 0 : index
    %c0_79 = arith.constant 0 : index
    %294 = vector.load %arg7[%c3_77, %c0_78, %c0_79] : memref<9x8x8xf32, #tpu.memory_space<vmem>>, vector<1x8x8xf32>
    %295 = vector.shape_cast %294 : vector<1x8x8xf32> to vector<8x8xf32>
    %296 = arith.truncf %295 : vector<8x8xf32> to vector<8x8xbf16>
    %297 = arith.truncf %293 : vector<8x286xf32> to vector<8x286xbf16>
    %cst_80 = arith.constant dense<0.000000e+00> : vector<8x286xf32>
    %298 = tpu.matmul %296, %297, %cst_80 {dimension_numbers = #tpu.dot_dimension_numbers<[1], [0], [0], [1], [0, 0, 1, 1], [], []>} : vector<8x8xbf16>, vector<8x286xbf16>, vector<8x286xf32> -> vector<8x286xf32>
    %299 = arith.addf %292, %298 : vector<8x286xf32>
    %300 = vector.extract_strided_slice %270 {offsets = [0, 19], sizes = [8, 286], strides = [1, 1]} : vector<8x324xf32> to vector<8x286xf32>
    %c4_81 = arith.constant 4 : index
    %c0_82 = arith.constant 0 : index
    %c0_83 = arith.constant 0 : index
    %301 = vector.load %arg7[%c4_81, %c0_82, %c0_83] : memref<9x8x8xf32, #tpu.memory_space<vmem>>, vector<1x8x8xf32>
    %302 = vector.shape_cast %301 : vector<1x8x8xf32> to vector<8x8xf32>
    %303 = arith.truncf %302 : vector<8x8xf32> to vector<8x8xbf16>
    %304 = arith.truncf %300 : vector<8x286xf32> to vector<8x286xbf16>
    %cst_84 = arith.constant dense<0.000000e+00> : vector<8x286xf32>
    %305 = tpu.matmul %303, %304, %cst_84 {dimension_numbers = #tpu.dot_dimension_numbers<[1], [0], [0], [1], [0, 0, 1, 1], [], []>} : vector<8x8xbf16>, vector<8x286xbf16>, vector<8x286xf32> -> vector<8x286xf32>
    %306 = arith.addf %299, %305 : vector<8x286xf32>
    %307 = vector.extract_strided_slice %270 {offsets = [0, 20], sizes = [8, 286], strides = [1, 1]} : vector<8x324xf32> to vector<8x286xf32>
    %c5_85 = arith.constant 5 : index
    %c0_86 = arith.constant 0 : index
    %c0_87 = arith.constant 0 : index
    %308 = vector.load %arg7[%c5_85, %c0_86, %c0_87] : memref<9x8x8xf32, #tpu.memory_space<vmem>>, vector<1x8x8xf32>
    %309 = vector.shape_cast %308 : vector<1x8x8xf32> to vector<8x8xf32>
    %310 = arith.truncf %309 : vector<8x8xf32> to vector<8x8xbf16>
    %311 = arith.truncf %307 : vector<8x286xf32> to vector<8x286xbf16>
    %cst_88 = arith.constant dense<0.000000e+00> : vector<8x286xf32>
    %312 = tpu.matmul %310, %311, %cst_88 {dimension_numbers = #tpu.dot_dimension_numbers<[1], [0], [0], [1], [0, 0, 1, 1], [], []>} : vector<8x8xbf16>, vector<8x286xbf16>, vector<8x286xf32> -> vector<8x286xf32>
    %313 = arith.addf %306, %312 : vector<8x286xf32>
    %314 = vector.extract_strided_slice %270 {offsets = [0, 36], sizes = [8, 286], strides = [1, 1]} : vector<8x324xf32> to vector<8x286xf32>
    %c6_89 = arith.constant 6 : index
    %c0_90 = arith.constant 0 : index
    %c0_91 = arith.constant 0 : index
    %315 = vector.load %arg7[%c6_89, %c0_90, %c0_91] : memref<9x8x8xf32, #tpu.memory_space<vmem>>, vector<1x8x8xf32>
    %316 = vector.shape_cast %315 : vector<1x8x8xf32> to vector<8x8xf32>
    %317 = arith.truncf %316 : vector<8x8xf32> to vector<8x8xbf16>
    %318 = arith.truncf %314 : vector<8x286xf32> to vector<8x286xbf16>
    %cst_92 = arith.constant dense<0.000000e+00> : vector<8x286xf32>
    %319 = tpu.matmul %317, %318, %cst_92 {dimension_numbers = #tpu.dot_dimension_numbers<[1], [0], [0], [1], [0, 0, 1, 1], [], []>} : vector<8x8xbf16>, vector<8x286xbf16>, vector<8x286xf32> -> vector<8x286xf32>
    %320 = arith.addf %313, %319 : vector<8x286xf32>
    %321 = vector.extract_strided_slice %270 {offsets = [0, 37], sizes = [8, 286], strides = [1, 1]} : vector<8x324xf32> to vector<8x286xf32>
    %c7_93 = arith.constant 7 : index
    %c0_94 = arith.constant 0 : index
    %c0_95 = arith.constant 0 : index
    %322 = vector.load %arg7[%c7_93, %c0_94, %c0_95] : memref<9x8x8xf32, #tpu.memory_space<vmem>>, vector<1x8x8xf32>
    %323 = vector.shape_cast %322 : vector<1x8x8xf32> to vector<8x8xf32>
    %324 = arith.truncf %323 : vector<8x8xf32> to vector<8x8xbf16>
    %325 = arith.truncf %321 : vector<8x286xf32> to vector<8x286xbf16>
    %cst_96 = arith.constant dense<0.000000e+00> : vector<8x286xf32>
    %326 = tpu.matmul %324, %325, %cst_96 {dimension_numbers = #tpu.dot_dimension_numbers<[1], [0], [0], [1], [0, 0, 1, 1], [], []>} : vector<8x8xbf16>, vector<8x286xbf16>, vector<8x286xf32> -> vector<8x286xf32>
    %327 = arith.addf %320, %326 : vector<8x286xf32>
    %328 = vector.extract_strided_slice %270 {offsets = [0, 38], sizes = [8, 286], strides = [1, 1]} : vector<8x324xf32> to vector<8x286xf32>
    %c8_97 = arith.constant 8 : index
    %c0_98 = arith.constant 0 : index
    %c0_99 = arith.constant 0 : index
    %329 = vector.load %arg7[%c8_97, %c0_98, %c0_99] : memref<9x8x8xf32, #tpu.memory_space<vmem>>, vector<1x8x8xf32>
    %330 = vector.shape_cast %329 : vector<1x8x8xf32> to vector<8x8xf32>
    %331 = arith.truncf %330 : vector<8x8xf32> to vector<8x8xbf16>
    %332 = arith.truncf %328 : vector<8x286xf32> to vector<8x286xbf16>
    %cst_100 = arith.constant dense<0.000000e+00> : vector<8x286xf32>
    %333 = tpu.matmul %331, %332, %cst_100 {dimension_numbers = #tpu.dot_dimension_numbers<[1], [0], [0], [1], [0, 0, 1, 1], [], []>} : vector<8x8xbf16>, vector<8x286xbf16>, vector<8x286xf32> -> vector<8x286xf32>
    %334 = arith.addf %327, %333 : vector<8x286xf32>
    %c0_101 = arith.constant 0 : index
    %c0_102 = arith.constant 0 : index
    %335 = vector.load %arg8[%c0_101, %c0_102] : memref<8x1xf32, #tpu.memory_space<vmem>>, vector<8x1xf32>
    %336 = vector.broadcast %335 : vector<8x1xf32> to vector<8x286xf32>
    %337 = arith.addf %334, %336 : vector<8x286xf32>
    %cst_103 = arith.constant 0.000000e+00 : f32
    %338 = vector.broadcast %cst_103 : f32 to vector<8x286xf32>
    %339 = arith.maximumf %337, %338 : vector<8x286xf32>
    %340 = vector.broadcast %0 : vector<1x286xf32> to vector<8x286xf32>
    %341 = arith.mulf %339, %340 : vector<8x286xf32>
    %cst_104 = arith.constant 0.000000e+00 : f32
    %342 = vector.broadcast %cst_104 : f32 to vector<8x19xf32>
    %c0_105 = arith.constant 0 : index
    %c0_106 = arith.constant 0 : index
    %c0_107 = arith.constant 0 : index
    %343 = vector.load %arg9[%c0_105, %c0_106, %c0_107] : memref<1x8x324xf32, #tpu.memory_space<vmem>>, vector<1x8x19xf32>
    %344 = vector.shape_cast %343 : vector<1x8x19xf32> to vector<8x19xf32>
    %345 = vector.shape_cast %342 : vector<8x19xf32> to vector<1x8x19xf32>
    tpu.vector_store %arg9[%c0_105, %c0_106, %c0_107], %345 {strides = array<i32>} : memref<1x8x324xf32, #tpu.memory_space<vmem>>, vector<1x8x19xf32>,
    %cst_108 = arith.constant 0.000000e+00 : f32
    %346 = vector.broadcast %cst_108 : f32 to vector<8x19xf32>
    %c0_109 = arith.constant 0 : index
    %c0_110 = arith.constant 0 : index
    %c305_111 = arith.constant 305 : index
    %347 = vector.load %arg9[%c0_109, %c0_110, %c305_111] : memref<1x8x324xf32, #tpu.memory_space<vmem>>, vector<1x8x19xf32>
    %348 = vector.shape_cast %347 : vector<1x8x19xf32> to vector<8x19xf32>
    %349 = vector.shape_cast %346 : vector<8x19xf32> to vector<1x8x19xf32>
    tpu.vector_store %arg9[%c0_109, %c0_110, %c305_111], %349 {strides = array<i32>} : memref<1x8x324xf32, #tpu.memory_space<vmem>>, vector<1x8x19xf32>,
    %c0_112 = arith.constant 0 : index
    %c0_113 = arith.constant 0 : index
    %c19_114 = arith.constant 19 : index
    %350 = vector.load %arg9[%c0_112, %c0_113, %c19_114] : memref<1x8x324xf32, #tpu.memory_space<vmem>>, vector<1x8x286xf32>
    %351 = vector.shape_cast %350 : vector<1x8x286xf32> to vector<8x286xf32>
    %352 = vector.shape_cast %341 : vector<8x286xf32> to vector<1x8x286xf32>
    tpu.vector_store %arg9[%c0_112, %c0_113, %c19_114], %352 {strides = array<i32>} : memref<1x8x324xf32, #tpu.memory_space<vmem>>, vector<1x8x286xf32>,
    return
  }
  func.func @transform_0(%arg0: i32) -> (i32, i32, i32) {
    %c0_i32 = arith.constant 0 : i32
    %c0_i32_0 = arith.constant 0 : i32
    %c0_i32_1 = arith.constant 0 : i32
    return %arg0, %c0_i32, %c0_i32_0 : i32, i32, i32
  }
  func.func @transform_1(%arg0: i32) -> (i32, i32, i32) {
    %c0_i32 = arith.constant 0 : i32
    %c0_i32_0 = arith.constant 0 : i32
    %c0_i32_1 = arith.constant 0 : i32
    return %arg0, %c0_i32, %c0_i32_0 : i32, i32, i32
  }
  func.func @transform_2(%arg0: i32) -> (i32, i32) {
    %c0_i32 = arith.constant 0 : i32
    %c0_i32_0 = arith.constant 0 : i32
    %c0_i32_1 = arith.constant 0 : i32
    return %c0_i32, %c0_i32_0 : i32, i32
  }
  func.func @transform_3(%arg0: i32) -> (i32, i32, i32) {
    %c0_i32 = arith.constant 0 : i32
    %c0_i32_0 = arith.constant 0 : i32
    %c0_i32_1 = arith.constant 0 : i32
    %c0_i32_2 = arith.constant 0 : i32
    return %c0_i32, %c0_i32_0, %c0_i32_1 : i32, i32, i32
  }
  func.func @transform_4(%arg0: i32) -> (i32, i32, i32) {
    %c0_i32 = arith.constant 0 : i32
    %c0_i32_0 = arith.constant 0 : i32
    %c0_i32_1 = arith.constant 0 : i32
    %c0_i32_2 = arith.constant 0 : i32
    return %c0_i32, %c0_i32_0, %c0_i32_1 : i32, i32, i32
  }
  func.func @transform_5(%arg0: i32) -> (i32, i32) {
    %c0_i32 = arith.constant 0 : i32
    %c0_i32_0 = arith.constant 0 : i32
    %c0_i32_1 = arith.constant 0 : i32
    return %c0_i32, %c0_i32_0 : i32, i32
  }
  func.func @transform_6(%arg0: i32) -> (i32, i32, i32) {
    %c0_i32 = arith.constant 0 : i32
    %c0_i32_0 = arith.constant 0 : i32
    %c0_i32_1 = arith.constant 0 : i32
    %c0_i32_2 = arith.constant 0 : i32
    return %c0_i32, %c0_i32_0, %c0_i32_1 : i32, i32, i32
  }
  func.func @transform_7(%arg0: i32) -> (i32, i32) {
    %c0_i32 = arith.constant 0 : i32
    %c0_i32_0 = arith.constant 0 : i32
    %c0_i32_1 = arith.constant 0 : i32
    return %c0_i32, %c0_i32_0 : i32, i32
  }
  func.func @transform_8(%arg0: i32) -> (i32, i32, i32) {
    %c0_i32 = arith.constant 0 : i32
    %c0_i32_0 = arith.constant 0 : i32
    %c0_i32_1 = arith.constant 0 : i32
    return %arg0, %c0_i32, %c0_i32_0 : i32, i32, i32
  }
}

module attributes {stable_mosaic.version = 11 : i64} {
  func.func @_head_bce_kernel(%arg0: i32, %arg1: memref<1x8x324xf32, #tpu.memory_space<vmem>>, %arg2: memref<1x3x324xf32, #tpu.memory_space<vmem>>, %arg3: memref<1x324xf32, #tpu.memory_space<vmem>>, %arg4: memref<3x8xf32, #tpu.memory_space<vmem>>, %arg5: memref<3x1xf32, #tpu.memory_space<vmem>>, %arg6: memref<3x1xf32, #tpu.memory_space<vmem>>, %arg7: memref<1x3x324xf32, #tpu.memory_space<vmem>>, %arg8: memref<1x1xf32, #tpu.memory_space<vmem>>, %arg9: memref<3x324xf32, #tpu.memory_space<vmem>>) attributes {dimension_semantics = [#tpu.dimension_semantics<arbitrary>], iteration_bounds = array<i64: 2>, scalar_prefetch = 0 : i64, scratch_operands = 1 : i64, tpu.core_type = #tpu.core_type<tc>, window_params = [{transform_indices = @transform_0, window_bounds = array<i64: 1, 8, 324>}, {transform_indices = @transform_1, window_bounds = array<i64: 1, 3, 324>}, {pipeline_mode = #tpu.pipeline_mode<synchronous>, transform_indices = @transform_2, window_bounds = array<i64: 1, 324>}, {pipeline_mode = #tpu.pipeline_mode<synchronous>, transform_indices = @transform_3, window_bounds = array<i64: 3, 8>}, {pipeline_mode = #tpu.pipeline_mode<synchronous>, transform_indices = @transform_4, window_bounds = array<i64: 3, 1>}, {pipeline_mode = #tpu.pipeline_mode<synchronous>, transform_indices = @transform_5, window_bounds = array<i64: 3, 1>}, {transform_indices = @transform_6, window_bounds = array<i64: 1, 3, 324>}, {pipeline_mode = #tpu.pipeline_mode<synchronous>, transform_indices = @transform_7, window_bounds = array<i64: 1, 1>}]} {
    %c0_i32 = arith.constant 0 : i32
    %0 = arith.cmpi eq, %arg0, %c0_i32 : i32
    %1 = arith.extui %0 : i1 to i32
    %c0_i32_0 = arith.constant 0 : i32
    %2 = arith.cmpi ne, %1, %c0_i32_0 : i32
    scf.if %2 {
      %cst_25 = arith.constant 0.000000e+00 : f32
      %41 = vector.broadcast %cst_25 : f32 to vector<3x324xf32>
      %c0_26 = arith.constant 0 : index
      %c0_27 = arith.constant 0 : index
      %42 = vector.load %arg9[%c0_26, %c0_27] : memref<3x324xf32, #tpu.memory_space<vmem>>, vector<3x324xf32>
      tpu.vector_store %arg9[%c0_26, %c0_27], %41 {strides = array<i32>} : memref<3x324xf32, #tpu.memory_space<vmem>>, vector<3x324xf32>,
    } else {
    }
    %c0 = arith.constant 0 : index
    %c0_1 = arith.constant 0 : index
    %c0_2 = arith.constant 0 : index
    %3 = vector.load %arg1[%c0, %c0_1, %c0_2] : memref<1x8x324xf32, #tpu.memory_space<vmem>>, vector<1x8x324xf32>
    %4 = vector.shape_cast %3 : vector<1x8x324xf32> to vector<8x324xf32>
    %5 = arith.truncf %4 : vector<8x324xf32> to vector<8x324xbf16>
    %c0_3 = arith.constant 0 : index
    %c0_4 = arith.constant 0 : index
    %6 = vector.load %arg4[%c0_3, %c0_4] : memref<3x8xf32, #tpu.memory_space<vmem>>, vector<3x8xf32>
    %7 = arith.truncf %6 : vector<3x8xf32> to vector<3x8xbf16>
    %cst = arith.constant dense<0.000000e+00> : vector<3x324xf32>
    %8 = tpu.matmul %7, %5, %cst {dimension_numbers = #tpu.dot_dimension_numbers<[1], [0], [0], [1], [0, 0, 1, 1], [], []>} : vector<3x8xbf16>, vector<8x324xbf16>, vector<3x324xf32> -> vector<3x324xf32>
    %c0_5 = arith.constant 0 : index
    %c0_6 = arith.constant 0 : index
    %9 = vector.load %arg5[%c0_5, %c0_6] : memref<3x1xf32, #tpu.memory_space<vmem>>, vector<3x1xf32>
    %10 = vector.broadcast %9 : vector<3x1xf32> to vector<3x324xf32>
    %11 = arith.addf %8, %10 : vector<3x324xf32>
    %c0_7 = arith.constant 0 : index
    %c0_8 = arith.constant 0 : index
    %c0_9 = arith.constant 0 : index
    %12 = vector.load %arg7[%c0_7, %c0_8, %c0_9] : memref<1x3x324xf32, #tpu.memory_space<vmem>>, vector<1x3x324xf32>
    %13 = vector.shape_cast %12 : vector<1x3x324xf32> to vector<3x324xf32>
    %14 = arith.addf %11, %13 : vector<3x324xf32>
    %c0_10 = arith.constant 0 : index
    %c0_11 = arith.constant 0 : index
    %c0_12 = arith.constant 0 : index
    %15 = vector.load %arg2[%c0_10, %c0_11, %c0_12] : memref<1x3x324xf32, #tpu.memory_space<vmem>>, vector<1x3x324xf32>
    %16 = vector.shape_cast %15 : vector<1x3x324xf32> to vector<3x324xf32>
    %cst_13 = arith.constant 0.000000e+00 : f32
    %17 = vector.broadcast %cst_13 : f32 to vector<3x324xf32>
    %18 = arith.maximumf %14, %17 : vector<3x324xf32>
    %19 = arith.mulf %14, %16 : vector<3x324xf32>
    %20 = arith.subf %18, %19 : vector<3x324xf32>
    %21 = math.absf %14 : vector<3x324xf32>
    %cst_14 = arith.constant 0.000000e+00 : f32
    %22 = vector.broadcast %cst_14 : f32 to vector<3x324xf32>
    %23 = arith.subf %22, %21 : vector<3x324xf32>
    %24 = math.exp %23 : vector<3x324xf32>
    %cst_15 = arith.constant 1.000000e+00 : f32
    %25 = vector.broadcast %cst_15 : f32 to vector<3x324xf32>
    %26 = arith.addf %25, %24 : vector<3x324xf32>
    %27 = math.log %26 : vector<3x324xf32>
    %28 = arith.addf %20, %27 : vector<3x324xf32>
    %c0_16 = arith.constant 0 : index
    %c0_17 = arith.constant 0 : index
    %29 = vector.load %arg9[%c0_16, %c0_17] : memref<3x324xf32, #tpu.memory_space<vmem>>, vector<3x324xf32>
    %c0_18 = arith.constant 0 : index
    %c0_19 = arith.constant 0 : index
    %30 = vector.load %arg6[%c0_18, %c0_19] : memref<3x1xf32, #tpu.memory_space<vmem>>, vector<3x1xf32>
    %31 = vector.broadcast %30 : vector<3x1xf32> to vector<3x324xf32>
    %32 = arith.mulf %28, %31 : vector<3x324xf32>
    %c0_20 = arith.constant 0 : index
    %c0_21 = arith.constant 0 : index
    %33 = vector.load %arg3[%c0_20, %c0_21] : memref<1x324xf32, #tpu.memory_space<vmem>>, vector<1x324xf32>
    %34 = vector.broadcast %33 : vector<1x324xf32> to vector<3x324xf32>
    %35 = arith.mulf %32, %34 : vector<3x324xf32>
    %36 = arith.addf %29, %35 : vector<3x324xf32>
    %c0_22 = arith.constant 0 : index
    %c0_23 = arith.constant 0 : index
    %37 = vector.load %arg9[%c0_22, %c0_23] : memref<3x324xf32, #tpu.memory_space<vmem>>, vector<3x324xf32>
    tpu.vector_store %arg9[%c0_22, %c0_23], %36 {strides = array<i32>} : memref<3x324xf32, #tpu.memory_space<vmem>>, vector<3x324xf32>,
    %c1_i32 = arith.constant 1 : i32
    %38 = arith.cmpi eq, %arg0, %c1_i32 : i32
    %39 = arith.extui %38 : i1 to i32
    %c0_i32_24 = arith.constant 0 : i32
    %40 = arith.cmpi ne, %39, %c0_i32_24 : i32
    scf.if %40 {
      %c0_25 = arith.constant 0 : index
      %c0_26 = arith.constant 0 : index
      %41 = vector.load %arg9[%c0_25, %c0_26] : memref<3x324xf32, #tpu.memory_space<vmem>>, vector<3x324xf32>
      %42 = vector.shape_cast %41 : vector<3x324xf32> to vector<1x3x324xf32>
      %cst_27 = arith.constant dense<0.000000e+00> : vector<1xf32>
      %43 = vector.multi_reduction <add>, %42, %cst_27 [1, 2] : vector<1x3x324xf32> to vector<1xf32>
      %44 = vector.shape_cast %43 : vector<1xf32> to vector<1x1x1xf32>
      %45 = vector.extract %44[0, 0, 0] : f32 from vector<1x1x1xf32>
      %46 = vector.broadcast %45 : f32 to vector<1x1xf32>
      %cst_28 = arith.constant 6.51041686E-4 : f32
      %47 = vector.broadcast %cst_28 : f32 to vector<1x1xf32>
      %48 = arith.mulf %46, %47 : vector<1x1xf32>
      %c0_29 = arith.constant 0 : index
      %c0_30 = arith.constant 0 : index
      %49 = vector.load %arg8[%c0_29, %c0_30] : memref<1x1xf32, #tpu.memory_space<vmem>>, vector<1x1xf32>
      tpu.vector_store %arg8[%c0_29, %c0_30], %48 {strides = array<i32>} : memref<1x1xf32, #tpu.memory_space<vmem>>, vector<1x1xf32>,
    } else {
    }
    return
  }
  func.func @transform_0(%arg0: i32) -> (i32, i32, i32) {
    %c0_i32 = arith.constant 0 : i32
    %c0_i32_0 = arith.constant 0 : i32
    %c0_i32_1 = arith.constant 0 : i32
    return %arg0, %c0_i32, %c0_i32_0 : i32, i32, i32
  }
  func.func @transform_1(%arg0: i32) -> (i32, i32, i32) {
    %c0_i32 = arith.constant 0 : i32
    %c0_i32_0 = arith.constant 0 : i32
    %c0_i32_1 = arith.constant 0 : i32
    return %arg0, %c0_i32, %c0_i32_0 : i32, i32, i32
  }
  func.func @transform_2(%arg0: i32) -> (i32, i32) {
    %c0_i32 = arith.constant 0 : i32
    %c0_i32_0 = arith.constant 0 : i32
    %c0_i32_1 = arith.constant 0 : i32
    return %c0_i32, %c0_i32_0 : i32, i32
  }
  func.func @transform_3(%arg0: i32) -> (i32, i32) {
    %c0_i32 = arith.constant 0 : i32
    %c0_i32_0 = arith.constant 0 : i32
    %c0_i32_1 = arith.constant 0 : i32
    return %c0_i32, %c0_i32_0 : i32, i32
  }
  func.func @transform_4(%arg0: i32) -> (i32, i32) {
    %c0_i32 = arith.constant 0 : i32
    %c0_i32_0 = arith.constant 0 : i32
    %c0_i32_1 = arith.constant 0 : i32
    return %c0_i32, %c0_i32_0 : i32, i32
  }
  func.func @transform_5(%arg0: i32) -> (i32, i32) {
    %c0_i32 = arith.constant 0 : i32
    %c0_i32_0 = arith.constant 0 : i32
    %c0_i32_1 = arith.constant 0 : i32
    return %c0_i32, %c0_i32_0 : i32, i32
  }
  func.func @transform_6(%arg0: i32) -> (i32, i32, i32) {
    %c0_i32 = arith.constant 0 : i32
    %c0_i32_0 = arith.constant 0 : i32
    %c0_i32_1 = arith.constant 0 : i32
    return %arg0, %c0_i32, %c0_i32_0 : i32, i32, i32
  }
  func.func @transform_7(%arg0: i32) -> (i32, i32) {
    %c0_i32 = arith.constant 0 : i32
    %c0_i32_0 = arith.constant 0 : i32
    %c0_i32_1 = arith.constant 0 : i32
    return %c0_i32, %c0_i32_0 : i32, i32
  }
}

</mosaic_0001>

<bundles_post_ra>
// kernel: score_residue_u_loss_forward.8
= control target key start
LH: loop header
LB: loop body
LE: loop exit
PB: predicated region body
PF: predicated region fallthrough
CT: control target
= control target key end

     0   :  { %s1816_s21 = smov 0   ;;  %s2163_s0 = inlined_call_operand.vmem [shape: f32[2,1,324], index: 0, kind: input, shape index: {}]   ;;  %s2164_s1 = inlined_call_operand.vmem [shape: f32[1,286], index: 1, kind: input, shape index: {}]   ;;  %s2165_s2 = inlined_call_operand.vmem [shape: f32[9,8,1], index: 2, kind: input, shape index: {}]   ;;  %s2166_s3 = inlined_call_operand.vmem [shape: f32[8,1], index: 3, kind: input, shape index: {}]   ;;  %s2167_s4 = inlined_call_operand.vmem [shape: f32[9,8,8], index: 4, kind: input, shape index: {}]   ;;  %s2168_s5 = inlined_call_operand.vmem [shape: f32[8,1], index: 5, kind: input, shape index: {}]   ;;  %s2169_s6 = inlined_call_operand.vmem [shape: f32[2,8,324], index: 6, kind: output, shape index: {}]  }
   0x1 LB: > { %s1614_s22 = sadd.s32 4294967295, %s1767_s21   ;;  %p1618_p0 = scmp.ge.s32.totalorder %s1767_s21, 1  ;;  %s1767_s21 = sphi %s1816_s21, %s16_s21  }
   0x2   : > { %p211_p1 = scmp.lt.s32.totalorder %s1767_s21, 3 }
   0x4   : > { %p212_p2 = pnand %p1618_p0, %p211_p1 }
   0x5   : > { %v1622_v0 = vld [vmem:[%s2165_s2 + $0x18] sm:$0xff] (!%p212_p2)  ;;  %v1620_v1 = vld [vmem:[%s2165_s2 + $0x8] sm:$0xff] (!%p212_p2)  ;;  %v1769_v2 = vmov (!%p212_p2), 0   ;;  %v1623_v3 = vld [vmem:[%s2165_s2 + $0x20] sm:$0xff] (!%p212_p2)  ;;  %p240_p3 = scmp.lt.s32.totalorder (!%p212_p2), %s1614_s22, 1  ;;  %v259_v11 = vlaneseq (!%p212_p2)  ;;  %s1770_s25 = smov (!%p212_p2), 127  }
   0x6   : > { %215 = sbr.rel (%p212_p2) target bundleno = 960 (0x3c0), region = 44  ;;  %1760 = vset.pattern.permute.xlu1 (!%p212_p2), %v1769_v2  ;;  %1759 = vset.pattern.permute.xlu0 (!%p212_p2), %v1769_v2  ;;  %v1621_v4 = vld [vmem:[%s2165_s2 + $0x10] sm:$0xff] (!%p212_p2)  ;;  %v1624_v6 = vld [vmem:[%s2165_s2 + $0x28] sm:$0xff] (!%p212_p2)  ;;  %v1627_v7 = vld [vmem:[%s2165_s2 + $0x40] sm:$0xff] (!%p212_p2)  ;;  %s1771_s26 = smov (!%p212_p2), 126   ;;  %vm299_vm0 = vcmask (!%p212_p2), 1039360  }
   0x7   : > { %340 = vperm.xlu1 (!%p212_p2), %1760, %v1622_v0   ;;  %284 = vperm.xlu0 (!%p212_p2), %1759, %v1620_v1   ;;  %v1625_v5 = vld [vmem:[%s2165_s2 + $0x30] sm:$0xff] (!%p212_p2)  ;;  %v1626_v8 = vld [vmem:[%s2165_s2 + $0x38] sm:$0xff] (!%p212_p2)  ;;  %v504_v9 = vld [vmem:[%s2166_s3] sm:$0xff] (!%p212_p2)  ;;  %v1864_v12 = vshrl.u32 (!%p212_p2), %v259_v11, 7  ;;  %s1772_s27 = smov (!%p212_p2), 110   ;;  %s1773_s28 = smov (!%p212_p2), 109  }
   0x8   : > { %627 = vmatprep.mubr.bf16.mxu0 (!%p212_p2), %v1769_v2  ;;  %v252_v10 = vld [vmem:[%s2165_s2] sm:$0xff] (!%p212_p2)  ;;  %s1774_s29 = smov (!%p212_p2), 108   ;;  %s1775_s30 = smov (!%p212_p2), 92   ;;  %vm327_vm1 = vcmask (!%p212_p2), 1031168   ;;  %vm355_vm2 = vcmask (!%p212_p2), 900096   ;;  %vm383_vm3 = vcmask (!%p212_p2), 891904  }
   0x9   : > { %v261_v13 = vsub.s32 (!%p212_p2), 0, %v1864_v12  ;;  %v265_v14 = vsub.s32 (!%p212_p2), 1, %v1864_v12  ;;  %v269_v16 = vsub.s32 (!%p212_p2), 2, %v1864_v12  ;;  %s1776_s7 = smov (!%p212_p2), 91   ;;  %s1777_s8 = smov (!%p212_p2), 90   ;;  %vm411_vm4 = vcmask (!%p212_p2), 883712  }
   0xa   : > { %vm439_vm5 = vcmask (!%p212_p2), 752640   ;;  %vm467_vm6 = vcmask (!%p212_p2), 744448   ;;  %vm535_vm7 = vcmask (!%p212_p2), 154624   ;;  %vm495_vm8 = vcmask (!%p212_p2), 736256   ;;  %s1779_s11 = smov (!%p212_p2), 19  }
   0xb   : > { %368 = vperm.xlu1 (!%p212_p2), %1760, %v1623_v3   ;;  %312 = vperm.xlu0 (!%p212_p2), %1759, %v1621_v4   ;;  %vm537_vm9 = vcmask (!%p212_p2), 556424   ;;  %vm553_vm10 = vcmask (!%p212_p2), 1047704   ;;  %vm556_vm11 = vcmask (!%p212_p2), 400384   ;;  %vm1780_vm12 = vmmov (!%p212_p2), 0  }
   0xc   : > { %vm585_vm13 = vcmask (!%p212_p2), 1043456   ;;  %vm581_vm14 = vcmask (!%p212_p2), 64512  }
   0xd   : > { %s2171_s22 = smov (!%p240_p3, %s1614_s22), 1 }
   0xe   : > { %s1737_s19 = smul.u32 3, %s2171_s22 }
   0xf   : > { %424 = vperm.xlu1 %1760, %v1625_v5   ;;  %396 = vperm.xlu0 %1759, %v1624_v6   ;;  %s1738_s10 = smul.u32 24, %s2171_s22 }
  0x10   : > { %s243_s24 = scalar_lea.vmem %s2163_s0, %s1737_s19 }
  0x11   : > { %v251_v15 = vld [vmem:[%s243_s24] sm:$0x7]  ;;  %s2139_s14 = scalar_lea.vmem %s2169_s6, %s1738_s10 }
  0x12   : > { %v1874_v17 = vrot.slane %v251_v15, %v261_v13  ;;  %v1878_v18 = vrot.slane %v251_v15, %v265_v14  ;;  %v1882_v20 = vrot.slane %v251_v15, %v269_v16 }
  0x13   : > { %480 = vperm.xlu1 %1760, %v1627_v7   ;;  %452 = vperm.xlu0 %1759, %v1626_v8  }
  0x17   : > { %507 = vperm.xlu1 %1760, %v504_v9   ;;  %255 = vperm.xlu0 %1759, %v252_v10  }
  0x86   : > { %v285_v19 = vpop.permute.xlu0 %284  ;;  %v341_v27 = vpop.permute.xlu1 %340 }
  0x87   : > { %v287_v21 = vmul.f32 %v285_v19, %v1874_v17  ;;  %v288_v22 = vmul.f32 %v285_v19, %v1878_v18  ;;  %v289_v24 = vmul.f32 %v285_v19, %v1882_v20  ;;  %v343_v29 = vmul.f32 %v341_v27, %v1874_v17 }
  0x88   : > { %v344_v30 = vmul.f32 %v341_v27, %v1878_v18  ;;  %v345_v31 = vmul.f32 %v341_v27, %v1882_v20 }
  0x89   : > { %293 = vrot.lane.b32.xlu1 %v287_v21, %s1770_s25  ;;  %295 = vrot.lane.b32.xlu0 %v288_v22, %s1770_s25 }
  0x8a   : > { %v313_v23 = vpop.permute.xlu0 %312  ;;  %v369_v32 = vpop.permute.xlu1 %368 }
  0x8b   : > { %v315_v25 = vmul.f32 %v313_v23, %v1874_v17  ;;  %v316_v26 = vmul.f32 %v313_v23, %v1878_v18  ;;  %v317_v28 = vmul.f32 %v313_v23, %v1882_v20  ;;  %v371_v33 = vmul.f32 %v369_v32, %v1874_v17 }
  0x8c   : > { %v372_v34 = vmul.f32 %v369_v32, %v1878_v18  ;;  %v373_v35 = vmul.f32 %v369_v32, %v1882_v20 }
  0x8d   : > { %297 = vrot.lane.b32.xlu1 %v289_v24, %s1770_s25  ;;  %321 = vrot.lane.b32.xlu0 %v315_v25, %s1771_s26 }
  0x8e   : > { %v397_v36 = vpop.permute.xlu0 %396  ;;  %v425_v39 = vpop.permute.xlu1 %424 }
  0x8f   : > { %v399_v37 = vmul.f32 %v397_v36, %v1874_v17  ;;  %v400_v38 = vmul.f32 %v397_v36, %v1878_v18  ;;  %v401_v40 = vmul.f32 %v397_v36, %v1882_v20  ;;  %v427_v41 = vmul.f32 %v425_v39, %v1874_v17 }
  0x90   : > { %v428_v42 = vmul.f32 %v425_v39, %v1878_v18  ;;  %v429_v43 = vmul.f32 %v425_v39, %v1882_v20 }
  0x91   : > { %323 = vrot.lane.b32.xlu1 %v316_v26, %s1771_s26  ;;  %325 = vrot.lane.b32.xlu0 %v317_v28, %s1771_s26 }
  0x92   : > { %v453_v44 = vpop.permute.xlu0 %452  ;;  %v481_v46 = vpop.permute.xlu1 %480 }
  0x93   : > { %v456_v45 = vmul.f32 %v453_v44, %v1878_v18  ;;  %v455_v47 = vmul.f32 %v453_v44, %v1874_v17  ;;  %v483_v48 = vmul.f32 %v481_v46, %v1874_v17  ;;  %v457_v49 = vmul.f32 %v453_v44, %v1882_v20 }
  0x94   : > { %v485_v50 = vmul.f32 %v481_v46, %v1882_v20  ;;  %v484_v51 = vmul.f32 %v481_v46, %v1878_v18 }
  0x95   : > { %349 = vrot.lane.b32.xlu1 %v343_v29, %s1772_s27  ;;  %351 = vrot.lane.b32.xlu0 %v344_v30, %s1772_s27 }
  0x96   : > { %v1932_v52 = vpop.permute.xlu1 %507  ;;  %v256_v53 = vpop.permute.xlu0 %255 }
  0x97   : > { %v276_v6 = vmul.f32 %v1882_v20, %v256_v53  ;;  %v274_v10 = vmul.f32 %v1874_v17, %v256_v53  ;;  %v275_v11 = vmul.f32 %v1878_v18, %v256_v53 }
  0x99   : > { %353 = vrot.lane.b32.xlu1 %v345_v31, %s1772_s27  ;;  %377 = vrot.lane.b32.xlu0 %v371_v33, %s1773_s28 }
  0x9d   : > { %379 = vrot.lane.b32.xlu1 %v372_v34, %s1773_s28  ;;  %381 = vrot.lane.b32.xlu0 %v373_v35, %s1773_s28 }
  0xa1   : > { %405 = vrot.lane.b32.xlu1 %v399_v37, %s1774_s29  ;;  %407 = vrot.lane.b32.xlu0 %v400_v38, %s1774_s29 }
  0xa5   : > { %409 = vrot.lane.b32.xlu1 %v401_v40, %s1774_s29  ;;  %433 = vrot.lane.b32.xlu0 %v427_v41, %s1775_s30 }
  0xa9   : > { %435 = vrot.lane.b32.xlu1 %v428_v42, %s1775_s30  ;;  %437 = vrot.lane.b32.xlu0 %v429_v43, %s1775_s30 }
  0xad   : > { %463 = vrot.lane.b32.xlu1 %v456_v45, %s1776_s7  ;;  %461 = vrot.lane.b32.xlu0 %v455_v47, %s1776_s7 }
  0xb1   : > { %489 = vrot.lane.b32.xlu1 %v483_v48, %s1777_s8  ;;  %465 = vrot.lane.b32.xlu0 %v457_v49, %s1776_s7  ;;  %v1778_v48 = vmov 0.0  }
  0xb2   : > { %536 = vst.msk [vmem:[#allocation2] sm:$0xff] %vm535_vm7, %v1778_v48  ;;  %1683 = vmatprep.subr.bf16.mxu1 %v1778_v48  ;;  %1685 = vmatprep.mubr.msk.bf16.mxu1 %vm1780_vm12, %v1778_v48  ;;  %1540 = vst.msk [vmem:[%s2139_s14] sm:$0xff] %vm535_vm7, %v1778_v48 }
  0xb3   : > { %538 = vst.msk [vmem:[#allocation2 + $0x10] sm:$0xff] %vm537_vm9, %v1778_v48  ;;  %1541 = vst.msk [vmem:[%s2139_s14 + $0x10] sm:$0xff] %vm537_vm9, %v1778_v48 }
  0xb5   : > { %493 = vrot.lane.b32.xlu1 %v485_v50, %s1777_s8  ;;  %491 = vrot.lane.b32.xlu0 %v484_v51, %s1777_s8 }
  0xfb   : > { %v294_v54 = vpop.permute.xlu1 %293  ;;  %v296_v55 = vpop.permute.xlu0 %295 }
  0xfc   : > { %v300_v8 = vsel %vm299_vm0, %v294_v54, %v296_v55 }
  0xfd   : > { %v305_v23 = vadd.f32 %v300_v8, %v274_v10 }
  0xff   : > { %v298_v56 = vpop.permute.xlu1 %297  ;;  %v322_v57 = vpop.permute.xlu0 %321 }
 0x100   : > { %v301_v9 = vsel %vm299_vm0, %v296_v55, %v298_v56  ;;  %v307_v15 = vadd.f32 %v298_v56, %v276_v6 }
 0x101   : > { %v306_v24 = vadd.f32 %v301_v9, %v275_v11 }
 0x103   : > { %v324_v58 = vpop.permute.xlu1 %323  ;;  %v326_v59 = vpop.permute.xlu0 %325 }
 0x104   : > { %v328_v19 = vsel %vm327_vm1, %v322_v57, %v324_v58  ;;  %v329_v21 = vsel %vm327_vm1, %v324_v58, %v326_v59  ;;  %v335_v20 = vadd.f32 %v326_v59, %v307_v15 }
 0x105   : > { %v333_v28 = vadd.f32 %v328_v19, %v305_v23  ;;  %v334_v17 = vadd.f32 %v329_v21, %v306_v24 }
 0x107   : > { %v350_v60 = vpop.permute.xlu1 %349  ;;  %v352_v61 = vpop.permute.xlu0 %351 }
 0x108   : > { %v356_v26 = vsel %vm355_vm2, %v350_v60, %v352_v61  ;;  %v250_v60 = vld [vmem:[%s2164_s1] sm:$0x7] }
 0x109   : > { %v361_v32 = vadd.f32 %v356_v26, %v333_v28  ;;  %v1970_v6 = vrot.slane %v250_v60, %v261_v13 }
 0x10b   : > { %v354_v62 = vpop.permute.xlu1 %353  ;;  %v378_v63 = vpop.permute.xlu0 %377 }
 0x10c   : > { %v357_v27 = vsel %vm355_vm2, %v352_v61, %v354_v62  ;;  %v363_v29 = vadd.f32 %v354_v62, %v335_v20 }
 0x10d   : > { %v362_v33 = vadd.f32 %v357_v27, %v334_v17  ;;  %v1628_v17 = vld [vmem:[%s2167_s4 + $0x8] sm:$0xff] }
 0x10f   : > { %v380_v0 = vpop.permute.xlu1 %379  ;;  %v382_v1 = vpop.permute.xlu0 %381 }
 0x110   : > { %v384_v18 = vsel %vm383_vm3, %v378_v63, %v380_v0  ;;  %v385_v30 = vsel %vm383_vm3, %v380_v0, %v382_v1  ;;  %v391_v34 = vadd.f32 %v382_v1, %v363_v29  ;;  %v1963_v1 = vrot.slane %v250_v60, %v265_v14 }
 0x111   : > { %v389_v38 = vadd.f32 %v384_v18, %v361_v32  ;;  %v390_v39 = vadd.f32 %v385_v30, %v362_v33  ;;  %v1976_v14 = vrot.slane %v250_v60, %v269_v16  ;;  %v568_v33 = vpack.c.bf16 %v1628_v17, %v1628_v17 }
 0x113   : > { %v406_v3 = vpop.permute.xlu1 %405  ;;  %v408_v4 = vpop.permute.xlu0 %407 }
 0x114   : > { %v412_v36 = vsel %vm411_vm4, %v406_v3, %v408_v4 }
 0x115   : > { %v417_v44 = vadd.f32 %v412_v36, %v389_v38 }
 0x117   : > { %v410_v5 = vpop.permute.xlu1 %409  ;;  %v434_v7 = vpop.permute.xlu0 %433 }
 0x118   : > { %v413_v37 = vsel %vm411_vm4, %v408_v4, %v410_v5  ;;  %v419_v40 = vadd.f32 %v410_v5, %v391_v34 }
 0x119   : > { %v418_v45 = vadd.f32 %v413_v37, %v390_v39  ;;  %v561_v39 = vld [vmem:[%s2167_s4] sm:$0xff] }
 0x11b   : > { %v436_v22 = vpop.permute.xlu1 %435  ;;  %v438_v25 = vpop.permute.xlu0 %437 }
 0x11c   : > { %v440_v41 = vsel %vm439_vm5, %v434_v7, %v436_v22  ;;  %v441_v42 = vsel %vm439_vm5, %v436_v22, %v438_v25  ;;  %v447_v46 = vadd.f32 %v438_v25, %v419_v40  ;;  %v1525_v25 = vld [vmem:[%s2168_s5] sm:$0xff] }
 0x11d   : > { %v445_v51 = vadd.f32 %v440_v41, %v417_v44  ;;  %v446_v53 = vadd.f32 %v441_v42, %v418_v45  ;;  %v562_v42 = vpack.c.bf16 %v561_v39, %v561_v39  ;;  %v1659_v39 = vld [vmem:[%s2167_s4 + $0x40] sm:$0xff] }
 0x11f   : > { %v464_v31 = vpop.permute.xlu1 %463  ;;  %v462_v35 = vpop.permute.xlu0 %461 }
 0x120   : > { %v468_v49 = vsel %vm467_vm6, %v462_v35, %v464_v31 }
 0x121   : > { %v473_v56 = vadd.f32 %v468_v49, %v445_v51 }
 0x123   : > { %v490_v43 = vpop.permute.xlu1 %489  ;;  %v466_v47 = vpop.permute.xlu0 %465 }
 0x124   : > { %v469_v50 = vsel %vm467_vm6, %v464_v31, %v466_v47  ;;  %v475_v54 = vadd.f32 %v466_v47, %v447_v46 }
 0x125   : > { %v474_v57 = vadd.f32 %v469_v50, %v446_v53  ;;  %v1635_v50 = vld [vmem:[%s2167_s4 + $0x10] sm:$0xff] }
 0x126   : > { %v771_v53 = vpack.c.bf16 %v1635_v50, %v1635_v50 }
 0x127   : > { %v494_v55 = vpop.permute.xlu1 %493  ;;  %v492_v58 = vpop.permute.xlu0 %491 }
 0x128   : > { %v503_v59 = vadd.f32 %v494_v55, %v475_v54  ;;  %v496_v61 = vsel %vm495_vm8, %v490_v43, %v492_v58  ;;  %v497_v62 = vsel %vm495_vm8, %v492_v58, %v494_v55 }
 0x129   : > { %v501_v63 = vadd.f32 %v496_v61, %v473_v56  ;;  %v502_v0 = vadd.f32 %v497_v62, %v474_v57 }
 0x12a   : > { %v512_v5 = vadd.f32 %v1932_v52, %v503_v59  ;;  %v1639_v59 = vld [vmem:[%s2167_s4 + $0x18] sm:$0xff] }
 0x12b   : > { %v510_v3 = vadd.f32 %v1932_v52, %v501_v63  ;;  %v511_v4 = vadd.f32 %v1932_v52, %v502_v0  ;;  %v879_v62 = vpack.c.bf16 %v1639_v59, %v1639_v59 }
 0x12c   : > { %v515_v9 = vmax.f32 %v512_v5, 0.0 }
 0x12d   : > { %v513_v7 = vmax.f32 %v510_v3, 0.0  ;;  %v514_v8 = vmax.f32 %v511_v4, 0.0 }
 0x12e   : > { %v534_v52 = vmul.f32 %v1976_v14, %v515_v9 }
 0x12f   : > { %v533_v10 = vmul.f32 %v1963_v1, %v514_v8  ;;  %v532_v11 = vmul.f32 %v1970_v6, %v513_v7  ;;  %v1643_v7 = vld [vmem:[%s2167_s4 + $0x20] sm:$0xff] }
 0x131   : > { %544 = vrot.lane.b32.xlu1 %v533_v10, %s1779_s11  ;;  %542 = vrot.lane.b32.xlu0 %v532_v11, %s1779_s11  ;;  %v987_v10 = vpack.c.bf16 %v1643_v7, %v1643_v7 }
 0x135   : > { %546 = vrot.lane.b32.xlu0 %v534_v52, %s1779_s11 }
 0x1a3   : > { %v545_v13 = vpop.permute.xlu1 %544  ;;  %v543_v15 = vpop.permute.xlu0 %542 }
 0x1a4   : > { %v548_v19 = vsel %vm535_vm7, %v543_v15, %v545_v13  ;;  %554 = vst.msk [vmem:[#allocation2] sm:$0xff] %vm553_vm10, %v543_v15 }
 0x1a5   : > { %v564_v21 = vpack.c.bf16 %v548_v19, %v548_v19 }
 0x1a7   : > { %v547_v12 = vpop.permute.xlu0 %546  ;;  %574 = vrot.lane.b32.xlu0 %v564_v21, %s1770_s25 }
 0x1a8   : > { %v549_v16 = vsel %vm535_vm7, %v545_v13, %v547_v12 }
 0x1a9   : > { %557 = vst.msk [vmem:[#allocation2 + $0x10] sm:$0xff] %vm556_vm11, %v549_v16 }
 0x1ab   : > { %v558_v22 = vld [vmem:[#allocation2] sm:$0xff] }
 0x1ac   : > { %v563_v23 = vpack.c.bf16 %v558_v22, %v558_v22 }
 0x1ae   : > { %572 = vrot.lane.b32.xlu1 %v563_v23, %s1770_s25  ;;  %772 = vrot.lane.b32.xlu0 %v563_v23, %s1771_s26  ;;  %v680_v37 = vsel %vm585_vm13, %v563_v23, 0 }
 0x1b0   : > { %v560_v24 = vld [vmem:[#allocation2 + $0x10] sm:$0xff] }
 0x1b1   : > { %v565_v20 = vpack.c.bf16 %v560_v24, %v560_v24 }
 0x1b3   : > { %576 = vrot.lane.b32.xlu1 %v565_v20, %s1770_s25  ;;  %776 = vrot.lane.b32.xlu0 %v565_v20, %s1771_s26  ;;  %v686_v36 = vsel %vm585_vm13, %v565_v20, 0 }
 0x1b7   : > { %774 = vrot.lane.b32.xlu1 %v564_v21, %s1771_s26  ;;  %882 = vrot.lane.b32.xlu0 %v564_v21, %s1772_s27 }
 0x1bb   : > { %880 = vrot.lane.b32.xlu1 %v563_v23, %s1772_s27  ;;  %988 = vrot.lane.b32.xlu0 %v563_v23, %s1773_s28 }
 0x1bf   : > { %884 = vrot.lane.b32.xlu1 %v565_v20, %s1772_s27  ;;  %992 = vrot.lane.b32.xlu0 %v565_v20, %s1773_s28 }
 0x1c3   : > { %990 = vrot.lane.b32.xlu1 %v564_v21, %s1773_s28  ;;  %1098 = vrot.lane.b32.xlu0 %v564_v21, %s1774_s29 }
 0x1c7   : > { %1096 = vrot.lane.b32.xlu1 %v563_v23, %s1774_s29  ;;  %1204 = vrot.lane.b32.xlu0 %v563_v23, %s1775_s30 }
 0x1cb   : > { %1100 = vrot.lane.b32.xlu1 %v565_v20, %s1774_s29  ;;  %1208 = vrot.lane.b32.xlu0 %v565_v20, %s1775_s30 }
 0x1cf   : > { %1206 = vrot.lane.b32.xlu1 %v564_v21, %s1775_s30  ;;  %1314 = vrot.lane.b32.xlu0 %v564_v21, %s1776_s7 }
 0x1d3   : > { %1312 = vrot.lane.b32.xlu1 %v563_v23, %s1776_s7  ;;  %1420 = vrot.lane.b32.xlu0 %v563_v23, %s1777_s8 }
 0x1d7   : > { %1316 = vrot.lane.b32.xlu1 %v565_v20, %s1776_s7  ;;  %1424 = vrot.lane.b32.xlu0 %v565_v20, %s1777_s8 }
 0x1db   : > { %1422 = vrot.lane.b32.xlu1 %v564_v21, %s1777_s8 }
 0x1df   : > { %1528 = vperm.xlu1 %1760, %v1525_v25  }
 0x219   : > { %v575_v26 = vpop.permute.xlu0 %574 }
 0x220   : > { %v573_v27 = vpop.permute.xlu1 %572  ;;  %v773_v28 = vpop.permute.xlu0 %772 }
 0x221   : > { %v579_v29 = vsel %vm299_vm0, %v573_v27, %v575_v26 }
 0x222   : > { %v587_v34 = vsel %vm585_vm13, %v579_v29, 0 }
 0x225   : > { %v577_v18 = vpop.permute.xlu1 %576  ;;  %v777_v30 = vpop.permute.xlu0 %776 }
 0x226   : > { %v580_v31 = vsel %vm299_vm0, %v575_v26, %v577_v18  ;;  %v593_v32 = vsel %vm585_vm13, %v577_v18, 0  ;;  %v791_v46 = vsel %vm585_vm13, %v777_v30, 0  ;;  %v1651_v26 = vld [vmem:[%s2167_s4 + $0x30] sm:$0xff] }
 0x227   : > { %1629 = vmatprep.subr.msk.bf16.mxu0 %vm585_vm13, %v580_v31  ;;  %1684 = vmatpush3.bf16.msra.mxu1 %v593_v32  ;;  %v1203_v17 = vpack.c.bf16 %v1651_v26, %v1651_v26 }
 0x228   : > { %596 = vmatpush1.bf16.msra.mxu0 %v587_v34  ;;  %1689 = vmatprep.subr.bf16.mxu1 %v1778_v48 }
 0x229   : > { %v775_v35 = vpop.permute.xlu1 %774  ;;  %1632 = vmatprep.subr.msk.bf16.mxu0 %vm585_vm13, %v564_v21  ;;  %v883_v38 = vpop.permute.xlu0 %882  ;;  %v1647_v21 = vld [vmem:[%s2167_s4 + $0x28] sm:$0xff] }
 0x22a   : > { %1686 = vmatmul.mubr.msk.bf16.vlgmr.msra.gmra.mrb[0].mxu1 %vm581_vm14, %v568_v33  ;;  %v780_v40 = vsel %vm327_vm1, %v775_v35, %v777_v30  ;;  %v779_v43 = vsel %vm327_vm1, %v773_v28, %v775_v35  ;;  %v1095_v16 = vpack.c.bf16 %v1647_v21, %v1647_v21 }
 0x22b   : > { %1630 = vmatmul.mubr.msk.bf16.vlgmr.msra.gmra.mrb[0].mxu0 %vm581_vm14, %v568_v33  ;;  %1690 = vmatpush3.bf16.msra.mxu1 %v686_v36  ;;  %v785_v49 = vsel %vm585_vm13, %v779_v43, 0  ;;  %v1655_v33 = vld [vmem:[%s2167_s4 + $0x38] sm:$0xff] }
 0x22c   : > { %689 = vmatpush1.bf16.msra.mxu0 %v680_v37  ;;  %1691 = vmatprep.mubr.msk.bf16.mxu1 %vm1780_vm12, %v1778_v48  ;;  %v1311_v35 = vpack.c.bf16 %v1655_v33, %v1655_v33 }
 0x22d   : > { %v881_v41 = vpop.permute.xlu1 %880  ;;  %1636 = vmatprep.subr.msk.bf16.mxu0 %vm585_vm13, %v780_v40  ;;  %1695 = vmatprep.subr.bf16.mxu1 %v1778_v48  ;;  %v989_v45 = vpop.permute.xlu0 %988  ;;  %v1419_v40 = vpack.c.bf16 %v1659_v39, %v1659_v39 }
 0x22e   : > { %720 = vmatprep.mubr.bf16.mxu0 %v1769_v2  ;;  %v887_v55 = vsel %vm355_vm2, %v881_v41, %v883_v38 }
 0x22f   : > { %v893_v58 = vsel %vm585_vm13, %v887_v55, 0 }
 0x231   : > { %v885_v44 = vpop.permute.xlu1 %884  ;;  %v993_v54 = vpop.permute.xlu0 %992 }
 0x232   : > { %v888_v47 = vsel %vm355_vm2, %v883_v38, %v885_v44  ;;  %1692 = vmatmul.mubr.msk.bf16.vlgmr.msra.gmra.mrb[4].mxu1 %vm581_vm14, %v562_v42  ;;  %v899_v57 = vsel %vm585_vm13, %v885_v44, 0  ;;  %v1007_v3 = vsel %vm585_vm13, %v993_v54, 0 }
 0x233   : > { %1696 = vmatpush3.bf16.msra.mxu1 %v791_v46  ;;  %1633 = vmatmul.mubr.msk.bf16.vlgmr.msra.gmra.mrb[4].mxu0 %vm581_vm14, %v562_v42 }
 0x234   : > { %794 = vmatpush1.bf16.msra.mxu0 %v785_v49  ;;  %1697 = vmatprep.mubr.msk.bf16.mxu1 %vm1780_vm12, %v1778_v48 }
 0x235   : > { %1640 = vmatprep.subr.msk.bf16.mxu0 %vm585_vm13, %v888_v47  ;;  %v991_v51 = vpop.permute.xlu1 %990  ;;  %1701 = vmatprep.subr.bf16.mxu1 %v1778_v48  ;;  %v1099_v61 = vpop.permute.xlu0 %1098 }
 0x236   : > { %825 = vmatprep.mubr.bf16.mxu0 %v1769_v2  ;;  %v996_v60 = vsel %vm383_vm3, %v991_v51, %v993_v54  ;;  %v995_v0 = vsel %vm383_vm3, %v989_v45, %v991_v51 }
 0x237   : > { %v1001_v4 = vsel %vm585_vm13, %v995_v0, 0 }
 0x239   : > { %v1097_v56 = vpop.permute.xlu1 %1096  ;;  %v1205_v5 = vpop.permute.xlu0 %1204 }
 0x23a   : > { %1698 = vmatmul.mubr.msk.bf16.vlgmr.msra.gmra.mrb[8].mxu1 %vm581_vm14, %v771_v53  ;;  %v1103_v11 = vsel %vm411_vm4, %v1097_v56, %v1099_v61 }
 0x23b   : > { %1702 = vmatpush3.bf16.msra.mxu1 %v899_v57  ;;  %1637 = vmatmul.mubr.msk.bf16.vlgmr.msra.gmra.mrb[8].mxu0 %vm581_vm14, %v771_v53  ;;  %v1109_v15 = vsel %vm585_vm13, %v1103_v11, 0 }
 0x23c   : > { %902 = vmatpush1.bf16.msra.mxu0 %v893_v58  ;;  %1703 = vmatprep.mubr.msk.bf16.mxu1 %vm1780_vm12, %v1778_v48 }
 0x23d   : > { %1644 = vmatprep.subr.msk.bf16.mxu0 %vm585_vm13, %v996_v60  ;;  %1707 = vmatprep.subr.bf16.mxu1 %v1778_v48  ;;  %v1101_v63 = vpop.permute.xlu1 %1100  ;;  %v1209_v52 = vpop.permute.xlu0 %1208 }
 0x23e   : > { %933 = vmatprep.mubr.bf16.mxu0 %v1769_v2  ;;  %v1104_v8 = vsel %vm411_vm4, %v1099_v61, %v1101_v63  ;;  %v1115_v13 = vsel %vm585_vm13, %v1101_v63, 0  ;;  %v1223_v20 = vsel %vm585_vm13, %v1209_v52, 0 }
 0x241   : > { %v1207_v9 = vpop.permute.xlu1 %1206  ;;  %v1315_v22 = vpop.permute.xlu0 %1314 }
 0x242   : > { %1704 = vmatmul.mubr.msk.bf16.vlgmr.msra.gmra.mrb[12].mxu1 %vm581_vm14, %v879_v62  ;;  %v1212_v12 = vsel %vm439_vm5, %v1207_v9, %v1209_v52  ;;  %v1211_v23 = vsel %vm439_vm5, %v1205_v5, %v1207_v9 }
 0x243   : > { %1708 = vmatpush3.bf16.msra.mxu1 %v1007_v3  ;;  %1641 = vmatmul.mubr.msk.bf16.vlgmr.msra.gmra.mrb[12].mxu0 %vm581_vm14, %v879_v62  ;;  %v1217_v25 = vsel %vm585_vm13, %v1211_v23, 0 }
 0x244   : > { %1010 = vmatpush1.bf16.msra.mxu0 %v1001_v4  ;;  %1709 = vmatprep.mubr.msk.bf16.mxu1 %vm1780_vm12, %v1778_v48 }
 0x245   : > { %1648 = vmatprep.subr.msk.bf16.mxu0 %vm585_vm13, %v1104_v8  ;;  %1713 = vmatprep.subr.bf16.mxu1 %v1778_v48  ;;  %v1313_v19 = vpop.permute.xlu1 %1312  ;;  %v1421_v28 = vpop.permute.xlu0 %1420 }
 0x246   : > { %1041 = vmatprep.mubr.bf16.mxu0 %v1769_v2  ;;  %v1319_v29 = vsel %vm467_vm6, %v1313_v19, %v1315_v22 }
 0x247   : > { %v1325_v31 = vsel %vm585_vm13, %v1319_v29, 0 }
 0x249   : > { %v1317_v24 = vpop.permute.xlu1 %1316  ;;  %v1425_v32 = vpop.permute.xlu0 %1424 }
 0x24a   : > { %1710 = vmatmul.mubr.msk.bf16.vlgmr.msra.gmra.mrb[16].mxu1 %vm581_vm14, %v987_v10  ;;  %v1320_v27 = vsel %vm467_vm6, %v1315_v22, %v1317_v24  ;;  %v1331_v30 = vsel %vm585_vm13, %v1317_v24, 0  ;;  %v1439_v37 = vsel %vm585_vm13, %v1425_v32, 0 }
 0x24b   : > { %1714 = vmatpush3.bf16.msra.mxu1 %v1115_v13  ;;  %1645 = vmatmul.mubr.msk.bf16.vlgmr.msra.gmra.mrb[16].mxu0 %vm581_vm14, %v987_v10 }
 0x24c   : > { %1118 = vmatpush1.bf16.msra.mxu0 %v1109_v15  ;;  %1715 = vmatprep.mubr.msk.bf16.mxu1 %vm1780_vm12, %v1778_v48 }
 0x24d   : > { %1652 = vmatprep.subr.msk.bf16.mxu0 %vm585_vm13, %v1212_v12  ;;  %1719 = vmatprep.subr.bf16.mxu1 %v1778_v48  ;;  %v1423_v18 = vpop.permute.xlu1 %1422 }
 0x24e   : > { %1149 = vmatprep.mubr.bf16.mxu0 %v1769_v2  ;;  %v1428_v34 = vsel %vm495_vm8, %v1423_v18, %v1425_v32  ;;  %v1427_v36 = vsel %vm495_vm8, %v1421_v28, %v1423_v18 }
 0x24f   : > { %v1433_v38 = vsel %vm585_vm13, %v1427_v36, 0 }
 0x252   : > { %1716 = vmatmul.mubr.msk.bf16.vlgmr.msra.gmra.mrb[20].mxu1 %vm581_vm14, %v1095_v16 }
 0x253   : > { %1720 = vmatpush3.bf16.msra.mxu1 %v1223_v20  ;;  %1649 = vmatmul.mubr.msk.bf16.vlgmr.msra.gmra.mrb[20].mxu0 %vm581_vm14, %v1095_v16 }
 0x254   : > { %1226 = vmatpush1.bf16.msra.mxu0 %v1217_v25  ;;  %1721 = vmatprep.mubr.msk.bf16.mxu1 %vm1780_vm12, %v1778_v48 }
 0x255   : > { %1656 = vmatprep.subr.msk.bf16.mxu0 %vm585_vm13, %v1320_v27  ;;  %1725 = vmatprep.subr.bf16.mxu1 %v1778_v48 }
 0x256   : > { %1257 = vmatprep.mubr.bf16.mxu0 %v1769_v2 }
 0x25a   : > { %1722 = vmatmul.mubr.msk.bf16.vlgmr.msra.gmra.mrb[24].mxu1 %vm581_vm14, %v1203_v17 }
 0x25b   : > { %1726 = vmatpush3.bf16.msra.mxu1 %v1331_v30  ;;  %1653 = vmatmul.mubr.msk.bf16.vlgmr.msra.gmra.mrb[24].mxu0 %vm581_vm14, %v1203_v17 }
 0x25c   : > { %1334 = vmatpush1.bf16.msra.mxu0 %v1325_v31  ;;  %1727 = vmatprep.mubr.msk.bf16.mxu1 %vm1780_vm12, %v1778_v48 }
 0x25d   : > { %1660 = vmatprep.subr.msk.bf16.mxu0 %vm585_vm13, %v1428_v34  ;;  %1731 = vmatprep.subr.bf16.mxu1 %v1778_v48 }
 0x25e   : > { %1365 = vmatprep.mubr.bf16.mxu0 %v1769_v2 }
 0x262   : > { %1728 = vmatmul.mubr.msk.bf16.vlgmr.msra.gmra.mrb[28].mxu1 %vm581_vm14, %v1311_v35 }
 0x263   : > { %1732 = vmatpush3.bf16.msra.mxu1 %v1439_v37  ;;  %1657 = vmatmul.mubr.msk.bf16.vlgmr.msra.gmra.mrb[28].mxu0 %vm581_vm14, %v1311_v35 }
 0x264   : > { %1442 = vmatpush1.bf16.msra.mxu0 %v1433_v38  ;;  %1733 = vmatprep.mubr.msk.bf16.mxu1 %vm1780_vm12, %v1778_v48 }
 0x265   : > { %1473 = vmatprep.mubr.bf16.mxu0 %v1769_v2 }
 0x26a   : > { %1734 = vmatmul.mubr.msk.bf16.vlgmr.msra.gmra.mrb[32].mxu1 %vm581_vm14, %v1419_v40 }
 0x26b   : > { %1661 = vmatmul.mubr.msk.bf16.vlgmr.msra.gmra.mrb[32].mxu0 %vm581_vm14, %v1419_v40 }
 0x2fd   : > { %v670_v2 = vpop.f32.mrb[0].mxu1 }
 0x2fe   : > { %v629_v41 = vpop.f32.mrb[0].mxu0  ;;  %v1687_v42 = vpop.f32.mrb[1].mxu1 }
 0x2ff   : > { %v631_v43 = vpop.f32.mrb[1].mxu0  ;;  %v673_v44 = vpop.f32.mrb[2].mxu1 }
 0x300   : > { %v633_v45 = vpop.f32.mrb[2].mxu0  ;;  %v1688_v46 = vpop.f32.mrb[3].mxu1 }
 0x301   : > { %v634_v47 = vpop.f32.mrb[3].mxu0 }
 0x305   : > { %v763_v49 = vpop.f32.mrb[4].mxu1 }
 0x306   : > { %v764_v50 = vadd.f32 %v763_v49, %v670_v2  ;;  %v722_v51 = vpop.f32.mrb[4].mxu0  ;;  %v1693_v53 = vpop.f32.mrb[5].mxu1 }
 0x307   : > { %v723_v54 = vadd.f32 %v722_v51, %v629_v41  ;;  %v724_v55 = vpop.f32.mrb[5].mxu0  ;;  %v766_v56 = vpop.f32.mrb[6].mxu1 }
 0x308   : > { %v725_v57 = vadd.f32 %v724_v55, %v631_v43  ;;  %v726_v58 = vpop.f32.mrb[6].mxu0  ;;  %v1694_v59 = vpop.f32.mrb[7].mxu1 }
 0x309   : > { %v727_v60 = vpop.f32.mrb[7].mxu0 }
 0x30d   : > { %v868_v48 = vpop.f32.mrb[8].mxu1 }
 0x30e   : > { %v876_v61 = vadd.f32 %v868_v48, %v764_v50  ;;  %v827_v62 = vpop.f32.mrb[8].mxu0  ;;  %v1699_v63 = vpop.f32.mrb[9].mxu1 }
 0x30f   : > { %v874_v0 = vadd.f32 %v827_v62, %v723_v54  ;;  %v829_v3 = vpop.f32.mrb[9].mxu0  ;;  %v871_v4 = vpop.f32.mrb[10].mxu1 }
 0x310   : > { %v875_v5 = vadd.f32 %v829_v3, %v725_v57  ;;  %v831_v7 = vpop.f32.mrb[10].mxu0  ;;  %v1700_v8 = vpop.f32.mrb[11].mxu1 }
 0x311   : > { %v832_v9 = vpop.f32.mrb[11].mxu0  ;;  %v1529_v3 = vpop.permute.xlu1 %1528 }
 0x315   : > { %v976_v10 = vpop.f32.mrb[12].mxu1 }
 0x316   : > { %v984_v11 = vadd.f32 %v976_v10, %v876_v61  ;;  %v935_v52 = vpop.f32.mrb[12].mxu0  ;;  %v1705_v13 = vpop.f32.mrb[13].mxu1 }
 0x317   : > { %v982_v15 = vadd.f32 %v935_v52, %v874_v0  ;;  %v937_v19 = vpop.f32.mrb[13].mxu0  ;;  %v979_v21 = vpop.f32.mrb[14].mxu1 }
 0x318   : > { %v983_v12 = vadd.f32 %v937_v19, %v875_v5  ;;  %v939_v16 = vpop.f32.mrb[14].mxu0  ;;  %v1706_v22 = vpop.f32.mrb[15].mxu1 }
 0x319   : > { %v940_v23 = vpop.f32.mrb[15].mxu0 }
 0x31d   : > { %v1084_v24 = vpop.f32.mrb[16].mxu1 }
 0x31e   : > { %v1092_v20 = vadd.f32 %v1084_v24, %v984_v11  ;;  %v1043_v25 = vpop.f32.mrb[16].mxu0  ;;  %v1711_v26 = vpop.f32.mrb[17].mxu1 }
 0x31f   : > { %v1090_v27 = vadd.f32 %v1043_v25, %v982_v15  ;;  %v1045_v28 = vpop.f32.mrb[17].mxu0  ;;  %v1087_v17 = vpop.f32.mrb[18].mxu1 }
 0x320   : > { %v1091_v29 = vadd.f32 %v1045_v28, %v983_v12  ;;  %v1047_v18 = vpop.f32.mrb[18].mxu0  ;;  %v1712_v30 = vpop.f32.mrb[19].mxu1 }
 0x321   : > { %v1048_v31 = vpop.f32.mrb[19].mxu0 }
 0x325   : > { %v1192_v32 = vpop.f32.mrb[20].mxu1 }
 0x326   : > { %v1200_v33 = vadd.f32 %v1192_v32, %v1092_v20  ;;  %v1151_v34 = vpop.f32.mrb[20].mxu0  ;;  %v1717_v35 = vpop.f32.mrb[21].mxu1 }
 0x327   : > { %v1198_v36 = vadd.f32 %v1151_v34, %v1090_v27  ;;  %v1153_v37 = vpop.f32.mrb[21].mxu0  ;;  %v1195_v38 = vpop.f32.mrb[22].mxu1 }
 0x328   : > { %v1199_v39 = vadd.f32 %v1153_v37, %v1091_v29  ;;  %v1155_v40 = vpop.f32.mrb[22].mxu0  ;;  %v1718_v2 = vpop.f32.mrb[23].mxu1 }
 0x329   : > { %v1156_v41 = vpop.f32.mrb[23].mxu0 }
 0x32d   : > { %v1300_v42 = vpop.f32.mrb[24].mxu1 }
 0x32e   : > { %v1308_v43 = vadd.f32 %v1300_v42, %v1200_v33  ;;  %v1259_v44 = vpop.f32.mrb[24].mxu0  ;;  %v1723_v45 = vpop.f32.mrb[25].mxu1 }
 0x32f   : > { %v1306_v46 = vadd.f32 %v1259_v44, %v1198_v36  ;;  %v1261_v47 = vpop.f32.mrb[25].mxu0  ;;  %v1303_v49 = vpop.f32.mrb[26].mxu1 }
 0x330   : > { %v1307_v50 = vadd.f32 %v1261_v47, %v1199_v39  ;;  %v1263_v51 = vpop.f32.mrb[26].mxu0  ;;  %v1724_v53 = vpop.f32.mrb[27].mxu1 }
 0x331   : > { %v1264_v54 = vpop.f32.mrb[27].mxu0 }
 0x335   : > { %v1408_v55 = vpop.f32.mrb[28].mxu1 }
 0x336   : > { %v1416_v56 = vadd.f32 %v1408_v55, %v1308_v43  ;;  %v1367_v57 = vpop.f32.mrb[28].mxu0  ;;  %v1729_v58 = vpop.f32.mrb[29].mxu1 }
 0x337   : > { %v1414_v59 = vadd.f32 %v1367_v57, %v1306_v46  ;;  %v1369_v60 = vpop.f32.mrb[29].mxu0  ;;  %v1411_v48 = vpop.f32.mrb[30].mxu1 }
 0x338   : > { %v1415_v61 = vadd.f32 %v1369_v60, %v1307_v50  ;;  %v1371_v62 = vpop.f32.mrb[30].mxu0  ;;  %v1730_v63 = vpop.f32.mrb[31].mxu1 }
 0x339   : > { %v1372_v0 = vpop.f32.mrb[31].mxu0 }
 0x33d   : > { %v1516_v4 = vpop.f32.mrb[32].mxu1 }
 0x33e   : > { %v1524_v5 = vadd.f32 %v1516_v4, %v1416_v56  ;;  %v1475_v7 = vpop.f32.mrb[32].mxu0  ;;  %v1735_v8 = vpop.f32.mrb[33].mxu1 }
 0x33f   : > { %v1522_v9 = vadd.f32 %v1475_v7, %v1414_v59  ;;  %v1477_v10 = vpop.f32.mrb[33].mxu0  ;;  %v1519_v11 = vpop.f32.mrb[34].mxu1 }
 0x340   : > { %v1523_v52 = vadd.f32 %v1477_v10, %v1415_v61  ;;  %v1479_v13 = vpop.f32.mrb[34].mxu0  ;;  %v1736_v15 = vpop.f32.mrb[35].mxu1  ;;  %v1533_v19 = vadd.f32 %v1529_v3, %v1524_v5 }
 0x341   : > { %v1531_v21 = vadd.f32 %v1529_v3, %v1522_v9  ;;  %v1480_v12 = vpop.f32.mrb[35].mxu0 }
 0x342   : > { %v1532_v16 = vadd.f32 %v1529_v3, %v1523_v52  ;;  %v1536_v24 = vmax.f32 %v1533_v19, 0.0 }
 0x343   : > { %v1534_v22 = vmax.f32 %v1531_v21, 0.0 }
 0x344   : > { %v1535_v23 = vmax.f32 %v1532_v16, 0.0  ;;  %v1539_v26 = vmul.f32 %v1536_v24, %v1976_v14 }
 0x345   : > { %v1537_v20 = vmul.f32 %v1534_v22, %v1970_v6 }
 0x346   : > { %v1538_v25 = vmul.f32 %v1535_v23, %v1963_v1 }
 0x347   : > { %1545 = vrot.lane.b32.xlu0 %v1537_v20, %s1779_s11 }
 0x348   : > { %1547 = vrot.lane.b32.xlu1 %v1538_v25, %s1779_s11 }
 0x34b   : > { %1549 = vrot.lane.b32.xlu0 %v1539_v26, %s1779_s11 }
 0x3b9   : > { %v1546_v27 = vpop.permute.xlu0 %1545 }
 0x3ba   : > { %1556 = vst.msk [vmem:[%s2139_s14] sm:$0xff] %vm553_vm10, %v1546_v27  ;;  %v1548_v28 = vpop.permute.xlu1 %1547 }
 0x3bb   : > { %v1551_v17 = vsel %vm535_vm7, %v1546_v27, %v1548_v28 }
 0x3bc   : > { %1557 = vst [vmem:[%s2139_s14 + $0x8] sm:$0xff] %v1551_v17 }
 0x3bd   : > { %v1550_v29 = vpop.permute.xlu0 %1549 }
 0x3be   : > { %v1552_v6 = vsel %vm535_vm7, %v1548_v28, %v1550_v29 }
 0x3bf   : > { %1558 = vst.msk [vmem:[%s2139_s14 + $0x10] sm:$0xff] %vm556_vm11, %v1552_v6 }
 0x3c0 PF: > { %s16_s21 = sadd.s32 1, %s1767_s21  }
 0x3c1   : > { %p13_p4 = scmp.ge.s32.totalorder %s16_s21, 4  }
 0x3c3   :  { %15 = sbr.rel (!%p13_p4) target bundleno = 1 (0x1), region = 90 }

// kernel: score_residue_u_loss_forward.9
= control target key start
LH: loop header
LB: loop body
LE: loop exit
PB: predicated region body
PF: predicated region fallthrough
CT: control target
= control target key end

     0   :  { %s1629_s21 = smov 0   ;;  %s1908_s0 = inlined_call_operand.vmem [shape: f32[2,8,100], index: 0, kind: input, shape index: {}]   ;;  %s1909_s1 = inlined_call_operand.vmem [shape: f32[1,78], index: 1, kind: input, shape index: {}]   ;;  %s1910_s2 = inlined_call_operand.vmem [shape: f32[9,16,8], index: 2, kind: input, shape index: {}]   ;;  %s1911_s3 = inlined_call_operand.vmem [shape: f32[16,1], index: 3, kind: input, shape index: {}]   ;;  %s1912_s4 = inlined_call_operand.vmem [shape: f32[9,16,16], index: 4, kind: input, shape index: {}]   ;;  %s1913_s5 = inlined_call_operand.vmem [shape: f32[16,1], index: 5, kind: input, shape index: {}]   ;;  %s1914_s6 = inlined_call_operand.vmem [shape: f32[2,16,100], index: 6, kind: output, shape index: {}]  }
   0x1 LB: > { %s1346_s22 = sadd.s32 4294967295, %s1580_s21   ;;  %p1350_p0 = scmp.ge.s32.totalorder %s1580_s21, 1  ;;  %s1580_s21 = sphi %s1629_s21, %s16_s21  }
   0x2   : > { %p211_p1 = scmp.lt.s32.totalorder %s1580_s21, 3 }
   0x4   : > { %p212_p2 = pnand %p1350_p0, %p211_p1 }
   0x5   : > { %p240_p3 = scmp.lt.s32.totalorder (!%p212_p2), %s1346_s22, 1  ;;  %v1582_v0 = vmov (!%p212_p2), 0.0   ;;  %vm1583_vm0 = vmmov (!%p212_p2), 0   ;;  %vm267_vm1 = vcmask (!%p212_p2), 1043456   ;;  %v252_v3 = vld [vmem:[%s1910_s2] sm:$0xff] (!%p212_p2)  ;;  %v253_v4 = vld [vmem:[%s1910_s2 + $0x8] sm:$0xff] (!%p212_p2) }
   0x6   : > { %215 = sbr.rel (%p212_p2) target bundleno = 1005 (0x3ed), region = 44  ;;  %1444 = vmatprep.subr.bf16.mxu0 (!%p212_p2), %v1582_v0  ;;  %1450 = vmatprep.subr.bf16.mxu1 (!%p212_p2), %v1582_v0  ;;  %s1584_s7 = smov (!%p212_p2), 127   ;;  %v254_v6 = vpack.c.bf16 (!%p212_p2), %v253_v4, %v252_v3  ;;  %vm263_vm2 = vcmask (!%p212_p2), 64512   ;;  %v744_v7 = vld [vmem:[%s1911_s3] sm:$0xff] (!%p212_p2)  ;;  %v745_v8 = vld [vmem:[%s1911_s3 + $0x8] sm:$0xff] (!%p212_p2)  ;;  %v1592_v9 = vmov (!%p212_p2), 0  }
   0x7   : > { %1446 = vmatprep.mubr.msk.bf16.mxu0 (!%p212_p2), %vm1583_vm0, %v1582_v0  ;;  %1452 = vmatprep.mubr.msk.bf16.mxu1 (!%p212_p2), %vm1583_vm0, %v1582_v0  ;;  %s1585_s8 = smov (!%p212_p2), 118   ;;  %s1586_s9 = smov (!%p212_p2), 126   ;;  %v1354_v10 = vld [vmem:[%s1910_s2 + $0x10] sm:$0xff] (!%p212_p2)  ;;  %v1355_v11 = vld [vmem:[%s1910_s2 + $0x18] sm:$0xff] (!%p212_p2)  ;;  %v1358_v22 = vld [vmem:[%s1910_s2 + $0x20] sm:$0xff] (!%p212_p2)  ;;  %vm768_vm3 = vcmask (!%p212_p2), 89088  }
   0x8   : > { %s1587_s10 = smov (!%p212_p2), 117   ;;  %s1588_s11 = smov (!%p212_p2), 116   ;;  %1572 = vset.pattern.permute.xlu0 (!%p212_p2), %v1592_v9  ;;  %1573 = vset.pattern.permute.xlu1 (!%p212_p2), %v1592_v9  ;;  %v1361_v12 = vld [vmem:[%s1910_s2 + $0x30] sm:$0xff] (!%p212_p2)  ;;  %v1362_v13 = vld [vmem:[%s1910_s2 + $0x38] sm:$0xff] (!%p212_p2)  ;;  %v259_v17 = vpack.c.bf16 (!%p212_p2), %v1355_v11, %v1354_v10  ;;  %v1359_v23 = vld [vmem:[%s1910_s2 + $0x28] sm:$0xff] (!%p212_p2)  ;;  %vm771_vm4 = vcmask (!%p212_p2), 818888  }
   0x9   : > { %s1589_s12 = smov (!%p212_p2), 108   ;;  %s1590_s13 = smov (!%p212_p2), 107   ;;  %v417_v19 = vpack.c.bf16 (!%p212_p2), %v1362_v13, %v1361_v12  ;;  %v1367_v24 = vld [vmem:[%s1910_s2 + $0x50] sm:$0xff] (!%p212_p2)  ;;  %v1368_v25 = vld [vmem:[%s1910_s2 + $0x58] sm:$0xff] (!%p212_p2)  ;;  %v362_v28 = vpack.c.bf16 (!%p212_p2), %v1359_v23, %v1358_v22  ;;  %v1364_v33 = vld [vmem:[%s1910_s2 + $0x40] sm:$0xff] (!%p212_p2)  ;;  %769 = vst.msk [vmem:[#allocation2] sm:$0xff] (!%p212_p2), %vm768_vm3, %v1582_v0 }
   0xa   : > { %s1591_s14 = smov (!%p212_p2), 106   ;;  %v527_v30 = vpack.c.bf16 (!%p212_p2), %v1368_v25, %v1367_v24  ;;  %v1365_v35 = vld [vmem:[%s1910_s2 + $0x48] sm:$0xff] (!%p212_p2)  ;;  %v1373_v36 = vld [vmem:[%s1910_s2 + $0x70] sm:$0xff] (!%p212_p2)  ;;  %v1374_v37 = vld [vmem:[%s1910_s2 + $0x78] sm:$0xff] (!%p212_p2)  ;;  %770 = vst.msk [vmem:[#allocation2 + $0x8] sm:$0xff] (!%p212_p2), %vm768_vm3, %v1582_v0  ;;  %s1593_s27 = smov (!%p212_p2), 11  }
   0xb   : > { %v472_v39 = vpack.c.bf16 (!%p212_p2), %v1365_v35, %v1364_v33  ;;  %v637_v40 = vpack.c.bf16 (!%p212_p2), %v1374_v37, %v1373_v36  ;;  %v1370_v42 = vld [vmem:[%s1910_s2 + $0x60] sm:$0xff] (!%p212_p2)  ;;  %v1371_v43 = vld [vmem:[%s1910_s2 + $0x68] sm:$0xff] (!%p212_p2)  ;;  %772 = vst.msk [vmem:[#allocation2] sm:$0xff] (!%p212_p2), %vm771_vm4, %v1582_v0  ;;  %773 = vst.msk [vmem:[#allocation2 + $0x8] sm:$0xff] (!%p212_p2), %vm771_vm4, %v1582_v0  ;;  %vm782_vm5 = vcmask (!%p212_p2), 728152   ;;  %vm799_vm6 = vcmask (!%p212_p2), 130048  }
   0xc   : > { %v582_v45 = vpack.c.bf16 (!%p212_p2), %v1371_v43, %v1370_v42  ;;  %v1376_v47 = vld [vmem:[%s1910_s2 + $0x80] sm:$0xff] (!%p212_p2)  ;;  %v1377_v48 = vld [vmem:[%s1910_s2 + $0x88] sm:$0xff] (!%p212_p2) }
   0xd   : > { %s1916_s22 = smov (!%p240_p3, %s1346_s22), 1  ;;  %v692_v49 = vpack.c.bf16 %v1377_v48, %v1376_v47  ;;  %v1773_v42 = vld [vmem:[%s1909_s1] ss:$0 sm:$0xff] }
   0xe   : > { %s1351_s23 = sshll.u32 %s1916_s22, 3  ;;  %s1407_s25 = sshll.u32 %s1916_s22, 4 }
   0xf   : > { %s243_s26 = scalar_lea.vmem %s1908_s0, %s1351_s23  ;;  %s1883_s29 = scalar_lea.vmem %s1914_s6, %s1407_s25 }
  0x10   : > { %v251_v1 = vld [vmem:[%s243_s26] sm:$0xff]  ;;  %1277 = vst.msk [vmem:[%s1883_s29] sm:$0xff] %vm768_vm3, %v1582_v0  ;;  %1278 = vst.msk [vmem:[%s1883_s29 + $0x8] sm:$0xff] %vm768_vm3, %v1582_v0 }
  0x11   : > { %v255_v2 = vpack.c.bf16 %v251_v1, %v251_v1  ;;  %1279 = vst.msk [vmem:[%s1883_s29] sm:$0xff] %vm771_vm4, %v1582_v0  ;;  %1280 = vst.msk [vmem:[%s1883_s29 + $0x8] sm:$0xff] %vm771_vm4, %v1582_v0 }
  0x13   : > { %261 = vrot.lane.b32.xlu0 %v255_v2, %s1584_s7  ;;  %418 = vrot.lane.b32.xlu1 %v255_v2, %s1585_s8  ;;  %v316_v5 = vsel %vm267_vm1, %v255_v2, 0 }
  0x14   : > { %1451 = vmatpush3.bf16.msra.mxu1 %v316_v5 }
  0x15   : > { %1462 = vmatprep.subr.bf16.mxu1 %v1582_v0 }
  0x17   : > { %363 = vrot.lane.b32.xlu0 %v255_v2, %s1586_s9  ;;  %473 = vrot.lane.b32.xlu1 %v255_v2, %s1587_s10 }
  0x18   : > { %1453 = vmatmul.mubr.msk.bf16.vlgmr.msra.gmra.mrb[0].mxu1 %vm263_vm2, %v254_v6 }
  0x19   : > { %1464 = vmatprep.mubr.msk.bf16.mxu1 %vm1583_vm0, %v1582_v0 }
  0x1b   : > { %528 = vrot.lane.b32.xlu0 %v255_v2, %s1588_s11  ;;  %583 = vrot.lane.b32.xlu1 %v255_v2, %s1589_s12 }
  0x1f   : > { %638 = vrot.lane.b32.xlu0 %v255_v2, %s1590_s13  ;;  %693 = vrot.lane.b32.xlu1 %v255_v2, %s1591_s14 }
  0x23   : > { %748 = vperm.xlu0 %1572, %v744_v7   ;;  %753 = vperm.xlu1 %1573, %v745_v8  }
  0x85   : > { %v262_v14 = vpop.permute.xlu0 %261  ;;  %v419_v15 = vpop.permute.xlu1 %418 }
  0x86   : > { %v269_v16 = vsel %vm267_vm1, %v262_v14, 0  ;;  %v424_v18 = vsel %vm267_vm1, %v419_v15, 0 }
  0x87   : > { %1445 = vmatpush3.bf16.msra.mxu0 %v269_v16  ;;  %1463 = vmatpush3.bf16.msra.mxu1 %v424_v18 }
  0x88   : > { %1456 = vmatprep.subr.bf16.mxu0 %v1582_v0  ;;  %1474 = vmatprep.subr.bf16.mxu1 %v1582_v0 }
  0x89   : > { %v364_v20 = vpop.permute.xlu0 %363  ;;  %v474_v26 = vpop.permute.xlu1 %473 }
  0x8a   : > { %1447 = vmatmul.mubr.msk.bf16.vlgmr.msra.gmra.mrb[0].mxu0 %vm263_vm2, %v259_v17  ;;  %v369_v21 = vsel %vm267_vm1, %v364_v20, 0  ;;  %1465 = vmatmul.mubr.msk.bf16.vlgmr.msra.gmra.mrb[4].mxu1 %vm263_vm2, %v417_v19  ;;  %v479_v31 = vsel %vm267_vm1, %v474_v26, 0 }
  0x8b   : > { %1457 = vmatpush3.bf16.msra.mxu0 %v369_v21  ;;  %1458 = vmatprep.mubr.msk.bf16.mxu0 %vm1583_vm0, %v1582_v0 }
  0x8c   : > { %1468 = vmatprep.subr.bf16.mxu0 %v1582_v0  ;;  %1476 = vmatprep.mubr.msk.bf16.mxu1 %vm1583_vm0, %v1582_v0 }
  0x8d   : > { %v529_v27 = vpop.permute.xlu0 %528  ;;  %v584_v38 = vpop.permute.xlu1 %583 }
  0x8e   : > { %v534_v29 = vsel %vm267_vm1, %v529_v27, 0  ;;  %v589_v41 = vsel %vm267_vm1, %v584_v38, 0 }
  0x8f   : > { %1475 = vmatpush3.bf16.msra.mxu1 %v534_v29 }
  0x90   : > { %1486 = vmatprep.subr.bf16.mxu1 %v1582_v0 }
  0x91   : > { %v639_v32 = vpop.permute.xlu0 %638  ;;  %v694_v44 = vpop.permute.xlu1 %693 }
  0x92   : > { %1459 = vmatmul.mubr.msk.bf16.vlgmr.msra.gmra.mrb[4].mxu0 %vm263_vm2, %v362_v28  ;;  %1477 = vmatmul.mubr.msk.bf16.vlgmr.msra.gmra.mrb[8].mxu1 %vm263_vm2, %v527_v30  ;;  %v644_v34 = vsel %vm267_vm1, %v639_v32, 0  ;;  %v699_v46 = vsel %vm267_vm1, %v694_v44, 0 }
  0x93   : > { %1469 = vmatpush3.bf16.msra.mxu0 %v479_v31  ;;  %1470 = vmatprep.mubr.msk.bf16.mxu0 %vm1583_vm0, %v1582_v0 }
  0x94   : > { %1480 = vmatprep.subr.bf16.mxu0 %v1582_v0  ;;  %1487 = vmatpush3.bf16.msra.mxu1 %v644_v34 }
  0x95   : > { %1488 = vmatprep.mubr.msk.bf16.mxu1 %vm1583_vm0, %v1582_v0  ;;  %1498 = vmatprep.subr.bf16.mxu1 %v1582_v0 }
  0x9a   : > { %1471 = vmatmul.mubr.msk.bf16.vlgmr.msra.gmra.mrb[8].mxu0 %vm263_vm2, %v472_v39  ;;  %1489 = vmatmul.mubr.msk.bf16.vlgmr.msra.gmra.mrb[12].mxu1 %vm263_vm2, %v637_v40 }
  0x9b   : > { %1481 = vmatpush3.bf16.msra.mxu0 %v589_v41  ;;  %1482 = vmatprep.mubr.msk.bf16.mxu0 %vm1583_vm0, %v1582_v0 }
  0x9c   : > { %1492 = vmatprep.subr.bf16.mxu0 %v1582_v0  ;;  %1500 = vmatprep.mubr.msk.bf16.mxu1 %vm1583_vm0, %v1582_v0 }
  0xa2   : > { %1483 = vmatmul.mubr.msk.bf16.vlgmr.msra.gmra.mrb[12].mxu0 %vm263_vm2, %v582_v45  ;;  %v749_v34 = vpop.permute.xlu0 %748  ;;  %v754_v38 = vpop.permute.xlu1 %753 }
  0xa3   : > { %1493 = vmatpush3.bf16.msra.mxu0 %v699_v46  ;;  %1494 = vmatprep.mubr.msk.bf16.mxu0 %vm1583_vm0, %v1582_v0 }
  0xa4   : > { %1504 = vmatprep.subr.bf16.mxu0 %v1582_v0 }
  0xaa   : > { %1495 = vmatmul.mubr.msk.bf16.vlgmr.msra.gmra.mrb[16].mxu0 %vm263_vm2, %v692_v49 }
  0xab   : > { %1506 = vmatprep.mubr.msk.bf16.mxu0 %vm1583_vm0, %v1582_v0 }
  0xeb   : > { %v352_v50 = vpop.f32.mrb[0].mxu1 }
  0xec   : > { %v1454_v51 = vpop.f32.mrb[1].mxu1 }
  0xed   : > { %v355_v52 = vpop.f32.mrb[2].mxu1 }
  0xee   : > { %v1455_v53 = vpop.f32.mrb[3].mxu1 }
  0xef   : > { %v787_v53 = vld [vmem:[%s1912_s4] sm:$0xff] }
 0x15d   : > { %v305_v54 = vpop.f32.mrb[0].mxu0  ;;  %v460_v55 = vpop.f32.mrb[4].mxu1 }
 0x15e   : > { %v353_v56 = vadd.f32 %v352_v50, %v305_v54  ;;  %v1448_v57 = vpop.f32.mrb[1].mxu0  ;;  %v1466_v58 = vpop.f32.mrb[5].mxu1  ;;  %v788_v54 = vld [vmem:[%s1912_s4 + $0x8] sm:$0xff] }
 0x15f   : > { %v308_v59 = vpop.f32.mrb[2].mxu0  ;;  %v463_v60 = vpop.f32.mrb[6].mxu1  ;;  %v1259_v57 = vld [vmem:[%s1913_s5] sm:$0xff]  ;;  %v1380_v58 = vld [vmem:[%s1912_s4 + $0x10] sm:$0xff] }
 0x160   : > { %v356_v61 = vadd.f32 %v355_v52, %v308_v59  ;;  %v1449_v62 = vpop.f32.mrb[3].mxu0  ;;  %v1467_v63 = vpop.f32.mrb[7].mxu1  ;;  %v1381_v59 = vld [vmem:[%s1912_s4 + $0x18] sm:$0xff] }
 0x161   : > { %v1387_v62 = vld [vmem:[%s1912_s4 + $0x30] sm:$0xff]  ;;  %v1388_v63 = vld [vmem:[%s1912_s4 + $0x38] sm:$0xff] }
 0x165   : > { %v405_v1 = vpop.f32.mrb[4].mxu0  ;;  %v570_v2 = vpop.f32.mrb[8].mxu1 }
 0x166   : > { %v412_v3 = vadd.f32 %v405_v1, %v353_v56  ;;  %v1460_v4 = vpop.f32.mrb[5].mxu0  ;;  %v1478_v5 = vpop.f32.mrb[9].mxu1  ;;  %v1260_v56 = vld [vmem:[%s1913_s5 + $0x8] sm:$0xff] }
 0x167   : > { %v408_v6 = vpop.f32.mrb[6].mxu0  ;;  %v573_v7 = vpop.f32.mrb[10].mxu1  ;;  %v1384_v4 = vld [vmem:[%s1912_s4 + $0x20] sm:$0xff]  ;;  %v1385_v5 = vld [vmem:[%s1912_s4 + $0x28] sm:$0xff] }
 0x168   : > { %v413_v8 = vadd.f32 %v408_v6, %v356_v61  ;;  %v467_v9 = vadd.f32 %v460_v55, %v412_v3  ;;  %v1461_v10 = vpop.f32.mrb[7].mxu0  ;;  %v1479_v11 = vpop.f32.mrb[11].mxu1  ;;  %v789_v55 = vpack.c.bf16 %v788_v54, %v787_v53  ;;  %v794_v61 = vpack.c.bf16 %v1381_v59, %v1380_v58 }
 0x169   : > { %v944_v3 = vpack.c.bf16 %v1388_v63, %v1387_v62 }
 0x16a   : > { %v468_v12 = vadd.f32 %v463_v60, %v413_v8  ;;  %v1393_v8 = vld [vmem:[%s1912_s4 + $0x50] sm:$0xff] }
 0x16d   : > { %v515_v13 = vpop.f32.mrb[8].mxu0  ;;  %v680_v14 = vpop.f32.mrb[12].mxu1 }
 0x16e   : > { %v522_v15 = vadd.f32 %v515_v13, %v467_v9  ;;  %v1472_v16 = vpop.f32.mrb[9].mxu0  ;;  %v1490_v17 = vpop.f32.mrb[13].mxu1  ;;  %v1394_v9 = vld [vmem:[%s1912_s4 + $0x58] sm:$0xff]  ;;  %v1391_v13 = vld [vmem:[%s1912_s4 + $0x48] sm:$0xff] }
 0x16f   : > { %v518_v18 = vpop.f32.mrb[10].mxu0  ;;  %v683_v19 = vpop.f32.mrb[14].mxu1  ;;  %v1050_v11 = vpack.c.bf16 %v1394_v9, %v1393_v8  ;;  %v1399_v16 = vld [vmem:[%s1912_s4 + $0x70] sm:$0xff]  ;;  %v1400_v17 = vld [vmem:[%s1912_s4 + $0x78] sm:$0xff] }
 0x170   : > { %v523_v20 = vadd.f32 %v518_v18, %v468_v12  ;;  %v577_v21 = vadd.f32 %v570_v2, %v522_v15  ;;  %v1473_v22 = vpop.f32.mrb[11].mxu0  ;;  %v1491_v23 = vpop.f32.mrb[15].mxu1  ;;  %v1390_v12 = vld [vmem:[%s1912_s4 + $0x40] sm:$0xff] }
 0x171   : > { %v997_v15 = vpack.c.bf16 %v1391_v13, %v1390_v12 }
 0x172   : > { %v578_v24 = vadd.f32 %v573_v7, %v523_v20  ;;  %v891_v7 = vpack.c.bf16 %v1385_v5, %v1384_v4  ;;  %v1396_v20 = vld [vmem:[%s1912_s4 + $0x60] sm:$0xff] }
 0x175   : > { %v625_v25 = vpop.f32.mrb[12].mxu0 }
 0x176   : > { %v632_v26 = vadd.f32 %v625_v25, %v577_v21  ;;  %v1484_v27 = vpop.f32.mrb[13].mxu0  ;;  %v1397_v21 = vld [vmem:[%s1912_s4 + $0x68] sm:$0xff] }
 0x177   : > { %v628_v28 = vpop.f32.mrb[14].mxu0  ;;  %v1103_v22 = vpack.c.bf16 %v1397_v21, %v1396_v20  ;;  %v1403_v25 = vld [vmem:[%s1912_s4 + $0x88] sm:$0xff] }
 0x178   : > { %v633_v29 = vadd.f32 %v628_v28, %v578_v24  ;;  %v687_v30 = vadd.f32 %v680_v14, %v632_v26  ;;  %v1485_v31 = vpop.f32.mrb[15].mxu0  ;;  %v1402_v24 = vld [vmem:[%s1912_s4 + $0x80] sm:$0xff] }
 0x179   : > { %v1209_v26 = vpack.c.bf16 %v1403_v25, %v1402_v24 }
 0x17a   : > { %v688_v32 = vadd.f32 %v683_v19, %v633_v29  ;;  %v1156_v19 = vpack.c.bf16 %v1400_v17, %v1399_v16 }
 0x17d   : > { %v735_v33 = vpop.f32.mrb[16].mxu0 }
 0x17e   : > { %v742_v35 = vadd.f32 %v735_v33, %v687_v30  ;;  %v1496_v36 = vpop.f32.mrb[17].mxu0 }
 0x17f   : > { %v738_v37 = vpop.f32.mrb[18].mxu0 }
 0x180   : > { %v743_v39 = vadd.f32 %v738_v37, %v688_v32  ;;  %v756_v40 = vadd.f32 %v749_v34, %v742_v35  ;;  %v1497_v41 = vpop.f32.mrb[19].mxu0 }
 0x182   : > { %v758_v43 = vmax.f32 %v756_v40, 0.0  ;;  %v757_v44 = vadd.f32 %v754_v38, %v743_v39 }
 0x184   : > { %v766_v45 = vmul.f32 %v1773_v42, %v758_v43  ;;  %v759_v46 = vmax.f32 %v757_v44, 0.0 }
 0x186   : > { %v767_v47 = vmul.f32 %v1773_v42, %v759_v46  ;;  %776 = vrot.lane.b32.xlu1 %v766_v45, %s1593_s27 }
 0x188   : > { %778 = vrot.lane.b32.xlu0 %v767_v47, %s1593_s27 }
 0x1f8   : > { %v777_v48 = vpop.permute.xlu1 %776 }
 0x1f9   : > { %783 = vst.msk [vmem:[#allocation2] sm:$0xff] %vm782_vm5, %v777_v48 }
 0x1fa   : > { %v779_v49 = vpop.permute.xlu0 %778 }
 0x1fb   : > { %784 = vst.msk [vmem:[#allocation2 + $0x8] sm:$0xff] %vm782_vm5, %v779_v49 }
 0x200   : > { %v785_v50 = vld [vmem:[#allocation2] sm:$0xff] }
 0x202   : > { %v786_v51 = vld [vmem:[#allocation2 + $0x8] sm:$0xff] }
 0x203   : > { %v790_v52 = vpack.c.bf16 %v786_v51, %v785_v50 }
 0x205   : > { %892 = vrot.lane.b32.xlu0 %v790_v52, %s1586_s9  ;;  %796 = vrot.lane.b32.xlu1 %v790_v52, %s1584_s7 }
 0x206   : > { %1505 = vmatpush3.bf16.msra.mxu0 %v790_v52 }
 0x207   : > { %1516 = vmatprep.subr.bf16.mxu0 %v1582_v0 }
 0x209   : > { %998 = vrot.lane.b32.xlu0 %v790_v52, %s1587_s10  ;;  %945 = vrot.lane.b32.xlu1 %v790_v52, %s1585_s8 }
 0x20a   : > { %1507 = vmatmul.mubr.msk.bf16.vlgmr.msra.gmra.mrb[20].mxu0 %vm799_vm6, %v789_v55 }
 0x20b   : > { %1518 = vmatprep.mubr.msk.bf16.mxu0 %vm1583_vm0, %v1582_v0 }
 0x20d   : > { %1104 = vrot.lane.b32.xlu0 %v790_v52, %s1589_s12  ;;  %1051 = vrot.lane.b32.xlu1 %v790_v52, %s1588_s11 }
 0x211   : > { %1210 = vrot.lane.b32.xlu0 %v790_v52, %s1591_s14  ;;  %1157 = vrot.lane.b32.xlu1 %v790_v52, %s1590_s13 }
 0x215   : > { %1268 = vperm.xlu0 %1572, %v1260_v56   ;;  %1263 = vperm.xlu1 %1573, %v1259_v57  }
 0x277   : > { %v797_v60 = vpop.permute.xlu1 %796  ;;  %v893_v1 = vpop.permute.xlu0 %892 }
 0x278   : > { %1499 = vmatpush3.bf16.msra.mxu1 %v797_v60 }
 0x279   : > { %1510 = vmatprep.subr.bf16.mxu1 %v1582_v0 }
 0x27b   : > { %1501 = vmatmul.mubr.msk.bf16.vlgmr.msra.gmra.mrb[16].mxu1 %vm799_vm6, %v794_v61  ;;  %v946_v2 = vpop.permute.xlu1 %945  ;;  %v999_v10 = vpop.permute.xlu0 %998 }
 0x27c   : > { %1511 = vmatpush3.bf16.msra.mxu1 %v893_v1  ;;  %1517 = vmatpush3.bf16.msra.mxu0 %v946_v2 }
 0x27d   : > { %1528 = vmatprep.subr.bf16.mxu0 %v1582_v0  ;;  %1512 = vmatprep.mubr.msk.bf16.mxu1 %vm1583_vm0, %v1582_v0 }
 0x27e   : > { %1522 = vmatprep.subr.bf16.mxu1 %v1582_v0 }
 0x27f   : > { %v1052_v6 = vpop.permute.xlu1 %1051  ;;  %1519 = vmatmul.mubr.msk.bf16.vlgmr.msra.gmra.mrb[24].mxu0 %vm799_vm6, %v944_v3  ;;  %v1105_v18 = vpop.permute.xlu0 %1104 }
 0x280   : > { %1529 = vmatpush3.bf16.msra.mxu0 %v1052_v6  ;;  %1530 = vmatprep.mubr.msk.bf16.mxu0 %vm1583_vm0, %v1582_v0 }
 0x281   : > { %1540 = vmatprep.subr.bf16.mxu0 %v1582_v0 }
 0x283   : > { %1513 = vmatmul.mubr.msk.bf16.vlgmr.msra.gmra.mrb[20].mxu1 %vm799_vm6, %v891_v7  ;;  %v1158_v14 = vpop.permute.xlu1 %1157  ;;  %v1211_v23 = vpop.permute.xlu0 %1210 }
 0x284   : > { %1523 = vmatpush3.bf16.msra.mxu1 %v999_v10  ;;  %1524 = vmatprep.mubr.msk.bf16.mxu1 %vm1583_vm0, %v1582_v0 }
 0x285   : > { %1534 = vmatprep.subr.bf16.mxu1 %v1582_v0 }
 0x287   : > { %1531 = vmatmul.mubr.msk.bf16.vlgmr.msra.gmra.mrb[28].mxu0 %vm799_vm6, %v1050_v11 }
 0x288   : > { %1541 = vmatpush3.bf16.msra.mxu0 %v1158_v14  ;;  %1542 = vmatprep.mubr.msk.bf16.mxu0 %vm1583_vm0, %v1582_v0 }
 0x28b   : > { %1525 = vmatmul.mubr.msk.bf16.vlgmr.msra.gmra.mrb[24].mxu1 %vm799_vm6, %v997_v15 }
 0x28c   : > { %1535 = vmatpush3.bf16.msra.mxu1 %v1105_v18  ;;  %1536 = vmatprep.mubr.msk.bf16.mxu1 %vm1583_vm0, %v1582_v0 }
 0x28d   : > { %1546 = vmatprep.subr.bf16.mxu1 %v1582_v0 }
 0x28f   : > { %1543 = vmatmul.mubr.msk.bf16.vlgmr.msra.gmra.mrb[32].mxu0 %vm799_vm6, %v1156_v19 }
 0x293   : > { %1537 = vmatmul.mubr.msk.bf16.vlgmr.msra.gmra.mrb[28].mxu1 %vm799_vm6, %v1103_v22 }
 0x294   : > { %1547 = vmatpush3.bf16.msra.mxu1 %v1211_v23  ;;  %1548 = vmatprep.mubr.msk.bf16.mxu1 %vm1583_vm0, %v1582_v0  ;;  %v1264_v13 = vpop.permute.xlu1 %1263  ;;  %v1269_v18 = vpop.permute.xlu0 %1268 }
 0x29b   : > { %1549 = vmatmul.mubr.msk.bf16.vlgmr.msra.gmra.mrb[32].mxu1 %vm799_vm6, %v1209_v26 }
 0x2dd   : > { %v881_v27 = vpop.f32.mrb[20].mxu0 }
 0x2de   : > { %v1508_v28 = vpop.f32.mrb[21].mxu0 }
 0x2df   : > { %v884_v29 = vpop.f32.mrb[22].mxu0 }
 0x2e0   : > { %v1509_v30 = vpop.f32.mrb[23].mxu0 }
 0x34e   : > { %v837_v31 = vpop.f32.mrb[16].mxu1 }
 0x34f   : > { %v1502_v32 = vpop.f32.mrb[17].mxu1  ;;  %v882_v33 = vadd.f32 %v881_v27, %v837_v31 }
 0x350   : > { %v840_v34 = vpop.f32.mrb[18].mxu1 }
 0x351   : > { %v1503_v35 = vpop.f32.mrb[19].mxu1  ;;  %v885_v36 = vadd.f32 %v884_v29, %v840_v34 }
 0x352   : > { %v985_v37 = vpop.f32.mrb[24].mxu0 }
 0x353   : > { %v1520_v38 = vpop.f32.mrb[25].mxu0 }
 0x354   : > { %v988_v39 = vpop.f32.mrb[26].mxu0 }
 0x355   : > { %v1521_v40 = vpop.f32.mrb[27].mxu0 }
 0x356   : > { %v932_v41 = vpop.f32.mrb[20].mxu1 }
 0x357   : > { %v939_v43 = vadd.f32 %v932_v41, %v882_v33  ;;  %v1514_v44 = vpop.f32.mrb[21].mxu1 }
 0x358   : > { %v935_v45 = vpop.f32.mrb[22].mxu1 }
 0x359   : > { %v940_v46 = vadd.f32 %v935_v45, %v885_v36  ;;  %v992_v47 = vadd.f32 %v985_v37, %v939_v43  ;;  %v1515_v48 = vpop.f32.mrb[23].mxu1 }
 0x35a   : > { %v1091_v49 = vpop.f32.mrb[28].mxu0 }
 0x35b   : > { %v993_v50 = vadd.f32 %v988_v39, %v940_v46  ;;  %v1532_v0 = vpop.f32.mrb[29].mxu0 }
 0x35c   : > { %v1094_v51 = vpop.f32.mrb[30].mxu0 }
 0x35d   : > { %v1533_v52 = vpop.f32.mrb[31].mxu0 }
 0x35e   : > { %v1038_v53 = vpop.f32.mrb[24].mxu1 }
 0x35f   : > { %v1045_v54 = vadd.f32 %v1038_v53, %v992_v47  ;;  %v1526_v55 = vpop.f32.mrb[25].mxu1 }
 0x360   : > { %v1041_v56 = vpop.f32.mrb[26].mxu1 }
 0x361   : > { %v1046_v57 = vadd.f32 %v1041_v56, %v993_v50  ;;  %v1098_v58 = vadd.f32 %v1091_v49, %v1045_v54  ;;  %v1527_v59 = vpop.f32.mrb[27].mxu1 }
 0x362   : > { %v1197_v60 = vpop.f32.mrb[32].mxu0 }
 0x363   : > { %v1099_v61 = vadd.f32 %v1094_v51, %v1046_v57  ;;  %v1544_v62 = vpop.f32.mrb[33].mxu0 }
 0x364   : > { %v1200_v63 = vpop.f32.mrb[34].mxu0 }
 0x365   : > { %v1545_v1 = vpop.f32.mrb[35].mxu0 }
 0x366   : > { %v1144_v2 = vpop.f32.mrb[28].mxu1 }
 0x367   : > { %v1151_v3 = vadd.f32 %v1144_v2, %v1098_v58  ;;  %v1538_v4 = vpop.f32.mrb[29].mxu1 }
 0x368   : > { %v1147_v5 = vpop.f32.mrb[30].mxu1 }
 0x369   : > { %v1152_v6 = vadd.f32 %v1147_v5, %v1099_v61  ;;  %v1204_v7 = vadd.f32 %v1197_v60, %v1151_v3  ;;  %v1539_v8 = vpop.f32.mrb[31].mxu1 }
 0x36b   : > { %v1205_v9 = vadd.f32 %v1200_v63, %v1152_v6 }
 0x36e   : > { %v1250_v10 = vpop.f32.mrb[32].mxu1 }
 0x36f   : > { %v1257_v11 = vadd.f32 %v1250_v10, %v1204_v7  ;;  %v1550_v12 = vpop.f32.mrb[33].mxu1 }
 0x370   : > { %v1253_v14 = vpop.f32.mrb[34].mxu1 }
 0x371   : > { %v1271_v15 = vadd.f32 %v1264_v13, %v1257_v11  ;;  %v1258_v16 = vadd.f32 %v1253_v14, %v1205_v9  ;;  %v1551_v17 = vpop.f32.mrb[35].mxu1 }
 0x373   : > { %v1273_v19 = vmax.f32 %v1271_v15, 0.0  ;;  %v1272_v20 = vadd.f32 %v1269_v18, %v1258_v16 }
 0x375   : > { %v1274_v21 = vmax.f32 %v1272_v20, 0.0  ;;  %v1275_v22 = vmul.f32 %v1773_v42, %v1273_v19 }
 0x377   : > { %1283 = vrot.lane.b32.xlu1 %v1275_v22, %s1593_s27  ;;  %v1276_v23 = vmul.f32 %v1773_v42, %v1274_v21 }
 0x379   : > { %1285 = vrot.lane.b32.xlu0 %v1276_v23, %s1593_s27 }
 0x3e9   : > { %v1284_v24 = vpop.permute.xlu1 %1283 }
 0x3ea   : > { %1289 = vst.msk [vmem:[%s1883_s29] sm:$0xff] %vm782_vm5, %v1284_v24 }
 0x3eb   : > { %v1286_v25 = vpop.permute.xlu0 %1285 }
 0x3ec   : > { %1290 = vst.msk [vmem:[%s1883_s29 + $0x8] sm:$0xff] %vm782_vm5, %v1286_v25 }
 0x3ed PF: > { %s16_s21 = sadd.s32 1, %s1580_s21  }
 0x3ee   : > { %p13_p4 = scmp.ge.s32.totalorder %s16_s21, 4  }
 0x3f0   :  { %15 = sbr.rel (!%p13_p4) target bundleno = 1 (0x1), region = 90 }

// kernel: score_residue_u_loss_forward.11
= control target key start
LH: loop header
LB: loop body
LE: loop exit
PB: predicated region body
PF: predicated region fallthrough
CT: control target
= control target key end

     0   :  { %s490_s15 = smov 0   ;;  %s520_s0 = inlined_call_operand.vmem [shape: f32[2,8,324], index: 0, kind: input, shape index: {}]   ;;  %s521_s1 = inlined_call_operand.vmem [shape: f32[1,324], index: 1, kind: input, shape index: {}]   ;;  %s522_s2 = inlined_call_operand.vmem [shape: f32[3,8], index: 2, kind: input, shape index: {}]   ;;  %s523_s3 = inlined_call_operand.vmem [shape: f32[3,1], index: 3, kind: input, shape index: {}]   ;;  %s524_s4 = inlined_call_operand.vmem [shape: f32[2,3,324], index: 4, kind: output, shape index: {}]  }
   0x1 LB: > { %s408_s16 = sadd.s32 4294967295, %s460_s15   ;;  %p412_p0 = scmp.ge.s32.totalorder %s460_s15, 1  ;;  %s460_s15 = sphi %s490_s15, %s14_s15  }
   0x2   : > { %p162_p1 = scmp.lt.s32.totalorder %s460_s15, 3 }
   0x4   : > { %p163_p2 = pnand %p412_p0, %p162_p1 }
   0x5   : > { %p188_p3 = scmp.lt.s32.totalorder (!%p163_p2), %s408_s16, 1  ;;  %v462_v0 = vmov (!%p163_p2), 0.0   ;;  %v463_v1 = vmov (!%p163_p2), 0   ;;  %v207_v2 = vld [vmem:[%s523_s3] sm:$0x7] (!%p163_p2)  ;;  %vm464_vm0 = vmmov (!%p163_p2), 0   ;;  %v328_v31 = vlaneseq (!%p163_p2) }
   0x6   : > { %166 = sbr.rel (%p163_p2) target bundleno = 273 (0x111), region = 36  ;;  %422 = vmatprep.subr.bf16.mxu1 (!%p163_p2), %v462_v0  ;;  %259 = vmatprep.mubr.bf16.mxu0 (!%p163_p2), %v463_v1  ;;  %v205_v3 = vld [vmem:[%s522_s2] sm:$0x7] (!%p163_p2)  ;;  %vm217_vm1 = vcmask (!%p163_p2), 1043456   ;;  %vm213_vm2 = vcmask (!%p163_p2), 64512   ;;  %vm351_vm3 = vcmask (!%p163_p2), 550912  }
   0x7   : > { %424 = vmatprep.mubr.msk.bf16.mxu1 (!%p163_p2), %vm464_vm0, %v462_v0  ;;  %441 = vset.pattern.permute.xlu0 (!%p163_p2), %v463_v1  ;;  %v206_v12 = vpack.c.bf16 (!%p163_p2), %v205_v3, %v205_v3  ;;  %v329_v36 = vshrl.u32 (!%p163_p2), %v328_v31, 7  ;;  %v326_v40 = vld [vmem:[%s521_s1] sm:$0x7] (!%p163_p2) }
   0x8   : > { %210 = vperm.xlu0 (!%p163_p2), %441, %v207_v2  }
   0x9   : > { %v330_v39 = vsub.s32 (!%p163_p2), 0, %v329_v36  ;;  %v338_v41 = vsub.s32 (!%p163_p2), 2, %v329_v36  ;;  %v334_v42 = vsub.s32 (!%p163_p2), 1, %v329_v36 }
   0xb   : > { %v331_v43 = vrot.slane (!%p163_p2), %v326_v40, %v330_v39  ;;  %v339_v44 = vrot.slane (!%p163_p2), %v326_v40, %v338_v41  ;;  %v335_v45 = vrot.slane (!%p163_p2), %v326_v40, %v334_v42 }
   0xd   : > { %s526_s16 = smov (!%p188_p3, %s408_s16), 1 }
   0xe   : > { %s428_s19 = smul.u32 24, %s526_s16 }
   0xf   : > { %s429_s27 = smul.u32 12, %s526_s16 }
  0x10   : > { %s192_s22 = scalar_lea.vmem %s520_s0, %s428_s19 }
  0x11   : > { %v200_v4 = vld [vmem:[%s192_s22 + $0x8] sm:$0xff]  ;;  %v199_v5 = vld [vmem:[%s192_s22] sm:$0xff]  ;;  %v201_v6 = vld [vmem:[%s192_s22 + $0x10] sm:$0xff]  ;;  %s197_s30 = scalar_lea.vmem %s524_s4, %s429_s27 }
  0x12   : > { %v203_v7 = vpack.c.bf16 %v200_v4, %v200_v4  ;;  %v202_v8 = vpack.c.bf16 %v199_v5, %v199_v5  ;;  %v204_v9 = vpack.c.bf16 %v201_v6, %v201_v6 }
  0x14   : > { %415 = vmatprep.subr.msk.bf16.mxu0 %vm217_vm1, %v203_v7  ;;  %v219_v10 = vsel %vm217_vm1, %v202_v8, 0  ;;  %v225_v11 = vsel %vm217_vm1, %v204_v9, 0 }
  0x15   : > { %228 = vmatpush1.bf16.msra.mxu0 %v219_v10  ;;  %423 = vmatpush3.bf16.msra.mxu1 %v225_v11 }
  0x18   : > { %416 = vmatmul.mubr.msk.bf16.vlgmr.msra.gmra.mrb[0].mxu0 %vm213_vm2, %v206_v12  ;;  %425 = vmatmul.mubr.msk.bf16.vlgmr.msra.gmra.mrb[0].mxu1 %vm213_vm2, %v206_v12 }
  0x87   : > { %v211_v13 = vpop.permute.xlu0 %210 }
  0xeb   : > { %v261_v14 = vpop.f32.mrb[0].mxu0  ;;  %v302_v15 = vpop.f32.mrb[0].mxu1 }
  0xec   : > { %v262_v16 = vadd.f32 %v261_v14, %v211_v13  ;;  %v303_v17 = vadd.f32 %v302_v15, %v211_v13  ;;  %v263_v18 = vpop.f32.mrb[1].mxu0  ;;  %v426_v19 = vpop.f32.mrb[1].mxu1 }
  0xed   : > { %v264_v20 = vadd.f32 %v263_v18, %v211_v13  ;;  %v265_v21 = vpop.f32.mrb[2].mxu0  ;;  %v305_v22 = vpop.f32.mrb[2].mxu1 }
  0xee   : > { %v308_v23 = vsub.f32 0.0, %v262_v16  ;;  %v310_v24 = vsub.f32 0.0, %v303_v17  ;;  %v266_v25 = vpop.f32.mrb[3].mxu0  ;;  %v427_v26 = vpop.f32.mrb[3].mxu1 }
  0xef   : > { %v309_v27 = vsub.f32 0.0, %v264_v20 }
  0xf0   : > { %v311_v28 = vmul.f32 1.442695, %v308_v23  ;;  %v315_v29 = vmul.f32 1.442695, %v310_v24 }
  0xf1   : > { %v313_v30 = vmul.f32 1.442695, %v309_v27 }
  0xf2   : > { %442 = vpow2.f32 %v311_v28 }
  0xf3   : > { %444 = vpow2.f32 %v315_v29 }
  0xf4   : > { %446 = vpow2.f32 %v313_v30 }
  0xfc   : > { %v443_v32 = vpop.eup %442 }
  0xfd   : > { %v445_v33 = vpop.eup %444  ;;  %v317_v34 = vadd.f32 1.0, %v443_v32 }
  0xfe   : > { %v447_v35 = vpop.eup %446  ;;  %v319_v37 = vadd.f32 1.0, %v445_v33 }
  0xff   : > { %448 = vrcp.f32 %v317_v34  ;;  %v318_v38 = vadd.f32 1.0, %v447_v35 }
 0x100   : > { %450 = vrcp.f32 %v319_v37 }
 0x101   : > { %452 = vrcp.f32 %v318_v38 }
 0x109   : > { %v449_v46 = vpop.eup %448 }
 0x10a   : > { %v451_v47 = vpop.eup %450  ;;  %v343_v48 = vmul.f32 %v449_v46, %v331_v43 }
 0x10b   : > { %v453_v49 = vpop.eup %452  ;;  %v345_v50 = vmul.f32 %v451_v47, %v339_v44 }
 0x10c   : > { %v344_v51 = vmul.f32 %v453_v49, %v335_v45 }
 0x10d   : > { %352 = vst.msk [vmem:[%s197_s30 + $0x8] sm:$0x7] %vm351_vm3, %v345_v50 }
 0x10e   : > { %v348_v52 = vcombine.low %v343_v48, %v344_v51 }
 0x110   : > { %350 = vst [vmem:[%s197_s30] sm:$0x77] %v348_v52 }
 0x111 PF: > { %s14_s15 = sadd.s32 1, %s460_s15  }
 0x112   : > { %p11_p4 = scmp.ge.s32.totalorder %s14_s15, 4  }
 0x114   :  { %13 = sbr.rel (!%p11_p4) target bundleno = 1 (0x1), region = 66 }

// kernel: score_residue_u_loss_forward.10
= control target key start
LH: loop header
LB: loop body
LE: loop exit
PB: predicated region body
PF: predicated region fallthrough
CT: control target
= control target key end

     0   :  { %s3728_s27 = smov 0   ;;  %s4291_s0 = inlined_call_operand.vmem [shape: f32[2,16,324], index: 0, kind: input, shape index: {}]   ;;  %s4292_s1 = inlined_call_operand.vmem [shape: f32[2,8,324], index: 1, kind: input, shape index: {}]   ;;  %s4293_s2 = inlined_call_operand.vmem [shape: f32[1,286], index: 2, kind: input, shape index: {}]   ;;  %s4294_s3 = inlined_call_operand.vmem [shape: f32[9,8,16], index: 3, kind: input, shape index: {}]   ;;  %s4295_s4 = inlined_call_operand.vmem [shape: f32[9,8,8], index: 4, kind: input, shape index: {}]   ;;  %s4296_s5 = inlined_call_operand.vmem [shape: f32[8,1], index: 5, kind: input, shape index: {}]   ;;  %s4297_s6 = inlined_call_operand.vmem [shape: f32[9,8,8], index: 6, kind: input, shape index: {}]   ;;  %s4298_s7 = inlined_call_operand.vmem [shape: f32[8,1], index: 7, kind: input, shape index: {}]   ;;  %s4299_s8 = inlined_call_operand.vmem [shape: f32[2,8,324], index: 8, kind: output, shape index: {}]  }
   0x1 LB: > { %s3317_s28 = sadd.s32 4294967295, %s3669_s27   ;;  %p3321_p0 = scmp.ge.s32.totalorder %s3669_s27, 1  ;;  %s3669_s27 = sphi %s3728_s27, %s18_s27  }
   0x2   : > { %p272_p1 = scmp.lt.s32.totalorder %s3669_s27, 3 }
   0x4   : > { %p273_p2 = pnand %p3321_p0, %p272_p1 }
   0x5   : > { %p311_p3 = scmp.lt.s32.totalorder (!%p273_p2), %s3317_s28, 1  ;;  %v3671_v0 = vmov (!%p273_p2), 0   ;;  %v3672_v1 = vmov (!%p273_p2), 0.0   ;;  %vm3673_vm0 = vmmov (!%p273_p2), 0   ;;  %v342_v5 = vld [vmem:[%s4295_s4] sm:$0xff] (!%p273_p2)  ;;  %vm351_vm1 = vcmask (!%p273_p2), 1043456  }
   0x6   : > { %276 = sbr.rel (%p273_p2) target bundleno = 1139 (0x473), region = 52  ;;  %393 = vmatprep.mubr.bf16.mxu0 (!%p273_p2), %v3671_v0  ;;  %3661 = vset.pattern.permute.xlu0 (!%p273_p2), %v3671_v0  ;;  %s3674_s17 = smov (!%p273_p2), 127   ;;  %v343_v19 = vpack.c.bf16 (!%p273_p2), %v342_v5, %v342_v5  ;;  %vm347_vm2 = vcmask (!%p273_p2), 64512   ;;  %v337_v21 = vld [vmem:[%s4294_s3] sm:$0xff] (!%p273_p2)  ;;  %vm442_vm3 = vcmask (!%p273_p2), 130048   ;;  %v3330_v25 = vld [vmem:[%s4294_s3 + $0x8] sm:$0xff] (!%p273_p2) }
   0x7   : > { %3477 = vmatprep.subr.bf16.mxu1 (!%p273_p2), %v3672_v1  ;;  %3479 = vmatprep.mubr.msk.bf16.mxu1 (!%p273_p2), %vm3673_vm0, %v3672_v1  ;;  %v338_v22 = vpack.c.bf16 (!%p273_p2), %v337_v21, %v337_v21  ;;  %s3675_s20 = smov (!%p273_p2), 126   ;;  %s3676_s21 = smov (!%p273_p2), 110   ;;  %v2205_v26 = vld [vmem:[%s4296_s5] sm:$0xff] (!%p273_p2)  ;;  %vm539_vm4 = vcmask (!%p273_p2), 1039360   ;;  %v529_v28 = vpack.c.bf16 (!%p273_p2), %v3330_v25, %v3330_v25  ;;  %v3333_v35 = vld [vmem:[%s4295_s4 + $0x8] sm:$0xff] (!%p273_p2)  ;;  %vm751_vm5 = vcmask (!%p273_p2), 1031168  }
   0x8   : > { %3662 = vset.pattern.permute.xlu1 (!%p273_p2), %v3671_v0  ;;  %s3677_s22 = smov (!%p273_p2), 109   ;;  %s3678_s23 = smov (!%p273_p2), 108   ;;  %v634_v40 = vpack.c.bf16 (!%p273_p2), %v3333_v35, %v3333_v35  ;;  %v3337_v46 = vld [vmem:[%s4294_s3 + $0x10] sm:$0xff] (!%p273_p2)  ;;  %vm960_vm6 = vcmask (!%p273_p2), 900096   ;;  %v3344_v63 = vld [vmem:[%s4294_s3 + $0x18] sm:$0xff] (!%p273_p2)  ;;  %vm1169_vm7 = vcmask (!%p273_p2), 891904  }
   0x9   : > { %s3679_s24 = smov (!%p273_p2), 92   ;;  %s3680_s25 = smov (!%p273_p2), 91   ;;  %v744_v48 = vpack.c.bf16 (!%p273_p2), %v3337_v46, %v3337_v46  ;;  %v3340_v55 = vld [vmem:[%s4295_s4 + $0x10] sm:$0xff] (!%p273_p2)  ;;  %vm1378_vm8 = vcmask (!%p273_p2), 883712   ;;  %vm1587_vm9 = vcmask (!%p273_p2), 752640   ;;  %vm1796_vm10 = vcmask (!%p273_p2), 744448  }
   0xa   : > { %s3681_s26 = smov (!%p273_p2), 90   ;;  %v846_v58 = vpack.c.bf16 (!%p273_p2), %v3340_v55, %v3340_v55  ;;  %vm2005_vm11 = vcmask (!%p273_p2), 736256   ;;  %vm2236_vm12 = vcmask (!%p273_p2), 154624   ;;  %vm2238_vm13 = vcmask (!%p273_p2), 556424  }
   0xb   : > { %2237 = vst.msk [vmem:[#allocation2] sm:$0xff] (!%p273_p2), %vm2236_vm12, %v3672_v1  ;;  %vm2254_vm14 = vcmask (!%p273_p2), 1047704   ;;  %vm2257_vm15 = vcmask (!%p273_p2), 400384  }
   0xc   : > { %2239 = vst.msk [vmem:[#allocation2 + $0x10] sm:$0xff] (!%p273_p2), %vm2238_vm13, %v3672_v1 }
   0xd   : > { %s4301_s28 = smov (!%p311_p3, %s3317_s28), 1 }
   0xe   : > { %s3639_s29 = smul.u32 48, %s4301_s28 }
   0xf   : > { %s3640_s30 = smul.u32 24, %s4301_s28 }
  0x10   : > { %s315_s11 = scalar_lea.vmem %s4291_s0, %s3639_s29 }
  0x11   : > { %v329_v2 = vld [vmem:[%s315_s11 + $0x8] sm:$0xff]  ;;  %v332_v3 = vld [vmem:[%s315_s11 + $0x20] sm:$0xff]  ;;  %s320_s14 = scalar_lea.vmem %s4292_s1, %s3640_s30  ;;  %v331_v7 = vld [vmem:[%s315_s11 + $0x18] sm:$0xff] }
  0x12   : > { %v328_v4 = vld [vmem:[%s315_s11] sm:$0xff]  ;;  %v3757_v6 = vpack.c.bf16 %v332_v3, %v329_v2  ;;  %v330_v8 = vld [vmem:[%s315_s11 + $0x10] sm:$0xff]  ;;  %v333_v9 = vld [vmem:[%s315_s11 + $0x28] sm:$0xff]  ;;  %s3682_s11 = smov 19  }
  0x13   : > { %v3759_v10 = vpack.c.bf16 %v331_v7, %v328_v4  ;;  %v334_v11 = vld [vmem:[%s320_s14] sm:$0xff]  ;;  %v335_v12 = vld [vmem:[%s320_s14 + $0x8] sm:$0xff]  ;;  %v336_v13 = vld [vmem:[%s320_s14 + $0x10] sm:$0xff]  ;;  %v3763_v14 = vpack.c.bf16 %v333_v9, %v330_v8  ;;  %v953_v4 = vpack.c.bf16 %v3344_v63, %v3344_v63 }
  0x14   : > { %535 = vrot.lane.b32.xlu0 %v3757_v6, %s3674_s17  ;;  %v3765_v15 = vpack.c.bf16 %v334_v11, %v334_v11  ;;  %v3767_v16 = vpack.c.bf16 %v335_v12, %v335_v12  ;;  %v3769_v17 = vpack.c.bf16 %v336_v13, %v336_v13  ;;  %v3347_v11 = vld [vmem:[%s4295_s4 + $0x18] sm:$0xff] }
  0x15   : > { %533 = vrot.lane.b32.xlu1 %v3759_v10, %s3674_s17 }
  0x16   : > { %3325 = vmatprep.subr.msk.bf16.mxu0 %vm351_vm1, %v3767_v16  ;;  %v353_v18 = vsel %vm351_vm1, %v3765_v15, 0  ;;  %v359_v20 = vsel %vm351_vm1, %v3769_v17, 0 }
  0x17   : > { %362 = vmatpush1.bf16.msra.mxu0 %v353_v18  ;;  %3478 = vmatpush3.bf16.msra.mxu1 %v359_v20 }
  0x18   : > { %537 = vrot.lane.b32.xlu0 %v3763_v14, %s3674_s17  ;;  %446 = vmatprep.subr.bf16.mxu0 %v3757_v6 }
  0x19   : > { %638 = vrot.lane.b32.xlu1 %v3765_v15, %s3674_s17  ;;  %3483 = vmatprep.subr.bf16.mxu1 %v3672_v1 }
  0x1a   : > { %3326 = vmatmul.mubr.msk.bf16.vlgmr.msra.gmra.mrb[0].mxu0 %vm347_vm2, %v343_v19  ;;  %3480 = vmatmul.mubr.msk.bf16.vlgmr.msra.gmra.mrb[0].mxu1 %vm347_vm2, %v343_v19  ;;  %v3351_v19 = vld [vmem:[%s4294_s3 + $0x20] sm:$0xff] }
  0x1b   : > { %447 = vmatpush1.bf16.msra.mxu0 %v3759_v10  ;;  %478 = vmatprep.mubr.bf16.mxu0 %v3671_v0 }
  0x1c   : > { %640 = vrot.lane.b32.xlu0 %v3767_v16, %s3674_s17  ;;  %3484 = vmatpush3.bf16.msra.mxu1 %v3763_v14 }
  0x1d   : > { %642 = vrot.lane.b32.xlu1 %v3769_v17, %s3674_s17  ;;  %3485 = vmatprep.mubr.msk.bf16.mxu1 %vm3673_vm0, %v3672_v1 }
  0x1e   : > { %3489 = vmatprep.subr.bf16.mxu1 %v3672_v1 }
  0x20   : > { %747 = vrot.lane.b32.xlu0 %v3757_v6, %s3675_s20 }
  0x21   : > { %749 = vrot.lane.b32.xlu1 %v3763_v14, %s3675_s20 }
  0x22   : > { %3328 = vmatmul.mubr.msk.bf16.vlgmr.msra.gmra.mrb[4].mxu0 %vm442_vm3, %v338_v22  ;;  %3486 = vmatmul.mubr.msk.bf16.vlgmr.msra.gmra.mrb[4].mxu1 %vm442_vm3, %v338_v22  ;;  %v1162_v22 = vpack.c.bf16 %v3351_v19, %v3351_v19 }
  0x23   : > { %3491 = vmatprep.mubr.msk.bf16.mxu1 %vm3673_vm0, %v3672_v1  ;;  %580 = vmatprep.mubr.bf16.mxu0 %v3671_v0 }
  0x24   : > { %745 = vrot.lane.b32.xlu0 %v3759_v10, %s3675_s20 }
  0x25   : > { %847 = vrot.lane.b32.xlu1 %v3765_v15, %s3675_s20 }
  0x28   : > { %849 = vrot.lane.b32.xlu0 %v3767_v16, %s3675_s20 }
  0x29   : > { %851 = vrot.lane.b32.xlu1 %v3769_v17, %s3675_s20 }
  0x2c   : > { %956 = vrot.lane.b32.xlu0 %v3757_v6, %s3676_s21 }
  0x2d   : > { %958 = vrot.lane.b32.xlu1 %v3763_v14, %s3676_s21 }
  0x30   : > { %954 = vrot.lane.b32.xlu0 %v3759_v10, %s3676_s21 }
  0x31   : > { %1056 = vrot.lane.b32.xlu1 %v3765_v15, %s3676_s21 }
  0x34   : > { %1058 = vrot.lane.b32.xlu0 %v3767_v16, %s3676_s21 }
  0x35   : > { %1060 = vrot.lane.b32.xlu1 %v3769_v17, %s3676_s21 }
  0x38   : > { %1165 = vrot.lane.b32.xlu0 %v3757_v6, %s3677_s22 }
  0x39   : > { %1167 = vrot.lane.b32.xlu1 %v3763_v14, %s3677_s22 }
  0x3c   : > { %1163 = vrot.lane.b32.xlu0 %v3759_v10, %s3677_s22 }
  0x3d   : > { %1265 = vrot.lane.b32.xlu1 %v3765_v15, %s3677_s22 }
  0x40   : > { %1267 = vrot.lane.b32.xlu0 %v3767_v16, %s3677_s22 }
  0x41   : > { %1269 = vrot.lane.b32.xlu1 %v3769_v17, %s3677_s22 }
  0x44   : > { %1374 = vrot.lane.b32.xlu0 %v3757_v6, %s3678_s23 }
  0x45   : > { %1376 = vrot.lane.b32.xlu1 %v3763_v14, %s3678_s23 }
  0x48   : > { %1372 = vrot.lane.b32.xlu0 %v3759_v10, %s3678_s23 }
  0x49   : > { %1474 = vrot.lane.b32.xlu1 %v3765_v15, %s3678_s23 }
  0x4c   : > { %1476 = vrot.lane.b32.xlu0 %v3767_v16, %s3678_s23 }
  0x4d   : > { %1478 = vrot.lane.b32.xlu1 %v3769_v17, %s3678_s23 }
  0x50   : > { %1583 = vrot.lane.b32.xlu0 %v3757_v6, %s3679_s24 }
  0x51   : > { %1585 = vrot.lane.b32.xlu1 %v3763_v14, %s3679_s24 }
  0x54   : > { %1581 = vrot.lane.b32.xlu0 %v3759_v10, %s3679_s24 }
  0x55   : > { %1683 = vrot.lane.b32.xlu1 %v3765_v15, %s3679_s24 }
  0x58   : > { %1685 = vrot.lane.b32.xlu0 %v3767_v16, %s3679_s24 }
  0x59   : > { %1687 = vrot.lane.b32.xlu1 %v3769_v17, %s3679_s24 }
  0x5c   : > { %1792 = vrot.lane.b32.xlu0 %v3757_v6, %s3680_s25 }
  0x5d   : > { %1794 = vrot.lane.b32.xlu1 %v3763_v14, %s3680_s25 }
  0x60   : > { %1790 = vrot.lane.b32.xlu0 %v3759_v10, %s3680_s25 }
  0x61   : > { %1892 = vrot.lane.b32.xlu1 %v3765_v15, %s3680_s25 }
  0x64   : > { %1894 = vrot.lane.b32.xlu0 %v3767_v16, %s3680_s25 }
  0x65   : > { %1896 = vrot.lane.b32.xlu1 %v3769_v17, %s3680_s25 }
  0x68   : > { %2001 = vrot.lane.b32.xlu0 %v3757_v6, %s3681_s26 }
  0x69   : > { %2003 = vrot.lane.b32.xlu1 %v3763_v14, %s3681_s26  ;;  %v1055_v14 = vpack.c.bf16 %v3347_v11, %v3347_v11 }
  0x6c   : > { %1999 = vrot.lane.b32.xlu0 %v3759_v10, %s3681_s26 }
  0x6d   : > { %2101 = vrot.lane.b32.xlu1 %v3765_v15, %s3681_s26 }
  0x70   : > { %2103 = vrot.lane.b32.xlu0 %v3767_v16, %s3681_s26 }
  0x71   : > { %2105 = vrot.lane.b32.xlu1 %v3769_v17, %s3681_s26 }
  0x74   : > { %2208 = vperm.xlu0 %3661, %v2205_v26  }
  0x86   : > { %v536_v23 = vpop.permute.xlu0 %535 }
  0x87   : > { %v534_v24 = vpop.permute.xlu1 %533 }
  0x88   : > { %v540_v31 = vsel %vm539_vm4, %v534_v24, %v536_v23 }
  0x8a   : > { %v538_v27 = vpop.permute.xlu0 %537 }
  0x8b   : > { %v639_v29 = vpop.permute.xlu1 %638  ;;  %3490 = vmatpush3.bf16.msra.mxu1 %v538_v27  ;;  %v541_v30 = vsel %vm539_vm4, %v536_v23, %v538_v27 }
  0x8c   : > { %548 = vmatprep.subr.bf16.mxu0 %v541_v30  ;;  %3495 = vmatprep.subr.bf16.mxu1 %v3672_v1 }
  0x8d   : > { %549 = vmatpush1.bf16.msra.mxu0 %v540_v31 }
  0x8e   : > { %3492 = vmatmul.mubr.msk.bf16.vlgmr.msra.gmra.mrb[8].mxu1 %vm442_vm3, %v529_v28  ;;  %v641_v32 = vpop.permute.xlu0 %640 }
  0x8f   : > { %v644_v33 = vsel %vm539_vm4, %v639_v29, %v641_v32  ;;  %v643_v34 = vpop.permute.xlu1 %642  ;;  %3497 = vmatprep.mubr.msk.bf16.mxu1 %vm3673_vm0, %v3672_v1 }
  0x90   : > { %v650_v36 = vsel %vm351_vm1, %v644_v33, 0  ;;  %v645_v37 = vsel %vm539_vm4, %v641_v32, %v643_v34  ;;  %v656_v38 = vsel %vm351_vm1, %v643_v34, 0  ;;  %3331 = vmatmul.mubr.msk.bf16.vlgmr.msra.gmra.mrb[8].mxu0 %vm442_vm3, %v529_v28  ;;  %v3354_v28 = vld [vmem:[%s4295_s4 + $0x20] sm:$0xff] }
  0x91   : > { %3334 = vmatprep.subr.msk.bf16.mxu0 %vm351_vm1, %v645_v37  ;;  %3496 = vmatpush3.bf16.msra.mxu1 %v656_v38  ;;  %v1264_v31 = vpack.c.bf16 %v3354_v28, %v3354_v28 }
  0x92   : > { %659 = vmatpush1.bf16.msra.mxu0 %v650_v36  ;;  %v748_v39 = vpop.permute.xlu0 %747  ;;  %690 = vmatprep.mubr.bf16.mxu0 %v3671_v0  ;;  %v3358_v36 = vld [vmem:[%s4294_s3 + $0x28] sm:$0xff] }
  0x93   : > { %v750_v41 = vpop.permute.xlu1 %749  ;;  %3501 = vmatprep.subr.bf16.mxu1 %v3672_v1  ;;  %v1371_v38 = vpack.c.bf16 %v3358_v36, %v3358_v36 }
  0x94   : > { %v753_v42 = vsel %vm751_vm5, %v748_v39, %v750_v41 }
  0x95   : > { %760 = vmatprep.subr.bf16.mxu0 %v753_v42 }
  0x96   : > { %3498 = vmatmul.mubr.msk.bf16.vlgmr.msra.gmra.mrb[12].mxu1 %vm347_vm2, %v634_v40  ;;  %v746_v43 = vpop.permute.xlu0 %745 }
  0x97   : > { %v752_v44 = vsel %vm751_vm5, %v746_v43, %v748_v39  ;;  %v848_v45 = vpop.permute.xlu1 %847  ;;  %3502 = vmatpush3.bf16.msra.mxu1 %v750_v41  ;;  %3503 = vmatprep.mubr.msk.bf16.mxu1 %vm3673_vm0, %v3672_v1 }
  0x98   : > { %3335 = vmatmul.mubr.msk.bf16.vlgmr.msra.gmra.mrb[12].mxu0 %vm347_vm2, %v634_v40  ;;  %3507 = vmatprep.subr.bf16.mxu1 %v3672_v1 }
  0x99   : > { %761 = vmatpush1.bf16.msra.mxu0 %v752_v44  ;;  %792 = vmatprep.mubr.bf16.mxu0 %v3671_v0  ;;  %v3361_v44 = vld [vmem:[%s4295_s4 + $0x28] sm:$0xff] }
  0x9a   : > { %v850_v47 = vpop.permute.xlu0 %849 }
  0x9b   : > { %v853_v49 = vsel %vm751_vm5, %v848_v45, %v850_v47  ;;  %v852_v50 = vpop.permute.xlu1 %851 }
  0x9c   : > { %v854_v51 = vsel %vm751_vm5, %v850_v47, %v852_v50  ;;  %v865_v52 = vsel %vm351_vm1, %v852_v50, 0  ;;  %v859_v53 = vsel %vm351_vm1, %v853_v49, 0  ;;  %v1473_v47 = vpack.c.bf16 %v3361_v44, %v3361_v44 }
  0x9d   : > { %3341 = vmatprep.subr.msk.bf16.mxu0 %vm351_vm1, %v854_v51 }
  0x9e   : > { %3504 = vmatmul.mubr.msk.bf16.vlgmr.msra.gmra.mrb[16].mxu1 %vm442_vm3, %v744_v48  ;;  %v957_v54 = vpop.permute.xlu0 %956 }
  0x9f   : > { %3508 = vmatpush3.bf16.msra.mxu1 %v865_v52  ;;  %3509 = vmatprep.mubr.msk.bf16.mxu1 %vm3673_vm0, %v3672_v1  ;;  %v959_v56 = vpop.permute.xlu1 %958  ;;  %v3365_v52 = vld [vmem:[%s4294_s3 + $0x30] sm:$0xff] }
  0xa0   : > { %3338 = vmatmul.mubr.msk.bf16.vlgmr.msra.gmra.mrb[16].mxu0 %vm442_vm3, %v744_v48  ;;  %v962_v57 = vsel %vm960_vm6, %v957_v54, %v959_v56  ;;  %3513 = vmatprep.subr.bf16.mxu1 %v3672_v1 }
  0xa1   : > { %868 = vmatpush1.bf16.msra.mxu0 %v859_v53  ;;  %899 = vmatprep.mubr.bf16.mxu0 %v3671_v0 }
  0xa2   : > { %v955_v59 = vpop.permute.xlu0 %954  ;;  %969 = vmatprep.subr.bf16.mxu0 %v962_v57 }
  0xa3   : > { %v1057_v60 = vpop.permute.xlu1 %1056  ;;  %v961_v61 = vsel %vm960_vm6, %v955_v59, %v957_v54  ;;  %v1580_v54 = vpack.c.bf16 %v3365_v52, %v3365_v52 }
  0xa6   : > { %3510 = vmatmul.mubr.msk.bf16.vlgmr.msra.gmra.mrb[20].mxu1 %vm347_vm2, %v846_v58  ;;  %v1059_v62 = vpop.permute.xlu0 %1058 }
  0xa7   : > { %3514 = vmatpush3.bf16.msra.mxu1 %v959_v56  ;;  %3515 = vmatprep.mubr.msk.bf16.mxu1 %vm3673_vm0, %v3672_v1  ;;  %v1061_v2 = vpop.permute.xlu1 %1060  ;;  %v1062_v6 = vsel %vm960_vm6, %v1057_v60, %v1059_v62  ;;  %v3368_v60 = vld [vmem:[%s4295_s4 + $0x30] sm:$0xff] }
  0xa8   : > { %3342 = vmatmul.mubr.msk.bf16.vlgmr.msra.gmra.mrb[20].mxu0 %vm347_vm2, %v846_v58  ;;  %v1063_v3 = vsel %vm960_vm6, %v1059_v62, %v1061_v2  ;;  %3519 = vmatprep.subr.bf16.mxu1 %v3672_v1  ;;  %v1074_v8 = vsel %vm351_vm1, %v1061_v2, 0  ;;  %v1068_v9 = vsel %vm351_vm1, %v1062_v6, 0  ;;  %v1682_v63 = vpack.c.bf16 %v3368_v60, %v3368_v60  ;;  %v3372_v6 = vld [vmem:[%s4294_s3 + $0x38] sm:$0xff] }
  0xa9   : > { %970 = vmatpush1.bf16.msra.mxu0 %v961_v61  ;;  %1001 = vmatprep.mubr.bf16.mxu0 %v3671_v0 }
  0xaa   : > { %3348 = vmatprep.subr.msk.bf16.mxu0 %vm351_vm1, %v1063_v3  ;;  %v1166_v5 = vpop.permute.xlu0 %1165 }
  0xab   : > { %v1168_v7 = vpop.permute.xlu1 %1167 }
  0xac   : > { %v1171_v12 = vsel %vm1169_vm7, %v1166_v5, %v1168_v7 }
  0xae   : > { %3516 = vmatmul.mubr.msk.bf16.vlgmr.msra.gmra.mrb[24].mxu1 %vm442_vm3, %v953_v4  ;;  %v1164_v10 = vpop.permute.xlu0 %1163 }
  0xaf   : > { %3520 = vmatpush3.bf16.msra.mxu1 %v1074_v8  ;;  %3521 = vmatprep.mubr.msk.bf16.mxu1 %vm3673_vm0, %v3672_v1  ;;  %v1266_v13 = vpop.permute.xlu1 %1265  ;;  %v1170_v17 = vsel %vm1169_vm7, %v1164_v10, %v1166_v5  ;;  %v1789_v8 = vpack.c.bf16 %v3372_v6, %v3372_v6 }
  0xb0   : > { %3345 = vmatmul.mubr.msk.bf16.vlgmr.msra.gmra.mrb[24].mxu0 %vm442_vm3, %v953_v4  ;;  %3525 = vmatprep.subr.bf16.mxu1 %v3672_v1 }
  0xb1   : > { %1077 = vmatpush1.bf16.msra.mxu0 %v1068_v9  ;;  %1108 = vmatprep.mubr.bf16.mxu0 %v3671_v0 }
  0xb2   : > { %1178 = vmatprep.subr.bf16.mxu0 %v1171_v12  ;;  %v1268_v15 = vpop.permute.xlu0 %1267 }
  0xb3   : > { %v1270_v16 = vpop.permute.xlu1 %1269  ;;  %v1271_v23 = vsel %vm1169_vm7, %v1266_v13, %v1268_v15 }
  0xb4   : > { %v1272_v20 = vsel %vm1169_vm7, %v1268_v15, %v1270_v16  ;;  %v1283_v24 = vsel %vm351_vm1, %v1270_v16, 0  ;;  %v1277_v27 = vsel %vm351_vm1, %v1271_v23, 0 }
  0xb6   : > { %3522 = vmatmul.mubr.msk.bf16.vlgmr.msra.gmra.mrb[28].mxu1 %vm347_vm2, %v1055_v14  ;;  %v1375_v18 = vpop.permute.xlu0 %1374 }
  0xb7   : > { %3526 = vmatpush3.bf16.msra.mxu1 %v1168_v7  ;;  %3527 = vmatprep.mubr.msk.bf16.mxu1 %vm3673_vm0, %v3672_v1  ;;  %v1377_v21 = vpop.permute.xlu1 %1376 }
  0xb8   : > { %3349 = vmatmul.mubr.msk.bf16.vlgmr.msra.gmra.mrb[28].mxu0 %vm347_vm2, %v1055_v14  ;;  %3531 = vmatprep.subr.bf16.mxu1 %v3672_v1  ;;  %v1380_v29 = vsel %vm1378_vm8, %v1375_v18, %v1377_v21 }
  0xb9   : > { %1179 = vmatpush1.bf16.msra.mxu0 %v1170_v17  ;;  %1210 = vmatprep.mubr.bf16.mxu0 %v3671_v0 }
  0xba   : > { %3355 = vmatprep.subr.msk.bf16.mxu0 %vm351_vm1, %v1272_v20  ;;  %v1373_v25 = vpop.permute.xlu0 %1372 }
  0xbb   : > { %v1475_v26 = vpop.permute.xlu1 %1474  ;;  %v1379_v33 = vsel %vm1378_vm8, %v1373_v25, %v1375_v18  ;;  %v3375_v18 = vld [vmem:[%s4295_s4 + $0x38] sm:$0xff] }
  0xbe   : > { %3528 = vmatmul.mubr.msk.bf16.vlgmr.msra.gmra.mrb[32].mxu1 %vm442_vm3, %v1162_v22  ;;  %v1477_v30 = vpop.permute.xlu0 %1476 }
  0xbf   : > { %3532 = vmatpush3.bf16.msra.mxu1 %v1283_v24  ;;  %3533 = vmatprep.mubr.msk.bf16.mxu1 %vm3673_vm0, %v3672_v1  ;;  %v1479_v32 = vpop.permute.xlu1 %1478  ;;  %v1480_v39 = vsel %vm1378_vm8, %v1475_v26, %v1477_v30  ;;  %v1891_v24 = vpack.c.bf16 %v3375_v18, %v3375_v18 }
  0xc0   : > { %3352 = vmatmul.mubr.msk.bf16.vlgmr.msra.gmra.mrb[32].mxu0 %vm442_vm3, %v1162_v22  ;;  %3537 = vmatprep.subr.bf16.mxu1 %v3672_v1  ;;  %v1481_v37 = vsel %vm1378_vm8, %v1477_v30, %v1479_v32  ;;  %v1492_v40 = vsel %vm351_vm1, %v1479_v32, 0  ;;  %v1486_v43 = vsel %vm351_vm1, %v1480_v39, 0 }
  0xc1   : > { %1286 = vmatpush1.bf16.msra.mxu0 %v1277_v27  ;;  %1317 = vmatprep.mubr.bf16.mxu0 %v3671_v0 }
  0xc2   : > { %1387 = vmatprep.subr.bf16.mxu0 %v1380_v29  ;;  %v1584_v34 = vpop.permute.xlu0 %1583 }
  0xc3   : > { %v1586_v35 = vpop.permute.xlu1 %1585 }
  0xc4   : > { %v1589_v45 = vsel %vm1587_vm9, %v1584_v34, %v1586_v35 }
  0xc6   : > { %3534 = vmatmul.mubr.msk.bf16.vlgmr.msra.gmra.mrb[36].mxu1 %vm347_vm2, %v1264_v31  ;;  %v1582_v41 = vpop.permute.xlu0 %1581 }
  0xc7   : > { %3538 = vmatpush3.bf16.msra.mxu1 %v1377_v21  ;;  %3539 = vmatprep.mubr.msk.bf16.mxu1 %vm3673_vm0, %v3672_v1  ;;  %v1684_v42 = vpop.permute.xlu1 %1683  ;;  %v1588_v49 = vsel %vm1587_vm9, %v1582_v41, %v1584_v34  ;;  %v3379_v34 = vld [vmem:[%s4294_s3 + $0x40] sm:$0xff] }
  0xc8   : > { %3356 = vmatmul.mubr.msk.bf16.vlgmr.msra.gmra.mrb[36].mxu0 %vm347_vm2, %v1264_v31  ;;  %3543 = vmatprep.subr.bf16.mxu1 %v3672_v1  ;;  %v1998_v41 = vpack.c.bf16 %v3379_v34, %v3379_v34 }
  0xc9   : > { %1388 = vmatpush1.bf16.msra.mxu0 %v1379_v33  ;;  %1419 = vmatprep.mubr.bf16.mxu0 %v3671_v0 }
  0xca   : > { %3362 = vmatprep.subr.msk.bf16.mxu0 %vm351_vm1, %v1481_v37  ;;  %v1686_v46 = vpop.permute.xlu0 %1685 }
  0xcb   : > { %v1688_v48 = vpop.permute.xlu1 %1687  ;;  %v1689_v55 = vsel %vm1587_vm9, %v1684_v42, %v1686_v46 }
  0xcc   : > { %v1690_v53 = vsel %vm1587_vm9, %v1686_v46, %v1688_v48  ;;  %v1701_v56 = vsel %vm351_vm1, %v1688_v48, 0  ;;  %v1695_v59 = vsel %vm351_vm1, %v1689_v55, 0 }
  0xce   : > { %3540 = vmatmul.mubr.msk.bf16.vlgmr.msra.gmra.mrb[40].mxu1 %vm442_vm3, %v1371_v38  ;;  %v1793_v50 = vpop.permute.xlu0 %1792 }
  0xcf   : > { %3544 = vmatpush3.bf16.msra.mxu1 %v1492_v40  ;;  %3545 = vmatprep.mubr.msk.bf16.mxu1 %vm3673_vm0, %v3672_v1  ;;  %v1795_v51 = vpop.permute.xlu1 %1794 }
  0xd0   : > { %3359 = vmatmul.mubr.msk.bf16.vlgmr.msra.gmra.mrb[40].mxu0 %vm442_vm3, %v1371_v38  ;;  %3549 = vmatprep.subr.bf16.mxu1 %v3672_v1  ;;  %v1798_v61 = vsel %vm1796_vm10, %v1793_v50, %v1795_v51 }
  0xd1   : > { %1495 = vmatpush1.bf16.msra.mxu0 %v1486_v43  ;;  %1526 = vmatprep.mubr.bf16.mxu0 %v3671_v0 }
  0xd2   : > { %1596 = vmatprep.subr.bf16.mxu0 %v1589_v45  ;;  %v1791_v57 = vpop.permute.xlu0 %1790  ;;  %v3382_v45 = vld [vmem:[%s4295_s4 + $0x40] sm:$0xff] }
  0xd3   : > { %v1893_v58 = vpop.permute.xlu1 %1892  ;;  %v1797_v3 = vsel %vm1796_vm10, %v1791_v57, %v1793_v50  ;;  %v2100_v46 = vpack.c.bf16 %v3382_v45, %v3382_v45 }
  0xd6   : > { %3546 = vmatmul.mubr.msk.bf16.vlgmr.msra.gmra.mrb[44].mxu1 %vm347_vm2, %v1473_v47  ;;  %v1895_v62 = vpop.permute.xlu0 %1894 }
  0xd7   : > { %3550 = vmatpush3.bf16.msra.mxu1 %v1586_v35  ;;  %3551 = vmatprep.mubr.msk.bf16.mxu1 %vm3673_vm0, %v3672_v1  ;;  %v1897_v2 = vpop.permute.xlu1 %1896  ;;  %v1898_v9 = vsel %vm1796_vm10, %v1893_v58, %v1895_v62 }
  0xd8   : > { %3363 = vmatmul.mubr.msk.bf16.vlgmr.msra.gmra.mrb[44].mxu0 %vm347_vm2, %v1473_v47  ;;  %3555 = vmatprep.subr.bf16.mxu1 %v3672_v1  ;;  %v1899_v7 = vsel %vm1796_vm10, %v1895_v62, %v1897_v2  ;;  %v1910_v10 = vsel %vm351_vm1, %v1897_v2, 0  ;;  %v1904_v15 = vsel %vm351_vm1, %v1898_v9, 0 }
  0xd9   : > { %1597 = vmatpush1.bf16.msra.mxu0 %v1588_v49  ;;  %1628 = vmatprep.mubr.bf16.mxu0 %v3671_v0 }
  0xda   : > { %3369 = vmatprep.subr.msk.bf16.mxu0 %vm351_vm1, %v1690_v53  ;;  %v2002_v4 = vpop.permute.xlu0 %2001 }
  0xdb   : > { %v2004_v5 = vpop.permute.xlu1 %2003 }
  0xdc   : > { %v2007_v19 = vsel %vm2005_vm11, %v2002_v4, %v2004_v5 }
  0xde   : > { %3552 = vmatmul.mubr.msk.bf16.vlgmr.msra.gmra.mrb[48].mxu1 %vm442_vm3, %v1580_v54  ;;  %v2000_v11 = vpop.permute.xlu0 %1999 }
  0xdf   : > { %3556 = vmatpush3.bf16.msra.mxu1 %v1701_v56  ;;  %3557 = vmatprep.mubr.msk.bf16.mxu1 %vm3673_vm0, %v3672_v1  ;;  %v2102_v12 = vpop.permute.xlu1 %2101  ;;  %v2006_v29 = vsel %vm2005_vm11, %v2000_v11, %v2002_v4 }
  0xe0   : > { %3366 = vmatmul.mubr.msk.bf16.vlgmr.msra.gmra.mrb[48].mxu0 %vm442_vm3, %v1580_v54  ;;  %3561 = vmatprep.subr.bf16.mxu1 %v3672_v1 }
  0xe1   : > { %1704 = vmatpush1.bf16.msra.mxu0 %v1695_v59  ;;  %1735 = vmatprep.mubr.bf16.mxu0 %v3671_v0 }
  0xe2   : > { %1805 = vmatprep.subr.bf16.mxu0 %v1798_v61  ;;  %v2104_v25 = vpop.permute.xlu0 %2103 }
  0xe3   : > { %v2106_v26 = vpop.permute.xlu1 %2105  ;;  %v2107_v42 = vsel %vm2005_vm11, %v2102_v12, %v2104_v25 }
  0xe4   : > { %v2108_v35 = vsel %vm2005_vm11, %v2104_v25, %v2106_v26  ;;  %v2119_v43 = vsel %vm351_vm1, %v2106_v26, 0  ;;  %v2113_v44 = vsel %vm351_vm1, %v2107_v42, 0 }
  0xe6   : > { %3558 = vmatmul.mubr.msk.bf16.vlgmr.msra.gmra.mrb[52].mxu1 %vm347_vm2, %v1682_v63 }
  0xe7   : > { %3562 = vmatpush3.bf16.msra.mxu1 %v1795_v51  ;;  %3563 = vmatprep.mubr.msk.bf16.mxu1 %vm3673_vm0, %v3672_v1 }
  0xe8   : > { %3370 = vmatmul.mubr.msk.bf16.vlgmr.msra.gmra.mrb[52].mxu0 %vm347_vm2, %v1682_v63  ;;  %3567 = vmatprep.subr.bf16.mxu1 %v3672_v1 }
  0xe9   : > { %1806 = vmatpush1.bf16.msra.mxu0 %v1797_v3  ;;  %1837 = vmatprep.mubr.bf16.mxu0 %v3671_v0 }
  0xea   : > { %3376 = vmatprep.subr.msk.bf16.mxu0 %vm351_vm1, %v1899_v7 }
  0xed   : > { %v395_v13 = vpop.f32.mrb[0].mxu0  ;;  %v436_v14 = vpop.f32.mrb[0].mxu1 }
  0xee   : > { %3564 = vmatmul.mubr.msk.bf16.vlgmr.msra.gmra.mrb[56].mxu1 %vm442_vm3, %v1789_v8  ;;  %v397_v16 = vpop.f32.mrb[1].mxu0  ;;  %v3481_v17 = vpop.f32.mrb[1].mxu1 }
  0xef   : > { %3568 = vmatpush3.bf16.msra.mxu1 %v1910_v10  ;;  %3569 = vmatprep.mubr.msk.bf16.mxu1 %vm3673_vm0, %v3672_v1  ;;  %v399_v20 = vpop.f32.mrb[2].mxu0  ;;  %v439_v21 = vpop.f32.mrb[2].mxu1 }
  0xf0   : > { %3373 = vmatmul.mubr.msk.bf16.vlgmr.msra.gmra.mrb[56].mxu0 %vm442_vm3, %v1789_v8  ;;  %3573 = vmatprep.subr.bf16.mxu1 %v3672_v1  ;;  %v400_v22 = vpop.f32.mrb[3].mxu0  ;;  %v3482_v23 = vpop.f32.mrb[3].mxu1 }
  0xf1   : > { %1913 = vmatpush1.bf16.msra.mxu0 %v1904_v15  ;;  %1944 = vmatprep.mubr.bf16.mxu0 %v3671_v0 }
  0xf2   : > { %2014 = vmatprep.subr.bf16.mxu0 %v2007_v19 }
  0xf5   : > { %v480_v27 = vpop.f32.mrb[4].mxu0  ;;  %v521_v28 = vpop.f32.mrb[4].mxu1 }
  0xf6   : > { %3570 = vmatmul.mubr.msk.bf16.vlgmr.msra.gmra.mrb[60].mxu1 %vm347_vm2, %v1891_v24  ;;  %v481_v30 = vadd.f32 %v480_v27, %v395_v13  ;;  %v482_v31 = vpop.f32.mrb[5].mxu0  ;;  %v522_v32 = vadd.f32 %v521_v28, %v436_v14  ;;  %v3487_v33 = vpop.f32.mrb[5].mxu1 }
  0xf7   : > { %3574 = vmatpush3.bf16.msra.mxu1 %v2004_v5  ;;  %3575 = vmatprep.mubr.msk.bf16.mxu1 %vm3673_vm0, %v3672_v1  ;;  %v483_v36 = vadd.f32 %v482_v31, %v397_v16  ;;  %v484_v37 = vpop.f32.mrb[6].mxu0  ;;  %v524_v38 = vpop.f32.mrb[6].mxu1 }
  0xf8   : > { %3377 = vmatmul.mubr.msk.bf16.vlgmr.msra.gmra.mrb[60].mxu0 %vm347_vm2, %v1891_v24  ;;  %3579 = vmatprep.subr.bf16.mxu1 %v3672_v1  ;;  %v485_v39 = vpop.f32.mrb[7].mxu0  ;;  %v3488_v40 = vpop.f32.mrb[7].mxu1 }
  0xf9   : > { %2015 = vmatpush1.bf16.msra.mxu0 %v2006_v29  ;;  %2046 = vmatprep.mubr.bf16.mxu0 %v3671_v0 }
  0xfa   : > { %3383 = vmatprep.subr.msk.bf16.mxu0 %vm351_vm1, %v2108_v35 }
  0xfe   : > { %3576 = vmatmul.mubr.msk.bf16.vlgmr.msra.gmra.mrb[64].mxu1 %vm442_vm3, %v1998_v41 }
  0xff   : > { %3580 = vmatpush3.bf16.msra.mxu1 %v2119_v43  ;;  %3581 = vmatprep.mubr.msk.bf16.mxu1 %vm3673_vm0, %v3672_v1 }
 0x100   : > { %3380 = vmatmul.mubr.msk.bf16.vlgmr.msra.gmra.mrb[64].mxu0 %vm442_vm3, %v1998_v41  ;;  %3585 = vmatprep.subr.bf16.mxu1 %v3672_v1 }
 0x101   : > { %2122 = vmatpush1.bf16.msra.mxu0 %v2113_v44  ;;  %2153 = vmatprep.mubr.bf16.mxu0 %v3671_v0 }
 0x106   : > { %3582 = vmatmul.mubr.msk.bf16.vlgmr.msra.gmra.mrb[68].mxu1 %vm347_vm2, %v2100_v46 }
 0x107   : > { %3587 = vmatprep.mubr.msk.bf16.mxu1 %vm3673_vm0, %v3672_v1 }
 0x108   : > { %3384 = vmatmul.mubr.msk.bf16.vlgmr.msra.gmra.mrb[68].mxu0 %vm347_vm2, %v2100_v46 }
 0x109   : > { %2325 = vmatprep.mubr.bf16.mxu0 %v3671_v0 }
 0x161   : > { %v623_v47 = vpop.f32.mrb[8].mxu1 }
 0x162   : > { %v631_v48 = vadd.f32 %v623_v47, %v522_v32  ;;  %v3493_v49 = vpop.f32.mrb[9].mxu1 }
 0x163   : > { %v582_v50 = vpop.f32.mrb[8].mxu0  ;;  %v626_v51 = vpop.f32.mrb[10].mxu1 }
 0x164   : > { %v629_v52 = vadd.f32 %v582_v50, %v481_v30  ;;  %v584_v53 = vpop.f32.mrb[9].mxu0  ;;  %v3494_v54 = vpop.f32.mrb[11].mxu1 }
 0x165   : > { %v630_v55 = vadd.f32 %v584_v53, %v483_v36  ;;  %v586_v56 = vpop.f32.mrb[10].mxu0 }
 0x166   : > { %v587_v57 = vpop.f32.mrb[11].mxu0 }
 0x169   : > { %v733_v58 = vpop.f32.mrb[12].mxu1 }
 0x16a   : > { %v741_v59 = vadd.f32 %v733_v58, %v631_v48  ;;  %v3499_v60 = vpop.f32.mrb[13].mxu1 }
 0x16b   : > { %v692_v61 = vpop.f32.mrb[12].mxu0  ;;  %v736_v62 = vpop.f32.mrb[14].mxu1 }
 0x16c   : > { %v739_v63 = vadd.f32 %v692_v61, %v629_v52  ;;  %v694_v2 = vpop.f32.mrb[13].mxu0  ;;  %v3500_v3 = vpop.f32.mrb[15].mxu1 }
 0x16d   : > { %v740_v4 = vadd.f32 %v694_v2, %v630_v55  ;;  %v696_v5 = vpop.f32.mrb[14].mxu0 }
 0x16e   : > { %v697_v6 = vpop.f32.mrb[15].mxu0 }
 0x171   : > { %v835_v7 = vpop.f32.mrb[16].mxu1 }
 0x172   : > { %v843_v8 = vadd.f32 %v835_v7, %v741_v59  ;;  %v3505_v9 = vpop.f32.mrb[17].mxu1 }
 0x173   : > { %v794_v10 = vpop.f32.mrb[16].mxu0  ;;  %v838_v11 = vpop.f32.mrb[18].mxu1 }
 0x174   : > { %v841_v12 = vadd.f32 %v794_v10, %v739_v63  ;;  %v796_v13 = vpop.f32.mrb[17].mxu0  ;;  %v3506_v14 = vpop.f32.mrb[19].mxu1 }
 0x175   : > { %v842_v15 = vadd.f32 %v796_v13, %v740_v4  ;;  %v798_v16 = vpop.f32.mrb[18].mxu0 }
 0x176   : > { %v799_v17 = vpop.f32.mrb[19].mxu0 }
 0x179   : > { %v942_v18 = vpop.f32.mrb[20].mxu1 }
 0x17a   : > { %v950_v19 = vadd.f32 %v942_v18, %v843_v8  ;;  %v3511_v20 = vpop.f32.mrb[21].mxu1 }
 0x17b   : > { %v901_v21 = vpop.f32.mrb[20].mxu0  ;;  %v945_v22 = vpop.f32.mrb[22].mxu1 }
 0x17c   : > { %v948_v23 = vadd.f32 %v901_v21, %v841_v12  ;;  %v903_v24 = vpop.f32.mrb[21].mxu0  ;;  %v3512_v25 = vpop.f32.mrb[23].mxu1 }
 0x17d   : > { %v949_v26 = vadd.f32 %v903_v24, %v842_v15  ;;  %v905_v27 = vpop.f32.mrb[22].mxu0 }
 0x17e   : > { %v906_v28 = vpop.f32.mrb[23].mxu0 }
 0x181   : > { %v1044_v29 = vpop.f32.mrb[24].mxu1 }
 0x182   : > { %v1052_v30 = vadd.f32 %v1044_v29, %v950_v19  ;;  %v3517_v31 = vpop.f32.mrb[25].mxu1 }
 0x183   : > { %v1003_v32 = vpop.f32.mrb[24].mxu0  ;;  %v1047_v33 = vpop.f32.mrb[26].mxu1 }
 0x184   : > { %v1050_v34 = vadd.f32 %v1003_v32, %v948_v23  ;;  %v1005_v35 = vpop.f32.mrb[25].mxu0  ;;  %v3518_v36 = vpop.f32.mrb[27].mxu1 }
 0x185   : > { %v1051_v37 = vadd.f32 %v1005_v35, %v949_v26  ;;  %v1007_v38 = vpop.f32.mrb[26].mxu0 }
 0x186   : > { %v1008_v39 = vpop.f32.mrb[27].mxu0 }
 0x189   : > { %v1151_v40 = vpop.f32.mrb[28].mxu1 }
 0x18a   : > { %v1159_v41 = vadd.f32 %v1151_v40, %v1052_v30  ;;  %v3523_v42 = vpop.f32.mrb[29].mxu1 }
 0x18b   : > { %v1110_v43 = vpop.f32.mrb[28].mxu0  ;;  %v1154_v44 = vpop.f32.mrb[30].mxu1 }
 0x18c   : > { %v1157_v45 = vadd.f32 %v1110_v43, %v1050_v34  ;;  %v1112_v46 = vpop.f32.mrb[29].mxu0  ;;  %v3524_v47 = vpop.f32.mrb[31].mxu1 }
 0x18d   : > { %v1158_v48 = vadd.f32 %v1112_v46, %v1051_v37  ;;  %v1114_v49 = vpop.f32.mrb[30].mxu0 }
 0x18e   : > { %v1115_v50 = vpop.f32.mrb[31].mxu0 }
 0x191   : > { %v1253_v51 = vpop.f32.mrb[32].mxu1 }
 0x192   : > { %v1261_v52 = vadd.f32 %v1253_v51, %v1159_v41  ;;  %v3529_v53 = vpop.f32.mrb[33].mxu1 }
 0x193   : > { %v1212_v54 = vpop.f32.mrb[32].mxu0  ;;  %v1256_v55 = vpop.f32.mrb[34].mxu1 }
 0x194   : > { %v1259_v56 = vadd.f32 %v1212_v54, %v1157_v45  ;;  %v1214_v57 = vpop.f32.mrb[33].mxu0  ;;  %v3530_v58 = vpop.f32.mrb[35].mxu1 }
 0x195   : > { %v1260_v59 = vadd.f32 %v1214_v57, %v1158_v48  ;;  %v1216_v60 = vpop.f32.mrb[34].mxu0 }
 0x196   : > { %v1217_v61 = vpop.f32.mrb[35].mxu0 }
 0x199   : > { %v1360_v62 = vpop.f32.mrb[36].mxu1 }
 0x19a   : > { %v1368_v63 = vadd.f32 %v1360_v62, %v1261_v52  ;;  %v3535_v2 = vpop.f32.mrb[37].mxu1 }
 0x19b   : > { %v1319_v3 = vpop.f32.mrb[36].mxu0  ;;  %v1363_v4 = vpop.f32.mrb[38].mxu1 }
 0x19c   : > { %v1366_v5 = vadd.f32 %v1319_v3, %v1259_v56  ;;  %v1321_v6 = vpop.f32.mrb[37].mxu0  ;;  %v3536_v7 = vpop.f32.mrb[39].mxu1 }
 0x19d   : > { %v1367_v8 = vadd.f32 %v1321_v6, %v1260_v59  ;;  %v1323_v9 = vpop.f32.mrb[38].mxu0 }
 0x19e   : > { %v1324_v10 = vpop.f32.mrb[39].mxu0 }
 0x1a1   : > { %v1462_v11 = vpop.f32.mrb[40].mxu1 }
 0x1a2   : > { %v1470_v12 = vadd.f32 %v1462_v11, %v1368_v63  ;;  %v3541_v13 = vpop.f32.mrb[41].mxu1 }
 0x1a3   : > { %v1421_v14 = vpop.f32.mrb[40].mxu0  ;;  %v1465_v15 = vpop.f32.mrb[42].mxu1 }
 0x1a4   : > { %v1468_v16 = vadd.f32 %v1421_v14, %v1366_v5  ;;  %v1423_v17 = vpop.f32.mrb[41].mxu0  ;;  %v3542_v18 = vpop.f32.mrb[43].mxu1  ;;  %v2218_v15 = vlaneseq }
 0x1a5   : > { %v1469_v19 = vadd.f32 %v1423_v17, %v1367_v8  ;;  %v1425_v20 = vpop.f32.mrb[42].mxu0 }
 0x1a6   : > { %v1426_v21 = vpop.f32.mrb[43].mxu0 }
 0x1a9   : > { %v1569_v22 = vpop.f32.mrb[44].mxu1 }
 0x1aa   : > { %v1577_v23 = vadd.f32 %v1569_v22, %v1470_v12  ;;  %v3547_v24 = vpop.f32.mrb[45].mxu1 }
 0x1ab   : > { %v1528_v25 = vpop.f32.mrb[44].mxu0  ;;  %v1572_v26 = vpop.f32.mrb[46].mxu1  ;;  %v2219_v24 = vshrl.u32 %v2218_v15, 7 }
 0x1ac   : > { %v1575_v27 = vadd.f32 %v1528_v25, %v1468_v16  ;;  %v1530_v28 = vpop.f32.mrb[45].mxu0  ;;  %v3548_v29 = vpop.f32.mrb[47].mxu1 }
 0x1ad   : > { %v1576_v30 = vadd.f32 %v1530_v28, %v1469_v19  ;;  %v1532_v31 = vpop.f32.mrb[46].mxu0  ;;  %v2228_v28 = vsub.s32 2, %v2219_v24 }
 0x1ae   : > { %v1533_v32 = vpop.f32.mrb[47].mxu0  ;;  %v327_v31 = vld [vmem:[%s4293_s2] sm:$0x7] }
 0x1b1   : > { %v1671_v33 = vpop.f32.mrb[48].mxu1 }
 0x1b2   : > { %v1679_v34 = vadd.f32 %v1671_v33, %v1577_v23  ;;  %v3553_v35 = vpop.f32.mrb[49].mxu1 }
 0x1b3   : > { %v1630_v36 = vpop.f32.mrb[48].mxu0  ;;  %v1674_v37 = vpop.f32.mrb[50].mxu1 }
 0x1b4   : > { %v1677_v38 = vadd.f32 %v1630_v36, %v1575_v27  ;;  %v1632_v39 = vpop.f32.mrb[49].mxu0  ;;  %v3554_v40 = vpop.f32.mrb[51].mxu1 }
 0x1b5   : > { %v1678_v41 = vadd.f32 %v1632_v39, %v1576_v30  ;;  %v1634_v42 = vpop.f32.mrb[50].mxu0  ;;  %v2209_v30 = vpop.permute.xlu0 %2208 }
 0x1b6   : > { %v1635_v43 = vpop.f32.mrb[51].mxu0 }
 0x1b9   : > { %v1778_v44 = vpop.f32.mrb[52].mxu1 }
 0x1ba   : > { %v1786_v45 = vadd.f32 %v1778_v44, %v1679_v34  ;;  %v3559_v46 = vpop.f32.mrb[53].mxu1  ;;  %v2220_v34 = vsub.s32 0, %v2219_v24 }
 0x1bb   : > { %v1737_v47 = vpop.f32.mrb[52].mxu0  ;;  %v1781_v48 = vpop.f32.mrb[54].mxu1 }
 0x1bc   : > { %v1784_v49 = vadd.f32 %v1737_v47, %v1677_v38  ;;  %v1739_v50 = vpop.f32.mrb[53].mxu0  ;;  %v3560_v51 = vpop.f32.mrb[55].mxu1  ;;  %v4101_v47 = vrot.slane %v327_v31, %v2220_v34  ;;  %v2224_v48 = vsub.s32 1, %v2219_v24 }
 0x1bd   : > { %v1785_v52 = vadd.f32 %v1739_v50, %v1678_v41  ;;  %v1741_v53 = vpop.f32.mrb[54].mxu0  ;;  %v4097_v41 = vrot.slane %v327_v31, %v2228_v28 }
 0x1be   : > { %v1742_v54 = vpop.f32.mrb[55].mxu0 }
 0x1bf   : > { %v4106_v54 = vrot.slane %v327_v31, %v2224_v48 }
 0x1c1   : > { %v1880_v55 = vpop.f32.mrb[56].mxu1 }
 0x1c2   : > { %v1888_v56 = vadd.f32 %v1880_v55, %v1786_v45  ;;  %v3565_v57 = vpop.f32.mrb[57].mxu1 }
 0x1c3   : > { %v1839_v58 = vpop.f32.mrb[56].mxu0  ;;  %v1883_v59 = vpop.f32.mrb[58].mxu1 }
 0x1c4   : > { %v1886_v60 = vadd.f32 %v1839_v58, %v1784_v49  ;;  %v1841_v61 = vpop.f32.mrb[57].mxu0  ;;  %v3566_v62 = vpop.f32.mrb[59].mxu1 }
 0x1c5   : > { %v1887_v63 = vadd.f32 %v1841_v61, %v1785_v52  ;;  %v1843_v2 = vpop.f32.mrb[58].mxu0 }
 0x1c6   : > { %v1844_v3 = vpop.f32.mrb[59].mxu0 }
 0x1c9   : > { %v1987_v4 = vpop.f32.mrb[60].mxu1 }
 0x1ca   : > { %v1995_v5 = vadd.f32 %v1987_v4, %v1888_v56  ;;  %v3571_v6 = vpop.f32.mrb[61].mxu1  ;;  %v3216_v4 = vld [vmem:[%s4298_s7] sm:$0xff] }
 0x1cb   : > { %v1946_v7 = vpop.f32.mrb[60].mxu0  ;;  %v1990_v8 = vpop.f32.mrb[62].mxu1 }
 0x1cc   : > { %v1993_v9 = vadd.f32 %v1946_v7, %v1886_v60  ;;  %v1948_v10 = vpop.f32.mrb[61].mxu0  ;;  %v3572_v11 = vpop.f32.mrb[63].mxu1  ;;  %v3386_v8 = vld [vmem:[%s4297_s6 + $0x8] sm:$0xff] }
 0x1cd   : > { %v1994_v12 = vadd.f32 %v1948_v10, %v1887_v63  ;;  %v1950_v13 = vpop.f32.mrb[62].mxu0 }
 0x1ce   : > { %v1951_v14 = vpop.f32.mrb[63].mxu0 }
 0x1cf   : > { %v2269_v14 = vpack.c.bf16 %v3386_v8, %v3386_v8 }
 0x1d1   : > { %v2089_v16 = vpop.f32.mrb[64].mxu1 }
 0x1d2   : > { %v2097_v17 = vadd.f32 %v2089_v16, %v1995_v5  ;;  %v3577_v18 = vpop.f32.mrb[65].mxu1 }
 0x1d3   : > { %v2048_v19 = vpop.f32.mrb[64].mxu0  ;;  %v2092_v20 = vpop.f32.mrb[66].mxu1 }
 0x1d4   : > { %v2095_v21 = vadd.f32 %v2048_v19, %v1993_v9  ;;  %v2050_v22 = vpop.f32.mrb[65].mxu0  ;;  %v3578_v23 = vpop.f32.mrb[67].mxu1  ;;  %v2262_v20 = vld [vmem:[%s4297_s6] sm:$0xff] }
 0x1d5   : > { %v2096_v25 = vadd.f32 %v2050_v22, %v1994_v12  ;;  %v2052_v26 = vpop.f32.mrb[66].mxu0  ;;  %v2263_v23 = vpack.c.bf16 %v2262_v20, %v2262_v20  ;;  %v3417_v20 = vld [vmem:[%s4297_s6 + $0x40] sm:$0xff] }
 0x1d6   : > { %v2053_v27 = vpop.f32.mrb[67].mxu0 }
 0x1d9   : > { %v2196_v29 = vpop.f32.mrb[68].mxu1 }
 0x1da   : > { %v2204_v32 = vadd.f32 %v2196_v29, %v2097_v17  ;;  %v3583_v33 = vpop.f32.mrb[69].mxu1 }
 0x1db   : > { %v2155_v35 = vpop.f32.mrb[68].mxu0  ;;  %v2199_v36 = vpop.f32.mrb[70].mxu1 }
 0x1dc   : > { %v2213_v37 = vadd.f32 %v2209_v30, %v2204_v32  ;;  %v2202_v38 = vadd.f32 %v2155_v35, %v2095_v21  ;;  %v2157_v39 = vpop.f32.mrb[69].mxu0  ;;  %v3584_v40 = vpop.f32.mrb[71].mxu1 }
 0x1dd   : > { %v2203_v42 = vadd.f32 %v2157_v39, %v2096_v25  ;;  %v2159_v43 = vpop.f32.mrb[70].mxu0 }
 0x1de   : > { %v2216_v44 = vmax.f32 %v2213_v37, 0.0  ;;  %v2211_v45 = vadd.f32 %v2209_v30, %v2202_v38  ;;  %v2160_v46 = vpop.f32.mrb[71].mxu0  ;;  %v3397_v38 = vld [vmem:[%s4297_s6 + $0x18] sm:$0xff] }
 0x1df   : > { %v2212_v49 = vadd.f32 %v2209_v30, %v2203_v42  ;;  %v3393_v30 = vld [vmem:[%s4297_s6 + $0x10] sm:$0xff]  ;;  %v2576_v42 = vpack.c.bf16 %v3397_v38, %v3397_v38 }
 0x1e0   : > { %v2214_v50 = vmax.f32 %v2211_v45, 0.0  ;;  %v2235_v51 = vmul.f32 %v4097_v41, %v2216_v44  ;;  %v2469_v32 = vpack.c.bf16 %v3393_v30, %v3393_v30 }
 0x1e1   : > { %v2215_v52 = vmax.f32 %v2212_v49, 0.0  ;;  %v3401_v49 = vld [vmem:[%s4297_s6 + $0x20] sm:$0xff] }
 0x1e2   : > { %2247 = vrot.lane.b32.xlu0 %v2235_v51, %s3682_s11  ;;  %v2233_v53 = vmul.f32 %v4101_v47, %v2214_v50 }
 0x1e3   : > { %v2234_v55 = vmul.f32 %v4106_v54, %v2215_v52  ;;  %v2683_v52 = vpack.c.bf16 %v3401_v49, %v3401_v49 }
 0x1e4   : > { %2243 = vrot.lane.b32.xlu1 %v2233_v53, %s3682_s11 }
 0x1e8   : > { %2245 = vrot.lane.b32.xlu1 %v2234_v55, %s3682_s11 }
 0x254   : > { %v2248_v57 = vpop.permute.xlu0 %2247 }
 0x256   : > { %v2244_v56 = vpop.permute.xlu1 %2243 }
 0x257   : > { %2255 = vst.msk [vmem:[#allocation2] sm:$0xff] %vm2254_vm14, %v2244_v56 }
 0x25a   : > { %v2246_v58 = vpop.permute.xlu1 %2245 }
 0x25b   : > { %v2249_v59 = vsel %vm2236_vm12, %v2244_v56, %v2246_v58  ;;  %v2250_v60 = vsel %vm2236_vm12, %v2246_v58, %v2248_v57 }
 0x25c   : > { %2258 = vst.msk [vmem:[#allocation2 + $0x10] sm:$0xff] %vm2257_vm15, %v2250_v60  ;;  %v2265_v61 = vpack.c.bf16 %v2249_v59, %v2249_v59  ;;  %v3405_v59 = vld [vmem:[%s4297_s6 + $0x28] sm:$0xff] }
 0x25e   : > { %v2259_v62 = vld [vmem:[#allocation2] sm:$0xff]  ;;  %2275 = vrot.lane.b32.xlu0 %v2265_v61, %s3674_s17 }
 0x25f   : > { %v2264_v63 = vpack.c.bf16 %v2259_v62, %v2259_v62 }
 0x261   : > { %2273 = vrot.lane.b32.xlu1 %v2264_v63, %s3674_s17  ;;  %v2378_v18 = vsel %vm351_vm1, %v2264_v63, 0 }
 0x262   : > { %2470 = vrot.lane.b32.xlu0 %v2264_v63, %s3675_s20 }
 0x263   : > { %v2261_v2 = vld [vmem:[#allocation2 + $0x10] sm:$0xff] }
 0x264   : > { %v2266_v3 = vpack.c.bf16 %v2261_v2, %v2261_v2 }
 0x266   : > { %2277 = vrot.lane.b32.xlu1 %v2266_v3, %s3674_s17  ;;  %2474 = vrot.lane.b32.xlu0 %v2266_v3, %s3675_s20  ;;  %v2384_v17 = vsel %vm351_vm1, %v2266_v3, 0 }
 0x26a   : > { %2472 = vrot.lane.b32.xlu1 %v2265_v61, %s3675_s20  ;;  %2579 = vrot.lane.b32.xlu0 %v2265_v61, %s3676_s21 }
 0x26e   : > { %2577 = vrot.lane.b32.xlu1 %v2264_v63, %s3676_s21  ;;  %2684 = vrot.lane.b32.xlu0 %v2264_v63, %s3677_s22 }
 0x272   : > { %2581 = vrot.lane.b32.xlu1 %v2266_v3, %s3676_s21  ;;  %2688 = vrot.lane.b32.xlu0 %v2266_v3, %s3677_s22 }
 0x276   : > { %2686 = vrot.lane.b32.xlu1 %v2265_v61, %s3677_s22  ;;  %2793 = vrot.lane.b32.xlu0 %v2265_v61, %s3678_s23 }
 0x27a   : > { %2791 = vrot.lane.b32.xlu1 %v2264_v63, %s3678_s23  ;;  %2898 = vrot.lane.b32.xlu0 %v2264_v63, %s3679_s24 }
 0x27e   : > { %2795 = vrot.lane.b32.xlu1 %v2266_v3, %s3678_s23  ;;  %2902 = vrot.lane.b32.xlu0 %v2266_v3, %s3679_s24  ;;  %s4267_s23 = scalar_lea.vmem %s4299_s8, %s3640_s30 }
 0x27f   : > { %3231 = vst.msk [vmem:[%s4267_s23] sm:$0xff] %vm2236_vm12, %v3672_v1 }
 0x280   : > { %3232 = vst.msk [vmem:[%s4267_s23 + $0x10] sm:$0xff] %vm2238_vm13, %v3672_v1 }
 0x282   : > { %2900 = vrot.lane.b32.xlu1 %v2265_v61, %s3679_s24  ;;  %3007 = vrot.lane.b32.xlu0 %v2265_v61, %s3680_s25 }
 0x286   : > { %3005 = vrot.lane.b32.xlu1 %v2264_v63, %s3680_s25  ;;  %3112 = vrot.lane.b32.xlu0 %v2264_v63, %s3681_s26 }
 0x28a   : > { %3009 = vrot.lane.b32.xlu1 %v2266_v3, %s3680_s25  ;;  %3116 = vrot.lane.b32.xlu0 %v2266_v3, %s3681_s26 }
 0x28e   : > { %3114 = vrot.lane.b32.xlu1 %v2265_v61, %s3681_s26 }
 0x292   : > { %3219 = vperm.xlu1 %3662, %v3216_v4  }
 0x2d0   : > { %v2276_v5 = vpop.permute.xlu0 %2275 }
 0x2d3   : > { %v2274_v6 = vpop.permute.xlu1 %2273 }
 0x2d4   : > { %v2471_v7 = vpop.permute.xlu0 %2470  ;;  %v2279_v9 = vsel %vm539_vm4, %v2274_v6, %v2276_v5 }
 0x2d5   : > { %v2285_v15 = vsel %vm351_vm1, %v2279_v9, 0 }
 0x2d8   : > { %v2278_v10 = vpop.permute.xlu1 %2277  ;;  %v2475_v11 = vpop.permute.xlu0 %2474 }
 0x2d9   : > { %v2280_v12 = vsel %vm539_vm4, %v2276_v5, %v2278_v10  ;;  %v2291_v13 = vsel %vm351_vm1, %v2278_v10, 0  ;;  %v2488_v27 = vsel %vm351_vm1, %v2475_v11, 0  ;;  %v3409_v5 = vld [vmem:[%s4297_s6 + $0x30] sm:$0xff] }
 0x2da   : > { %3387 = vmatprep.subr.msk.bf16.mxu0 %vm351_vm1, %v2280_v12  ;;  %3586 = vmatpush3.bf16.msra.mxu1 %v2291_v13  ;;  %v2897_v8 = vpack.c.bf16 %v3409_v5, %v3409_v5 }
 0x2db   : > { %2294 = vmatpush1.bf16.msra.mxu0 %v2285_v15  ;;  %3591 = vmatprep.subr.bf16.mxu1 %v3672_v1 }
 0x2dc   : > { %3390 = vmatprep.subr.msk.bf16.mxu0 %vm351_vm1, %v2265_v61  ;;  %v2473_v16 = vpop.permute.xlu1 %2472  ;;  %v2580_v19 = vpop.permute.xlu0 %2579  ;;  %v2790_v61 = vpack.c.bf16 %v3405_v59, %v3405_v59 }
 0x2dd   : > { %3588 = vmatmul.mubr.msk.bf16.vlgmr.msra.gmra.mrb[72].mxu1 %vm347_vm2, %v2269_v14  ;;  %v2477_v21 = vsel %vm751_vm5, %v2473_v16, %v2475_v11  ;;  %v2476_v24 = vsel %vm751_vm5, %v2471_v7, %v2473_v16 }
 0x2de   : > { %3388 = vmatmul.mubr.msk.bf16.vlgmr.msra.gmra.mrb[72].mxu0 %vm347_vm2, %v2269_v14  ;;  %3592 = vmatpush3.bf16.msra.mxu1 %v2384_v17  ;;  %v2482_v29 = vsel %vm351_vm1, %v2476_v24, 0  ;;  %v3413_v14 = vld [vmem:[%s4297_s6 + $0x38] sm:$0xff] }
 0x2df   : > { %2387 = vmatpush1.bf16.msra.mxu0 %v2378_v18  ;;  %3593 = vmatprep.mubr.msk.bf16.mxu1 %vm3673_vm0, %v3672_v1  ;;  %v3004_v16 = vpack.c.bf16 %v3413_v14, %v3413_v14 }
 0x2e0   : > { %v2578_v22 = vpop.permute.xlu1 %2577  ;;  %3394 = vmatprep.subr.msk.bf16.mxu0 %vm351_vm1, %v2477_v21  ;;  %3597 = vmatprep.subr.bf16.mxu1 %v3672_v1  ;;  %v2685_v26 = vpop.permute.xlu0 %2684  ;;  %v3111_v21 = vpack.c.bf16 %v3417_v20, %v3417_v20 }
 0x2e1   : > { %2418 = vmatprep.mubr.bf16.mxu0 %v3671_v0  ;;  %v2583_v34 = vsel %vm960_vm6, %v2578_v22, %v2580_v19 }
 0x2e2   : > { %v2589_v37 = vsel %vm351_vm1, %v2583_v34, 0 }
 0x2e4   : > { %v2582_v25 = vpop.permute.xlu1 %2581  ;;  %v2689_v33 = vpop.permute.xlu0 %2688 }
 0x2e5   : > { %v2584_v28 = vsel %vm960_vm6, %v2580_v19, %v2582_v25  ;;  %3594 = vmatmul.mubr.msk.bf16.vlgmr.msra.gmra.mrb[76].mxu1 %vm347_vm2, %v2263_v23  ;;  %v2595_v36 = vsel %vm351_vm1, %v2582_v25, 0  ;;  %v2702_v45 = vsel %vm351_vm1, %v2689_v33, 0 }
 0x2e6   : > { %3598 = vmatpush3.bf16.msra.mxu1 %v2488_v27  ;;  %3391 = vmatmul.mubr.msk.bf16.vlgmr.msra.gmra.mrb[76].mxu0 %vm347_vm2, %v2263_v23 }
 0x2e7   : > { %2491 = vmatpush1.bf16.msra.mxu0 %v2482_v29  ;;  %3599 = vmatprep.mubr.msk.bf16.mxu1 %vm3673_vm0, %v3672_v1 }
 0x2e8   : > { %3398 = vmatprep.subr.msk.bf16.mxu0 %vm351_vm1, %v2584_v28  ;;  %v2687_v31 = vpop.permute.xlu1 %2686  ;;  %3603 = vmatprep.subr.bf16.mxu1 %v3672_v1  ;;  %v2794_v40 = vpop.permute.xlu0 %2793 }
 0x2e9   : > { %2522 = vmatprep.mubr.bf16.mxu0 %v3671_v0  ;;  %v2691_v39 = vsel %vm1169_vm7, %v2687_v31, %v2689_v33  ;;  %v2690_v44 = vsel %vm1169_vm7, %v2685_v26, %v2687_v31 }
 0x2ea   : > { %v2696_v46 = vsel %vm351_vm1, %v2690_v44, 0 }
 0x2ec   : > { %v2792_v35 = vpop.permute.xlu1 %2791  ;;  %v2899_v48 = vpop.permute.xlu0 %2898 }
 0x2ed   : > { %3600 = vmatmul.mubr.msk.bf16.vlgmr.msra.gmra.mrb[80].mxu1 %vm347_vm2, %v2469_v32  ;;  %v2797_v53 = vsel %vm1378_vm8, %v2792_v35, %v2794_v40 }
 0x2ee   : > { %3604 = vmatpush3.bf16.msra.mxu1 %v2595_v36  ;;  %3395 = vmatmul.mubr.msk.bf16.vlgmr.msra.gmra.mrb[80].mxu0 %vm347_vm2, %v2469_v32  ;;  %v2803_v57 = vsel %vm351_vm1, %v2797_v53, 0 }
 0x2ef   : > { %2598 = vmatpush1.bf16.msra.mxu0 %v2589_v37  ;;  %3605 = vmatprep.mubr.msk.bf16.mxu1 %vm3673_vm0, %v3672_v1 }
 0x2f0   : > { %3402 = vmatprep.subr.msk.bf16.mxu0 %vm351_vm1, %v2691_v39  ;;  %3609 = vmatprep.subr.bf16.mxu1 %v3672_v1  ;;  %v2796_v43 = vpop.permute.xlu1 %2795  ;;  %v2903_v55 = vpop.permute.xlu0 %2902 }
 0x2f1   : > { %2629 = vmatprep.mubr.bf16.mxu0 %v3671_v0  ;;  %v2798_v50 = vsel %vm1378_vm8, %v2794_v40, %v2796_v43  ;;  %v2809_v56 = vsel %vm351_vm1, %v2796_v43, 0  ;;  %v2916_v3 = vsel %vm351_vm1, %v2903_v55, 0 }
 0x2f4   : > { %v2901_v51 = vpop.permute.xlu1 %2900  ;;  %v3008_v62 = vpop.permute.xlu0 %3007 }
 0x2f5   : > { %3606 = vmatmul.mubr.msk.bf16.vlgmr.msra.gmra.mrb[84].mxu1 %vm347_vm2, %v2576_v42  ;;  %v2905_v60 = vsel %vm1587_vm9, %v2901_v51, %v2903_v55  ;;  %v2904_v63 = vsel %vm1587_vm9, %v2899_v48, %v2901_v51 }
 0x2f6   : > { %3610 = vmatpush3.bf16.msra.mxu1 %v2702_v45  ;;  %3399 = vmatmul.mubr.msk.bf16.vlgmr.msra.gmra.mrb[84].mxu0 %vm347_vm2, %v2576_v42  ;;  %v2910_v4 = vsel %vm351_vm1, %v2904_v63, 0 }
 0x2f7   : > { %2705 = vmatpush1.bf16.msra.mxu0 %v2696_v46  ;;  %3611 = vmatprep.mubr.msk.bf16.mxu1 %vm3673_vm0, %v3672_v1 }
 0x2f8   : > { %3406 = vmatprep.subr.msk.bf16.mxu0 %vm351_vm1, %v2798_v50  ;;  %3615 = vmatprep.subr.bf16.mxu1 %v3672_v1  ;;  %v3006_v58 = vpop.permute.xlu1 %3005  ;;  %v3113_v7 = vpop.permute.xlu0 %3112 }
 0x2f9   : > { %2736 = vmatprep.mubr.bf16.mxu0 %v3671_v0  ;;  %v3011_v9 = vsel %vm1796_vm10, %v3006_v58, %v3008_v62 }
 0x2fa   : > { %v3017_v12 = vsel %vm351_vm1, %v3011_v9, 0 }
 0x2fc   : > { %v3010_v2 = vpop.permute.xlu1 %3009  ;;  %v3117_v13 = vpop.permute.xlu0 %3116 }
 0x2fd   : > { %3612 = vmatmul.mubr.msk.bf16.vlgmr.msra.gmra.mrb[88].mxu1 %vm347_vm2, %v2683_v52  ;;  %v3012_v6 = vsel %vm1796_vm10, %v3008_v62, %v3010_v2  ;;  %v3023_v11 = vsel %vm351_vm1, %v3010_v2, 0  ;;  %v3130_v18 = vsel %vm351_vm1, %v3117_v13, 0 }
 0x2fe   : > { %3616 = vmatpush3.bf16.msra.mxu1 %v2809_v56  ;;  %3403 = vmatmul.mubr.msk.bf16.vlgmr.msra.gmra.mrb[88].mxu0 %vm347_vm2, %v2683_v52 }
 0x2ff   : > { %2812 = vmatpush1.bf16.msra.mxu0 %v2803_v57  ;;  %3617 = vmatprep.mubr.msk.bf16.mxu1 %vm3673_vm0, %v3672_v1 }
 0x300   : > { %3410 = vmatprep.subr.msk.bf16.mxu0 %vm351_vm1, %v2905_v60  ;;  %3621 = vmatprep.subr.bf16.mxu1 %v3672_v1  ;;  %v3115_v10 = vpop.permute.xlu1 %3114 }
 0x301   : > { %2843 = vmatprep.mubr.bf16.mxu0 %v3671_v0  ;;  %v3119_v15 = vsel %vm2005_vm11, %v3115_v10, %v3117_v13  ;;  %v3118_v17 = vsel %vm2005_vm11, %v3113_v7, %v3115_v10 }
 0x302   : > { %v3124_v19 = vsel %vm351_vm1, %v3118_v17, 0 }
 0x305   : > { %3618 = vmatmul.mubr.msk.bf16.vlgmr.msra.gmra.mrb[92].mxu1 %vm347_vm2, %v2790_v61 }
 0x306   : > { %3622 = vmatpush3.bf16.msra.mxu1 %v2916_v3  ;;  %3407 = vmatmul.mubr.msk.bf16.vlgmr.msra.gmra.mrb[92].mxu0 %vm347_vm2, %v2790_v61 }
 0x307   : > { %2919 = vmatpush1.bf16.msra.mxu0 %v2910_v4  ;;  %3623 = vmatprep.mubr.msk.bf16.mxu1 %vm3673_vm0, %v3672_v1 }
 0x308   : > { %3414 = vmatprep.subr.msk.bf16.mxu0 %vm351_vm1, %v3012_v6  ;;  %3627 = vmatprep.subr.bf16.mxu1 %v3672_v1 }
 0x309   : > { %2950 = vmatprep.mubr.bf16.mxu0 %v3671_v0 }
 0x30d   : > { %3624 = vmatmul.mubr.msk.bf16.vlgmr.msra.gmra.mrb[96].mxu1 %vm347_vm2, %v2897_v8 }
 0x30e   : > { %3628 = vmatpush3.bf16.msra.mxu1 %v3023_v11  ;;  %3411 = vmatmul.mubr.msk.bf16.vlgmr.msra.gmra.mrb[96].mxu0 %vm347_vm2, %v2897_v8 }
 0x30f   : > { %3026 = vmatpush1.bf16.msra.mxu0 %v3017_v12  ;;  %3629 = vmatprep.mubr.msk.bf16.mxu1 %vm3673_vm0, %v3672_v1 }
 0x310   : > { %3418 = vmatprep.subr.msk.bf16.mxu0 %vm351_vm1, %v3119_v15  ;;  %3633 = vmatprep.subr.bf16.mxu1 %v3672_v1 }
 0x311   : > { %3057 = vmatprep.mubr.bf16.mxu0 %v3671_v0 }
 0x315   : > { %3630 = vmatmul.mubr.msk.bf16.vlgmr.msra.gmra.mrb[100].mxu1 %vm347_vm2, %v3004_v16 }
 0x316   : > { %3634 = vmatpush3.bf16.msra.mxu1 %v3130_v18  ;;  %3415 = vmatmul.mubr.msk.bf16.vlgmr.msra.gmra.mrb[100].mxu0 %vm347_vm2, %v3004_v16 }
 0x317   : > { %3133 = vmatpush1.bf16.msra.mxu0 %v3124_v19  ;;  %3635 = vmatprep.mubr.msk.bf16.mxu1 %vm3673_vm0, %v3672_v1 }
 0x318   : > { %3164 = vmatprep.mubr.bf16.mxu0 %v3671_v0 }
 0x31d   : > { %3636 = vmatmul.mubr.msk.bf16.vlgmr.msra.gmra.mrb[104].mxu1 %vm347_vm2, %v3111_v21 }
 0x31e   : > { %3419 = vmatmul.mubr.msk.bf16.vlgmr.msra.gmra.mrb[104].mxu0 %vm347_vm2, %v3111_v21 }
 0x3b0   : > { %v2368_v0 = vpop.f32.mrb[72].mxu1 }
 0x3b1   : > { %v2327_v22 = vpop.f32.mrb[72].mxu0  ;;  %v3589_v23 = vpop.f32.mrb[73].mxu1 }
 0x3b2   : > { %v2329_v24 = vpop.f32.mrb[73].mxu0  ;;  %v2371_v25 = vpop.f32.mrb[74].mxu1 }
 0x3b3   : > { %v2331_v26 = vpop.f32.mrb[74].mxu0  ;;  %v3590_v27 = vpop.f32.mrb[75].mxu1 }
 0x3b4   : > { %v2332_v28 = vpop.f32.mrb[75].mxu0 }
 0x3b8   : > { %v2461_v29 = vpop.f32.mrb[76].mxu1 }
 0x3b9   : > { %v2420_v30 = vpop.f32.mrb[76].mxu0  ;;  %v2462_v31 = vadd.f32 %v2461_v29, %v2368_v0  ;;  %v3595_v32 = vpop.f32.mrb[77].mxu1 }
 0x3ba   : > { %v2421_v33 = vadd.f32 %v2420_v30, %v2327_v22  ;;  %v2422_v34 = vpop.f32.mrb[77].mxu0  ;;  %v2464_v35 = vpop.f32.mrb[78].mxu1 }
 0x3bb   : > { %v2423_v36 = vadd.f32 %v2422_v34, %v2329_v24  ;;  %v2424_v37 = vpop.f32.mrb[78].mxu0  ;;  %v3596_v38 = vpop.f32.mrb[79].mxu1 }
 0x3bc   : > { %v2425_v39 = vpop.f32.mrb[79].mxu0 }
 0x3c0   : > { %v2565_v1 = vpop.f32.mrb[80].mxu1 }
 0x3c1   : > { %v2573_v40 = vadd.f32 %v2565_v1, %v2462_v31  ;;  %v2524_v42 = vpop.f32.mrb[80].mxu0  ;;  %v3601_v43 = vpop.f32.mrb[81].mxu1 }
 0x3c2   : > { %v2571_v44 = vadd.f32 %v2524_v42, %v2421_v33  ;;  %v2526_v45 = vpop.f32.mrb[81].mxu0  ;;  %v2568_v46 = vpop.f32.mrb[82].mxu1 }
 0x3c3   : > { %v2572_v48 = vadd.f32 %v2526_v45, %v2423_v36  ;;  %v2528_v49 = vpop.f32.mrb[82].mxu0  ;;  %v3602_v50 = vpop.f32.mrb[83].mxu1 }
 0x3c4   : > { %v2529_v51 = vpop.f32.mrb[83].mxu0  ;;  %v3220_v46 = vpop.permute.xlu1 %3219 }
 0x3c8   : > { %v2672_v52 = vpop.f32.mrb[84].mxu1 }
 0x3c9   : > { %v2680_v53 = vadd.f32 %v2672_v52, %v2573_v40  ;;  %v2631_v55 = vpop.f32.mrb[84].mxu0  ;;  %v3607_v56 = vpop.f32.mrb[85].mxu1 }
 0x3ca   : > { %v2678_v57 = vadd.f32 %v2631_v55, %v2571_v44  ;;  %v2633_v58 = vpop.f32.mrb[85].mxu0  ;;  %v2675_v59 = vpop.f32.mrb[86].mxu1 }
 0x3cb   : > { %v2679_v60 = vadd.f32 %v2633_v58, %v2572_v48  ;;  %v2635_v61 = vpop.f32.mrb[86].mxu0  ;;  %v3608_v62 = vpop.f32.mrb[87].mxu1 }
 0x3cc   : > { %v2636_v63 = vpop.f32.mrb[87].mxu0 }
 0x3d0   : > { %v2779_v2 = vpop.f32.mrb[88].mxu1 }
 0x3d1   : > { %v2787_v3 = vadd.f32 %v2779_v2, %v2680_v53  ;;  %v2738_v4 = vpop.f32.mrb[88].mxu0  ;;  %v3613_v5 = vpop.f32.mrb[89].mxu1 }
 0x3d2   : > { %v2785_v6 = vadd.f32 %v2738_v4, %v2678_v57  ;;  %v2740_v7 = vpop.f32.mrb[89].mxu0  ;;  %v2782_v8 = vpop.f32.mrb[90].mxu1 }
 0x3d3   : > { %v2786_v9 = vadd.f32 %v2740_v7, %v2679_v60  ;;  %v2742_v10 = vpop.f32.mrb[90].mxu0  ;;  %v3614_v11 = vpop.f32.mrb[91].mxu1 }
 0x3d4   : > { %v2743_v12 = vpop.f32.mrb[91].mxu0 }
 0x3d8   : > { %v2886_v13 = vpop.f32.mrb[92].mxu1 }
 0x3d9   : > { %v2894_v14 = vadd.f32 %v2886_v13, %v2787_v3  ;;  %v2845_v15 = vpop.f32.mrb[92].mxu0  ;;  %v3619_v16 = vpop.f32.mrb[93].mxu1 }
 0x3da   : > { %v2892_v17 = vadd.f32 %v2845_v15, %v2785_v6  ;;  %v2847_v18 = vpop.f32.mrb[93].mxu0  ;;  %v2889_v19 = vpop.f32.mrb[94].mxu1 }
 0x3db   : > { %v2893_v20 = vadd.f32 %v2847_v18, %v2786_v9  ;;  %v2849_v21 = vpop.f32.mrb[94].mxu0  ;;  %v3620_v0 = vpop.f32.mrb[95].mxu1 }
 0x3dc   : > { %v2850_v22 = vpop.f32.mrb[95].mxu0 }
 0x3e0   : > { %v2993_v23 = vpop.f32.mrb[96].mxu1 }
 0x3e1   : > { %v3001_v24 = vadd.f32 %v2993_v23, %v2894_v14  ;;  %v2952_v25 = vpop.f32.mrb[96].mxu0  ;;  %v3625_v26 = vpop.f32.mrb[97].mxu1 }
 0x3e2   : > { %v2999_v27 = vadd.f32 %v2952_v25, %v2892_v17  ;;  %v2954_v28 = vpop.f32.mrb[97].mxu0  ;;  %v2996_v29 = vpop.f32.mrb[98].mxu1 }
 0x3e3   : > { %v3000_v30 = vadd.f32 %v2954_v28, %v2893_v20  ;;  %v2956_v31 = vpop.f32.mrb[98].mxu0  ;;  %v3626_v32 = vpop.f32.mrb[99].mxu1 }
 0x3e4   : > { %v2957_v33 = vpop.f32.mrb[99].mxu0 }
 0x3e8   : > { %v3100_v34 = vpop.f32.mrb[100].mxu1 }
 0x3e9   : > { %v3108_v35 = vadd.f32 %v3100_v34, %v3001_v24  ;;  %v3059_v36 = vpop.f32.mrb[100].mxu0  ;;  %v3631_v37 = vpop.f32.mrb[101].mxu1 }
 0x3ea   : > { %v3106_v38 = vadd.f32 %v3059_v36, %v2999_v27  ;;  %v3061_v39 = vpop.f32.mrb[101].mxu0  ;;  %v3103_v1 = vpop.f32.mrb[102].mxu1 }
 0x3eb   : > { %v3107_v40 = vadd.f32 %v3061_v39, %v3000_v30  ;;  %v3063_v42 = vpop.f32.mrb[102].mxu0  ;;  %v3632_v43 = vpop.f32.mrb[103].mxu1 }
 0x3ec   : > { %v3064_v44 = vpop.f32.mrb[103].mxu0 }
 0x3f0   : > { %v3207_v45 = vpop.f32.mrb[104].mxu1 }
 0x3f1   : > { %v3215_v48 = vadd.f32 %v3207_v45, %v3108_v35  ;;  %v3166_v49 = vpop.f32.mrb[104].mxu0  ;;  %v3637_v50 = vpop.f32.mrb[105].mxu1 }
 0x3f2   : > { %v3213_v51 = vadd.f32 %v3166_v49, %v3106_v38  ;;  %v3168_v52 = vpop.f32.mrb[105].mxu0  ;;  %v3210_v53 = vpop.f32.mrb[106].mxu1 }
 0x3f3   : > { %v3214_v55 = vadd.f32 %v3168_v52, %v3107_v40  ;;  %v3170_v56 = vpop.f32.mrb[106].mxu0  ;;  %v3638_v57 = vpop.f32.mrb[107].mxu1  ;;  %v3224_v59 = vadd.f32 %v3220_v46, %v3215_v48 }
 0x3f4   : > { %v3222_v58 = vadd.f32 %v3220_v46, %v3213_v51  ;;  %v3171_v60 = vpop.f32.mrb[107].mxu0 }
 0x3f5   : > { %v3223_v61 = vadd.f32 %v3220_v46, %v3214_v55  ;;  %v3227_v2 = vmax.f32 %v3224_v59, 0.0 }
 0x3f6   : > { %v3225_v62 = vmax.f32 %v3222_v58, 0.0 }
 0x3f7   : > { %v3226_v63 = vmax.f32 %v3223_v61, 0.0  ;;  %v3230_v5 = vmul.f32 %v3227_v2, %v4097_v41 }
 0x3f8   : > { %v3228_v3 = vmul.f32 %v3225_v62, %v4101_v47 }
 0x3f9   : > { %v3229_v4 = vmul.f32 %v3226_v63, %v4106_v54 }
 0x3fa   : > { %3236 = vrot.lane.b32.xlu0 %v3228_v3, %s3682_s11 }
 0x3fb   : > { %3238 = vrot.lane.b32.xlu1 %v3229_v4, %s3682_s11 }
 0x3fe   : > { %3240 = vrot.lane.b32.xlu0 %v3230_v5, %s3682_s11 }
 0x46c   : > { %v3237_v6 = vpop.permute.xlu0 %3236 }
 0x46d   : > { %3247 = vst.msk [vmem:[%s4267_s23] sm:$0xff] %vm2254_vm14, %v3237_v6  ;;  %v3239_v7 = vpop.permute.xlu1 %3238 }
 0x46e   : > { %v3242_v8 = vsel %vm2236_vm12, %v3237_v6, %v3239_v7 }
 0x46f   : > { %3248 = vst [vmem:[%s4267_s23 + $0x8] sm:$0xff] %v3242_v8 }
 0x470   : > { %v3241_v9 = vpop.permute.xlu0 %3240 }
 0x471   : > { %v3243_v47 = vsel %vm2236_vm12, %v3239_v7, %v3241_v9 }
 0x472   : > { %3249 = vst.msk [vmem:[%s4267_s23 + $0x10] sm:$0xff] %vm2257_vm15, %v3243_v47 }
 0x473 PF: > { %s18_s27 = sadd.s32 1, %s3669_s27  }
 0x474   : > { %p15_p4 = scmp.ge.s32.totalorder %s18_s27, 4  }
 0x476   :  { %17 = sbr.rel (!%p15_p4) target bundleno = 1 (0x1), region = 109 }

// kernel: score_residue_u_loss_forward.15
= control target key start
LH: loop header
LB: loop body
LE: loop exit
PB: predicated region body
PF: predicated region fallthrough
CT: control target
= control target key end

     0   :  { %12 = vsyncpa [#allocation4], 0  ;;  %s750_s24 = smov 0   ;;  %s824_s0 = inlined_call_operand.vmem [shape: f32[2,8,324], index: 0, kind: input, shape index: {}]   ;;  %s825_s1 = inlined_call_operand.vmem [shape: f32[2,3,324], index: 1, kind: input, shape index: {}]   ;;  %s826_s2 = inlined_call_operand.vmem [shape: f32[1,324], index: 2, kind: input, shape index: {}]   ;;  %s827_s3 = inlined_call_operand.vmem [shape: f32[3,8], index: 3, kind: input, shape index: {}]   ;;  %s828_s4 = inlined_call_operand.vmem [shape: f32[3,1], index: 4, kind: input, shape index: {}]   ;;  %s829_s5 = inlined_call_operand.vmem [shape: f32[3,1], index: 5, kind: input, shape index: {}]   ;;  %s830_s6 = inlined_call_operand.vmem [shape: f32[2,3,324], index: 6, kind: input, shape index: {}]   ;;  %s831_s7 = inlined_call_operand.hbm [shape: f32[1,1], index: 7, kind: output, shape index: {}]  }
   0x1 LB: > { %s756_s25 = sadd.s32 4294967295, %s703_s24   ;;  %p609_p0 = scmp.ge.s32.totalorder %s703_s24, 1  ;;  %s703_s24 = sphi %s750_s24, %s18_s24  }
   0x2   : > { %p253_p1 = scmp.lt.s32.totalorder %s703_s24, 3 }
   0x4   : > { %p254_p2 = pnand %p609_p0, %p253_p1 }
   0x5   : > { %p290_p3 = scmp.lt.s32.totalorder (!%p254_p2), %s756_s25, 1  ;;  %p613_p4 = scmp.ne.s32.totalorder (!%p254_p2), %s756_s25, 0 }
   0x6   : > { %257 = sbr.rel (%p254_p2) target bundleno = 536 (0x218), region = 48 }
   0xd   : > { %s291_s26 = scalar_select %p290_p3, %s756_s25, 1 }
   0xe   : > { %309 = sbr.rel (%p613_p4) target bundleno = 21 (0x15), region = 52  ;;  %vm311_vm0 = vcmask (!%p613_p4), 550912   ;;  %v705_v0 = vmov (!%p613_p4), 0.0  }
   0xf   : > { %s630_s27 = smul.u32 24, %s291_s26  ;;  %310 = vst [vmem:[#allocation2] sm:$0x77] (!%p613_p4), %v705_v0  ;;  %312 = vst.msk [vmem:[#allocation2 + $0x8] sm:$0x7] (!%p613_p4), %vm311_vm0, %v705_v0 }
  0x10   : > { %s631_s28 = smul.u32 12, %s291_s26 }
  0x11   : > { %s294_s8 = scalar_lea.vmem %s824_s0, %s630_s27 }
  0x12   : > { %s768_s11 = scalar_lea.vmem %s825_s1, %s631_s28  ;;  %s773_s14 = scalar_lea.vmem %s830_s6, %s631_s28 }
  0x15 PF: > { %v314_v1 = vld [vmem:[%s294_s8 + $0x8] sm:$0xff]  ;;  %vm331_vm1 = vcmask 1043456   ;;  %v313_v2 = vld [vmem:[%s294_s8] sm:$0xff]  ;;  %v315_v3 = vld [vmem:[%s294_s8 + $0x10] sm:$0xff]  ;;  %v706_v5 = vmov 0.0   ;;  %v707_v8 = vmov 0   ;;  %v481_v48 = vlaneseq }
  0x16   : > { %v317_v4 = vpack.c.bf16 %v314_v1, %v314_v1  ;;  %624 = vmatprep.subr.bf16.mxu1 %v706_v5  ;;  %v316_v6 = vpack.c.bf16 %v313_v2, %v313_v2  ;;  %v318_v7 = vpack.c.bf16 %v315_v3, %v315_v3  ;;  %373 = vmatprep.mubr.bf16.mxu0 %v707_v8  ;;  %v319_v9 = vld [vmem:[%s827_s3] sm:$0x7]  ;;  %vm708_vm2 = vmmov 0   ;;  %v423_v19 = vld [vmem:[%s773_s14 + $0x8] sm:$0x7]  ;;  %p617_p5 = scmp.ne.s32.totalorder %s756_s25, 1 }
  0x17   : > { %v321_v10 = vld [vmem:[%s828_s4] sm:$0x7]  ;;  %626 = vmatprep.mubr.msk.bf16.mxu1 %vm708_vm2, %v706_v5  ;;  %653 = vset.pattern.permute.xlu0 %v707_v8  ;;  %v320_v13 = vpack.c.bf16 %v319_v9, %v319_v9  ;;  %vm327_vm3 = vcmask 64512   ;;  %v431_v50 = vld [vmem:[%s768_s11 + $0x8] sm:$0x7]  ;;  %v482_v51 = vshrl.u32 %v481_v48, 7 }
  0x18   : > { %614 = vmatprep.subr.msk.bf16.mxu0 %vm331_vm1, %v317_v4  ;;  %v333_v11 = vsel %vm331_vm1, %v316_v6, 0  ;;  %v339_v12 = vsel %vm331_vm1, %v318_v7, 0  ;;  %324 = vperm.xlu0 %653, %v321_v10   ;;  %v470_v14 = vld [vmem:[%s829_s5] sm:$0x7]  ;;  %vm506_vm4 = vcmask 550912   ;;  %vm517_vm5 = vcmask (!%p617_p5), 1042432  }
  0x19   : > { %342 = vmatpush1.bf16.msra.mxu0 %v333_v11  ;;  %625 = vmatpush3.bf16.msra.mxu1 %v339_v12  ;;  %v422_v15 = vld [vmem:[%s773_s14] sm:$0x77]  ;;  %v483_v57 = vsub.s32 0, %v482_v51  ;;  %v491_v62 = vsub.s32 2, %v482_v51  ;;  %v487_v0 = vsub.s32 1, %v482_v51  ;;  %vm534_vm6 = vcmask (!%p617_p5), 0  }
  0x1a   : > { %v425_v20 = vcombine.high %v422_v15, %v422_v15  ;;  %v430_v49 = vld [vmem:[%s768_s11] sm:$0x77] }
  0x1b   : > { %v436_v52 = vcombine.high %v430_v49, %v430_v49  ;;  %v479_v61 = vld [vmem:[%s826_s2] sm:$0x7] }
  0x1c   : > { %615 = vmatmul.mubr.msk.bf16.vlgmr.msra.gmra.mrb[0].mxu0 %vm327_vm3, %v320_v13  ;;  %627 = vmatmul.mubr.msk.bf16.vlgmr.msra.gmra.mrb[0].mxu1 %vm327_vm3, %v320_v13  ;;  %v484_v6 = vrot.slane %v479_v61, %v483_v57  ;;  %v492_v10 = vrot.slane %v479_v61, %v491_v62  ;;  %v488_v13 = vrot.slane %v479_v61, %v487_v0 }
  0x1d   : > { %473 = vperm.xlu0 %653, %v470_v14  }
  0x97   : > { %v325_v16 = vpop.permute.xlu0 %324 }
  0x9c   : > { %v474_v11 = vpop.permute.xlu0 %473 }
  0xef   : > { %v375_v17 = vpop.f32.mrb[0].mxu0  ;;  %v416_v18 = vpop.f32.mrb[0].mxu1 }
  0xf0   : > { %v376_v21 = vadd.f32 %v375_v17, %v325_v16  ;;  %v417_v22 = vadd.f32 %v416_v18, %v325_v16  ;;  %v377_v23 = vpop.f32.mrb[1].mxu0  ;;  %v628_v24 = vpop.f32.mrb[1].mxu1  ;;  %v469_v17 = vld [vmem:[#allocation2 + $0x8] sm:$0x7] }
  0xf1   : > { %v378_v25 = vadd.f32 %v377_v23, %v325_v16  ;;  %v379_v26 = vpop.f32.mrb[2].mxu0  ;;  %v419_v27 = vpop.f32.mrb[2].mxu1  ;;  %v468_v23 = vld [vmem:[#allocation2] sm:$0x77] }
  0xf2   : > { %v427_v28 = vadd.f32 %v422_v15, %v376_v21  ;;  %v429_v29 = vadd.f32 %v423_v19, %v417_v22  ;;  %v380_v30 = vpop.f32.mrb[3].mxu0  ;;  %v629_v31 = vpop.f32.mrb[3].mxu1 }
  0xf3   : > { %v428_v32 = vadd.f32 %v425_v20, %v378_v25 }
  0xf4   : > { %v444_v33 = vand.u32 2147483647, %v427_v28  ;;  %v446_v34 = vand.u32 2147483647, %v429_v29  ;;  %v432_v53 = vmax.f32 %v427_v28, 0.0  ;;  %v438_v54 = vmul.f32 %v430_v49, %v427_v28 }
  0xf5   : > { %v445_v36 = vand.u32 2147483647, %v428_v32  ;;  %v434_v55 = vmax.f32 %v429_v29, 0.0  ;;  %v440_v56 = vmul.f32 %v431_v50, %v429_v29  ;;  %v433_v58 = vmax.f32 %v428_v32, 0.0 }
  0xf6   : > { %v447_v35 = vsub.f32 0.0, %v444_v33  ;;  %v449_v37 = vsub.f32 0.0, %v446_v34  ;;  %v439_v59 = vmul.f32 %v436_v52, %v428_v32  ;;  %v441_v1 = vsub.f32 %v432_v53, %v438_v54 }
  0xf7   : > { %v448_v39 = vsub.f32 0.0, %v445_v36  ;;  %v443_v4 = vsub.f32 %v434_v55, %v440_v56 }
  0xf8   : > { %v450_v38 = vmul.f32 1.442695, %v447_v35  ;;  %v454_v40 = vmul.f32 1.442695, %v449_v37  ;;  %v442_v8 = vsub.f32 %v433_v58, %v439_v59 }
  0xf9   : > { %v452_v41 = vmul.f32 1.442695, %v448_v39 }
  0xfa   : > { %654 = vpow2.f32 %v450_v38 }
  0xfb   : > { %656 = vpow2.f32 %v454_v40 }
  0xfc   : > { %658 = vpow2.f32 %v452_v41 }
 0x104   : > { %v655_v42 = vpop.eup %654 }
 0x105   : > { %v657_v43 = vpop.eup %656  ;;  %v456_v44 = vadd.f32 1.0, %v655_v42 }
 0x106   : > { %v659_v45 = vpop.eup %658  ;;  %v458_v46 = vadd.f32 1.0, %v657_v43 }
 0x107   : > { %660 = vlog2.f32 %v456_v44  ;;  %v457_v47 = vadd.f32 1.0, %v659_v45 }
 0x108   : > { %662 = vlog2.f32 %v458_v46 }
 0x109   : > { %664 = vlog2.f32 %v457_v47 }
 0x111   : > { %v661_v60 = vpop.eup %660 }
 0x112   : > { %v663_v63 = vpop.eup %662  ;;  %v460_v2 = vmul.f32 0.6931472, %v661_v60 }
 0x113   : > { %v665_v3 = vpop.eup %664  ;;  %v464_v5 = vmul.f32 0.6931472, %v663_v63 }
 0x114   : > { %v465_v7 = vadd.f32 %v460_v2, %v441_v1  ;;  %v462_v9 = vmul.f32 0.6931472, %v665_v3 }
 0x115   : > { %v467_v12 = vadd.f32 %v464_v5, %v443_v4 }
 0x116   : > { %v476_v14 = vmul.f32 %v474_v11, %v465_v7  ;;  %v466_v15 = vadd.f32 %v462_v9, %v442_v8 }
 0x117   : > { %v478_v16 = vmul.f32 %v474_v11, %v467_v12 }
 0x118   : > { %v496_v18 = vmul.f32 %v484_v6, %v476_v14  ;;  %v477_v19 = vmul.f32 %v474_v11, %v466_v15 }
 0x119   : > { %v498_v20 = vmul.f32 %v492_v10, %v478_v16 }
 0x11a   : > { %v497_v21 = vmul.f32 %v488_v13, %v477_v19  ;;  %511 = sbr.rel (%p617_p5) target bundleno = 511 (0x1ff), region = 56 }
 0x11b   : > { %v504_v22 = vadd.f32 %v498_v20, %v469_v17 }
 0x11c   : > { %v501_v24 = vcombine.low %v496_v18, %v497_v21 }
 0x11d   : > { %507 = vst.msk [vmem:[#allocation2 + $0x8] sm:$0x7] %vm506_vm4, %v504_v22 }
 0x11e   : > { %v503_v25 = vadd.f32 %v501_v24, %v468_v23 }
 0x120   : > { %505 = vst [vmem:[#allocation2] sm:$0x77] %v503_v25 }
 0x124   : > { %v513_v27 = vld [vmem:[#allocation2 + $0x8] sm:$0x7] }
 0x125   : > { %v521_v31 = vsel %vm506_vm4, %v513_v27, 0.0 }
 0x127   : > { %v512_v26 = vld [vmem:[#allocation2] sm:$0x77] }
 0x128   : > { %v515_v28 = vcombine.high %v512_v26, %v512_v26  ;;  %v518_v29 = vsel %vm517_vm5, %v512_v26, 0.0 }
 0x12a   : > { %v519_v30 = vsel %vm517_vm5, %v515_v28, 0.0 }
 0x12b   : > { %v520_v32 = vadd.f32 %v519_v30, %v518_v29 }
 0x12d   : > { %v522_v33 = vadd.f32 %v521_v31, %v520_v32 }
 0x12f   : > { %523 = vadd.xlane.f32.xlu0 %v522_v33 }
 0x1bc   : > { %v524_v34 = vpop.xlane.xlu0 %523 }
 0x1bd   : > { %v525_v35 = vrot.slane %v524_v34, 4 }
 0x1bf   : > { %v526_v36 = vadd.f32 %v525_v35, %v524_v34 }
 0x1c1   : > { %v527_v37 = vrot.slane %v526_v36, 2 }
 0x1c3   : > { %v528_v38 = vadd.f32 %v527_v37, %v526_v36 }
 0x1c5   : > { %v529_v39 = vrot.slane %v528_v38, 1 }
 0x1c7   : > { %v530_v40 = vadd.f32 %v529_v39, %v528_v38 }
 0x1c9   : > { %632 = vpush %v530_v40 }
 0x1fa   : > { %s633_s23 = spop %632 }
 0x1fb   : > { %v532_v41 = vstv %s633_s23 }
 0x1fc   : > { %v533_v42 = vmul.f32 0.0006510417, %v532_v41 }
 0x1fe   : > { %535 = vst.msk [vmem:[#allocation3] sm:$0x1] %vm534_vm6, %v533_v42 }
 0x1ff PF: > { %p638_p6 = scmp.eq.s32.totalorder %s756_s25, 1  ;;  %s709_s26 = smov [#allocation3]  }
 0x200   : > { %s543_s27 = sshll.u32 %s709_s26, 4  ;;  %s544_s27 = int_to_ptr.vmem [resolvable:$true] %s543_s27 }
 0x201   : > { %s667_s28 = scalar_lea.vmem %s544_s27, 16  ;;  %s673_s29 = scalar_lea.vmem %s544_s27, 32 }
 0x202   : > { %p668_p7 = scmp.ne.s32.totalorder %s544_s27, %s667_s28  ;;  %p674_p10 = scmp.lt.s32.totalorder %s544_s27, %s544_s27 }
 0x203   : > { %p675_p11 = scmp.lt.s32.totalorder %s673_s29, %s667_s28 }
 0x204   : > { %p669_p8 = pnand %p668_p7, %p638_p6 }
 0x205   : > { %p676_p12 = por %p675_p11, %p674_p10 }
 0x206   : > { %p670_p9 = pneg %p669_p8 }
 0x208   : > { %p677_p13 = pnand %p676_p12, %p670_p9 }
 0x20a   : > { %680 = shalt.err (!%p677_p13)
}
 0x20b   : > { %s681_s9 = scalar_lea.hbm %s831_s7, 16 }
 0x20c   : > { %p682_p0 = scmp.ne.s32.totalorder %s831_s7, %s681_s9  ;;  %p687_p3 = scmp.lt.u32.totalorder %s681_s9, %s831_s7 }
 0x20e   : > { %p683_p1 = pnand %p682_p0, %p638_p6 }
 0x210   : > { %p684_p2 = pneg %p683_p1 }
 0x212   : > { %p689_p4 = pnand %p687_p3, %p684_p2 }
 0x214   : > { %692 = shalt.err (!%p689_p4)
}
 0x215   : > { %635 = dma.vmem_to_hbm [thread:$0]  (%p638_p6), %s544_s27, 16, %s831_s7, [#allocation4]  }
 0x216   : > { %698 = dma.done.wait (%p638_p6), [#allocation4], 16  }
 0x217   : > { %700 = vsyncadd (%p638_p6), [#allocation4], 4294967280 }
 0x218 PF: > { %s18_s24 = sadd.s32 1, %s703_s24  }
 0x219   : > { %p15_p5 = scmp.ge.s32.totalorder %s18_s24, 4  }
 0x21b   :  { %17 = sbr.rel (!%p15_p5) target bundleno = 1 (0x1), region = 89 }
 0x222   :  { %556 = vsyncpa [#allocation4], 1 }
 0x223   :  { %558 = vsyncpa [#allocation4 + $0x1], 1 }

// kernel: score_residue_u_loss_forward.12
= control target key start
LH: loop header
LB: loop body
LE: loop exit
PB: predicated region body
PF: predicated region fallthrough
CT: control target
= control target key end

     0   :  { %s2665_s27 = smov 0   ;;  %s3505_s0 = inlined_call_operand.vmem [shape: f32[2,1,324], index: 0, kind: input, shape index: {}]   ;;  %s3506_s1 = inlined_call_operand.vmem [shape: f32[2,3,324], index: 1, kind: input, shape index: {}]   ;;  %s3507_s2 = inlined_call_operand.vmem [shape: f32[1,286], index: 2, kind: input, shape index: {}]   ;;  %s3508_s3 = inlined_call_operand.vmem [shape: f32[9,8,1], index: 3, kind: input, shape index: {}]   ;;  %s3509_s4 = inlined_call_operand.vmem [shape: f32[9,8,3], index: 4, kind: input, shape index: {}]   ;;  %s3510_s5 = inlined_call_operand.vmem [shape: f32[8,1], index: 5, kind: input, shape index: {}]   ;;  %s3511_s6 = inlined_call_operand.vmem [shape: f32[9,8,8], index: 6, kind: input, shape index: {}]   ;;  %s3512_s7 = inlined_call_operand.vmem [shape: f32[8,1], index: 7, kind: input, shape index: {}]   ;;  %s3513_s8 = inlined_call_operand.vmem [shape: f32[2,8,324], index: 8, kind: output, shape index: {}]  }
   0x1 LB: > { %s2417_s28 = sadd.s32 4294967295, %s2604_s27   ;;  %p2421_p0 = scmp.ge.s32.totalorder %s2604_s27, 1  ;;  %s2604_s27 = sphi %s2665_s27, %s18_s27  }
   0x2   : > { %p271_p1 = scmp.lt.s32.totalorder %s2604_s27, 3 }
   0x4   : > { %p272_p2 = pnand %p2421_p0, %p271_p1 }
   0x5   : > { %v2427_v0 = vld [vmem:[%s3509_s4 + $0x10] sm:$0xff] (!%p272_p2)  ;;  %v2425_v1 = vld [vmem:[%s3509_s4 + $0x8] sm:$0xff] (!%p272_p2)  ;;  %v2606_v2 = vmov (!%p272_p2), 1   ;;  %v2431_v3 = vld [vmem:[%s3509_s4 + $0x20] sm:$0xff] (!%p272_p2)  ;;  %v2607_v4 = vmov (!%p272_p2), 0   ;;  %v2608_v5 = vmov (!%p272_p2), 2   ;;  %v335_v23 = vlaneseq (!%p272_p2) }
   0x6   : > { %275 = sbr.rel (%p272_p2) target bundleno = 1134 (0x46e), region = 52  ;;  %2577 = vset.pattern.permute.xlu0 (!%p272_p2), %v2606_v2  ;;  %2574 = vset.pattern.permute.xlu1 (!%p272_p2), %v2606_v2  ;;  %v2435_v6 = vld [vmem:[%s3509_s4 + $0x30] sm:$0xff] (!%p272_p2)  ;;  %v356_v7 = vld [vmem:[%s3509_s4] sm:$0xff] (!%p272_p2)  ;;  %v2424_v8 = vld [vmem:[%s3508_s3 + $0x8] sm:$0xff] (!%p272_p2)  ;;  %p309_p3 = scmp.lt.s32.totalorder (!%p272_p2), %s2417_s28, 1  ;;  %vm490_vm0 = vcmask (!%p272_p2), 1039360  }
   0x7   : > { %630 = vperm.xlu0 (!%p272_p2), %2577, %v2427_v0   ;;  %527 = vperm.xlu1 (!%p272_p2), %2574, %v2425_v1   ;;  %v2428_v9 = vld [vmem:[%s3508_s3 + $0x18] sm:$0xff] (!%p272_p2)  ;;  %v2426_v10 = vld [vmem:[%s3508_s3 + $0x10] sm:$0xff] (!%p272_p2)  ;;  %v2430_v12 = vld [vmem:[%s3508_s3 + $0x20] sm:$0xff] (!%p272_p2)  ;;  %v336_v26 = vshrl.u32 (!%p272_p2), %v335_v23, 7  ;;  %s2609_s11 = smov (!%p272_p2), 127   ;;  %s2610_s12 = smov (!%p272_p2), 126  }
   0x8   : > { %1418 = vmatprep.mubr.bf16.mxu0 (!%p272_p2), %v2607_v4  ;;  %v2429_v11 = vld [vmem:[%s3509_s4 + $0x18] sm:$0xff] (!%p272_p2)  ;;  %v2433_v13 = vld [vmem:[%s3509_s4 + $0x28] sm:$0xff] (!%p272_p2)  ;;  %v2434_v14 = vld [vmem:[%s3508_s3 + $0x30] sm:$0xff] (!%p272_p2)  ;;  %s2611_s13 = smov (!%p272_p2), 110   ;;  %s2612_s14 = smov (!%p272_p2), 109   ;;  %vm593_vm1 = vcmask (!%p272_p2), 1031168  }
   0x9   : > { %v2437_v15 = vld [vmem:[%s3509_s4 + $0x38] sm:$0xff] (!%p272_p2)  ;;  %v2432_v16 = vld [vmem:[%s3508_s3 + $0x28] sm:$0xff] (!%p272_p2)  ;;  %v2439_v17 = vld [vmem:[%s3509_s4 + $0x40] sm:$0xff] (!%p272_p2)  ;;  %v2772_v27 = vsub.s32 (!%p272_p2), 0, %v336_v26  ;;  %v2774_v29 = vsub.s32 (!%p272_p2), 1, %v336_v26  ;;  %v2778_v33 = vsub.s32 (!%p272_p2), 2, %v336_v26 }
   0xa   : > { %v2436_v18 = vld [vmem:[%s3508_s3 + $0x38] sm:$0xff] (!%p272_p2)  ;;  %v328_v19 = vld [vmem:[%s3508_s3] sm:$0xff] (!%p272_p2)  ;;  %v370_v37 = vsub.s32 (!%p272_p2), 4, %v336_v26  ;;  %v407_v39 = vsub.s32 (!%p272_p2), 5, %v336_v26  ;;  %v444_v57 = vsub.s32 (!%p272_p2), 6, %v336_v26  ;;  %s2613_s15 = smov (!%p272_p2), 108  }
   0xb   : > { %836 = vperm.xlu0 (!%p272_p2), %2577, %v2431_v3   ;;  %2575 = vset.pattern.permute.xlu1 (!%p272_p2), %v2608_v5  ;;  %v2438_v20 = vld [vmem:[%s3508_s3 + $0x40] sm:$0xff] (!%p272_p2)  ;;  %s2614_s16 = smov (!%p272_p2), 92   ;;  %s2615_s17 = smov (!%p272_p2), 91   ;;  %vm696_vm2 = vcmask (!%p272_p2), 900096   ;;  %vm799_vm3 = vcmask (!%p272_p2), 891904   ;;  %vm1326_vm4 = vcmask (!%p272_p2), 154624  }
   0xc   : > { %551 = vperm.xlu1 (!%p272_p2), %2575, %v2425_v1   ;;  %s2616_s18 = smov (!%p272_p2), 90   ;;  %vm902_vm5 = vcmask (!%p272_p2), 883712   ;;  %vm1005_vm6 = vcmask (!%p272_p2), 752640   ;;  %vm1108_vm7 = vcmask (!%p272_p2), 744448   ;;  %vm1211_vm8 = vcmask (!%p272_p2), 736256  }
   0xd   : > { %s3515_s28 = smov (!%p309_p3, %s2417_s28), 1  ;;  %vm1328_vm9 = vcmask 556424   ;;  %vm1344_vm10 = vcmask 1047704   ;;  %vm1347_vm11 = vcmask 400384   ;;  %vm2619_vm12 = vmmov 0  }
   0xe   : > { %s2549_s23 = smul.u32 3, %s3515_s28  ;;  %vm1376_vm13 = vcmask 1043456   ;;  %vm1372_vm14 = vcmask 64512  }
   0xf   : > { %1042 = vperm.xlu0 %2577, %v2435_v6   ;;  %s2550_s24 = smul.u32 12, %s3515_s28 }
  0x10   : > { %2576 = vset.pattern.permute.xlu1 %v2607_v4  ;;  %s312_s29 = scalar_lea.vmem %s3505_s0, %s2549_s23  ;;  %s2618_s23 = smov 19  }
  0x11   : > { %606 = vperm.xlu1 %2576, %v2427_v0   ;;  %s317_s10 = scalar_lea.vmem %s3506_s1, %s2550_s24  ;;  %v325_v28 = vld [vmem:[%s312_s29] sm:$0x7]  ;;  %s2551_s25 = smul.u32 24, %s3515_s28 }
  0x12   : > { %v326_v32 = vld [vmem:[%s317_s10] sm:$0x77]  ;;  %v2781_v34 = vrot.slane %v325_v28, %v2774_v29  ;;  %v2784_v35 = vrot.slane %v325_v28, %v2772_v27  ;;  %v327_v38 = vld [vmem:[%s317_s10 + $0x8] sm:$0x7]  ;;  %v2788_v41 = vrot.slane %v325_v28, %v2778_v33 }
  0x13   : > { %398 = vperm.xlu0 %2577, %v356_v7   ;;  %v367_v36 = vrot.slane %v326_v32, %v2772_v27  ;;  %v375_v42 = vrot.slane %v327_v38, %v2772_v27  ;;  %v371_v47 = vrot.slane %v326_v32, %v370_v37  ;;  %v408_v48 = vrot.slane %v326_v32, %v407_v39  ;;  %s3481_s30 = scalar_lea.vmem %s3513_s8, %s2551_s25 }
  0x14   : > { %v404_v49 = vrot.slane %v326_v32, %v2774_v29  ;;  %v441_v55 = vrot.slane %v326_v32, %v2778_v33  ;;  %v412_v62 = vrot.slane %v327_v38, %v2774_v29 }
  0x15   : > { %2578 = vset.pattern.permute.xlu1 %v2608_v5  ;;  %v2794_v46 = vrot.slane %v367_v36, %v2772_v27  ;;  %v2802_v53 = vrot.slane %v375_v42, %v2772_v27  ;;  %v2805_v54 = vrot.slane %v371_v47, %v2772_v27  ;;  %v2811_v58 = vrot.slane %v408_v48, %v2774_v29 }
  0x16   : > { %654 = vperm.xlu1 %2578, %v2427_v0   ;;  %v2814_v59 = vrot.slane %v404_v49, %v2774_v29  ;;  %v2820_v63 = vrot.slane %v441_v55, %v2778_v33  ;;  %v449_v0 = vrot.slane %v327_v38, %v2778_v33 }
  0x17   : > { %2593 = vset.pattern.permute.xlu0 %v2607_v4 }
  0x18   : > { %475 = vperm.xlu0 %2593, %v2424_v8   ;;  %v2834_v8 = vrot.slane %v449_v0, %v2778_v33 }
  0x1a   : > { %2579 = vset.pattern.permute.xlu1 %v2607_v4 }
  0x1b   : > { %681 = vperm.xlu1 %2579, %v2428_v9  }
  0x1c   : > { %503 = vperm.xlu0 %2593, %v2425_v1  }
  0x1f   : > { %2580 = vset.pattern.permute.xlu1 %v2606_v2 }
  0x20   : > { %578 = vperm.xlu0 %2593, %v2426_v10   ;;  %733 = vperm.xlu1 %2580, %v2429_v11  }
  0x24   : > { %709 = vperm.xlu0 %2593, %v2429_v11   ;;  %2581 = vset.pattern.permute.xlu1 %v2608_v5 }
  0x25   : > { %757 = vperm.xlu1 %2581, %v2429_v11  }
  0x28   : > { %784 = vperm.xlu0 %2593, %v2430_v12  }
  0x29   : > { %2582 = vset.pattern.permute.xlu1 %v2607_v4 }
  0x2a   : > { %812 = vperm.xlu1 %2582, %v2431_v3  }
  0x2c   : > { %915 = vperm.xlu0 %2593, %v2433_v13  }
  0x2e   : > { %2583 = vset.pattern.permute.xlu1 %v2608_v5 }
  0x2f   : > { %860 = vperm.xlu1 %2583, %v2431_v3   ;;  %v445_v3 = vrot.slane %v326_v32, %v444_v57 }
  0x30   : > { %990 = vperm.xlu0 %2593, %v2434_v14  }
  0x31   : > { %v2837_v9 = vrot.slane %v445_v3, %v2778_v33 }
  0x33   : > { %2584 = vset.pattern.permute.xlu1 %v2607_v4 }
  0x34   : > { %1121 = vperm.xlu0 %2593, %v2437_v15   ;;  %887 = vperm.xlu1 %2584, %v2432_v16  }
  0x38   : > { %359 = vperm.xlu0 %2593, %v356_v7   ;;  %2585 = vset.pattern.permute.xlu1 %v2606_v2 }
  0x39   : > { %939 = vperm.xlu1 %2585, %v2433_v13  }
  0x3c   : > { %1224 = vperm.xlu0 %2593, %v2439_v17  }
  0x3d   : > { %2586 = vset.pattern.permute.xlu1 %v2608_v5 }
  0x3e   : > { %963 = vperm.xlu1 %2586, %v2433_v13  }
  0x42   : > { %2587 = vset.pattern.permute.xlu1 %v2607_v4 }
  0x43   : > { %1018 = vperm.xlu1 %2587, %v2435_v6  }
  0x47   : > { %2588 = vset.pattern.permute.xlu1 %v2608_v5 }
  0x48   : > { %1066 = vperm.xlu1 %2588, %v2435_v6   ;;  %v2828_v6 = vrot.slane %v412_v62, %v2774_v29 }
  0x4c   : > { %2589 = vset.pattern.permute.xlu1 %v2607_v4 }
  0x4d   : > { %1093 = vperm.xlu1 %2589, %v2436_v18  }
  0x51   : > { %2590 = vset.pattern.permute.xlu1 %v2606_v2 }
  0x52   : > { %1145 = vperm.xlu1 %2590, %v2437_v15  }
  0x56   : > { %2591 = vset.pattern.permute.xlu1 %v2607_v4 }
  0x57   : > { %331 = vperm.xlu1 %2591, %v328_v19  }
  0x5b   : > { %2592 = vset.pattern.permute.xlu1 %v2608_v5 }
  0x5c   : > { %1169 = vperm.xlu1 %2592, %v2437_v15  }
  0x60   : > { %2594 = vset.pattern.permute.xlu1 %v2607_v4 }
  0x61   : > { %1196 = vperm.xlu1 %2594, %v2438_v20  }
  0x65   : > { %2595 = vset.pattern.permute.xlu1 %v2608_v5 }
  0x66   : > { %435 = vperm.xlu1 %2595, %v356_v7  }
  0x6a   : > { %2596 = vset.pattern.permute.xlu1 %v2606_v2 }
  0x6b   : > { %1248 = vperm.xlu1 %2596, %v2439_v17  }
  0x6f   : > { %2597 = vset.pattern.permute.xlu1 %v2608_v5 }
  0x70   : > { %1272 = vperm.xlu1 %2597, %v2439_v17  }
  0x86   : > { %v2754_v21 = vpop.permute.xlu0 %630  ;;  %v528_v24 = vpop.permute.xlu1 %527 }
  0x87   : > { %v531_v1 = vmul.f32 %v528_v24, %v2811_v58  ;;  %v530_v2 = vmul.f32 %v528_v24, %v2814_v59  ;;  %v532_v10 = vmul.f32 %v528_v24, %v2828_v6  ;;  %v634_v28 = vmul.f32 %v2754_v21, %v2811_v58 }
  0x88   : > { %v635_v36 = vmul.f32 %v2754_v21, %v2828_v6 }
  0x8a   : > { %v2760_v22 = vpop.permute.xlu0 %836 }
  0x8b   : > { %v552_v31 = vpop.permute.xlu1 %551 }
  0x8c   : > { %v554_v7 = vmul.f32 %v552_v31, %v2820_v63  ;;  %v556_v12 = vmul.f32 %v552_v31, %v2834_v8  ;;  %v555_v13 = vmul.f32 %v552_v31, %v2837_v9  ;;  %v633_v31 = vmul.f32 %v2754_v21, %v2814_v59 }
  0x8e   : > { %v2764_v25 = vpop.permute.xlu0 %1042 }
  0x90   : > { %v607_v45 = vpop.permute.xlu1 %606 }
  0x91   : > { %v609_v18 = vmul.f32 %v607_v45, %v2794_v46  ;;  %v611_v23 = vmul.f32 %v607_v45, %v2802_v53  ;;  %v610_v24 = vmul.f32 %v607_v45, %v2805_v54 }
  0x92   : > { %v2776_v30 = vpop.permute.xlu0 %398 }
  0x95   : > { %v655_v56 = vpop.permute.xlu1 %654 }
  0x96   : > { %v657_v32 = vmul.f32 %v655_v56, %v2820_v63  ;;  %v659_v38 = vmul.f32 %v655_v56, %v2834_v8  ;;  %v658_v39 = vmul.f32 %v655_v56, %v2837_v9 }
  0x97   : > { %v476_v40 = vpop.permute.xlu0 %475 }
  0x98   : > { %v479_v43 = vmul.f32 %v476_v40, %v2781_v34  ;;  %v478_v44 = vmul.f32 %v476_v40, %v2784_v35  ;;  %v480_v52 = vmul.f32 %v476_v40, %v2788_v41 }
  0x9a   : > { %486 = vrot.lane.b32.xlu1 %v479_v43, %s2609_s11  ;;  %484 = vrot.lane.b32.xlu0 %v478_v44, %s2609_s11  ;;  %v682_v5 = vpop.permute.xlu1 %681 }
  0x9b   : > { %v504_v50 = vpop.permute.xlu0 %503  ;;  %v685_v42 = vmul.f32 %v682_v5, %v2781_v34  ;;  %v684_v21 = vmul.f32 %v682_v5, %v2784_v35  ;;  %v686_v45 = vmul.f32 %v682_v5, %v2788_v41 }
  0x9c   : > { %v506_v51 = vmul.f32 %v504_v50, %v2794_v46  ;;  %v508_v60 = vmul.f32 %v504_v50, %v2802_v53  ;;  %v507_v61 = vmul.f32 %v504_v50, %v2805_v54 }
  0x9e   : > { %512 = vrot.lane.b32.xlu1 %v506_v51, %s2609_s11  ;;  %488 = vrot.lane.b32.xlu0 %v480_v52, %s2609_s11 }
  0x9f   : > { %v734_v11 = vpop.permute.xlu1 %733  ;;  %v579_v14 = vpop.permute.xlu0 %578 }
  0xa0   : > { %v582_v16 = vmul.f32 %v579_v14, %v2781_v34  ;;  %v581_v17 = vmul.f32 %v579_v14, %v2784_v35  ;;  %v583_v19 = vmul.f32 %v579_v14, %v2788_v41  ;;  %v737_v51 = vmul.f32 %v734_v11, %v2811_v58 }
  0xa1   : > { %v736_v52 = vmul.f32 %v734_v11, %v2814_v59  ;;  %v738_v56 = vmul.f32 %v734_v11, %v2828_v6  ;;  %v839_v14 = vmul.f32 %v2760_v22, %v2814_v59 }
  0xa2   : > { %516 = vrot.lane.b32.xlu1 %v508_v60, %s2609_s11  ;;  %514 = vrot.lane.b32.xlu0 %v507_v61, %s2609_s11 }
  0xa3   : > { %v710_v43 = vpop.permute.xlu0 %709 }
  0xa4   : > { %v758_v15 = vpop.permute.xlu1 %757  ;;  %v712_v44 = vmul.f32 %v710_v43, %v2794_v46  ;;  %v714_v48 = vmul.f32 %v710_v43, %v2802_v53  ;;  %v713_v49 = vmul.f32 %v710_v43, %v2805_v54 }
  0xa5   : > { %v760_v55 = vmul.f32 %v758_v15, %v2820_v63  ;;  %v762_v60 = vmul.f32 %v758_v15, %v2834_v8  ;;  %v761_v61 = vmul.f32 %v758_v15, %v2837_v9 }
  0xa6   : > { %538 = vrot.lane.b32.xlu1 %v531_v1, %s2609_s11  ;;  %536 = vrot.lane.b32.xlu0 %v530_v2, %s2609_s11 }
  0xa7   : > { %v785_v62 = vpop.permute.xlu0 %784 }
  0xa8   : > { %v788_v1 = vmul.f32 %v785_v62, %v2781_v34  ;;  %v787_v2 = vmul.f32 %v785_v62, %v2784_v35  ;;  %v789_v5 = vmul.f32 %v785_v62, %v2788_v41 }
  0xa9   : > { %v2852_v20 = vpop.permute.xlu1 %812 }
  0xaa   : > { %560 = vrot.lane.b32.xlu1 %v554_v7, %s2609_s11  ;;  %540 = vrot.lane.b32.xlu0 %v532_v10, %s2609_s11  ;;  %v815_v3 = vmul.f32 %v2852_v20, %v2794_v46  ;;  %v817_v10 = vmul.f32 %v2852_v20, %v2802_v53  ;;  %v816_v11 = vmul.f32 %v2852_v20, %v2805_v54 }
  0xab   : > { %v916_v15 = vpop.permute.xlu0 %915 }
  0xae   : > { %564 = vrot.lane.b32.xlu1 %v556_v12, %s2609_s11  ;;  %562 = vrot.lane.b32.xlu0 %v555_v13, %s2609_s11  ;;  %v2860_v26 = vpop.permute.xlu1 %860  ;;  %v840_v13 = vmul.f32 %v2760_v22, %v2811_v58 }
  0xaf   : > { %v864_v20 = vmul.f32 %v2860_v26, %v2837_v9 }
  0xb2   : > { %589 = vrot.lane.b32.xlu1 %v582_v16, %s2610_s12  ;;  %587 = vrot.lane.b32.xlu0 %v581_v17, %s2610_s12  ;;  %v863_v17 = vmul.f32 %v2860_v26, %v2820_v63 }
  0xb3   : > { %v2871_v37 = vpop.permute.xlu1 %887 }
  0xb6   : > { %615 = vrot.lane.b32.xlu1 %v609_v18, %s2610_s12  ;;  %591 = vrot.lane.b32.xlu0 %v583_v19, %s2610_s12  ;;  %v841_v18 = vmul.f32 %v2760_v22, %v2828_v6  ;;  %v865_v19 = vmul.f32 %v2860_v26, %v2834_v8  ;;  %v891_v22 = vmul.f32 %v2871_v37, %v2781_v34 }
  0xb8   : > { %v2879_v40 = vpop.permute.xlu1 %939 }
  0xb9   : > { %v943_v43 = vmul.f32 %v2879_v40, %v2811_v58 }
  0xba   : > { %619 = vrot.lane.b32.xlu1 %v611_v23, %s2610_s12  ;;  %617 = vrot.lane.b32.xlu0 %v610_v24, %s2610_s12  ;;  %v991_v23 = vpop.permute.xlu0 %990 }
  0xbb   : > { %v993_v62 = vmul.f32 %v991_v23, %v2784_v35 }
  0xbd   : > { %v2887_v47 = vpop.permute.xlu1 %963 }
  0xbe   : > { %641 = vrot.lane.b32.xlu1 %v634_v28, %s2610_s12  ;;  %639 = vrot.lane.b32.xlu0 %v633_v31, %s2610_s12  ;;  %v890_v28 = vmul.f32 %v2871_v37, %v2784_v35  ;;  %v2960_v31 = vpop.permute.xlu0 %1121 }
  0xc2   : > { %663 = vrot.lane.b32.xlu1 %v657_v32, %s2610_s12  ;;  %643 = vrot.lane.b32.xlu0 %v635_v36, %s2610_s12  ;;  %v2895_v50 = vpop.permute.xlu1 %1018  ;;  %v918_v32 = vmul.f32 %v916_v15, %v2794_v46  ;;  %v892_v36 = vmul.f32 %v2871_v37, %v2788_v41  ;;  %v942_v37 = vmul.f32 %v2879_v40, %v2814_v59 }
  0xc6   : > { %667 = vrot.lane.b32.xlu1 %v659_v38, %s2610_s12  ;;  %665 = vrot.lane.b32.xlu0 %v658_v39, %s2610_s12  ;;  %v920_v38 = vmul.f32 %v916_v15, %v2802_v53  ;;  %v919_v39 = vmul.f32 %v916_v15, %v2805_v54 }
  0xc7   : > { %v2903_v57 = vpop.permute.xlu1 %1066 }
  0xca   : > { %692 = vrot.lane.b32.xlu1 %v685_v42, %s2611_s13  ;;  %690 = vrot.lane.b32.xlu0 %v684_v21, %s2611_s13  ;;  %v2973_v21 = vpop.permute.xlu0 %359 }
  0xcc   : > { %v2911_v0 = vpop.permute.xlu1 %1093 }
  0xce   : > { %718 = vrot.lane.b32.xlu1 %v712_v44, %s2611_s13  ;;  %694 = vrot.lane.b32.xlu0 %v686_v45, %s2611_s13  ;;  %v2985_v45 = vpop.permute.xlu0 %1224 }
  0xd1   : > { %v2920_v7 = vpop.permute.xlu1 %1145 }
  0xd2   : > { %722 = vrot.lane.b32.xlu1 %v714_v48, %s2611_s13  ;;  %720 = vrot.lane.b32.xlu0 %v713_v49, %s2611_s13  ;;  %v966_v48 = vmul.f32 %v2887_v47, %v2820_v63  ;;  %v944_v49 = vmul.f32 %v2879_v40, %v2828_v6  ;;  %v994_v40 = vmul.f32 %v991_v23, %v2781_v34 }
  0xd6   : > { %744 = vrot.lane.b32.xlu1 %v737_v51, %s2611_s13  ;;  %742 = vrot.lane.b32.xlu0 %v736_v52, %s2611_s13  ;;  %v2930_v12 = vpop.permute.xlu1 %331  ;;  %v968_v51 = vmul.f32 %v2887_v47, %v2834_v8 }
  0xda   : > { %766 = vrot.lane.b32.xlu1 %v760_v55, %s2611_s13  ;;  %746 = vrot.lane.b32.xlu0 %v738_v56, %s2611_s13  ;;  %v967_v56 = vmul.f32 %v2887_v47, %v2837_v9  ;;  %v1021_v47 = vmul.f32 %v2895_v50, %v2794_v46 }
  0xdb   : > { %v2938_v16 = vpop.permute.xlu1 %1169 }
  0xde   : > { %770 = vrot.lane.b32.xlu1 %v762_v60, %s2611_s13  ;;  %768 = vrot.lane.b32.xlu0 %v761_v61, %s2611_s13 }
  0xe0   : > { %v2950_v24 = vpop.permute.xlu1 %1196 }
  0xe2   : > { %795 = vrot.lane.b32.xlu1 %v788_v1, %s2612_s14  ;;  %793 = vrot.lane.b32.xlu0 %v787_v2, %s2612_s14 }
  0xe5   : > { %v2962_v26 = vpop.permute.xlu1 %435 }
  0xe6   : > { %821 = vrot.lane.b32.xlu1 %v815_v3, %s2612_s14  ;;  %797 = vrot.lane.b32.xlu0 %v789_v5, %s2612_s14  ;;  %v995_v3 = vmul.f32 %v991_v23, %v2788_v41  ;;  %v1023_v5 = vmul.f32 %v2895_v50, %v2802_v53  ;;  %v1047_v23 = vmul.f32 %v2764_v25, %v2828_v6 }
  0xea   : > { %825 = vrot.lane.b32.xlu1 %v817_v10, %s2612_s14  ;;  %823 = vrot.lane.b32.xlu0 %v816_v11, %s2612_s14  ;;  %v2971_v42 = vpop.permute.xlu1 %1248 }
  0xee   : > { %847 = vrot.lane.b32.xlu1 %v840_v13, %s2612_s14  ;;  %845 = vrot.lane.b32.xlu0 %v839_v14, %s2612_s14  ;;  %v1022_v13 = vmul.f32 %v2895_v50, %v2805_v54  ;;  %v1046_v14 = vmul.f32 %v2764_v25, %v2811_v58  ;;  %v1069_v50 = vmul.f32 %v2903_v57, %v2820_v63 }
  0xef   : > { %v2983_v44 = vpop.permute.xlu1 %1272 }
  0xf2   : > { %869 = vrot.lane.b32.xlu1 %v863_v17, %s2612_s14  ;;  %849 = vrot.lane.b32.xlu0 %v841_v18, %s2612_s14  ;;  %v1045_v18 = vmul.f32 %v2764_v25, %v2814_v59  ;;  %v1096_v25 = vmul.f32 %v2911_v0, %v2784_v35 }
  0xf6   : > { %873 = vrot.lane.b32.xlu1 %v865_v19, %s2612_s14  ;;  %871 = vrot.lane.b32.xlu0 %v864_v20, %s2612_s14 }
  0xfa   : > { %898 = vrot.lane.b32.xlu1 %v891_v22, %s2613_s15  ;;  %896 = vrot.lane.b32.xlu0 %v890_v28, %s2613_s15  ;;  %v1070_v22 = vmul.f32 %v2903_v57, %v2837_v9  ;;  %v1071_v28 = vmul.f32 %v2903_v57, %v2834_v8  ;;  %v350_v57 = vmul.f32 %v2784_v35, %v2930_v12 }
  0xfe   : > { %924 = vrot.lane.b32.xlu1 %v918_v32, %s2613_s15  ;;  %900 = vrot.lane.b32.xlu0 %v892_v36, %s2613_s15 }
 0x102   : > { %928 = vrot.lane.b32.xlu1 %v920_v38, %s2613_s15  ;;  %926 = vrot.lane.b32.xlu0 %v919_v39, %s2613_s15  ;;  %v1097_v38 = vmul.f32 %v2911_v0, %v2781_v34 }
 0x106   : > { %950 = vrot.lane.b32.xlu1 %v943_v43, %s2613_s15  ;;  %948 = vrot.lane.b32.xlu0 %v942_v37, %s2613_s15  ;;  %v1124_v37 = vmul.f32 %v2960_v31, %v2794_v46 }
 0x10a   : > { %972 = vrot.lane.b32.xlu1 %v966_v48, %s2613_s15  ;;  %952 = vrot.lane.b32.xlu0 %v944_v49, %s2613_s15  ;;  %v391_v48 = vmul.f32 %v2794_v46, %v2973_v21  ;;  %v1098_v49 = vmul.f32 %v2911_v0, %v2788_v41  ;;  %v393_v0 = vmul.f32 %v2802_v53, %v2973_v21 }
 0x10c   : > { %v2995_v52 = vpop.permute.xlu1 %486  ;;  %v2997_v55 = vpop.permute.xlu0 %484 }
 0x10e   : > { %976 = vrot.lane.b32.xlu1 %v968_v51, %s2613_s15  ;;  %974 = vrot.lane.b32.xlu0 %v967_v56, %s2613_s15 }
 0x110   : > { %v3004_v60 = vpop.permute.xlu1 %512  ;;  %v3006_v61 = vpop.permute.xlu0 %488 }
 0x112   : > { %1001 = vrot.lane.b32.xlu1 %v994_v40, %s2614_s16  ;;  %999 = vrot.lane.b32.xlu0 %v993_v62, %s2614_s16  ;;  %v352_v40 = vmul.f32 %v2788_v41, %v2930_v12  ;;  %v351_v62 = vmul.f32 %v2781_v34, %v2930_v12  ;;  %v392_v12 = vmul.f32 %v2805_v54, %v2973_v21 }
 0x113   : > { %v467_v21 = vmul.f32 %v2834_v8, %v2962_v26 }
 0x114   : > { %v3013_v1 = vpop.permute.xlu1 %516  ;;  %v3015_v2 = vpop.permute.xlu0 %514 }
 0x116   : > { %1027 = vrot.lane.b32.xlu1 %v1021_v47, %s2614_s16  ;;  %1003 = vrot.lane.b32.xlu0 %v995_v3, %s2614_s16  ;;  %v394_v47 = vadd.f32 %v391_v48, %v350_v57  ;;  %v428_v3 = vmul.f32 %v2814_v59, %v2776_v30  ;;  %v1148_v57 = vmul.f32 %v2920_v7, %v2814_v59 }
 0x117   : > { %v466_v48 = vmul.f32 %v2837_v9, %v2962_v26 }
 0x118   : > { %v3022_v10 = vpop.permute.xlu1 %538  ;;  %v3024_v11 = vpop.permute.xlu0 %536 }
 0x11a   : > { %1031 = vrot.lane.b32.xlu1 %v1023_v5, %s2614_s16  ;;  %1029 = vrot.lane.b32.xlu0 %v1022_v13, %s2614_s16  ;;  %v1125_v5 = vmul.f32 %v2960_v31, %v2805_v54  ;;  %v1126_v13 = vmul.f32 %v2960_v31, %v2802_v53  ;;  %v430_v31 = vmul.f32 %v2828_v6, %v2776_v30 }
 0x11c   : > { %v3032_v15 = vpop.permute.xlu1 %560  ;;  %v3034_v17 = vpop.permute.xlu0 %540 }
 0x11e   : > { %1053 = vrot.lane.b32.xlu1 %v1046_v14, %s2614_s16  ;;  %1051 = vrot.lane.b32.xlu0 %v1045_v18, %s2614_s16  ;;  %v465_v14 = vmul.f32 %v2820_v63, %v2962_v26  ;;  %v492_v26 = vsel %vm490_vm0, %v2995_v52, %v3006_v61 }
 0x120   : > { %v3042_v19 = vpop.permute.xlu1 %564  ;;  %v3044_v20 = vpop.permute.xlu0 %562 }
 0x122   : > { %1075 = vrot.lane.b32.xlu1 %v1069_v50, %s2614_s16  ;;  %1055 = vrot.lane.b32.xlu0 %v1047_v23, %s2614_s16  ;;  %v396_v23 = vadd.f32 %v393_v0, %v352_v40 }
 0x124   : > { %v3054_v32 = vpop.permute.xlu1 %589  ;;  %v3056_v36 = vpop.permute.xlu0 %587 }
 0x126   : > { %1079 = vrot.lane.b32.xlu1 %v1071_v28, %s2614_s16  ;;  %1077 = vrot.lane.b32.xlu0 %v1070_v22, %s2614_s16  ;;  %v395_v22 = vadd.f32 %v392_v12, %v351_v62  ;;  %v431_v28 = vadd.f32 %v428_v3, %v394_v47  ;;  %v518_v47 = vsel %vm490_vm0, %v3004_v60, %v3015_v2 }
 0x127   : > { %v1172_v60 = vmul.f32 %v2938_v16, %v2820_v63 }
 0x128   : > { %v3064_v39 = vpop.permute.xlu1 %615  ;;  %v3066_v43 = vpop.permute.xlu0 %591 }
 0x12a   : > { %1104 = vrot.lane.b32.xlu1 %v1097_v38, %s2615_s17  ;;  %1102 = vrot.lane.b32.xlu0 %v1096_v25, %s2615_s17  ;;  %v429_v25 = vmul.f32 %v2811_v58, %v2776_v30  ;;  %v491_v38 = vsel %vm490_vm0, %v2997_v55, %v2995_v52  ;;  %v433_v30 = vadd.f32 %v430_v31, %v396_v23 }
 0x12b   : > { %v519_v52 = vsel %vm490_vm0, %v3015_v2, %v3013_v1  ;;  %v594_v2 = vsel %vm593_vm1, %v3056_v36, %v3054_v32 }
 0x12c   : > { %v3078_v51 = vpop.permute.xlu1 %619  ;;  %v3080_v56 = vpop.permute.xlu0 %617  ;;  %v432_v3 = vadd.f32 %v429_v25, %v395_v22  ;;  %v470_v0 = vadd.f32 %v467_v21, %v433_v30  ;;  %v1173_v21 = vmul.f32 %v2938_v16, %v2837_v9 }
 0x12d   : > { %v621_v36 = vsel %vm593_vm1, %v3064_v39, %v3080_v56  ;;  %v1200_v39 = vmul.f32 %v2950_v24, %v2781_v34 }
 0x12e   : > { %1130 = vrot.lane.b32.xlu1 %v1124_v37, %s2615_s17  ;;  %1106 = vrot.lane.b32.xlu0 %v1098_v49, %s2615_s17  ;;  %v1149_v37 = vmul.f32 %v2920_v7, %v2811_v58  ;;  %v468_v49 = vadd.f32 %v465_v14, %v431_v28  ;;  %v469_v12 = vadd.f32 %v466_v48, %v432_v3 }
 0x12f   : > { %v498_v28 = vadd.f32 %v3006_v61, %v470_v0  ;;  %v543_v61 = vsel %vm490_vm0, %v3022_v10, %v3034_v17 }
 0x130   : > { %v3100_v18 = vpop.permute.xlu1 %641  ;;  %v640_v50 = vpop.permute.xlu0 %639  ;;  %v496_v55 = vadd.f32 %v491_v38, %v468_v49  ;;  %v497_v25 = vadd.f32 %v492_v26, %v469_v12 }
 0x132   : > { %1134 = vrot.lane.b32.xlu1 %v1126_v13, %s2615_s17  ;;  %1132 = vrot.lane.b32.xlu0 %v1125_v5, %s2615_s17  ;;  %v542_v5 = vsel %vm490_vm0, %v3024_v11, %v3022_v10  ;;  %v1150_v13 = vmul.f32 %v2920_v7, %v2828_v6  ;;  %v523_v14 = vadd.f32 %v518_v47, %v496_v55 }
 0x133   : > { %v566_v11 = vsel %vm490_vm0, %v3032_v15, %v3044_v20  ;;  %v525_v7 = vadd.f32 %v3013_v1, %v498_v28  ;;  %v1174_v15 = vmul.f32 %v2938_v16, %v2834_v8  ;;  %v524_v38 = vadd.f32 %v519_v52, %v497_v25 }
 0x134   : > { %v664_v40 = vpop.permute.xlu1 %663  ;;  %v3119_v62 = vpop.permute.xlu0 %643  ;;  %v547_v31 = vadd.f32 %v542_v5, %v523_v14  ;;  %v567_v10 = vsel %vm490_vm0, %v3044_v20, %v3042_v19  ;;  %v645_v47 = vsel %vm593_vm1, %v640_v50, %v3100_v18  ;;  %v1199_v20 = vmul.f32 %v2950_v24, %v2784_v35 }
 0x135   : > { %v549_v1 = vadd.f32 %v3034_v17, %v525_v7  ;;  %v548_v49 = vadd.f32 %v543_v61, %v524_v38  ;;  %v595_v17 = vsel %vm593_vm1, %v3054_v32, %v3066_v43  ;;  %v622_v32 = vsel %vm593_vm1, %v3080_v56, %v3078_v51 }
 0x136   : > { %1156 = vrot.lane.b32.xlu1 %v1149_v37, %s2615_s17  ;;  %1154 = vrot.lane.b32.xlu0 %v1148_v57, %s2615_s17  ;;  %v571_v57 = vadd.f32 %v566_v11, %v547_v31  ;;  %v646_v35 = vsel %vm593_vm1, %v3100_v18, %v3119_v62  ;;  %v1227_v56 = vmul.f32 %v2985_v45, %v2794_v46 }
 0x137   : > { %v573_v16 = vadd.f32 %v3042_v19, %v549_v1  ;;  %v572_v3 = vadd.f32 %v567_v10, %v548_v49  ;;  %v1252_v49 = vmul.f32 %v2971_v42, %v2811_v58  ;;  %v1275_v58 = vmul.f32 %v2983_v44, %v2820_v63 }
 0x138   : > { %v668_v23 = vpop.permute.xlu1 %667  ;;  %v666_v22 = vpop.permute.xlu0 %665  ;;  %v599_v30 = vadd.f32 %v594_v2, %v571_v57 }
 0x139   : > { %v601_v19 = vadd.f32 %v3066_v43, %v573_v16  ;;  %v669_v5 = vsel %vm593_vm1, %v664_v40, %v666_v22  ;;  %v600_v50 = vadd.f32 %v595_v17, %v572_v3  ;;  %v1201_v40 = vmul.f32 %v2950_v24, %v2788_v41 }
 0x13a   : > { %1178 = vrot.lane.b32.xlu1 %v1172_v60, %s2615_s17  ;;  %1158 = vrot.lane.b32.xlu0 %v1150_v13, %s2615_s17  ;;  %v626_v55 = vadd.f32 %v621_v36, %v599_v30  ;;  %v1228_v41 = vmul.f32 %v2985_v45, %v2805_v54  ;;  %v1229_v24 = vmul.f32 %v2985_v45, %v2802_v53  ;;  %v1295_v53 = vld [vmem:[%s3510_s5] sm:$0xff] }
 0x13b   : > { %v628_v34 = vadd.f32 %v3078_v51, %v601_v19  ;;  %v627_v60 = vadd.f32 %v622_v32, %v600_v50  ;;  %v670_v51 = vsel %vm593_vm1, %v666_v22, %v668_v23  ;;  %v1251_v54 = vmul.f32 %v2971_v42, %v2814_v59 }
 0x13c   : > { %v693_v37 = vpop.permute.xlu1 %692  ;;  %v691_v48 = vpop.permute.xlu0 %690  ;;  %v650_v13 = vadd.f32 %v645_v47, %v626_v55  ;;  %v1253_v30 = vmul.f32 %v2971_v42, %v2828_v6  ;;  %v1276_v6 = vmul.f32 %v2983_v44, %v2837_v9  ;;  %v1277_v19 = vmul.f32 %v2983_v44, %v2834_v8 }
 0x13d   : > { %v697_v43 = vsel %vm696_vm2, %v691_v48, %v693_v37  ;;  %v652_v52 = vadd.f32 %v3119_v62, %v628_v34  ;;  %v651_v25 = vadd.f32 %v646_v35, %v627_v60 }
 0x13e   : > { %1182 = vrot.lane.b32.xlu1 %v1174_v15, %s2615_s17  ;;  %1180 = vrot.lane.b32.xlu0 %v1173_v21, %s2615_s17  ;;  %v674_v12 = vadd.f32 %v669_v5, %v650_v13 }
 0x13f   : > { %v676_v46 = vadd.f32 %v668_v23, %v652_v52  ;;  %v675_v62 = vadd.f32 %v670_v51, %v651_v25  ;;  %v2617_v51 = vmov 0.0  }
 0x140   : > { %v719_v0 = vpop.permute.xlu1 %718  ;;  %v695_v26 = vpop.permute.xlu0 %694  ;;  %v702_v18 = vadd.f32 %v697_v43, %v674_v12  ;;  %1327 = vst.msk [vmem:[#allocation2] sm:$0xff] %vm1326_vm4, %v2617_v51  ;;  %2495 = vmatprep.subr.bf16.mxu1 %v2617_v51  ;;  %2497 = vmatprep.mubr.msk.bf16.mxu1 %vm2619_vm12, %v2617_v51  ;;  %2331 = vst.msk [vmem:[%s3481_s30] sm:$0xff] %vm1326_vm4, %v2617_v51 }
 0x141   : > { %v698_v31 = vsel %vm696_vm2, %v693_v37, %v695_v26  ;;  %v704_v2 = vadd.f32 %v695_v26, %v676_v46  ;;  %1329 = vst.msk [vmem:[#allocation2 + $0x10] sm:$0xff] %vm1328_vm9, %v2617_v51  ;;  %2332 = vst.msk [vmem:[%s3481_s30 + $0x10] sm:$0xff] %vm1328_vm9, %v2617_v51 }
 0x142   : > { %1207 = vrot.lane.b32.xlu1 %v1200_v39, %s2616_s18  ;;  %1205 = vrot.lane.b32.xlu0 %v1199_v20, %s2616_s18  ;;  %v703_v38 = vadd.f32 %v698_v31, %v675_v62 }
 0x144   : > { %v723_v14 = vpop.permute.xlu1 %722  ;;  %v721_v28 = vpop.permute.xlu0 %720 }
 0x145   : > { %v724_v11 = vsel %vm696_vm2, %v719_v0, %v721_v28  ;;  %v725_v21 = vsel %vm696_vm2, %v721_v28, %v723_v14  ;;  %v731_v23 = vadd.f32 %v723_v14, %v704_v2 }
 0x146   : > { %1233 = vrot.lane.b32.xlu1 %v1227_v56, %s2616_s18  ;;  %1209 = vrot.lane.b32.xlu0 %v1201_v40, %s2616_s18  ;;  %v729_v7 = vadd.f32 %v724_v11, %v702_v18  ;;  %v730_v45 = vadd.f32 %v725_v21, %v703_v38 }
 0x148   : > { %v745_v22 = vpop.permute.xlu1 %744  ;;  %v743_v61 = vpop.permute.xlu0 %742 }
 0x149   : > { %v748_v15 = vsel %vm696_vm2, %v743_v61, %v745_v22 }
 0x14a   : > { %v753_v57 = vadd.f32 %v748_v15, %v729_v7  ;;  %1237 = vrot.lane.b32.xlu1 %v1229_v24, %s2616_s18  ;;  %1235 = vrot.lane.b32.xlu0 %v1228_v41, %s2616_s18 }
 0x14c   : > { %v767_v37 = vpop.permute.xlu1 %766  ;;  %v747_v48 = vpop.permute.xlu0 %746 }
 0x14d   : > { %v749_v1 = vsel %vm696_vm2, %v745_v22, %v747_v48  ;;  %v755_v10 = vadd.f32 %v747_v48, %v731_v23 }
 0x14e   : > { %v754_v36 = vadd.f32 %v749_v1, %v730_v45  ;;  %1257 = vrot.lane.b32.xlu1 %v1251_v54, %s2616_s18  ;;  %1298 = vperm.xlu0 %2593, %v1295_v53  }
 0x150   : > { %v771_v16 = vpop.permute.xlu1 %770  ;;  %v769_v17 = vpop.permute.xlu0 %768 }
 0x151   : > { %v779_v47 = vadd.f32 %v771_v16, %v755_v10  ;;  %v772_v59 = vsel %vm696_vm2, %v767_v37, %v769_v17  ;;  %v773_v20 = vsel %vm696_vm2, %v769_v17, %v771_v16 }
 0x152   : > { %v777_v39 = vadd.f32 %v772_v59, %v753_v57  ;;  %v778_v3 = vadd.f32 %v773_v20, %v754_v36  ;;  %1261 = vrot.lane.b32.xlu1 %v1253_v30, %s2616_s18  ;;  %1259 = vrot.lane.b32.xlu0 %v1252_v49, %s2616_s18 }
 0x154   : > { %v796_v42 = vpop.permute.xlu1 %795  ;;  %v794_v55 = vpop.permute.xlu0 %793 }
 0x155   : > { %v800_v0 = vsel %vm799_vm3, %v794_v55, %v796_v42 }
 0x156   : > { %v805_v26 = vadd.f32 %v800_v0, %v777_v39  ;;  %1283 = vrot.lane.b32.xlu1 %v1276_v6, %s2616_s18  ;;  %1281 = vrot.lane.b32.xlu0 %v1275_v58, %s2616_s18 }
 0x158   : > { %v822_v32 = vpop.permute.xlu1 %821  ;;  %v798_v5 = vpop.permute.xlu0 %797 }
 0x159   : > { %v801_v50 = vsel %vm799_vm3, %v796_v42, %v798_v5  ;;  %v807_v63 = vadd.f32 %v798_v5, %v779_v47 }
 0x15a   : > { %v806_v13 = vadd.f32 %v801_v50, %v778_v3  ;;  %1285 = vrot.lane.b32.xlu0 %v1277_v19, %s2616_s18 }
 0x15c   : > { %v826_v9 = vpop.permute.xlu1 %825  ;;  %v824_v34 = vpop.permute.xlu0 %823 }
 0x15d   : > { %v834_v35 = vadd.f32 %v826_v9, %v807_v63  ;;  %v827_v43 = vsel %vm799_vm3, %v822_v32, %v824_v34  ;;  %v828_v56 = vsel %vm799_vm3, %v824_v34, %v826_v9 }
 0x15e   : > { %v832_v40 = vadd.f32 %v827_v43, %v805_v26  ;;  %v833_v60 = vadd.f32 %v828_v56, %v806_v13 }
 0x160   : > { %v848_v12 = vpop.permute.xlu1 %847  ;;  %v846_v14 = vpop.permute.xlu0 %845 }
 0x161   : > { %v851_v8 = vsel %vm799_vm3, %v846_v14, %v848_v12 }
 0x162   : > { %v856_v44 = vadd.f32 %v851_v8, %v832_v40 }
 0x164   : > { %v870_v28 = vpop.permute.xlu1 %869  ;;  %v850_v52 = vpop.permute.xlu0 %849 }
 0x165   : > { %v852_v11 = vsel %vm799_vm3, %v848_v12, %v850_v52  ;;  %v858_v25 = vadd.f32 %v850_v52, %v834_v35 }
 0x166   : > { %v857_v18 = vadd.f32 %v852_v11, %v833_v60 }
 0x168   : > { %v874_v46 = vpop.permute.xlu1 %873  ;;  %v872_v31 = vpop.permute.xlu0 %871 }
 0x169   : > { %v882_v41 = vadd.f32 %v874_v46, %v858_v25  ;;  %v875_v24 = vsel %vm799_vm3, %v870_v28, %v872_v31  ;;  %v876_v62 = vsel %vm799_vm3, %v872_v31, %v874_v46 }
 0x16a   : > { %v880_v7 = vadd.f32 %v875_v24, %v856_v44  ;;  %v881_v22 = vadd.f32 %v876_v62, %v857_v18 }
 0x16c   : > { %v899_v61 = vpop.permute.xlu1 %898  ;;  %v897_v2 = vpop.permute.xlu0 %896 }
 0x16d   : > { %v903_v34 = vsel %vm902_vm5, %v897_v2, %v899_v61 }
 0x16e   : > { %v908_v40 = vadd.f32 %v903_v34, %v880_v7 }
 0x170   : > { %v925_v21 = vpop.permute.xlu1 %924  ;;  %v901_v15 = vpop.permute.xlu0 %900 }
 0x171   : > { %v904_v38 = vsel %vm902_vm5, %v899_v61, %v901_v15  ;;  %v910_v14 = vadd.f32 %v901_v15, %v882_v41 }
 0x172   : > { %v909_v57 = vadd.f32 %v904_v38, %v881_v22 }
 0x174   : > { %v929_v23 = vpop.permute.xlu1 %928  ;;  %v927_v53 = vpop.permute.xlu0 %926 }
 0x175   : > { %v930_v56 = vsel %vm902_vm5, %v925_v21, %v927_v53  ;;  %v931_v8 = vsel %vm902_vm5, %v927_v53, %v929_v23  ;;  %v937_v25 = vadd.f32 %v929_v23, %v910_v14 }
 0x176   : > { %v935_v12 = vadd.f32 %v930_v56, %v908_v40  ;;  %v936_v31 = vadd.f32 %v931_v8, %v909_v57 }
 0x178   : > { %v951_v54 = vpop.permute.xlu1 %950  ;;  %v949_v45 = vpop.permute.xlu0 %948 }
 0x179   : > { %v954_v60 = vsel %vm902_vm5, %v949_v45, %v951_v54 }
 0x17a   : > { %v959_v28 = vadd.f32 %v954_v60, %v935_v12 }
 0x17c   : > { %v973_v37 = vpop.permute.xlu1 %972  ;;  %v953_v48 = vpop.permute.xlu0 %952 }
 0x17d   : > { %v955_v18 = vsel %vm902_vm5, %v951_v54, %v953_v48  ;;  %v961_v62 = vadd.f32 %v953_v48, %v937_v25 }
 0x17e   : > { %v960_v41 = vadd.f32 %v955_v18, %v936_v31 }
 0x180   : > { %v977_v1 = vpop.permute.xlu1 %976  ;;  %v975_v10 = vpop.permute.xlu0 %974 }
 0x181   : > { %v978_v44 = vsel %vm902_vm5, %v973_v37, %v975_v10  ;;  %v979_v7 = vsel %vm902_vm5, %v975_v10, %v977_v1  ;;  %v985_v2 = vadd.f32 %v977_v1, %v961_v62 }
 0x182   : > { %v983_v24 = vadd.f32 %v978_v44, %v959_v28  ;;  %v984_v38 = vadd.f32 %v979_v7, %v960_v41 }
 0x184   : > { %v1002_v36 = vpop.permute.xlu1 %1001  ;;  %v1000_v49 = vpop.permute.xlu0 %999 }
 0x185   : > { %v1006_v46 = vsel %vm1005_vm6, %v1000_v49, %v1002_v36 }
 0x186   : > { %v1011_v61 = vadd.f32 %v1006_v46, %v983_v24 }
 0x188   : > { %v1028_v30 = vpop.permute.xlu1 %1027  ;;  %v1004_v16 = vpop.permute.xlu0 %1003 }
 0x189   : > { %v1007_v21 = vsel %vm1005_vm6, %v1002_v36, %v1004_v16  ;;  %v1013_v45 = vadd.f32 %v1004_v16, %v985_v2 }
 0x18a   : > { %v1012_v48 = vadd.f32 %v1007_v21, %v984_v38 }
 0x18c   : > { %v1032_v17 = vpop.permute.xlu1 %1031  ;;  %v1030_v47 = vpop.permute.xlu0 %1029 }
 0x18d   : > { %v1033_v22 = vsel %vm1005_vm6, %v1028_v30, %v1030_v47  ;;  %v1034_v57 = vsel %vm1005_vm6, %v1030_v47, %v1032_v17  ;;  %v1040_v49 = vadd.f32 %v1032_v17, %v1013_v45 }
 0x18e   : > { %v1038_v23 = vadd.f32 %v1033_v22, %v1011_v61  ;;  %v1039_v36 = vadd.f32 %v1034_v57, %v1012_v48 }
 0x190   : > { %v1054_v59 = vpop.permute.xlu1 %1053  ;;  %v1052_v20 = vpop.permute.xlu0 %1051 }
 0x191   : > { %v1057_v15 = vsel %vm1005_vm6, %v1052_v20, %v1054_v59 }
 0x192   : > { %v1062_v10 = vadd.f32 %v1057_v15, %v1038_v23 }
 0x194   : > { %v1076_v39 = vpop.permute.xlu1 %1075  ;;  %v1056_v3 = vpop.permute.xlu0 %1055 }
 0x195   : > { %v1058_v30 = vsel %vm1005_vm6, %v1054_v59, %v1056_v3  ;;  %v1064_v20 = vadd.f32 %v1056_v3, %v1040_v49 }
 0x196   : > { %v1063_v16 = vadd.f32 %v1058_v30, %v1039_v36 }
 0x198   : > { %v1080_v58 = vpop.permute.xlu1 %1079  ;;  %v1078_v6 = vpop.permute.xlu0 %1077 }
 0x199   : > { %v1081_v37 = vsel %vm1005_vm6, %v1076_v39, %v1078_v6  ;;  %v1082_v56 = vsel %vm1005_vm6, %v1078_v6, %v1080_v58  ;;  %v1088_v39 = vadd.f32 %v1080_v58, %v1064_v20 }
 0x19a   : > { %v1086_v34 = vadd.f32 %v1081_v37, %v1062_v10 }
 0x19c   : > { %v1105_v42 = vpop.permute.xlu1 %1104  ;;  %v1103_v55 = vpop.permute.xlu0 %1102 }
 0x19d   : > { %v1109_v1 = vsel %vm1108_vm7, %v1103_v55, %v1105_v42  ;;  %v1087_v55 = vadd.f32 %v1082_v56, %v1063_v16 }
 0x19e   : > { %v1114_v60 = vadd.f32 %v1109_v1, %v1086_v34 }
 0x1a0   : > { %v1131_v0 = vpop.permute.xlu1 %1130  ;;  %v3241_v26 = vpop.permute.xlu0 %1106 }
 0x1a1   : > { %v1110_v17 = vsel %vm1108_vm7, %v1105_v42, %v3241_v26  ;;  %v1116_v3 = vadd.f32 %v3241_v26, %v1088_v39 }
 0x1a2   : > { %v1115_v8 = vadd.f32 %v1110_v17, %v1087_v55 }
 0x1a4   : > { %v3243_v19 = vpop.permute.xlu1 %1134  ;;  %v3245_v32 = vpop.permute.xlu0 %1132 }
 0x1a5   : > { %v1136_v40 = vsel %vm1108_vm7, %v1131_v0, %v3245_v32  ;;  %v1137_v6 = vsel %vm1108_vm7, %v3245_v32, %v3243_v19  ;;  %v1143_v42 = vadd.f32 %v3243_v19, %v1116_v3 }
 0x1a6   : > { %v1141_v14 = vadd.f32 %v1136_v40, %v1114_v60  ;;  %v1142_v26 = vadd.f32 %v1137_v6, %v1115_v8  ;;  %v2316_v6 = vld [vmem:[%s3512_s7] sm:$0xff] }
 0x1a8   : > { %v3247_v5 = vpop.permute.xlu1 %1156  ;;  %v1155_v50 = vpop.permute.xlu0 %1154 }
 0x1a9   : > { %v1160_v59 = vsel %vm1108_vm7, %v1155_v50, %v3247_v5 }
 0x1aa   : > { %v1165_v58 = vadd.f32 %v1160_v59, %v1141_v14 }
 0x1ac   : > { %v1179_v63 = vpop.permute.xlu1 %1178  ;;  %v3249_v13 = vpop.permute.xlu0 %1158 }
 0x1ad   : > { %v1161_v50 = vsel %vm1108_vm7, %v3247_v5, %v3249_v13  ;;  %v1167_v32 = vadd.f32 %v3249_v13, %v1143_v42 }
 0x1ae   : > { %v1166_v31 = vadd.f32 %v1161_v50, %v1142_v26 }
 0x1b0   : > { %v3251_v9 = vpop.permute.xlu1 %1182  ;;  %v3254_v35 = vpop.permute.xlu0 %1180 }
 0x1b1   : > { %v1184_v0 = vsel %vm1108_vm7, %v1179_v63, %v3254_v35  ;;  %v1185_v63 = vsel %vm1108_vm7, %v3254_v35, %v3251_v9  ;;  %v1191_v62 = vadd.f32 %v3251_v9, %v1167_v32  ;;  %v324_v9 = vld [vmem:[%s3507_s2] sm:$0x7] }
 0x1b2   : > { %v1189_v25 = vadd.f32 %v1184_v0, %v1165_v58  ;;  %v1190_v7 = vadd.f32 %v1185_v63, %v1166_v31  ;;  %v3309_v57 = vrot.slane %v324_v9, %v2772_v27  ;;  %v3313_v1 = vrot.slane %v324_v9, %v2778_v33 }
 0x1b3   : > { %v3317_v20 = vrot.slane %v324_v9, %v2774_v29 }
 0x1b4   : > { %v3256_v43 = vpop.permute.xlu1 %1207  ;;  %v1206_v52 = vpop.permute.xlu0 %1205 }
 0x1b5   : > { %v1212_v28 = vsel %vm1211_vm8, %v1206_v52, %v3256_v43 }
 0x1b6   : > { %v1217_v19 = vadd.f32 %v1212_v28, %v1189_v25 }
 0x1b8   : > { %v1234_v11 = vpop.permute.xlu1 %1233  ;;  %v1210_v53 = vpop.permute.xlu0 %1209 }
 0x1b9   : > { %v1213_v5 = vsel %vm1211_vm8, %v3256_v43, %v1210_v53  ;;  %v1219_v41 = vadd.f32 %v1210_v53, %v1191_v62 }
 0x1ba   : > { %v1218_v61 = vadd.f32 %v1213_v5, %v1190_v7 }
 0x1bc   : > { %v1238_v54 = vpop.permute.xlu1 %1237  ;;  %v1236_v47 = vpop.permute.xlu0 %1235 }
 0x1bd   : > { %v1239_v46 = vsel %vm1211_vm8, %v1234_v11, %v1236_v47  ;;  %v1240_v13 = vsel %vm1211_vm8, %v1236_v47, %v1238_v54  ;;  %v1246_v11 = vadd.f32 %v1238_v54, %v1219_v41 }
 0x1be   : > { %v1244_v22 = vadd.f32 %v1239_v46, %v1217_v19  ;;  %v1245_v38 = vadd.f32 %v1240_v13, %v1218_v61 }
 0x1c0   : > { %v1258_v12 = vpop.permute.xlu1 %1257 }
 0x1c4   : > { %v1262_v18 = vpop.permute.xlu1 %1261 }
 0x1c5   : > { %v1270_v53 = vadd.f32 %v1262_v18, %v1246_v11 }
 0x1c8   : > { %v1284_v2 = vpop.permute.xlu1 %1283 }
 0x1cd   : > { %v1299_v44 = vpop.permute.xlu0 %1298 }
 0x1d1   : > { %v1260_v24 = vpop.permute.xlu0 %1259 }
 0x1d2   : > { %v1263_v52 = vsel %vm1211_vm8, %v1258_v12, %v1260_v24  ;;  %v1264_v15 = vsel %vm1211_vm8, %v1260_v24, %v1262_v18  ;;  %v1352_v24 = vld [vmem:[%s3511_s6] sm:$0xff] }
 0x1d3   : > { %v1268_v35 = vadd.f32 %v1263_v52, %v1244_v22  ;;  %v1269_v45 = vadd.f32 %v1264_v15, %v1245_v38  ;;  %v1353_v52 = vpack.c.bf16 %v1352_v24, %v1352_v24  ;;  %v2471_v24 = vld [vmem:[%s3511_s6 + $0x40] sm:$0xff] }
 0x1d5   : > { %v1282_v21 = vpop.permute.xlu0 %1281 }
 0x1d6   : > { %v1287_v43 = vsel %vm1211_vm8, %v1282_v21, %v1284_v2 }
 0x1d7   : > { %v1292_v23 = vadd.f32 %v1287_v43, %v1268_v35  ;;  %v2447_v35 = vld [vmem:[%s3511_s6 + $0x10] sm:$0xff] }
 0x1d8   : > { %v1562_v11 = vpack.c.bf16 %v2447_v35, %v2447_v35 }
 0x1d9   : > { %v1301_v54 = vadd.f32 %v1299_v44, %v1292_v23  ;;  %v1286_v37 = vpop.permute.xlu0 %1285 }
 0x1da   : > { %v1288_v48 = vsel %vm1211_vm8, %v1284_v2, %v1286_v37  ;;  %v1294_v10 = vadd.f32 %v1286_v37, %v1270_v53  ;;  %v2451_v53 = vld [vmem:[%s3511_s6 + $0x18] sm:$0xff] }
 0x1db   : > { %v1304_v49 = vmax.f32 %v1301_v54, 0.0  ;;  %v1293_v30 = vadd.f32 %v1288_v48, %v1269_v45  ;;  %v1670_v37 = vpack.c.bf16 %v2451_v53, %v2451_v53 }
 0x1dc   : > { %v1303_v36 = vadd.f32 %v1299_v44, %v1294_v10 }
 0x1dd   : > { %v1323_v34 = vmul.f32 %v3309_v57, %v1304_v49  ;;  %v1302_v56 = vadd.f32 %v1299_v44, %v1293_v30  ;;  %v2440_v44 = vld [vmem:[%s3511_s6 + $0x8] sm:$0xff] }
 0x1de   : > { %v1306_v40 = vmax.f32 %v1303_v36, 0.0  ;;  %v1359_v18 = vpack.c.bf16 %v2440_v44, %v2440_v44 }
 0x1df   : > { %v1305_v27 = vmax.f32 %v1302_v56, 0.0  ;;  %1333 = vrot.lane.b32.xlu1 %v1323_v34, %s2618_s23  ;;  %v2455_v34 = vld [vmem:[%s3511_s6 + $0x20] sm:$0xff] }
 0x1e0   : > { %v1325_v16 = vmul.f32 %v3313_v1, %v1306_v40 }
 0x1e1   : > { %v1324_v60 = vmul.f32 %v3317_v20, %v1305_v27  ;;  %v1778_v27 = vpack.c.bf16 %v2455_v34, %v2455_v34 }
 0x1e3   : > { %1335 = vrot.lane.b32.xlu0 %v1324_v60, %s2618_s23  ;;  %1337 = vrot.lane.b32.xlu1 %v1325_v16, %s2618_s23 }
 0x251   : > { %v1334_v33 = vpop.permute.xlu1 %1333 }
 0x252   : > { %1345 = vst.msk [vmem:[#allocation2] sm:$0xff] %vm1344_vm10, %v1334_v33 }
 0x255   : > { %v1336_v29 = vpop.permute.xlu0 %1335  ;;  %v1338_v47 = vpop.permute.xlu1 %1337 }
 0x256   : > { %v1339_v12 = vsel %vm1326_vm4, %v1334_v33, %v1336_v29  ;;  %v1340_v39 = vsel %vm1326_vm4, %v1336_v29, %v1338_v47 }
 0x257   : > { %v1355_v17 = vpack.c.bf16 %v1339_v12, %v1339_v12  ;;  %1348 = vst.msk [vmem:[#allocation2 + $0x10] sm:$0xff] %vm1347_vm11, %v1340_v39  ;;  %v2459_v12 = vld [vmem:[%s3511_s6 + $0x28] sm:$0xff] }
 0x259   : > { %v1349_v59 = vld [vmem:[#allocation2] sm:$0xff]  ;;  %1365 = vrot.lane.b32.xlu1 %v1355_v17, %s2609_s11 }
 0x25a   : > { %v1354_v55 = vpack.c.bf16 %v1349_v59, %v1349_v59 }
 0x25c   : > { %1363 = vrot.lane.b32.xlu0 %v1354_v55, %s2609_s11  ;;  %v1471_v31 = vsel %vm1376_vm13, %v1354_v55, 0 }
 0x25d   : > { %1563 = vrot.lane.b32.xlu1 %v1354_v55, %s2610_s12 }
 0x25e   : > { %v1351_v14 = vld [vmem:[#allocation2 + $0x10] sm:$0xff] }
 0x25f   : > { %v1356_v3 = vpack.c.bf16 %v1351_v14, %v1351_v14 }
 0x261   : > { %1367 = vrot.lane.b32.xlu0 %v1356_v3, %s2609_s11  ;;  %1567 = vrot.lane.b32.xlu1 %v1356_v3, %s2610_s12  ;;  %v1477_v46 = vsel %vm1376_vm13, %v1356_v3, 0 }
 0x265   : > { %1565 = vrot.lane.b32.xlu0 %v1355_v17, %s2610_s12  ;;  %1673 = vrot.lane.b32.xlu1 %v1355_v17, %s2611_s13 }
 0x269   : > { %1671 = vrot.lane.b32.xlu0 %v1354_v55, %s2611_s13  ;;  %1779 = vrot.lane.b32.xlu1 %v1354_v55, %s2612_s14 }
 0x26d   : > { %1675 = vrot.lane.b32.xlu0 %v1356_v3, %s2611_s13  ;;  %1783 = vrot.lane.b32.xlu1 %v1356_v3, %s2612_s14 }
 0x271   : > { %1781 = vrot.lane.b32.xlu0 %v1355_v17, %s2612_s14  ;;  %1889 = vrot.lane.b32.xlu1 %v1355_v17, %s2613_s15 }
 0x275   : > { %1887 = vrot.lane.b32.xlu0 %v1354_v55, %s2613_s15  ;;  %1995 = vrot.lane.b32.xlu1 %v1354_v55, %s2614_s16 }
 0x279   : > { %1891 = vrot.lane.b32.xlu0 %v1356_v3, %s2613_s15  ;;  %1999 = vrot.lane.b32.xlu1 %v1356_v3, %s2614_s16 }
 0x27d   : > { %1997 = vrot.lane.b32.xlu0 %v1355_v17, %s2614_s16  ;;  %2105 = vrot.lane.b32.xlu1 %v1355_v17, %s2615_s17 }
 0x281   : > { %2103 = vrot.lane.b32.xlu0 %v1354_v55, %s2615_s17  ;;  %2211 = vrot.lane.b32.xlu1 %v1354_v55, %s2616_s18 }
 0x285   : > { %2107 = vrot.lane.b32.xlu0 %v1356_v3, %s2615_s17  ;;  %2215 = vrot.lane.b32.xlu1 %v1356_v3, %s2616_s18 }
 0x289   : > { %2213 = vrot.lane.b32.xlu0 %v1355_v17, %s2616_s18 }
 0x28d   : > { %2319 = vperm.xlu0 %2593, %v2316_v6  }
 0x2cb   : > { %v1366_v0 = vpop.permute.xlu1 %1365 }
 0x2ce   : > { %v1364_v8 = vpop.permute.xlu0 %1363 }
 0x2cf   : > { %v1564_v58 = vpop.permute.xlu1 %1563  ;;  %v1370_v42 = vsel %vm490_vm0, %v1364_v8, %v1366_v0 }
 0x2d0   : > { %v1378_v32 = vsel %vm1376_vm13, %v1370_v42, 0 }
 0x2d3   : > { %v1368_v50 = vpop.permute.xlu0 %1367  ;;  %v1568_v28 = vpop.permute.xlu1 %1567 }
 0x2d4   : > { %v1371_v26 = vsel %vm490_vm0, %v1366_v0, %v1368_v50  ;;  %v1384_v25 = vsel %vm1376_vm13, %v1368_v50, 0  ;;  %v1582_v13 = vsel %vm1376_vm13, %v1568_v28, 0  ;;  %v2463_v0 = vld [vmem:[%s3511_s6 + $0x30] sm:$0xff] }
 0x2d5   : > { %2441 = vmatprep.subr.msk.bf16.mxu0 %vm1376_vm13, %v1371_v26  ;;  %2496 = vmatpush3.bf16.msra.mxu1 %v1384_v25  ;;  %v1994_v44 = vpack.c.bf16 %v2463_v0, %v2463_v0 }
 0x2d6   : > { %1387 = vmatpush1.bf16.msra.mxu0 %v1378_v32  ;;  %2501 = vmatprep.subr.bf16.mxu1 %v2617_v51 }
 0x2d7   : > { %v1566_v63 = vpop.permute.xlu0 %1565  ;;  %2444 = vmatprep.subr.msk.bf16.mxu0 %vm1376_vm13, %v1355_v17  ;;  %v1674_v19 = vpop.permute.xlu1 %1673  ;;  %v1886_v17 = vpack.c.bf16 %v2459_v12, %v2459_v12 }
 0x2d8   : > { %2498 = vmatmul.mubr.msk.bf16.vlgmr.msra.gmra.mrb[0].mxu1 %vm1372_vm14, %v1359_v18  ;;  %v1571_v62 = vsel %vm593_vm1, %v1566_v63, %v1568_v28  ;;  %v1570_v7 = vsel %vm593_vm1, %v1564_v58, %v1566_v63 }
 0x2d9   : > { %2442 = vmatmul.mubr.msk.bf16.vlgmr.msra.gmra.mrb[0].mxu0 %vm1372_vm14, %v1359_v18  ;;  %2502 = vmatpush3.bf16.msra.mxu1 %v1477_v46  ;;  %v1576_v2 = vsel %vm1376_vm13, %v1570_v7, 0  ;;  %v2467_v18 = vld [vmem:[%s3511_s6 + $0x38] sm:$0xff] }
 0x2da   : > { %1480 = vmatpush1.bf16.msra.mxu0 %v1471_v31  ;;  %2503 = vmatprep.mubr.msk.bf16.mxu1 %vm2619_vm12, %v2617_v51  ;;  %v2102_v63 = vpack.c.bf16 %v2467_v18, %v2467_v18 }
 0x2db   : > { %v1672_v5 = vpop.permute.xlu0 %1671  ;;  %2448 = vmatprep.subr.msk.bf16.mxu0 %vm1376_vm13, %v1571_v62  ;;  %2507 = vmatprep.subr.bf16.mxu1 %v2617_v51  ;;  %v1780_v41 = vpop.permute.xlu1 %1779  ;;  %v2210_v62 = vpack.c.bf16 %v2471_v24, %v2471_v24 }
 0x2dc   : > { %1511 = vmatprep.mubr.bf16.mxu0 %v2607_v4  ;;  %v1678_v9 = vsel %vm696_vm2, %v1672_v5, %v1674_v19 }
 0x2dd   : > { %v1684_v23 = vsel %vm1376_vm13, %v1678_v9, 0 }
 0x2df   : > { %v1676_v22 = vpop.permute.xlu0 %1675  ;;  %v1784_v15 = vpop.permute.xlu1 %1783 }
 0x2e0   : > { %v1679_v61 = vsel %vm696_vm2, %v1674_v19, %v1676_v22  ;;  %2504 = vmatmul.mubr.msk.bf16.vlgmr.msra.gmra.mrb[4].mxu1 %vm1372_vm14, %v1353_v52  ;;  %v1690_v38 = vsel %vm1376_vm13, %v1676_v22, 0  ;;  %v1798_v49 = vsel %vm1376_vm13, %v1784_v15, 0 }
 0x2e1   : > { %2508 = vmatpush3.bf16.msra.mxu1 %v1582_v13  ;;  %2445 = vmatmul.mubr.msk.bf16.vlgmr.msra.gmra.mrb[4].mxu0 %vm1372_vm14, %v1353_v52 }
 0x2e2   : > { %1585 = vmatpush1.bf16.msra.mxu0 %v1576_v2  ;;  %2509 = vmatprep.mubr.msk.bf16.mxu1 %vm2619_vm12, %v2617_v51 }
 0x2e3   : > { %2452 = vmatprep.subr.msk.bf16.mxu0 %vm1376_vm13, %v1679_v61  ;;  %v1782_v21 = vpop.permute.xlu0 %1781  ;;  %2513 = vmatprep.subr.bf16.mxu1 %v2617_v51  ;;  %v1890_v54 = vpop.permute.xlu1 %1889 }
 0x2e4   : > { %1616 = vmatprep.mubr.bf16.mxu0 %v2607_v4  ;;  %v1787_v45 = vsel %vm799_vm3, %v1782_v21, %v1784_v15  ;;  %v1786_v10 = vsel %vm799_vm3, %v1780_v41, %v1782_v21 }
 0x2e5   : > { %v1792_v30 = vsel %vm1376_vm13, %v1786_v10, 0 }
 0x2e7   : > { %v1888_v43 = vpop.permute.xlu0 %1887  ;;  %v1996_v36 = vpop.permute.xlu1 %1995 }
 0x2e8   : > { %2510 = vmatmul.mubr.msk.bf16.vlgmr.msra.gmra.mrb[8].mxu1 %vm1372_vm14, %v1562_v11  ;;  %v1894_v16 = vsel %vm902_vm5, %v1888_v43, %v1890_v54 }
 0x2e9   : > { %2514 = vmatpush3.bf16.msra.mxu1 %v1690_v38  ;;  %2449 = vmatmul.mubr.msk.bf16.vlgmr.msra.gmra.mrb[8].mxu0 %vm1372_vm14, %v1562_v11  ;;  %v1900_v29 = vsel %vm1376_vm13, %v1894_v16, 0 }
 0x2ea   : > { %1693 = vmatpush1.bf16.msra.mxu0 %v1684_v23  ;;  %2515 = vmatprep.mubr.msk.bf16.mxu1 %vm2619_vm12, %v2617_v51 }
 0x2eb   : > { %2456 = vmatprep.subr.msk.bf16.mxu0 %vm1376_vm13, %v1787_v45  ;;  %2519 = vmatprep.subr.bf16.mxu1 %v2617_v51  ;;  %v1892_v48 = vpop.permute.xlu0 %1891  ;;  %v2000_v60 = vpop.permute.xlu1 %1999 }
 0x2ec   : > { %1724 = vmatprep.mubr.bf16.mxu0 %v2607_v4  ;;  %v1895_v56 = vsel %vm902_vm5, %v1890_v54, %v1892_v48  ;;  %v1906_v33 = vsel %vm1376_vm13, %v1892_v48, 0  ;;  %v2014_v3 = vsel %vm1376_vm13, %v2000_v60, 0 }
 0x2ef   : > { %v1998_v40 = vpop.permute.xlu0 %1997  ;;  %v2106_v59 = vpop.permute.xlu1 %2105 }
 0x2f0   : > { %2516 = vmatmul.mubr.msk.bf16.vlgmr.msra.gmra.mrb[12].mxu1 %vm1372_vm14, %v1670_v37  ;;  %v2003_v39 = vsel %vm1005_vm6, %v1998_v40, %v2000_v60  ;;  %v2002_v55 = vsel %vm1005_vm6, %v1996_v36, %v1998_v40 }
 0x2f1   : > { %2520 = vmatpush3.bf16.msra.mxu1 %v1798_v49  ;;  %2453 = vmatmul.mubr.msk.bf16.vlgmr.msra.gmra.mrb[12].mxu0 %vm1372_vm14, %v1670_v37  ;;  %v2008_v6 = vsel %vm1376_vm13, %v2002_v55, 0 }
 0x2f2   : > { %1801 = vmatpush1.bf16.msra.mxu0 %v1792_v30  ;;  %2521 = vmatprep.mubr.msk.bf16.mxu1 %vm2619_vm12, %v2617_v51 }
 0x2f3   : > { %2460 = vmatprep.subr.msk.bf16.mxu0 %vm1376_vm13, %v1895_v56  ;;  %2525 = vmatprep.subr.bf16.mxu1 %v2617_v51  ;;  %v2104_v47 = vpop.permute.xlu0 %2103  ;;  %v2212_v58 = vpop.permute.xlu1 %2211 }
 0x2f4   : > { %1832 = vmatprep.mubr.bf16.mxu0 %v2607_v4  ;;  %v2110_v42 = vsel %vm1108_vm7, %v2104_v47, %v2106_v59 }
 0x2f5   : > { %v2116_v26 = vsel %vm1376_vm13, %v2110_v42, 0 }
 0x2f7   : > { %v2108_v14 = vpop.permute.xlu0 %2107  ;;  %v2216_v25 = vpop.permute.xlu1 %2215 }
 0x2f8   : > { %2522 = vmatmul.mubr.msk.bf16.vlgmr.msra.gmra.mrb[16].mxu1 %vm1372_vm14, %v1778_v27  ;;  %v2111_v8 = vsel %vm1108_vm7, %v2106_v59, %v2108_v14  ;;  %v2122_v28 = vsel %vm1376_vm13, %v2108_v14, 0  ;;  %v2230_v31 = vsel %vm1376_vm13, %v2216_v25, 0 }
 0x2f9   : > { %2526 = vmatpush3.bf16.msra.mxu1 %v1906_v33  ;;  %2457 = vmatmul.mubr.msk.bf16.vlgmr.msra.gmra.mrb[16].mxu0 %vm1372_vm14, %v1778_v27 }
 0x2fa   : > { %1909 = vmatpush1.bf16.msra.mxu0 %v1900_v29  ;;  %2527 = vmatprep.mubr.msk.bf16.mxu1 %vm2619_vm12, %v2617_v51 }
 0x2fb   : > { %2464 = vmatprep.subr.msk.bf16.mxu0 %vm1376_vm13, %v2003_v39  ;;  %2531 = vmatprep.subr.bf16.mxu1 %v2617_v51  ;;  %v2214_v50 = vpop.permute.xlu0 %2213 }
 0x2fc   : > { %1940 = vmatprep.mubr.bf16.mxu0 %v2607_v4  ;;  %v2219_v32 = vsel %vm1211_vm8, %v2214_v50, %v2216_v25  ;;  %v2218_v46 = vsel %vm1211_vm8, %v2212_v58, %v2214_v50 }
 0x2fd   : > { %v2224_v19 = vsel %vm1376_vm13, %v2218_v46, 0 }
 0x300   : > { %2528 = vmatmul.mubr.msk.bf16.vlgmr.msra.gmra.mrb[20].mxu1 %vm1372_vm14, %v1886_v17 }
 0x301   : > { %2532 = vmatpush3.bf16.msra.mxu1 %v2014_v3  ;;  %2461 = vmatmul.mubr.msk.bf16.vlgmr.msra.gmra.mrb[20].mxu0 %vm1372_vm14, %v1886_v17 }
 0x302   : > { %2017 = vmatpush1.bf16.msra.mxu0 %v2008_v6  ;;  %2533 = vmatprep.mubr.msk.bf16.mxu1 %vm2619_vm12, %v2617_v51 }
 0x303   : > { %2468 = vmatprep.subr.msk.bf16.mxu0 %vm1376_vm13, %v2111_v8  ;;  %2537 = vmatprep.subr.bf16.mxu1 %v2617_v51 }
 0x304   : > { %2048 = vmatprep.mubr.bf16.mxu0 %v2607_v4 }
 0x308   : > { %2534 = vmatmul.mubr.msk.bf16.vlgmr.msra.gmra.mrb[24].mxu1 %vm1372_vm14, %v1994_v44 }
 0x309   : > { %2538 = vmatpush3.bf16.msra.mxu1 %v2122_v28  ;;  %2465 = vmatmul.mubr.msk.bf16.vlgmr.msra.gmra.mrb[24].mxu0 %vm1372_vm14, %v1994_v44 }
 0x30a   : > { %2125 = vmatpush1.bf16.msra.mxu0 %v2116_v26  ;;  %2539 = vmatprep.mubr.msk.bf16.mxu1 %vm2619_vm12, %v2617_v51 }
 0x30b   : > { %2472 = vmatprep.subr.msk.bf16.mxu0 %vm1376_vm13, %v2219_v32  ;;  %2543 = vmatprep.subr.bf16.mxu1 %v2617_v51 }
 0x30c   : > { %2156 = vmatprep.mubr.bf16.mxu0 %v2607_v4 }
 0x310   : > { %2540 = vmatmul.mubr.msk.bf16.vlgmr.msra.gmra.mrb[28].mxu1 %vm1372_vm14, %v2102_v63 }
 0x311   : > { %2544 = vmatpush3.bf16.msra.mxu1 %v2230_v31  ;;  %2469 = vmatmul.mubr.msk.bf16.vlgmr.msra.gmra.mrb[28].mxu0 %vm1372_vm14, %v2102_v63 }
 0x312   : > { %2233 = vmatpush1.bf16.msra.mxu0 %v2224_v19  ;;  %2545 = vmatprep.mubr.msk.bf16.mxu1 %vm2619_vm12, %v2617_v51 }
 0x313   : > { %2264 = vmatprep.mubr.bf16.mxu0 %v2607_v4 }
 0x318   : > { %2546 = vmatmul.mubr.msk.bf16.vlgmr.msra.gmra.mrb[32].mxu1 %vm1372_vm14, %v2210_v62 }
 0x319   : > { %2473 = vmatmul.mubr.msk.bf16.vlgmr.msra.gmra.mrb[32].mxu0 %vm1372_vm14, %v2210_v62 }
 0x3ab   : > { %v1461_v4 = vpop.f32.mrb[0].mxu1 }
 0x3ac   : > { %v1420_v5 = vpop.f32.mrb[0].mxu0  ;;  %v2499_v52 = vpop.f32.mrb[1].mxu1 }
 0x3ad   : > { %v1422_v7 = vpop.f32.mrb[1].mxu0  ;;  %v1464_v22 = vpop.f32.mrb[2].mxu1 }
 0x3ae   : > { %v1424_v41 = vpop.f32.mrb[2].mxu0  ;;  %v2500_v13 = vpop.f32.mrb[3].mxu1 }
 0x3af   : > { %v1425_v61 = vpop.f32.mrb[3].mxu0 }
 0x3b3   : > { %v1554_v2 = vpop.f32.mrb[4].mxu1 }
 0x3b4   : > { %v1555_v35 = vadd.f32 %v1554_v2, %v1461_v4  ;;  %v1513_v21 = vpop.f32.mrb[4].mxu0  ;;  %v2505_v11 = vpop.f32.mrb[5].mxu1 }
 0x3b5   : > { %v1514_v15 = vadd.f32 %v1513_v21, %v1420_v5  ;;  %v1515_v9 = vpop.f32.mrb[5].mxu0  ;;  %v1557_v43 = vpop.f32.mrb[6].mxu1 }
 0x3b6   : > { %v1516_v38 = vadd.f32 %v1515_v9, %v1422_v7  ;;  %v1517_v23 = vpop.f32.mrb[6].mxu0  ;;  %v2506_v53 = vpop.f32.mrb[7].mxu1 }
 0x3b7   : > { %v1518_v45 = vpop.f32.mrb[7].mxu0 }
 0x3bb   : > { %v1659_v51 = vpop.f32.mrb[8].mxu1 }
 0x3bc   : > { %v1667_v54 = vadd.f32 %v1659_v51, %v1555_v35  ;;  %v1618_v37 = vpop.f32.mrb[8].mxu0  ;;  %v2511_v48 = vpop.f32.mrb[9].mxu1 }
 0x3bd   : > { %v1665_v10 = vadd.f32 %v1618_v37, %v1514_v15  ;;  %v1620_v49 = vpop.f32.mrb[9].mxu0  ;;  %v1662_v30 = vpop.f32.mrb[10].mxu1 }
 0x3be   : > { %v1666_v36 = vadd.f32 %v1620_v49, %v1516_v38  ;;  %v1622_v34 = vpop.f32.mrb[10].mxu0  ;;  %v2512_v56 = vpop.f32.mrb[11].mxu1 }
 0x3bf   : > { %v1623_v40 = vpop.f32.mrb[11].mxu0  ;;  %v2320_v49 = vpop.permute.xlu0 %2319 }
 0x3c3   : > { %v1767_v27 = vpop.f32.mrb[12].mxu1 }
 0x3c4   : > { %v1775_v16 = vadd.f32 %v1767_v27, %v1667_v54  ;;  %v1726_v60 = vpop.f32.mrb[12].mxu0  ;;  %v2517_v33 = vpop.f32.mrb[13].mxu1 }
 0x3c5   : > { %v1773_v29 = vadd.f32 %v1726_v60, %v1665_v10  ;;  %v1728_v47 = vpop.f32.mrb[13].mxu0  ;;  %v1770_v12 = vpop.f32.mrb[14].mxu1 }
 0x3c6   : > { %v1774_v39 = vadd.f32 %v1728_v47, %v1666_v36  ;;  %v1730_v17 = vpop.f32.mrb[14].mxu0  ;;  %v2518_v59 = vpop.f32.mrb[15].mxu1 }
 0x3c7   : > { %v1731_v55 = vpop.f32.mrb[15].mxu0 }
 0x3cb   : > { %v1875_v14 = vpop.f32.mrb[16].mxu1 }
 0x3cc   : > { %v1883_v3 = vadd.f32 %v1875_v14, %v1775_v16  ;;  %v1834_v6 = vpop.f32.mrb[16].mxu0  ;;  %v2523_v0 = vpop.f32.mrb[17].mxu1 }
 0x3cd   : > { %v1881_v8 = vadd.f32 %v1834_v6, %v1773_v29  ;;  %v1836_v58 = vpop.f32.mrb[17].mxu0  ;;  %v1878_v44 = vpop.f32.mrb[18].mxu1 }
 0x3ce   : > { %v1882_v42 = vadd.f32 %v1836_v58, %v1774_v39  ;;  %v1838_v50 = vpop.f32.mrb[18].mxu0  ;;  %v2524_v28 = vpop.f32.mrb[19].mxu1 }
 0x3cf   : > { %v1839_v26 = vpop.f32.mrb[19].mxu0 }
 0x3d3   : > { %v1983_v25 = vpop.f32.mrb[20].mxu1 }
 0x3d4   : > { %v1991_v18 = vadd.f32 %v1983_v25, %v1883_v3  ;;  %v1942_v32 = vpop.f32.mrb[20].mxu0  ;;  %v2529_v63 = vpop.f32.mrb[21].mxu1 }
 0x3d5   : > { %v1989_v46 = vadd.f32 %v1942_v32, %v1881_v8  ;;  %v1944_v31 = vpop.f32.mrb[21].mxu0  ;;  %v1986_v19 = vpop.f32.mrb[22].mxu1 }
 0x3d6   : > { %v1990_v24 = vadd.f32 %v1944_v31, %v1882_v42  ;;  %v1946_v62 = vpop.f32.mrb[22].mxu0  ;;  %v2530_v4 = vpop.f32.mrb[23].mxu1 }
 0x3d7   : > { %v1947_v5 = vpop.f32.mrb[23].mxu0 }
 0x3db   : > { %v2091_v52 = vpop.f32.mrb[24].mxu1 }
 0x3dc   : > { %v2099_v7 = vadd.f32 %v2091_v52, %v1991_v18  ;;  %v2050_v22 = vpop.f32.mrb[24].mxu0  ;;  %v2535_v41 = vpop.f32.mrb[25].mxu1 }
 0x3dd   : > { %v2097_v13 = vadd.f32 %v2050_v22, %v1989_v46  ;;  %v2052_v61 = vpop.f32.mrb[25].mxu0  ;;  %v2094_v2 = vpop.f32.mrb[26].mxu1 }
 0x3de   : > { %v2098_v35 = vadd.f32 %v2052_v61, %v1990_v24  ;;  %v2054_v21 = vpop.f32.mrb[26].mxu0  ;;  %v2536_v11 = vpop.f32.mrb[27].mxu1 }
 0x3df   : > { %v2055_v15 = vpop.f32.mrb[27].mxu0 }
 0x3e3   : > { %v2199_v9 = vpop.f32.mrb[28].mxu1 }
 0x3e4   : > { %v2207_v43 = vadd.f32 %v2199_v9, %v2099_v7  ;;  %v2158_v38 = vpop.f32.mrb[28].mxu0  ;;  %v2541_v23 = vpop.f32.mrb[29].mxu1 }
 0x3e5   : > { %v2205_v53 = vadd.f32 %v2158_v38, %v2097_v13  ;;  %v2160_v45 = vpop.f32.mrb[29].mxu0  ;;  %v2202_v51 = vpop.f32.mrb[30].mxu1 }
 0x3e6   : > { %v2206_v54 = vadd.f32 %v2160_v45, %v2098_v35  ;;  %v2162_v37 = vpop.f32.mrb[30].mxu0  ;;  %v2542_v48 = vpop.f32.mrb[31].mxu1 }
 0x3e7   : > { %v2163_v10 = vpop.f32.mrb[31].mxu0 }
 0x3eb   : > { %v2307_v30 = vpop.f32.mrb[32].mxu1 }
 0x3ec   : > { %v2315_v36 = vadd.f32 %v2307_v30, %v2207_v43  ;;  %v2266_v34 = vpop.f32.mrb[32].mxu0  ;;  %v2547_v56 = vpop.f32.mrb[33].mxu1 }
 0x3ed   : > { %v2313_v40 = vadd.f32 %v2266_v34, %v2205_v53  ;;  %v2268_v27 = vpop.f32.mrb[33].mxu0  ;;  %v2310_v16 = vpop.f32.mrb[34].mxu1 }
 0x3ee   : > { %v2314_v60 = vadd.f32 %v2268_v27, %v2206_v54  ;;  %v2270_v33 = vpop.f32.mrb[34].mxu0  ;;  %v2548_v29 = vpop.f32.mrb[35].mxu1  ;;  %v2324_v47 = vadd.f32 %v2320_v49, %v2315_v36 }
 0x3ef   : > { %v2322_v12 = vadd.f32 %v2320_v49, %v2313_v40  ;;  %v2271_v39 = vpop.f32.mrb[35].mxu0 }
 0x3f0   : > { %v2323_v17 = vadd.f32 %v2320_v49, %v2314_v60  ;;  %v2327_v14 = vmax.f32 %v2324_v47, 0.0 }
 0x3f1   : > { %v2325_v59 = vmax.f32 %v2322_v12, 0.0 }
 0x3f2   : > { %v2326_v55 = vmax.f32 %v2323_v17, 0.0  ;;  %v2330_v0 = vmul.f32 %v2327_v14, %v3313_v1 }
 0x3f3   : > { %v2328_v3 = vmul.f32 %v2325_v59, %v3309_v57 }
 0x3f4   : > { %v2329_v6 = vmul.f32 %v2326_v55, %v3317_v20 }
 0x3f5   : > { %2336 = vrot.lane.b32.xlu1 %v2328_v3, %s2618_s23 }
 0x3f6   : > { %2338 = vrot.lane.b32.xlu0 %v2329_v6, %s2618_s23 }
 0x3f9   : > { %2340 = vrot.lane.b32.xlu1 %v2330_v0, %s2618_s23 }
 0x467   : > { %v2337_v8 = vpop.permute.xlu1 %2336 }
 0x468   : > { %2347 = vst.msk [vmem:[%s3481_s30] sm:$0xff] %vm1344_vm10, %v2337_v8  ;;  %v2339_v58 = vpop.permute.xlu0 %2338 }
 0x469   : > { %v2342_v44 = vsel %vm1326_vm4, %v2337_v8, %v2339_v58 }
 0x46a   : > { %2348 = vst [vmem:[%s3481_s30 + $0x8] sm:$0xff] %v2342_v44 }
 0x46b   : > { %v2341_v42 = vpop.permute.xlu1 %2340 }
 0x46c   : > { %v2343_v57 = vsel %vm1326_vm4, %v2339_v58, %v2341_v42 }
 0x46d   : > { %2349 = vst.msk [vmem:[%s3481_s30 + $0x10] sm:$0xff] %vm1347_vm11, %v2343_v57 }
 0x46e PF: > { %s18_s27 = sadd.s32 1, %s2604_s27  }
 0x46f   : > { %p15_p4 = scmp.ge.s32.totalorder %s18_s27, 4  }
 0x471   :  { %17 = sbr.rel (!%p15_p4) target bundleno = 1 (0x1), region = 109 }

</bundles_post_ra>
